<compile_context>
chip_gen: v6e
topology: v6e:2x2x1
jax: 0.10.0
libtpu: 0.0.40
codegen_flags: <defaults>
</compile_context>

<pallas_src>
import functools

import jax
import jax.numpy as jnp
import numpy as np
from jax.experimental import pallas as pl
from jax.experimental.pallas import tpu as pltpu


# ------------------------------ fused kernel ------------------------------- #

def fused_head_kernel(x_ref, cls_ref, w1_ref, b1_ref, w2_ref, b2_ref,
                      wh_ref, bh_ref, u_ref, wp_ref, bp_ref,
                      head_ref, pts_ref,
                      pad1_ref, pad2_ref, *, Bc, P, Ho, Wo):
    """One grid step = `Bc` images: conv+BN -> bilinear upsample -> conv+BN ->
    head conv -> sigmoid, plus points = cls @ W + b.  Everything stays in VMEM."""
    D = x_ref.shape[-1]
    HW = P * P
    HWo = Ho * Wo

    def zero_border(pad_ref, H, W):
        # Zero only the 1-px border ring; the interior is fully overwritten below.
        z_row = jnp.zeros((Bc, 1, W + 2, D), jnp.float32)
        z_col = jnp.zeros((Bc, H + 2, 1, D), jnp.float32)
        pad_ref[:, 0:1, :, :] = z_row
        pad_ref[:, H + 1:H + 2, :, :] = z_row
        pad_ref[:, :, 0:1, :] = z_col
        pad_ref[:, :, W + 1:W + 2, :] = z_col

    def conv3x3(pad_ref, w_ref, b_ref, H, W):
        # 9 accumulating K=D dots straight from the shifted padded windows.
        # Result: (Bc*H*W, Cout).  Tap order (dy-major, dx) matches the
        # host-side (9, Cin, Cout) weight flattening.
        acc = None
        for dy in range(3):
            for dx in range(3):
                win = pad_ref[:, dy:dy + H, dx:dx + W, :].reshape(Bc * H * W, D)
                part = jnp.dot(win, w_ref[dy * 3 + dx],
                               preferred_element_type=jnp.float32)
                acc = part if acc is None else acc + part
        return acc + b_ref[...]

    def conv3x3_t(pad_ref, wt_ref, b_ref, H, W):
        # Same conv but with the output already transposed: (Cout, Bc*H*W),
        # lane-dense, via dot_general contracting the channel axis of both
        # operands (the standard q.k^T pattern).
        acc = None
        for dy in range(3):
            for dx in range(3):
                win = pad_ref[:, dy:dy + H, dx:dx + W, :].reshape(Bc * H * W, D)
                part = jax.lax.dot_general(
                    wt_ref[dy * 3 + dx], win,
                    dimension_numbers=(((1,), (1,)), ((), ())),
                    preferred_element_type=jnp.float32)
                acc = part if acc is None else acc + part
        return acc + b_ref[...]          # bias (Cout, 1) broadcasts along lanes

    # ---- conv1 (+ folded BN) on the P x P token grid ----------------------- #
    zero_border(pad1_ref, P, P)
    pad1_ref[:, 1:P + 1, 1:P + 1, :] = x_ref[...]
    h1 = conv3x3(pad1_ref, w1_ref, b1_ref, P, P)                 # (Bc*P*P, D)

    # ---- bilinear upsample: one (HoWo, HW) x (HW, D) matmul per image ------ #
    zero_border(pad2_ref, Ho, Wo)
    ups = [jnp.dot(u_ref[...], h1[b * HW:(b + 1) * HW, :],
                   preferred_element_type=jnp.float32)           # (HoWo, D)
           for b in range(Bc)]
    pad2_ref[:, 1:Ho + 1, 1:Wo + 1, :] = (
        jnp.concatenate(ups, axis=0).reshape(Bc, Ho, Wo, D))

    # ---- conv2 (+ folded BN) on the upsampled map -------------------------- #
    h2 = conv3x3(pad2_ref, w2_ref, b2_ref, Ho, Wo)               # (Bc*HoWo, D)
    pad2_ref[:, 1:Ho + 1, 1:Wo + 1, :] = h2.reshape(Bc, Ho, Wo, D)  # border stays 0

    # ---- fused head conv (4 heatmap ch + 1 edge ch), lane-dense sigmoid ---- #
    head_t = jax.nn.sigmoid(conv3x3_t(pad2_ref, wh_ref, bh_ref, Ho, Wo))  # (5, Bc*HoWo)
    for b in range(Bc):
        head_ref[b] = head_t[:, b * HWo:(b + 1) * HWo].astype(head_ref.dtype)

    # ---- points = cls @ W + b (fused in: no extra kernel launch) ----------- #
    cls = cls_ref[...].reshape(Bc, D)
    pts = jnp.dot(cls, wp_ref[...], preferred_element_type=jnp.float32) + bp_ref[...]
    pts_ref[...] = pts.reshape(Bc, 1, pts.shape[-1]).astype(pts_ref.dtype)


# ------------------------------ forward (glue) ------------------------------ #

def _tensorcores_per_chip():
    """Best-effort probe; only used to pick how many grid steps to run."""
    try:
        kind = jax.devices()[0].device_kind.lower()
    except Exception:
        return 1
    return 2 if ("v7" in kind or "7x" in kind) else 1


def vit_head_forward(cls_token, img_token, params, *, patch_size, up_scale,
                     grid_steps=None):
    N, B, D = img_token.shape
    P = patch_size
    assert N == P * P
    Ho = Wo = P * up_scale
    HW, HWo = P * P, Ho * Wo
    Np = params['w_pt'].shape[1]

    # Collapse the grid (whole batch in one step) on 1-TensorCore chips
    # (v5e/v6e); split across 2 "parallel" steps only on 2-core chips (v7x).
    if grid_steps is None:
        cores = _tensorcores_per_chip()
        grid_steps = cores if (cores > 1 and B % cores == 0) else 1
    G = grid_steps
    assert B % G == 0
    Bc = B // G

    # (N, B, D) -> NHWC (B, P, P, D);  cls (1, B, D) -> (B, 1, D)
    x = img_token.transpose(1, 0, 2).reshape(B, P, P, D)
    cls = cls_token.transpose(1, 0, 2)

    kern = functools.partial(fused_head_kernel, Bc=Bc, P=P, Ho=Ho, Wo=Wo)
    c2 = lambda i: (0, 0)
    c3 = lambda i: (0, 0, 0)

    flops = 2 * B * (9 * HW * D * D + HWo * HW * D + 9 * HWo * D * D
                     + 9 * HWo * D * 5 + D * Np)
    bytes_accessed = 4 * (B * (HW * D + D + 5 * HWo + Np)
                          + 18 * D * D + 45 * D + HWo * HW + D * Np + 2 * D + 5 + Np)

    head_out, pts_out = pl.pallas_call(
        kern,
        out_shape=(
            jax.ShapeDtypeStruct((B, 5, HWo), jnp.float32),   # 4 heat ch + 1 edge ch
            jax.ShapeDtypeStruct((B, 1, Np), jnp.float32),
        ),
        grid=(G,),
        in_specs=[
            pl.BlockSpec((Bc, P, P, D), lambda i: (i, 0, 0, 0)),  # img tokens
            pl.BlockSpec((Bc, 1, D), lambda i: (i, 0, 0)),        # cls token
            pl.BlockSpec((9, D, D), c3),                          # conv1 per-tap W
            pl.BlockSpec((1, D), c2),
            pl.BlockSpec((9, D, D), c3),                          # conv2 per-tap W
            pl.BlockSpec((1, D), c2),
            pl.BlockSpec((9, 5, D), c3),                          # head per-tap W^T
            pl.BlockSpec((5, 1), c2),
            pl.BlockSpec((HWo, HW), c2),                          # kron(Ah, Aw)
            pl.BlockSpec((D, Np), c2),                            # point_reg W
            pl.BlockSpec((1, Np), c2),                            # point_reg b
        ],
        out_specs=(
            pl.BlockSpec((Bc, 5, HWo), lambda i: (i, 0, 0)),
            pl.BlockSpec((Bc, 1, Np), lambda i: (i, 0, 0)),
        ),
        scratch_shapes=[
            pltpu.VMEM((Bc, P + 2, P + 2, D), jnp.float32),       # padded conv1 in
            pltpu.VMEM((Bc, Ho + 2, Wo + 2, D), jnp.float32),     # padded conv2/head in
        ],
        compiler_params=pltpu.CompilerParams(dimension_semantics=("parallel",)),
        cost_estimate=pl.CostEstimate(flops=flops,
                                      transcendentals=B * 5 * HWo,
                                      bytes_accessed=bytes_accessed),
    )(x, cls,
      params['w1_taps'], params['b1_2d'],
      params['w2_taps'], params['b2_2d'],
      params['wh_taps_t'], params['bh_2d'],
      params['u'], params['w_pt'], params['b_pt_2d'])

    heatmap = head_out[:, :4, :].reshape(B, 4, Ho, Wo)   # NCHW (free reshape)
    edge = head_out[:, 4, :].reshape(B, Ho, Wo)
    points = pts_out.reshape(B, Np)
    return points, heatmap, edge


# -------------------------- parameters / utilities -------------------------- #

def make_conv_params(key, cin, cout):
    kw, kb = jax.random.split(key)
    w = jax.random.normal(kw, (3, 3, cin, cout), jnp.float32) * 0.05  # HWIO
    b = jax.random.normal(kb, (cout,), jnp.float32) * 0.05
    return w, b


def make_bn_params(key, c):
    k1, k2, k3, k4 = jax.random.split(key, 4)
    gamma = 1.0 + 0.1 * jax.random.normal(k1, (c,), jnp.float32)
    beta = 0.1 * jax.random.normal(k2, (c,), jnp.float32)
    mean = 0.1 * jax.random.normal(k3, (c,), jnp.float32)
    var = jnp.abs(1.0 + 0.1 * jax.random.normal(k4, (c,), jnp.float32))
    return gamma, beta, mean, var


def fold_bn(w, b, gamma, beta, mean, var, eps=1e-5):
    """Fold eval-mode BatchNorm2d into the preceding conv's weight & bias."""
    scale = gamma / jnp.sqrt(var + eps)
    return w * scale[None, None, None, :], (b - mean) * scale + beta


def bilinear_matrix(in_size, scale):
    """PyTorch nn.Upsample(mode='bilinear', align_corners=False) as a matrix."""
    out_size = in_size * scale
    A = np.zeros((out_size, in_size), dtype=np.float32)
    for o in range(out_size):
        src = max((o + 0.5) / scale - 0.5, 0.0)
        i0 = min(int(np.floor(src)), in_size - 1)
        i1 = min(i0 + 1, in_size - 1)
        l1 = src - i0
        A[o, i0] += 1.0 - l1
        A[o, i1] += l1
    return A


# ------------------------------ pure-JAX reference --------------------------- #

def ref_forward(cls_token, img_token, params, *, patch_size):
    """Pure-JAX reference (same folded params / same interp matrices)."""
    N, B, D = img_token.shape
    P = patch_size
    x = img_token.transpose(1, 0, 2).reshape(B, P, P, D)

    def conv(x, w, b):
        y = jax.lax.conv_general_dilated(
            x, w, (1, 1), 'SAME', dimension_numbers=('NHWC', 'HWIO', 'NHWC'))
        return y + b[None, None, None, :]

    h = conv(x, params['w1f'], params['b1f'])
    h = jnp.einsum('oh,bhwc->bowc', params['ah'], h)
    h = jnp.einsum('ow,bhwc->bhoc', params['aw'], h)
    h = conv(h, params['w2f'], params['b2f'])
    out = jax.nn.sigmoid(conv(h, params['w_head'], params['b_head']))
    heatmap = out[..., :4].transpose(0, 3, 1, 2)
    edge = out[..., 4]
    points = cls_token[0] @ params['w_pt'] + params['b_pt']
    return points, heatmap, edge


# ----------------------------------- main ----------------------------------- #

if __name__ == "__main__":
    B, D, P, S, NPTS = 2, 32, 8, 2, 6   # batch, d_model, patch_size, up_scale, n_points

    key = jax.random.PRNGKey(0)
    (k_cls, k_img, k1, k2, k3, k4, k5, k6) = jax.random.split(key, 8)

    cls_token = jax.random.normal(k_cls, (1, B, D), jnp.float32)
    img_token = jax.random.normal(k_img, (P * P, B, D), jnp.float32)

    w1, b1 = make_conv_params(k1, D, D)
    g1, be1, m1, v1 = make_bn_params(k2, D)
    w2, b2 = make_conv_params(k3, D, D)
    g2, be2, m2, v2 = make_bn_params(k4, D)
    w1f, b1f = fold_bn(w1, b1, g1, be1, m1, v1)
    w2f, b2f = fold_bn(w2, b2, g2, be2, m2, v2)
    w_head, b_head = make_conv_params(k5, D, 5)   # 4 heatmap ch + 1 edge ch
    w_pt = jax.random.normal(k6, (D, NPTS), jnp.float32) * 0.05
    b_pt = jnp.zeros((NPTS,), jnp.float32)

    ah_np = bilinear_matrix(P, S)
    aw_np = bilinear_matrix(P, S)
    u = jnp.asarray(np.kron(ah_np, aw_np))        # (Ho*Wo, P*P) combined interp

    params = dict(
        # kernel-side (per-tap / transposed / kron) forms
        w1_taps=w1f.reshape(9, D, D), b1_2d=b1f.reshape(1, D),
        w2_taps=w2f.reshape(9, D, D), b2_2d=b2f.reshape(1, D),
        wh_taps_t=w_head.reshape(9, D, 5).transpose(0, 2, 1),   # (9, 5, D)
        bh_2d=b_head.reshape(5, 1),
        u=u, w_pt=w_pt, b_pt_2d=b_pt.reshape(1, NPTS),
        # reference-side forms
        w1f=w1f, b1f=b1f, w2f=w2f, b2f=b2f,
        w_head=w_head, b_head=b_head, b_pt=b_pt,
        ah=jnp.asarray(ah_np), aw=jnp.asarray(aw_np),
    )

    points, heatmap, edge = vit_head_forward(
        cls_token, img_token, params, patch_size=P, up_scale=S)
    jax.block_until_ready((points, heatmap, edge))

    assert points.shape == (B, NPTS)
    assert heatmap.shape == (B, 4, P * S, P * S)
    assert edge.shape == (B, P * S, P * S)

    # correctness check against a pure-JAX reference (both f32)
    rp, rh, re = ref_forward(cls_token, img_token, params, patch_size=P)
    np.testing.assert_allclose(np.asarray(points), np.asarray(rp), atol=1e-4, rtol=1e-4)
    np.testing.assert_allclose(np.asarray(heatmap), np.asarray(rh), atol=1e-4, rtol=1e-4)
    np.testing.assert_allclose(np.asarray(edge), np.asarray(re), atol=1e-4, rtol=1e-4)

    print("KERNEL_OK")
</pallas_src>

<mosaic_0001>
module attributes {stable_mosaic.version = 11 : i64} {
  func.func @fused_head_kernel(%arg0: i32, %arg1: memref<2x8x8x32xf32, #tpu.memory_space<vmem>>, %arg2: memref<2x1x32xf32, #tpu.memory_space<vmem>>, %arg3: memref<9x32x32xf32, #tpu.memory_space<vmem>>, %arg4: memref<1x32xf32, #tpu.memory_space<vmem>>, %arg5: memref<9x32x32xf32, #tpu.memory_space<vmem>>, %arg6: memref<1x32xf32, #tpu.memory_space<vmem>>, %arg7: memref<9x5x32xf32, #tpu.memory_space<vmem>>, %arg8: memref<5x1xf32, #tpu.memory_space<vmem>>, %arg9: memref<256x64xf32, #tpu.memory_space<vmem>>, %arg10: memref<32x6xf32, #tpu.memory_space<vmem>>, %arg11: memref<1x6xf32, #tpu.memory_space<vmem>>, %arg12: memref<2x5x256xf32, #tpu.memory_space<vmem>>, %arg13: memref<2x1x6xf32, #tpu.memory_space<vmem>>, %arg14: memref<2x10x10x32xf32, #tpu.memory_space<vmem>>, %arg15: memref<2x18x18x32xf32, #tpu.memory_space<vmem>>) attributes {dimension_semantics = [#tpu.dimension_semantics<parallel>], iteration_bounds = array<i64: 1>, scalar_prefetch = 0 : i64, scratch_operands = 2 : i64, tpu.core_type = #tpu.core_type<tc>, window_params = [{transform_indices = @transform_0, window_bounds = array<i64: 2, 8, 8, 32>}, {transform_indices = @transform_1, window_bounds = array<i64: 2, 1, 32>}, {pipeline_mode = #tpu.pipeline_mode<synchronous>, transform_indices = @transform_2, window_bounds = array<i64: 9, 32, 32>}, {pipeline_mode = #tpu.pipeline_mode<synchronous>, transform_indices = @transform_3, window_bounds = array<i64: 1, 32>}, {pipeline_mode = #tpu.pipeline_mode<synchronous>, transform_indices = @transform_4, window_bounds = array<i64: 9, 32, 32>}, {pipeline_mode = #tpu.pipeline_mode<synchronous>, transform_indices = @transform_5, window_bounds = array<i64: 1, 32>}, {pipeline_mode = #tpu.pipeline_mode<synchronous>, transform_indices = @transform_6, window_bounds = array<i64: 9, 5, 32>}, {pipeline_mode = #tpu.pipeline_mode<synchronous>, transform_indices = @transform_7, window_bounds = array<i64: 5, 1>}, {pipeline_mode = #tpu.pipeline_mode<synchronous>, transform_indices = @transform_8, window_bounds = array<i64: 256, 64>}, {pipeline_mode = #tpu.pipeline_mode<synchronous>, transform_indices = @transform_9, window_bounds = array<i64: 32, 6>}, {pipeline_mode = #tpu.pipeline_mode<synchronous>, transform_indices = @transform_10, window_bounds = array<i64: 1, 6>}, {transform_indices = @transform_11, window_bounds = array<i64: 2, 5, 256>}, {transform_indices = @transform_12, window_bounds = array<i64: 2, 1, 6>}]} {
    %cst = arith.constant 0.000000e+00 : f32
    %0 = vector.broadcast %cst : f32 to vector<2x1x10x32xf32>
    %cst_0 = arith.constant 0.000000e+00 : f32
    %1 = vector.broadcast %cst_0 : f32 to vector<2x10x1x32xf32>
    %c0 = arith.constant 0 : index
    %c0_1 = arith.constant 0 : index
    %c0_2 = arith.constant 0 : index
    %c0_3 = arith.constant 0 : index
    %2 = vector.load %arg14[%c0, %c0_1, %c0_2, %c0_3] : memref<2x10x10x32xf32, #tpu.memory_space<vmem>>, vector<2x1x10x32xf32>
    tpu.vector_store %arg14[%c0, %c0_1, %c0_2, %c0_3], %0 {strides = array<i32>} : memref<2x10x10x32xf32, #tpu.memory_space<vmem>>, vector<2x1x10x32xf32>,
    %c0_4 = arith.constant 0 : index
    %c9 = arith.constant 9 : index
    %c0_5 = arith.constant 0 : index
    %c0_6 = arith.constant 0 : index
    %3 = vector.load %arg14[%c0_4, %c9, %c0_5, %c0_6] : memref<2x10x10x32xf32, #tpu.memory_space<vmem>>, vector<2x1x10x32xf32>
    tpu.vector_store %arg14[%c0_4, %c9, %c0_5, %c0_6], %0 {strides = array<i32>} : memref<2x10x10x32xf32, #tpu.memory_space<vmem>>, vector<2x1x10x32xf32>,
    %c0_7 = arith.constant 0 : index
    %c0_8 = arith.constant 0 : index
    %c0_9 = arith.constant 0 : index
    %c0_10 = arith.constant 0 : index
    %4 = vector.load %arg14[%c0_7, %c0_8, %c0_9, %c0_10] : memref<2x10x10x32xf32, #tpu.memory_space<vmem>>, vector<2x10x1x32xf32>
    tpu.vector_store %arg14[%c0_7, %c0_8, %c0_9, %c0_10], %1 {strides = array<i32>} : memref<2x10x10x32xf32, #tpu.memory_space<vmem>>, vector<2x10x1x32xf32>,
    %c0_11 = arith.constant 0 : index
    %c0_12 = arith.constant 0 : index
    %c9_13 = arith.constant 9 : index
    %c0_14 = arith.constant 0 : index
    %5 = vector.load %arg14[%c0_11, %c0_12, %c9_13, %c0_14] : memref<2x10x10x32xf32, #tpu.memory_space<vmem>>, vector<2x10x1x32xf32>
    tpu.vector_store %arg14[%c0_11, %c0_12, %c9_13, %c0_14], %1 {strides = array<i32>} : memref<2x10x10x32xf32, #tpu.memory_space<vmem>>, vector<2x10x1x32xf32>,
    %c0_15 = arith.constant 0 : index
    %c0_16 = arith.constant 0 : index
    %c0_17 = arith.constant 0 : index
    %c0_18 = arith.constant 0 : index
    %6 = vector.load %arg1[%c0_15, %c0_16, %c0_17, %c0_18] : memref<2x8x8x32xf32, #tpu.memory_space<vmem>>, vector<2x8x8x32xf32>
    %c0_19 = arith.constant 0 : index
    %c1 = arith.constant 1 : index
    %c1_20 = arith.constant 1 : index
    %c0_21 = arith.constant 0 : index
    %7 = vector.load %arg14[%c0_19, %c1, %c1_20, %c0_21] : memref<2x10x10x32xf32, #tpu.memory_space<vmem>>, vector<2x8x8x32xf32>
    tpu.vector_store %arg14[%c0_19, %c1, %c1_20, %c0_21], %6 {strides = array<i32>} : memref<2x10x10x32xf32, #tpu.memory_space<vmem>>, vector<2x8x8x32xf32>,
    %c0_22 = arith.constant 0 : index
    %c0_23 = arith.constant 0 : index
    %c0_24 = arith.constant 0 : index
    %c0_25 = arith.constant 0 : index
    %8 = vector.load %arg14[%c0_22, %c0_23, %c0_24, %c0_25] : memref<2x10x10x32xf32, #tpu.memory_space<vmem>>, vector<2x8x8x32xf32>
    %9 = vector.shape_cast %8 : vector<2x8x8x32xf32> to vector<128x32xf32>
    %c0_26 = arith.constant 0 : index
    %c0_27 = arith.constant 0 : index
    %c0_28 = arith.constant 0 : index
    %10 = vector.load %arg3[%c0_26, %c0_27, %c0_28] : memref<9x32x32xf32, #tpu.memory_space<vmem>>, vector<1x32x32xf32>
    %11 = vector.shape_cast %10 : vector<1x32x32xf32> to vector<32x32xf32>
    %cst_29 = arith.constant dense<0.000000e+00> : vector<128x32xf32>
    %12 = tpu.matmul %9, %11, %cst_29 {dimension_numbers = #tpu.dot_dimension_numbers<[1], [0], [0], [1], [0, 0, 1, 1], [], []>} : vector<128x32xf32>, vector<32x32xf32>, vector<128x32xf32> -> vector<128x32xf32>
    %c0_30 = arith.constant 0 : index
    %c0_31 = arith.constant 0 : index
    %c1_32 = arith.constant 1 : index
    %c0_33 = arith.constant 0 : index
    %13 = vector.load %arg14[%c0_30, %c0_31, %c1_32, %c0_33] : memref<2x10x10x32xf32, #tpu.memory_space<vmem>>, vector<2x8x8x32xf32>
    %14 = vector.shape_cast %13 : vector<2x8x8x32xf32> to vector<128x32xf32>
    %c1_34 = arith.constant 1 : index
    %c0_35 = arith.constant 0 : index
    %c0_36 = arith.constant 0 : index
    %15 = vector.load %arg3[%c1_34, %c0_35, %c0_36] : memref<9x32x32xf32, #tpu.memory_space<vmem>>, vector<1x32x32xf32>
    %16 = vector.shape_cast %15 : vector<1x32x32xf32> to vector<32x32xf32>
    %cst_37 = arith.constant dense<0.000000e+00> : vector<128x32xf32>
    %17 = tpu.matmul %14, %16, %cst_37 {dimension_numbers = #tpu.dot_dimension_numbers<[1], [0], [0], [1], [0, 0, 1, 1], [], []>} : vector<128x32xf32>, vector<32x32xf32>, vector<128x32xf32> -> vector<128x32xf32>
    %18 = arith.addf %12, %17 : vector<128x32xf32>
    %c0_38 = arith.constant 0 : index
    %c0_39 = arith.constant 0 : index
    %c2 = arith.constant 2 : index
    %c0_40 = arith.constant 0 : index
    %19 = vector.load %arg14[%c0_38, %c0_39, %c2, %c0_40] : memref<2x10x10x32xf32, #tpu.memory_space<vmem>>, vector<2x8x8x32xf32>
    %20 = vector.shape_cast %19 : vector<2x8x8x32xf32> to vector<128x32xf32>
    %c2_41 = arith.constant 2 : index
    %c0_42 = arith.constant 0 : index
    %c0_43 = arith.constant 0 : index
    %21 = vector.load %arg3[%c2_41, %c0_42, %c0_43] : memref<9x32x32xf32, #tpu.memory_space<vmem>>, vector<1x32x32xf32>
    %22 = vector.shape_cast %21 : vector<1x32x32xf32> to vector<32x32xf32>
    %cst_44 = arith.constant dense<0.000000e+00> : vector<128x32xf32>
    %23 = tpu.matmul %20, %22, %cst_44 {dimension_numbers = #tpu.dot_dimension_numbers<[1], [0], [0], [1], [0, 0, 1, 1], [], []>} : vector<128x32xf32>, vector<32x32xf32>, vector<128x32xf32> -> vector<128x32xf32>
    %24 = arith.addf %18, %23 : vector<128x32xf32>
    %c0_45 = arith.constant 0 : index
    %c1_46 = arith.constant 1 : index
    %c0_47 = arith.constant 0 : index
    %c0_48 = arith.constant 0 : index
    %25 = vector.load %arg14[%c0_45, %c1_46, %c0_47, %c0_48] : memref<2x10x10x32xf32, #tpu.memory_space<vmem>>, vector<2x8x8x32xf32>
    %26 = vector.shape_cast %25 : vector<2x8x8x32xf32> to vector<128x32xf32>
    %c3 = arith.constant 3 : index
    %c0_49 = arith.constant 0 : index
    %c0_50 = arith.constant 0 : index
    %27 = vector.load %arg3[%c3, %c0_49, %c0_50] : memref<9x32x32xf32, #tpu.memory_space<vmem>>, vector<1x32x32xf32>
    %28 = vector.shape_cast %27 : vector<1x32x32xf32> to vector<32x32xf32>
    %cst_51 = arith.constant dense<0.000000e+00> : vector<128x32xf32>
    %29 = tpu.matmul %26, %28, %cst_51 {dimension_numbers = #tpu.dot_dimension_numbers<[1], [0], [0], [1], [0, 0, 1, 1], [], []>} : vector<128x32xf32>, vector<32x32xf32>, vector<128x32xf32> -> vector<128x32xf32>
    %30 = arith.addf %24, %29 : vector<128x32xf32>
    %c0_52 = arith.constant 0 : index
    %c1_53 = arith.constant 1 : index
    %c1_54 = arith.constant 1 : index
    %c0_55 = arith.constant 0 : index
    %31 = vector.load %arg14[%c0_52, %c1_53, %c1_54, %c0_55] : memref<2x10x10x32xf32, #tpu.memory_space<vmem>>, vector<2x8x8x32xf32>
    %32 = vector.shape_cast %31 : vector<2x8x8x32xf32> to vector<128x32xf32>
    %c4 = arith.constant 4 : index
    %c0_56 = arith.constant 0 : index
    %c0_57 = arith.constant 0 : index
    %33 = vector.load %arg3[%c4, %c0_56, %c0_57] : memref<9x32x32xf32, #tpu.memory_space<vmem>>, vector<1x32x32xf32>
    %34 = vector.shape_cast %33 : vector<1x32x32xf32> to vector<32x32xf32>
    %cst_58 = arith.constant dense<0.000000e+00> : vector<128x32xf32>
    %35 = tpu.matmul %32, %34, %cst_58 {dimension_numbers = #tpu.dot_dimension_numbers<[1], [0], [0], [1], [0, 0, 1, 1], [], []>} : vector<128x32xf32>, vector<32x32xf32>, vector<128x32xf32> -> vector<128x32xf32>
    %36 = arith.addf %30, %35 : vector<128x32xf32>
    %c0_59 = arith.constant 0 : index
    %c1_60 = arith.constant 1 : index
    %c2_61 = arith.constant 2 : index
    %c0_62 = arith.constant 0 : index
    %37 = vector.load %arg14[%c0_59, %c1_60, %c2_61, %c0_62] : memref<2x10x10x32xf32, #tpu.memory_space<vmem>>, vector<2x8x8x32xf32>
    %38 = vector.shape_cast %37 : vector<2x8x8x32xf32> to vector<128x32xf32>
    %c5 = arith.constant 5 : index
    %c0_63 = arith.constant 0 : index
    %c0_64 = arith.constant 0 : index
    %39 = vector.load %arg3[%c5, %c0_63, %c0_64] : memref<9x32x32xf32, #tpu.memory_space<vmem>>, vector<1x32x32xf32>
    %40 = vector.shape_cast %39 : vector<1x32x32xf32> to vector<32x32xf32>
    %cst_65 = arith.constant dense<0.000000e+00> : vector<128x32xf32>
    %41 = tpu.matmul %38, %40, %cst_65 {dimension_numbers = #tpu.dot_dimension_numbers<[1], [0], [0], [1], [0, 0, 1, 1], [], []>} : vector<128x32xf32>, vector<32x32xf32>, vector<128x32xf32> -> vector<128x32xf32>
    %42 = arith.addf %36, %41 : vector<128x32xf32>
    %c0_66 = arith.constant 0 : index
    %c2_67 = arith.constant 2 : index
    %c0_68 = arith.constant 0 : index
    %c0_69 = arith.constant 0 : index
    %43 = vector.load %arg14[%c0_66, %c2_67, %c0_68, %c0_69] : memref<2x10x10x32xf32, #tpu.memory_space<vmem>>, vector<2x8x8x32xf32>
    %44 = vector.shape_cast %43 : vector<2x8x8x32xf32> to vector<128x32xf32>
    %c6 = arith.constant 6 : index
    %c0_70 = arith.constant 0 : index
    %c0_71 = arith.constant 0 : index
    %45 = vector.load %arg3[%c6, %c0_70, %c0_71] : memref<9x32x32xf32, #tpu.memory_space<vmem>>, vector<1x32x32xf32>
    %46 = vector.shape_cast %45 : vector<1x32x32xf32> to vector<32x32xf32>
    %cst_72 = arith.constant dense<0.000000e+00> : vector<128x32xf32>
    %47 = tpu.matmul %44, %46, %cst_72 {dimension_numbers = #tpu.dot_dimension_numbers<[1], [0], [0], [1], [0, 0, 1, 1], [], []>} : vector<128x32xf32>, vector<32x32xf32>, vector<128x32xf32> -> vector<128x32xf32>
    %48 = arith.addf %42, %47 : vector<128x32xf32>
    %c0_73 = arith.constant 0 : index
    %c2_74 = arith.constant 2 : index
    %c1_75 = arith.constant 1 : index
    %c0_76 = arith.constant 0 : index
    %49 = vector.load %arg14[%c0_73, %c2_74, %c1_75, %c0_76] : memref<2x10x10x32xf32, #tpu.memory_space<vmem>>, vector<2x8x8x32xf32>
    %50 = vector.shape_cast %49 : vector<2x8x8x32xf32> to vector<128x32xf32>
    %c7 = arith.constant 7 : index
    %c0_77 = arith.constant 0 : index
    %c0_78 = arith.constant 0 : index
    %51 = vector.load %arg3[%c7, %c0_77, %c0_78] : memref<9x32x32xf32, #tpu.memory_space<vmem>>, vector<1x32x32xf32>
    %52 = vector.shape_cast %51 : vector<1x32x32xf32> to vector<32x32xf32>
    %cst_79 = arith.constant dense<0.000000e+00> : vector<128x32xf32>
    %53 = tpu.matmul %50, %52, %cst_79 {dimension_numbers = #tpu.dot_dimension_numbers<[1], [0], [0], [1], [0, 0, 1, 1], [], []>} : vector<128x32xf32>, vector<32x32xf32>, vector<128x32xf32> -> vector<128x32xf32>
    %54 = arith.addf %48, %53 : vector<128x32xf32>
    %c0_80 = arith.constant 0 : index
    %c2_81 = arith.constant 2 : index
    %c2_82 = arith.constant 2 : index
    %c0_83 = arith.constant 0 : index
    %55 = vector.load %arg14[%c0_80, %c2_81, %c2_82, %c0_83] : memref<2x10x10x32xf32, #tpu.memory_space<vmem>>, vector<2x8x8x32xf32>
    %56 = vector.shape_cast %55 : vector<2x8x8x32xf32> to vector<128x32xf32>
    %c8 = arith.constant 8 : index
    %c0_84 = arith.constant 0 : index
    %c0_85 = arith.constant 0 : index
    %57 = vector.load %arg3[%c8, %c0_84, %c0_85] : memref<9x32x32xf32, #tpu.memory_space<vmem>>, vector<1x32x32xf32>
    %58 = vector.shape_cast %57 : vector<1x32x32xf32> to vector<32x32xf32>
    %cst_86 = arith.constant dense<0.000000e+00> : vector<128x32xf32>
    %59 = tpu.matmul %56, %58, %cst_86 {dimension_numbers = #tpu.dot_dimension_numbers<[1], [0], [0], [1], [0, 0, 1, 1], [], []>} : vector<128x32xf32>, vector<32x32xf32>, vector<128x32xf32> -> vector<128x32xf32>
    %60 = arith.addf %54, %59 : vector<128x32xf32>
    %c0_87 = arith.constant 0 : index
    %c0_88 = arith.constant 0 : index
    %61 = vector.load %arg4[%c0_87, %c0_88] : memref<1x32xf32, #tpu.memory_space<vmem>>, vector<1x32xf32>
    %62 = vector.broadcast %61 : vector<1x32xf32> to vector<128x32xf32>
    %63 = arith.addf %60, %62 : vector<128x32xf32>
    %cst_89 = arith.constant 0.000000e+00 : f32
    %64 = vector.broadcast %cst_89 : f32 to vector<2x1x18x32xf32>
    %cst_90 = arith.constant 0.000000e+00 : f32
    %65 = vector.broadcast %cst_90 : f32 to vector<2x18x1x32xf32>
    %c0_91 = arith.constant 0 : index
    %c0_92 = arith.constant 0 : index
    %c0_93 = arith.constant 0 : index
    %c0_94 = arith.constant 0 : index
    %66 = vector.load %arg15[%c0_91, %c0_92, %c0_93, %c0_94] : memref<2x18x18x32xf32, #tpu.memory_space<vmem>>, vector<2x1x18x32xf32>
    tpu.vector_store %arg15[%c0_91, %c0_92, %c0_93, %c0_94], %64 {strides = array<i32>} : memref<2x18x18x32xf32, #tpu.memory_space<vmem>>, vector<2x1x18x32xf32>,
    %c0_95 = arith.constant 0 : index
    %c17 = arith.constant 17 : index
    %c0_96 = arith.constant 0 : index
    %c0_97 = arith.constant 0 : index
    %67 = vector.load %arg15[%c0_95, %c17, %c0_96, %c0_97] : memref<2x18x18x32xf32, #tpu.memory_space<vmem>>, vector<2x1x18x32xf32>
    tpu.vector_store %arg15[%c0_95, %c17, %c0_96, %c0_97], %64 {strides = array<i32>} : memref<2x18x18x32xf32, #tpu.memory_space<vmem>>, vector<2x1x18x32xf32>,
    %c0_98 = arith.constant 0 : index
    %c0_99 = arith.constant 0 : index
    %c0_100 = arith.constant 0 : index
    %c0_101 = arith.constant 0 : index
    %68 = vector.load %arg15[%c0_98, %c0_99, %c0_100, %c0_101] : memref<2x18x18x32xf32, #tpu.memory_space<vmem>>, vector<2x18x1x32xf32>
    tpu.vector_store %arg15[%c0_98, %c0_99, %c0_100, %c0_101], %65 {strides = array<i32>} : memref<2x18x18x32xf32, #tpu.memory_space<vmem>>, vector<2x18x1x32xf32>,
    %c0_102 = arith.constant 0 : index
    %c0_103 = arith.constant 0 : index
    %c17_104 = arith.constant 17 : index
    %c0_105 = arith.constant 0 : index
    %69 = vector.load %arg15[%c0_102, %c0_103, %c17_104, %c0_105] : memref<2x18x18x32xf32, #tpu.memory_space<vmem>>, vector<2x18x1x32xf32>
    tpu.vector_store %arg15[%c0_102, %c0_103, %c17_104, %c0_105], %65 {strides = array<i32>} : memref<2x18x18x32xf32, #tpu.memory_space<vmem>>, vector<2x18x1x32xf32>,
    %c0_106 = arith.constant 0 : index
    %c0_107 = arith.constant 0 : index
    %70 = vector.load %arg9[%c0_106, %c0_107] : memref<256x64xf32, #tpu.memory_space<vmem>>, vector<256x64xf32>
    %71 = vector.extract_strided_slice %63 {offsets = [0, 0], sizes = [64, 32], strides = [1, 1]} : vector<128x32xf32> to vector<64x32xf32>
    %cst_108 = arith.constant dense<0.000000e+00> : vector<256x32xf32>
    %72 = tpu.matmul %70, %71, %cst_108 {dimension_numbers = #tpu.dot_dimension_numbers<[1], [0], [0], [1], [0, 0, 1, 1], [], []>} : vector<256x64xf32>, vector<64x32xf32>, vector<256x32xf32> -> vector<256x32xf32>
    %c0_109 = arith.constant 0 : index
    %c0_110 = arith.constant 0 : index
    %73 = vector.load %arg9[%c0_109, %c0_110] : memref<256x64xf32, #tpu.memory_space<vmem>>, vector<256x64xf32>
    %74 = vector.extract_strided_slice %63 {offsets = [64, 0], sizes = [64, 32], strides = [1, 1]} : vector<128x32xf32> to vector<64x32xf32>
    %cst_111 = arith.constant dense<0.000000e+00> : vector<256x32xf32>
    %75 = tpu.matmul %73, %74, %cst_111 {dimension_numbers = #tpu.dot_dimension_numbers<[1], [0], [0], [1], [0, 0, 1, 1], [], []>} : vector<256x64xf32>, vector<64x32xf32>, vector<256x32xf32> -> vector<256x32xf32>
    %76 = tpu.concatenate %72, %75 in 0 : vector<256x32xf32>, vector<256x32xf32> -> vector<512x32xf32>
    %77 = vector.shape_cast %76 : vector<512x32xf32> to vector<2x16x16x32xf32>
    %c0_112 = arith.constant 0 : index
    %c1_113 = arith.constant 1 : index
    %c1_114 = arith.constant 1 : index
    %c0_115 = arith.constant 0 : index
    %78 = vector.load %arg15[%c0_112, %c1_113, %c1_114, %c0_115] : memref<2x18x18x32xf32, #tpu.memory_space<vmem>>, vector<2x16x16x32xf32>
    tpu.vector_store %arg15[%c0_112, %c1_113, %c1_114, %c0_115], %77 {strides = array<i32>} : memref<2x18x18x32xf32, #tpu.memory_space<vmem>>, vector<2x16x16x32xf32>,
    %c0_116 = arith.constant 0 : index
    %c0_117 = arith.constant 0 : index
    %c0_118 = arith.constant 0 : index
    %c0_119 = arith.constant 0 : index
    %79 = vector.load %arg15[%c0_116, %c0_117, %c0_118, %c0_119] : memref<2x18x18x32xf32, #tpu.memory_space<vmem>>, vector<2x16x16x32xf32>
    %80 = vector.shape_cast %79 : vector<2x16x16x32xf32> to vector<512x32xf32>
    %c0_120 = arith.constant 0 : index
    %c0_121 = arith.constant 0 : index
    %c0_122 = arith.constant 0 : index
    %81 = vector.load %arg5[%c0_120, %c0_121, %c0_122] : memref<9x32x32xf32, #tpu.memory_space<vmem>>, vector<1x32x32xf32>
    %82 = vector.shape_cast %81 : vector<1x32x32xf32> to vector<32x32xf32>
    %cst_123 = arith.constant dense<0.000000e+00> : vector<512x32xf32>
    %83 = tpu.matmul %80, %82, %cst_123 {dimension_numbers = #tpu.dot_dimension_numbers<[1], [0], [0], [1], [0, 0, 1, 1], [], []>} : vector<512x32xf32>, vector<32x32xf32>, vector<512x32xf32> -> vector<512x32xf32>
    %c0_124 = arith.constant 0 : index
    %c0_125 = arith.constant 0 : index
    %c1_126 = arith.constant 1 : index
    %c0_127 = arith.constant 0 : index
    %84 = vector.load %arg15[%c0_124, %c0_125, %c1_126, %c0_127] : memref<2x18x18x32xf32, #tpu.memory_space<vmem>>, vector<2x16x16x32xf32>
    %85 = vector.shape_cast %84 : vector<2x16x16x32xf32> to vector<512x32xf32>
    %c1_128 = arith.constant 1 : index
    %c0_129 = arith.constant 0 : index
    %c0_130 = arith.constant 0 : index
    %86 = vector.load %arg5[%c1_128, %c0_129, %c0_130] : memref<9x32x32xf32, #tpu.memory_space<vmem>>, vector<1x32x32xf32>
    %87 = vector.shape_cast %86 : vector<1x32x32xf32> to vector<32x32xf32>
    %cst_131 = arith.constant dense<0.000000e+00> : vector<512x32xf32>
    %88 = tpu.matmul %85, %87, %cst_131 {dimension_numbers = #tpu.dot_dimension_numbers<[1], [0], [0], [1], [0, 0, 1, 1], [], []>} : vector<512x32xf32>, vector<32x32xf32>, vector<512x32xf32> -> vector<512x32xf32>
    %89 = arith.addf %83, %88 : vector<512x32xf32>
    %c0_132 = arith.constant 0 : index
    %c0_133 = arith.constant 0 : index
    %c2_134 = arith.constant 2 : index
    %c0_135 = arith.constant 0 : index
    %90 = vector.load %arg15[%c0_132, %c0_133, %c2_134, %c0_135] : memref<2x18x18x32xf32, #tpu.memory_space<vmem>>, vector<2x16x16x32xf32>
    %91 = vector.shape_cast %90 : vector<2x16x16x32xf32> to vector<512x32xf32>
    %c2_136 = arith.constant 2 : index
    %c0_137 = arith.constant 0 : index
    %c0_138 = arith.constant 0 : index
    %92 = vector.load %arg5[%c2_136, %c0_137, %c0_138] : memref<9x32x32xf32, #tpu.memory_space<vmem>>, vector<1x32x32xf32>
    %93 = vector.shape_cast %92 : vector<1x32x32xf32> to vector<32x32xf32>
    %cst_139 = arith.constant dense<0.000000e+00> : vector<512x32xf32>
    %94 = tpu.matmul %91, %93, %cst_139 {dimension_numbers = #tpu.dot_dimension_numbers<[1], [0], [0], [1], [0, 0, 1, 1], [], []>} : vector<512x32xf32>, vector<32x32xf32>, vector<512x32xf32> -> vector<512x32xf32>
    %95 = arith.addf %89, %94 : vector<512x32xf32>
    %c0_140 = arith.constant 0 : index
    %c1_141 = arith.constant 1 : index
    %c0_142 = arith.constant 0 : index
    %c0_143 = arith.constant 0 : index
    %96 = vector.load %arg15[%c0_140, %c1_141, %c0_142, %c0_143] : memref<2x18x18x32xf32, #tpu.memory_space<vmem>>, vector<2x16x16x32xf32>
    %97 = vector.shape_cast %96 : vector<2x16x16x32xf32> to vector<512x32xf32>
    %c3_144 = arith.constant 3 : index
    %c0_145 = arith.constant 0 : index
    %c0_146 = arith.constant 0 : index
    %98 = vector.load %arg5[%c3_144, %c0_145, %c0_146] : memref<9x32x32xf32, #tpu.memory_space<vmem>>, vector<1x32x32xf32>
    %99 = vector.shape_cast %98 : vector<1x32x32xf32> to vector<32x32xf32>
    %cst_147 = arith.constant dense<0.000000e+00> : vector<512x32xf32>
    %100 = tpu.matmul %97, %99, %cst_147 {dimension_numbers = #tpu.dot_dimension_numbers<[1], [0], [0], [1], [0, 0, 1, 1], [], []>} : vector<512x32xf32>, vector<32x32xf32>, vector<512x32xf32> -> vector<512x32xf32>
    %101 = arith.addf %95, %100 : vector<512x32xf32>
    %c0_148 = arith.constant 0 : index
    %c1_149 = arith.constant 1 : index
    %c1_150 = arith.constant 1 : index
    %c0_151 = arith.constant 0 : index
    %102 = vector.load %arg15[%c0_148, %c1_149, %c1_150, %c0_151] : memref<2x18x18x32xf32, #tpu.memory_space<vmem>>, vector<2x16x16x32xf32>
    %103 = vector.shape_cast %102 : vector<2x16x16x32xf32> to vector<512x32xf32>
    %c4_152 = arith.constant 4 : index
    %c0_153 = arith.constant 0 : index
    %c0_154 = arith.constant 0 : index
    %104 = vector.load %arg5[%c4_152, %c0_153, %c0_154] : memref<9x32x32xf32, #tpu.memory_space<vmem>>, vector<1x32x32xf32>
    %105 = vector.shape_cast %104 : vector<1x32x32xf32> to vector<32x32xf32>
    %cst_155 = arith.constant dense<0.000000e+00> : vector<512x32xf32>
    %106 = tpu.matmul %103, %105, %cst_155 {dimension_numbers = #tpu.dot_dimension_numbers<[1], [0], [0], [1], [0, 0, 1, 1], [], []>} : vector<512x32xf32>, vector<32x32xf32>, vector<512x32xf32> -> vector<512x32xf32>
    %107 = arith.addf %101, %106 : vector<512x32xf32>
    %c0_156 = arith.constant 0 : index
    %c1_157 = arith.constant 1 : index
    %c2_158 = arith.constant 2 : index
    %c0_159 = arith.constant 0 : index
    %108 = vector.load %arg15[%c0_156, %c1_157, %c2_158, %c0_159] : memref<2x18x18x32xf32, #tpu.memory_space<vmem>>, vector<2x16x16x32xf32>
    %109 = vector.shape_cast %108 : vector<2x16x16x32xf32> to vector<512x32xf32>
    %c5_160 = arith.constant 5 : index
    %c0_161 = arith.constant 0 : index
    %c0_162 = arith.constant 0 : index
    %110 = vector.load %arg5[%c5_160, %c0_161, %c0_162] : memref<9x32x32xf32, #tpu.memory_space<vmem>>, vector<1x32x32xf32>
    %111 = vector.shape_cast %110 : vector<1x32x32xf32> to vector<32x32xf32>
    %cst_163 = arith.constant dense<0.000000e+00> : vector<512x32xf32>
    %112 = tpu.matmul %109, %111, %cst_163 {dimension_numbers = #tpu.dot_dimension_numbers<[1], [0], [0], [1], [0, 0, 1, 1], [], []>} : vector<512x32xf32>, vector<32x32xf32>, vector<512x32xf32> -> vector<512x32xf32>
    %113 = arith.addf %107, %112 : vector<512x32xf32>
    %c0_164 = arith.constant 0 : index
    %c2_165 = arith.constant 2 : index
    %c0_166 = arith.constant 0 : index
    %c0_167 = arith.constant 0 : index
    %114 = vector.load %arg15[%c0_164, %c2_165, %c0_166, %c0_167] : memref<2x18x18x32xf32, #tpu.memory_space<vmem>>, vector<2x16x16x32xf32>
    %115 = vector.shape_cast %114 : vector<2x16x16x32xf32> to vector<512x32xf32>
    %c6_168 = arith.constant 6 : index
    %c0_169 = arith.constant 0 : index
    %c0_170 = arith.constant 0 : index
    %116 = vector.load %arg5[%c6_168, %c0_169, %c0_170] : memref<9x32x32xf32, #tpu.memory_space<vmem>>, vector<1x32x32xf32>
    %117 = vector.shape_cast %116 : vector<1x32x32xf32> to vector<32x32xf32>
    %cst_171 = arith.constant dense<0.000000e+00> : vector<512x32xf32>
    %118 = tpu.matmul %115, %117, %cst_171 {dimension_numbers = #tpu.dot_dimension_numbers<[1], [0], [0], [1], [0, 0, 1, 1], [], []>} : vector<512x32xf32>, vector<32x32xf32>, vector<512x32xf32> -> vector<512x32xf32>
    %119 = arith.addf %113, %118 : vector<512x32xf32>
    %c0_172 = arith.constant 0 : index
    %c2_173 = arith.constant 2 : index
    %c1_174 = arith.constant 1 : index
    %c0_175 = arith.constant 0 : index
    %120 = vector.load %arg15[%c0_172, %c2_173, %c1_174, %c0_175] : memref<2x18x18x32xf32, #tpu.memory_space<vmem>>, vector<2x16x16x32xf32>
    %121 = vector.shape_cast %120 : vector<2x16x16x32xf32> to vector<512x32xf32>
    %c7_176 = arith.constant 7 : index
    %c0_177 = arith.constant 0 : index
    %c0_178 = arith.constant 0 : index
    %122 = vector.load %arg5[%c7_176, %c0_177, %c0_178] : memref<9x32x32xf32, #tpu.memory_space<vmem>>, vector<1x32x32xf32>
    %123 = vector.shape_cast %122 : vector<1x32x32xf32> to vector<32x32xf32>
    %cst_179 = arith.constant dense<0.000000e+00> : vector<512x32xf32>
    %124 = tpu.matmul %121, %123, %cst_179 {dimension_numbers = #tpu.dot_dimension_numbers<[1], [0], [0], [1], [0, 0, 1, 1], [], []>} : vector<512x32xf32>, vector<32x32xf32>, vector<512x32xf32> -> vector<512x32xf32>
    %125 = arith.addf %119, %124 : vector<512x32xf32>
    %c0_180 = arith.constant 0 : index
    %c2_181 = arith.constant 2 : index
    %c2_182 = arith.constant 2 : index
    %c0_183 = arith.constant 0 : index
    %126 = vector.load %arg15[%c0_180, %c2_181, %c2_182, %c0_183] : memref<2x18x18x32xf32, #tpu.memory_space<vmem>>, vector<2x16x16x32xf32>
    %127 = vector.shape_cast %126 : vector<2x16x16x32xf32> to vector<512x32xf32>
    %c8_184 = arith.constant 8 : index
    %c0_185 = arith.constant 0 : index
    %c0_186 = arith.constant 0 : index
    %128 = vector.load %arg5[%c8_184, %c0_185, %c0_186] : memref<9x32x32xf32, #tpu.memory_space<vmem>>, vector<1x32x32xf32>
    %129 = vector.shape_cast %128 : vector<1x32x32xf32> to vector<32x32xf32>
    %cst_187 = arith.constant dense<0.000000e+00> : vector<512x32xf32>
    %130 = tpu.matmul %127, %129, %cst_187 {dimension_numbers = #tpu.dot_dimension_numbers<[1], [0], [0], [1], [0, 0, 1, 1], [], []>} : vector<512x32xf32>, vector<32x32xf32>, vector<512x32xf32> -> vector<512x32xf32>
    %131 = arith.addf %125, %130 : vector<512x32xf32>
    %c0_188 = arith.constant 0 : index
    %c0_189 = arith.constant 0 : index
    %132 = vector.load %arg6[%c0_188, %c0_189] : memref<1x32xf32, #tpu.memory_space<vmem>>, vector<1x32xf32>
    %133 = vector.broadcast %132 : vector<1x32xf32> to vector<512x32xf32>
    %134 = arith.addf %131, %133 : vector<512x32xf32>
    %135 = vector.shape_cast %134 : vector<512x32xf32> to vector<2x16x16x32xf32>
    %c0_190 = arith.constant 0 : index
    %c1_191 = arith.constant 1 : index
    %c1_192 = arith.constant 1 : index
    %c0_193 = arith.constant 0 : index
    %136 = vector.load %arg15[%c0_190, %c1_191, %c1_192, %c0_193] : memref<2x18x18x32xf32, #tpu.memory_space<vmem>>, vector<2x16x16x32xf32>
    tpu.vector_store %arg15[%c0_190, %c1_191, %c1_192, %c0_193], %135 {strides = array<i32>} : memref<2x18x18x32xf32, #tpu.memory_space<vmem>>, vector<2x16x16x32xf32>,
    %c0_194 = arith.constant 0 : index
    %c0_195 = arith.constant 0 : index
    %c0_196 = arith.constant 0 : index
    %c0_197 = arith.constant 0 : index
    %137 = vector.load %arg15[%c0_194, %c0_195, %c0_196, %c0_197] : memref<2x18x18x32xf32, #tpu.memory_space<vmem>>, vector<2x16x16x32xf32>
    %138 = vector.shape_cast %137 : vector<2x16x16x32xf32> to vector<512x32xf32>
    %c0_198 = arith.constant 0 : index
    %c0_199 = arith.constant 0 : index
    %c0_200 = arith.constant 0 : index
    %139 = vector.load %arg7[%c0_198, %c0_199, %c0_200] : memref<9x5x32xf32, #tpu.memory_space<vmem>>, vector<1x5x32xf32>
    %140 = vector.shape_cast %139 : vector<1x5x32xf32> to vector<5x32xf32>
    %cst_201 = arith.constant dense<0.000000e+00> : vector<5x512xf32>
    %141 = tpu.matmul %140, %138, %cst_201 {dimension_numbers = #tpu.dot_dimension_numbers<[1], [1], [0], [0], [0, 0, 1, 0], [], []>} : vector<5x32xf32>, vector<512x32xf32>, vector<5x512xf32> -> vector<5x512xf32>
    %c0_202 = arith.constant 0 : index
    %c0_203 = arith.constant 0 : index
    %c1_204 = arith.constant 1 : index
    %c0_205 = arith.constant 0 : index
    %142 = vector.load %arg15[%c0_202, %c0_203, %c1_204, %c0_205] : memref<2x18x18x32xf32, #tpu.memory_space<vmem>>, vector<2x16x16x32xf32>
    %143 = vector.shape_cast %142 : vector<2x16x16x32xf32> to vector<512x32xf32>
    %c1_206 = arith.constant 1 : index
    %c0_207 = arith.constant 0 : index
    %c0_208 = arith.constant 0 : index
    %144 = vector.load %arg7[%c1_206, %c0_207, %c0_208] : memref<9x5x32xf32, #tpu.memory_space<vmem>>, vector<1x5x32xf32>
    %145 = vector.shape_cast %144 : vector<1x5x32xf32> to vector<5x32xf32>
    %cst_209 = arith.constant dense<0.000000e+00> : vector<5x512xf32>
    %146 = tpu.matmul %145, %143, %cst_209 {dimension_numbers = #tpu.dot_dimension_numbers<[1], [1], [0], [0], [0, 0, 1, 0], [], []>} : vector<5x32xf32>, vector<512x32xf32>, vector<5x512xf32> -> vector<5x512xf32>
    %147 = arith.addf %141, %146 : vector<5x512xf32>
    %c0_210 = arith.constant 0 : index
    %c0_211 = arith.constant 0 : index
    %c2_212 = arith.constant 2 : index
    %c0_213 = arith.constant 0 : index
    %148 = vector.load %arg15[%c0_210, %c0_211, %c2_212, %c0_213] : memref<2x18x18x32xf32, #tpu.memory_space<vmem>>, vector<2x16x16x32xf32>
    %149 = vector.shape_cast %148 : vector<2x16x16x32xf32> to vector<512x32xf32>
    %c2_214 = arith.constant 2 : index
    %c0_215 = arith.constant 0 : index
    %c0_216 = arith.constant 0 : index
    %150 = vector.load %arg7[%c2_214, %c0_215, %c0_216] : memref<9x5x32xf32, #tpu.memory_space<vmem>>, vector<1x5x32xf32>
    %151 = vector.shape_cast %150 : vector<1x5x32xf32> to vector<5x32xf32>
    %cst_217 = arith.constant dense<0.000000e+00> : vector<5x512xf32>
    %152 = tpu.matmul %151, %149, %cst_217 {dimension_numbers = #tpu.dot_dimension_numbers<[1], [1], [0], [0], [0, 0, 1, 0], [], []>} : vector<5x32xf32>, vector<512x32xf32>, vector<5x512xf32> -> vector<5x512xf32>
    %153 = arith.addf %147, %152 : vector<5x512xf32>
    %c0_218 = arith.constant 0 : index
    %c1_219 = arith.constant 1 : index
    %c0_220 = arith.constant 0 : index
    %c0_221 = arith.constant 0 : index
    %154 = vector.load %arg15[%c0_218, %c1_219, %c0_220, %c0_221] : memref<2x18x18x32xf32, #tpu.memory_space<vmem>>, vector<2x16x16x32xf32>
    %155 = vector.shape_cast %154 : vector<2x16x16x32xf32> to vector<512x32xf32>
    %c3_222 = arith.constant 3 : index
    %c0_223 = arith.constant 0 : index
    %c0_224 = arith.constant 0 : index
    %156 = vector.load %arg7[%c3_222, %c0_223, %c0_224] : memref<9x5x32xf32, #tpu.memory_space<vmem>>, vector<1x5x32xf32>
    %157 = vector.shape_cast %156 : vector<1x5x32xf32> to vector<5x32xf32>
    %cst_225 = arith.constant dense<0.000000e+00> : vector<5x512xf32>
    %158 = tpu.matmul %157, %155, %cst_225 {dimension_numbers = #tpu.dot_dimension_numbers<[1], [1], [0], [0], [0, 0, 1, 0], [], []>} : vector<5x32xf32>, vector<512x32xf32>, vector<5x512xf32> -> vector<5x512xf32>
    %159 = arith.addf %153, %158 : vector<5x512xf32>
    %c0_226 = arith.constant 0 : index
    %c1_227 = arith.constant 1 : index
    %c1_228 = arith.constant 1 : index
    %c0_229 = arith.constant 0 : index
    %160 = vector.load %arg15[%c0_226, %c1_227, %c1_228, %c0_229] : memref<2x18x18x32xf32, #tpu.memory_space<vmem>>, vector<2x16x16x32xf32>
    %161 = vector.shape_cast %160 : vector<2x16x16x32xf32> to vector<512x32xf32>
    %c4_230 = arith.constant 4 : index
    %c0_231 = arith.constant 0 : index
    %c0_232 = arith.constant 0 : index
    %162 = vector.load %arg7[%c4_230, %c0_231, %c0_232] : memref<9x5x32xf32, #tpu.memory_space<vmem>>, vector<1x5x32xf32>
    %163 = vector.shape_cast %162 : vector<1x5x32xf32> to vector<5x32xf32>
    %cst_233 = arith.constant dense<0.000000e+00> : vector<5x512xf32>
    %164 = tpu.matmul %163, %161, %cst_233 {dimension_numbers = #tpu.dot_dimension_numbers<[1], [1], [0], [0], [0, 0, 1, 0], [], []>} : vector<5x32xf32>, vector<512x32xf32>, vector<5x512xf32> -> vector<5x512xf32>
    %165 = arith.addf %159, %164 : vector<5x512xf32>
    %c0_234 = arith.constant 0 : index
    %c1_235 = arith.constant 1 : index
    %c2_236 = arith.constant 2 : index
    %c0_237 = arith.constant 0 : index
    %166 = vector.load %arg15[%c0_234, %c1_235, %c2_236, %c0_237] : memref<2x18x18x32xf32, #tpu.memory_space<vmem>>, vector<2x16x16x32xf32>
    %167 = vector.shape_cast %166 : vector<2x16x16x32xf32> to vector<512x32xf32>
    %c5_238 = arith.constant 5 : index
    %c0_239 = arith.constant 0 : index
    %c0_240 = arith.constant 0 : index
    %168 = vector.load %arg7[%c5_238, %c0_239, %c0_240] : memref<9x5x32xf32, #tpu.memory_space<vmem>>, vector<1x5x32xf32>
    %169 = vector.shape_cast %168 : vector<1x5x32xf32> to vector<5x32xf32>
    %cst_241 = arith.constant dense<0.000000e+00> : vector<5x512xf32>
    %170 = tpu.matmul %169, %167, %cst_241 {dimension_numbers = #tpu.dot_dimension_numbers<[1], [1], [0], [0], [0, 0, 1, 0], [], []>} : vector<5x32xf32>, vector<512x32xf32>, vector<5x512xf32> -> vector<5x512xf32>
    %171 = arith.addf %165, %170 : vector<5x512xf32>
    %c0_242 = arith.constant 0 : index
    %c2_243 = arith.constant 2 : index
    %c0_244 = arith.constant 0 : index
    %c0_245 = arith.constant 0 : index
    %172 = vector.load %arg15[%c0_242, %c2_243, %c0_244, %c0_245] : memref<2x18x18x32xf32, #tpu.memory_space<vmem>>, vector<2x16x16x32xf32>
    %173 = vector.shape_cast %172 : vector<2x16x16x32xf32> to vector<512x32xf32>
    %c6_246 = arith.constant 6 : index
    %c0_247 = arith.constant 0 : index
    %c0_248 = arith.constant 0 : index
    %174 = vector.load %arg7[%c6_246, %c0_247, %c0_248] : memref<9x5x32xf32, #tpu.memory_space<vmem>>, vector<1x5x32xf32>
    %175 = vector.shape_cast %174 : vector<1x5x32xf32> to vector<5x32xf32>
    %cst_249 = arith.constant dense<0.000000e+00> : vector<5x512xf32>
    %176 = tpu.matmul %175, %173, %cst_249 {dimension_numbers = #tpu.dot_dimension_numbers<[1], [1], [0], [0], [0, 0, 1, 0], [], []>} : vector<5x32xf32>, vector<512x32xf32>, vector<5x512xf32> -> vector<5x512xf32>
    %177 = arith.addf %171, %176 : vector<5x512xf32>
    %c0_250 = arith.constant 0 : index
    %c2_251 = arith.constant 2 : index
    %c1_252 = arith.constant 1 : index
    %c0_253 = arith.constant 0 : index
    %178 = vector.load %arg15[%c0_250, %c2_251, %c1_252, %c0_253] : memref<2x18x18x32xf32, #tpu.memory_space<vmem>>, vector<2x16x16x32xf32>
    %179 = vector.shape_cast %178 : vector<2x16x16x32xf32> to vector<512x32xf32>
    %c7_254 = arith.constant 7 : index
    %c0_255 = arith.constant 0 : index
    %c0_256 = arith.constant 0 : index
    %180 = vector.load %arg7[%c7_254, %c0_255, %c0_256] : memref<9x5x32xf32, #tpu.memory_space<vmem>>, vector<1x5x32xf32>
    %181 = vector.shape_cast %180 : vector<1x5x32xf32> to vector<5x32xf32>
    %cst_257 = arith.constant dense<0.000000e+00> : vector<5x512xf32>
    %182 = tpu.matmul %181, %179, %cst_257 {dimension_numbers = #tpu.dot_dimension_numbers<[1], [1], [0], [0], [0, 0, 1, 0], [], []>} : vector<5x32xf32>, vector<512x32xf32>, vector<5x512xf32> -> vector<5x512xf32>
    %183 = arith.addf %177, %182 : vector<5x512xf32>
    %c0_258 = arith.constant 0 : index
    %c2_259 = arith.constant 2 : index
    %c2_260 = arith.constant 2 : index
    %c0_261 = arith.constant 0 : index
    %184 = vector.load %arg15[%c0_258, %c2_259, %c2_260, %c0_261] : memref<2x18x18x32xf32, #tpu.memory_space<vmem>>, vector<2x16x16x32xf32>
    %185 = vector.shape_cast %184 : vector<2x16x16x32xf32> to vector<512x32xf32>
    %c8_262 = arith.constant 8 : index
    %c0_263 = arith.constant 0 : index
    %c0_264 = arith.constant 0 : index
    %186 = vector.load %arg7[%c8_262, %c0_263, %c0_264] : memref<9x5x32xf32, #tpu.memory_space<vmem>>, vector<1x5x32xf32>
    %187 = vector.shape_cast %186 : vector<1x5x32xf32> to vector<5x32xf32>
    %cst_265 = arith.constant dense<0.000000e+00> : vector<5x512xf32>
    %188 = tpu.matmul %187, %185, %cst_265 {dimension_numbers = #tpu.dot_dimension_numbers<[1], [1], [0], [0], [0, 0, 1, 0], [], []>} : vector<5x32xf32>, vector<512x32xf32>, vector<5x512xf32> -> vector<5x512xf32>
    %189 = arith.addf %183, %188 : vector<5x512xf32>
    %c0_266 = arith.constant 0 : index
    %c0_267 = arith.constant 0 : index
    %190 = vector.load %arg8[%c0_266, %c0_267] : memref<5x1xf32, #tpu.memory_space<vmem>>, vector<5x1xf32>
    %191 = vector.broadcast %190 : vector<5x1xf32> to vector<5x512xf32>
    %192 = arith.addf %189, %191 : vector<5x512xf32>
    %193 = arith.negf %192 : vector<5x512xf32>
    %194 = math.exp %193 : vector<5x512xf32>
    %cst_268 = arith.constant 1.000000e+00 : f32
    %195 = vector.broadcast %cst_268 : f32 to vector<5x512xf32>
    %196 = arith.addf %195, %194 : vector<5x512xf32>
    %197 = arith.divf %195, %196 : vector<5x512xf32>
    %198 = vector.extract_strided_slice %197 {offsets = [0, 0], sizes = [5, 256], strides = [1, 1]} : vector<5x512xf32> to vector<5x256xf32>
    %c0_269 = arith.constant 0 : index
    %c0_270 = arith.constant 0 : index
    %c0_271 = arith.constant 0 : index
    %199 = vector.load %arg12[%c0_269, %c0_270, %c0_271] : memref<2x5x256xf32, #tpu.memory_space<vmem>>, vector<1x5x256xf32>
    %200 = vector.shape_cast %199 : vector<1x5x256xf32> to vector<5x256xf32>
    %201 = vector.shape_cast %198 : vector<5x256xf32> to vector<1x5x256xf32>
    tpu.vector_store %arg12[%c0_269, %c0_270, %c0_271], %201 {strides = array<i32>} : memref<2x5x256xf32, #tpu.memory_space<vmem>>, vector<1x5x256xf32>,
    %202 = vector.extract_strided_slice %197 {offsets = [0, 256], sizes = [5, 256], strides = [1, 1]} : vector<5x512xf32> to vector<5x256xf32>
    %c1_272 = arith.constant 1 : index
    %c0_273 = arith.constant 0 : index
    %c0_274 = arith.constant 0 : index
    %203 = vector.load %arg12[%c1_272, %c0_273, %c0_274] : memref<2x5x256xf32, #tpu.memory_space<vmem>>, vector<1x5x256xf32>
    %204 = vector.shape_cast %203 : vector<1x5x256xf32> to vector<5x256xf32>
    %205 = vector.shape_cast %202 : vector<5x256xf32> to vector<1x5x256xf32>
    tpu.vector_store %arg12[%c1_272, %c0_273, %c0_274], %205 {strides = array<i32>} : memref<2x5x256xf32, #tpu.memory_space<vmem>>, vector<1x5x256xf32>,
    %c0_275 = arith.constant 0 : index
    %c0_276 = arith.constant 0 : index
    %c0_277 = arith.constant 0 : index
    %206 = vector.load %arg2[%c0_275, %c0_276, %c0_277] : memref<2x1x32xf32, #tpu.memory_space<vmem>>, vector<2x1x32xf32>
    %207 = vector.shape_cast %206 : vector<2x1x32xf32> to vector<2x32xf32>
    %c0_278 = arith.constant 0 : index
    %c0_279 = arith.constant 0 : index
    %208 = vector.load %arg10[%c0_278, %c0_279] : memref<32x6xf32, #tpu.memory_space<vmem>>, vector<32x6xf32>
    %cst_280 = arith.constant dense<0.000000e+00> : vector<2x6xf32>
    %209 = tpu.matmul %207, %208, %cst_280 {dimension_numbers = #tpu.dot_dimension_numbers<[1], [0], [0], [1], [0, 0, 1, 1], [], []>} : vector<2x32xf32>, vector<32x6xf32>, vector<2x6xf32> -> vector<2x6xf32>
    %c0_281 = arith.constant 0 : index
    %c0_282 = arith.constant 0 : index
    %210 = vector.load %arg11[%c0_281, %c0_282] : memref<1x6xf32, #tpu.memory_space<vmem>>, vector<1x6xf32>
    %211 = vector.broadcast %210 : vector<1x6xf32> to vector<2x6xf32>
    %212 = arith.addf %209, %211 : vector<2x6xf32>
    %213 = vector.shape_cast %212 : vector<2x6xf32> to vector<2x1x6xf32>
    %c0_283 = arith.constant 0 : index
    %c0_284 = arith.constant 0 : index
    %c0_285 = arith.constant 0 : index
    %214 = vector.load %arg13[%c0_283, %c0_284, %c0_285] : memref<2x1x6xf32, #tpu.memory_space<vmem>>, vector<2x1x6xf32>
    tpu.vector_store %arg13[%c0_283, %c0_284, %c0_285], %213 {strides = array<i32>} : memref<2x1x6xf32, #tpu.memory_space<vmem>>, vector<2x1x6xf32>,
    return
  }
  func.func @transform_0(%arg0: i32) -> (i32, i32, i32, i32) {
    %c0_i32 = arith.constant 0 : i32
    %c0_i32_0 = arith.constant 0 : i32
    %c0_i32_1 = arith.constant 0 : i32
    %c0_i32_2 = arith.constant 0 : i32
    return %arg0, %c0_i32, %c0_i32_0, %c0_i32_1 : i32, i32, i32, i32
  }
  func.func @transform_1(%arg0: i32) -> (i32, i32, i32) {
    %c0_i32 = arith.constant 0 : i32
    %c0_i32_0 = arith.constant 0 : i32
    %c0_i32_1 = arith.constant 0 : i32
    return %arg0, %c0_i32, %c0_i32_0 : i32, i32, i32
  }
  func.func @transform_2(%arg0: i32) -> (i32, i32, i32) {
    %c0_i32 = arith.constant 0 : i32
    %c0_i32_0 = arith.constant 0 : i32
    %c0_i32_1 = arith.constant 0 : i32
    %c0_i32_2 = arith.constant 0 : i32
    return %c0_i32, %c0_i32_0, %c0_i32_1 : i32, i32, i32
  }
  func.func @transform_3(%arg0: i32) -> (i32, i32) {
    %c0_i32 = arith.constant 0 : i32
    %c0_i32_0 = arith.constant 0 : i32
    %c0_i32_1 = arith.constant 0 : i32
    return %c0_i32, %c0_i32_0 : i32, i32
  }
  func.func @transform_4(%arg0: i32) -> (i32, i32, i32) {
    %c0_i32 = arith.constant 0 : i32
    %c0_i32_0 = arith.constant 0 : i32
    %c0_i32_1 = arith.constant 0 : i32
    %c0_i32_2 = arith.constant 0 : i32
    return %c0_i32, %c0_i32_0, %c0_i32_1 : i32, i32, i32
  }
  func.func @transform_5(%arg0: i32) -> (i32, i32) {
    %c0_i32 = arith.constant 0 : i32
    %c0_i32_0 = arith.constant 0 : i32
    %c0_i32_1 = arith.constant 0 : i32
    return %c0_i32, %c0_i32_0 : i32, i32
  }
  func.func @transform_6(%arg0: i32) -> (i32, i32, i32) {
    %c0_i32 = arith.constant 0 : i32
    %c0_i32_0 = arith.constant 0 : i32
    %c0_i32_1 = arith.constant 0 : i32
    %c0_i32_2 = arith.constant 0 : i32
    return %c0_i32, %c0_i32_0, %c0_i32_1 : i32, i32, i32
  }
  func.func @transform_7(%arg0: i32) -> (i32, i32) {
    %c0_i32 = arith.constant 0 : i32
    %c0_i32_0 = arith.constant 0 : i32
    %c0_i32_1 = arith.constant 0 : i32
    return %c0_i32, %c0_i32_0 : i32, i32
  }
  func.func @transform_8(%arg0: i32) -> (i32, i32) {
    %c0_i32 = arith.constant 0 : i32
    %c0_i32_0 = arith.constant 0 : i32
    %c0_i32_1 = arith.constant 0 : i32
    return %c0_i32, %c0_i32_0 : i32, i32
  }
  func.func @transform_9(%arg0: i32) -> (i32, i32) {
    %c0_i32 = arith.constant 0 : i32
    %c0_i32_0 = arith.constant 0 : i32
    %c0_i32_1 = arith.constant 0 : i32
    return %c0_i32, %c0_i32_0 : i32, i32
  }
  func.func @transform_10(%arg0: i32) -> (i32, i32) {
    %c0_i32 = arith.constant 0 : i32
    %c0_i32_0 = arith.constant 0 : i32
    %c0_i32_1 = arith.constant 0 : i32
    return %c0_i32, %c0_i32_0 : i32, i32
  }
  func.func @transform_11(%arg0: i32) -> (i32, i32, i32) {
    %c0_i32 = arith.constant 0 : i32
    %c0_i32_0 = arith.constant 0 : i32
    %c0_i32_1 = arith.constant 0 : i32
    return %arg0, %c0_i32, %c0_i32_0 : i32, i32, i32
  }
  func.func @transform_12(%arg0: i32) -> (i32, i32, i32) {
    %c0_i32 = arith.constant 0 : i32
    %c0_i32_0 = arith.constant 0 : i32
    %c0_i32_1 = arith.constant 0 : i32
    return %arg0, %c0_i32, %c0_i32_0 : i32, i32, i32
  }
}

</mosaic_0001>

<bundles_post_ra>
// kernel: tpu_custom_call.1
= control target key start
LH: loop header
LB: loop body
LE: loop exit
PB: predicated region body
PF: predicated region fallthrough
CT: control target
= control target key end

     0   :  { %18 = vsyncpa [#allocation5], 0  ;;  %s22702_s0 = inlined_call_operand.vmem [shape: f32[2,8,8,32], index: 0, kind: input, shape index: {}]   ;;  %s22703_s1 = inlined_call_operand.vmem [shape: f32[2,1,32], index: 1, kind: input, shape index: {}]   ;;  %s22704_s2 = inlined_call_operand.vmem [shape: f32[9,32,32], index: 2, kind: input, shape index: {}]   ;;  %s22705_s3 = inlined_call_operand.vmem [shape: f32[1,32], index: 3, kind: input, shape index: {}]   ;;  %s22706_s4 = inlined_call_operand.hbm [shape: f32[9,32,32], index: 4, kind: input, shape index: {}]   ;;  %s22707_s5 = inlined_call_operand.vmem [shape: f32[1,32], index: 5, kind: input, shape index: {}]   ;;  %s22708_s6 = inlined_call_operand.hbm [shape: f32[9,5,32], index: 6, kind: input, shape index: {}]   ;;  %s22709_s7 = inlined_call_operand.vmem [shape: f32[5,1], index: 7, kind: input, shape index: {}]   ;;  %s22710_s8 = inlined_call_operand.vmem [shape: f32[256,64], index: 8, kind: input, shape index: {}]   ;;  %s22711_s9 = inlined_call_operand.vmem [shape: f32[32,6], index: 9, kind: input, shape index: {}]   ;;  %s22712_s10 = inlined_call_operand.vmem [shape: f32[1,6], index: 10, kind: input, shape index: {}]   ;;  %s22713_s11 = inlined_call_operand.vmem [shape: f32[2,5,256], index: 11, kind: output, shape index: {0}]   ;;  %s22714_s12 = inlined_call_operand.hbm [shape: f32[2,1,6], index: 12, kind: output, shape index: {1}]  }
   0x1   :  { %19 = vsyncpa [#allocation8], 0 }
   0x2   :  { %20 = vsyncpa [#allocation6], 0  ;;  %s17564_s21 = smov [#allocation4]  }
   0x3   :  { %s34_s22 = sshll.u32 %s17564_s21, 4  ;;  %s35_s22 = int_to_ptr.vmem [resolvable:$true] %s34_s22 }
   0x4   :  { %s17506_s23 = scalar_lea.vmem %s35_s22, 4608  ;;  %p17511_p1 = scmp.lt.s32.totalorder %s35_s22, %s35_s22 }
   0x5   :  { %p17507_p0 = scmp.ne.s32.totalorder %s35_s22, %s17506_s23  ;;  %p17512_p2 = scmp.lt.s32.totalorder %s17506_s23, %s17506_s23 }
   0x7   :  { %p17513_p3 = por %p17512_p2, %p17511_p1 }
   0x9   :  { %p17514_p4 = pnand %p17513_p3, %p17507_p0 }
   0xb   :  { %17517 = shalt.err (!%p17514_p4)
}
   0xc   :  { %s17565_s24 = smov 128   ;;  %s17566_s25 = smov 8  }
   0xd   :  { %40 = dma.hbm_to_vmem [thread:$0]  %s22706_s4, 4608, %s35_s22, [#allocation5], %s17565_s24, %s17565_s24, %s17566_s25  }
   0xe   :  { %s17567_s28 = smov [#allocation7]  }
   0xf   :  { %s48_s29 = sshll.u32 %s17567_s28, 4  ;;  %s49_s29 = int_to_ptr.vmem [resolvable:$true] %s48_s29 }
  0x10   :  { %s17526_s30 = scalar_lea.vmem %s49_s29, 1152  ;;  %p17531_p6 = scmp.lt.s32.totalorder %s49_s29, %s49_s29 }
  0x11   :  { %p17527_p5 = scmp.ne.s32.totalorder %s49_s29, %s17526_s30  ;;  %p17532_p7 = scmp.lt.s32.totalorder %s17526_s30, %s17526_s30 }
  0x13   :  { %p17533_p8 = por %p17532_p7, %p17531_p6 }
  0x15   :  { %p17534_p9 = pnand %p17533_p8, %p17527_p5 }
  0x17   :  { %17537 = shalt.err (!%p17534_p9)
}
  0x18   :  { %54 = dma.hbm_to_vmem [thread:$0]  %s22708_s6, 1152, %s49_s29, [#allocation8], %s17565_s24, %s17565_s24, %s17566_s25  }
  0x19   :  { %17558 = dma.done.wait [#allocation5], 4608  }
  0x1a   :  { %17559 = vsyncadd [#allocation5], 4294962688 }
  0x1b   :  { %17560 = dma.done.wait [#allocation8], 1152  }
  0x1c   :  { %17561 = vsyncadd [#allocation8], 4294966144  ;;  %vm69_vm0 = vcmask 261120   ;;  %vm71_vm1 = vcmask 254976   ;;  %vm80_vm2 = vcmask 253952   ;;  %v22715_v0 = vmov 0.0  }
  0x1d   :  { %70 = vst.msk [vmem:[#allocation2] sm:$0xff] %vm69_vm0, %v22715_v0  ;;  %73 = vst.msk [vmem:[#allocation2 + $0xa0] sm:$0xff] %vm69_vm0, %v22715_v0  ;;  %v13189_v1 = vld [vmem:[%s22704_s2 + $0x38] sm:$0xff]  ;;  %v13188_v2 = vld [vmem:[%s22704_s2 + $0x30] sm:$0xff]  ;;  %vm2332_vm3 = vcmask 523264   ;;  %vm17571_vm4 = vmmov 0  }
  0x1e   :  { %72 = vst.msk [vmem:[#allocation2 + $0x8] sm:$0x3] %vm71_vm1, %v22715_v0  ;;  %74 = vst.msk [vmem:[#allocation2 + $0xa8] sm:$0x3] %vm71_vm1, %v22715_v0  ;;  %16095 = vmatprep.subr.mxu0 %v13189_v1  ;;  %17458 = vmatprep.subr.mxu1 %v13189_v1  ;;  %v13187_v3 = vld [vmem:[%s22704_s2 + $0x28] sm:$0xff]  ;;  %v121_v4 = vld [vmem:[%s22702_s0] sm:$0xff] }
  0x1f   :  { %76 = vst.msk [vmem:[#allocation2 + $0x90] sm:$0xff] %vm69_vm0, %v22715_v0  ;;  %78 = vst.msk [vmem:[#allocation2 + $0x130] sm:$0xff] %vm69_vm0, %v22715_v0  ;;  %16096 = vmatpush3.msra.mxu0 %v13189_v1  ;;  %17462 = vmatpush3.msra.mxu1 %v13189_v1  ;;  %v130_v5 = vld [vmem:[%s22702_s0 + $0x48] sm:$0xff]  ;;  %v131_v6 = vld [vmem:[%s22702_s0 + $0x50] sm:$0xff]  ;;  %vm13161_vm5 = vcmask 40960   ;;  %s17572_s26 = smov [#allocation9]  }
  0x20   :  { %77 = vst.msk [vmem:[#allocation2 + $0x98] sm:$0x3] %vm71_vm1, %v22715_v0  ;;  %79 = vst.msk [vmem:[#allocation2 + $0x138] sm:$0x3] %vm71_vm1, %v22715_v0  ;;  %v122_v7 = vld [vmem:[%s22702_s0 + $0x8] sm:$0xff]  ;;  %16097 = vmatprep.subr.mxu0 %v13188_v2  ;;  %17459 = vmatprep.subr.mxu1 %v13188_v2  ;;  %v123_v8 = vld [vmem:[%s22702_s0 + $0x10] sm:$0xff] }
  0x21   :  { %2215 = vst.msk [vmem:[#allocation3] sm:$0xff] %vm69_vm0, %v22715_v0  ;;  %2216 = vst.msk [vmem:[#allocation3 + $0x8] sm:$0xff] %vm69_vm0, %v22715_v0  ;;  %v132_v9 = vld [vmem:[%s22702_s0 + $0x58] sm:$0xff]  ;;  %v133_v10 = vld [vmem:[%s22702_s0 + $0x60] sm:$0xff]  ;;  %16098 = vmatpush3.msra.mxu0 %v13188_v2  ;;  %17463 = vmatpush3.msra.mxu1 %v13188_v2  ;;  %s13171_s27 = sshll.u32 %s17572_s26, 4  ;;  %s13172_s27 = int_to_ptr.vmem [resolvable:$true] %s13171_s27 }
  0x22   :  { %2217 = vst.msk [vmem:[#allocation3 + $0x10] sm:$0x3] %vm71_vm1, %v22715_v0  ;;  %2220 = vst.msk [vmem:[#allocation3 + $0x1c0] sm:$0x3] %vm71_vm1, %v22715_v0  ;;  %v13186_v11 = vld [vmem:[%s22704_s2 + $0x20] sm:$0xff]  ;;  %v124_v13 = vld [vmem:[%s22702_s0 + $0x18] sm:$0xff]  ;;  %16099 = vmatprep.subr.mxu0 %v13187_v3  ;;  %17460 = vmatprep.subr.mxu1 %v13187_v3  ;;  %p17543_p11 = scmp.lt.s32.totalorder %s13172_s27, %s13172_s27 }
  0x23   :  { %2218 = vst.msk [vmem:[#allocation3 + $0x1b0] sm:$0xff] %vm69_vm0, %v22715_v0  ;;  %2219 = vst.msk [vmem:[#allocation3 + $0x1b8] sm:$0xff] %vm69_vm0, %v22715_v0  ;;  %v125_v14 = vld [vmem:[%s22702_s0 + $0x20] sm:$0xff]  ;;  %v134_v15 = vld [vmem:[%s22702_s0 + $0x68] sm:$0xff]  ;;  %16100 = vmatpush3.msra.mxu0 %v13187_v3  ;;  %17464 = vmatpush3.msra.mxu1 %v13187_v3 }
  0x24   :  { %2222 = vst.msk [vmem:[#allocation3 + $0x198] sm:$0xff] %vm69_vm0, %v22715_v0  ;;  %2223 = vst.msk [vmem:[#allocation3 + $0x1a0] sm:$0xff] %vm69_vm0, %v22715_v0  ;;  %v135_v16 = vld [vmem:[%s22702_s0 + $0x70] sm:$0xff]  ;;  %v126_v17 = vld [vmem:[%s22702_s0 + $0x28] sm:$0xff]  ;;  %16101 = vmatprep.subr.mxu0 %v13186_v11  ;;  %17461 = vmatprep.subr.mxu1 %v13186_v11 }
  0x25   :  { %2224 = vst.msk [vmem:[#allocation3 + $0x1a8] sm:$0x3] %vm71_vm1, %v22715_v0  ;;  %2227 = vst.msk [vmem:[#allocation3 + $0x358] sm:$0x3] %vm71_vm1, %v22715_v0  ;;  %v174_v12 = vld [vmem:[#allocation2 + $0x1] sm:$0xff]  ;;  %v173_v18 = vld [vmem:[%s22704_s2 + $0x18] sm:$0xff]  ;;  %16102 = vmatpush3.msra.mxu0 %v13186_v11  ;;  %17465 = vmatpush3.msra.mxu1 %v13186_v11 }
  0x26   :  { %2225 = vst.msk [vmem:[#allocation3 + $0x348] sm:$0xff] %vm69_vm0, %v22715_v0  ;;  %2226 = vst.msk [vmem:[#allocation3 + $0x350] sm:$0xff] %vm69_vm0, %v22715_v0  ;;  %v127_v19 = vld [vmem:[%s22702_s0 + $0x30] sm:$0xff]  ;;  %v13225_v20 = vld [vmem:[%s22704_s2 + $0x58] sm:$0xff]  ;;  %16103 = vmatprep.mubr.msk.f32.mxu0 %vm69_vm0, %v174_v12  ;;  %16127 = vmatprep.subr.mxu1 %v173_v18 }
  0x27   :  { %82 = vst.msk [vmem:[#allocation2 + $0x10] sm:$0x1] %vm80_vm2, %v22715_v0  ;;  %83 = vst.msk [vmem:[#allocation2 + $0x20] sm:$0x1] %vm80_vm2, %v22715_v0  ;;  %v129_v21 = vld [vmem:[%s22702_s0 + $0x40] sm:$0xff]  ;;  %16159 = vmatprep.subr.mxu0 %v13225_v20  ;;  %v172_v28 = vld [vmem:[%s22704_s2 + $0x10] sm:$0xff] }
  0x28   :  { %84 = vst.msk [vmem:[#allocation2 + $0x30] sm:$0x1] %vm80_vm2, %v22715_v0  ;;  %85 = vst.msk [vmem:[#allocation2 + $0x40] sm:$0x1] %vm80_vm2, %v22715_v0  ;;  %v171_v31 = vld [vmem:[%s22704_s2 + $0x8] sm:$0xff]  ;;  %v170_v34 = vld [vmem:[%s22704_s2] sm:$0xff] }
  0x29   :  { %86 = vst.msk [vmem:[#allocation2 + $0x50] sm:$0x1] %vm80_vm2, %v22715_v0  ;;  %87 = vst.msk [vmem:[#allocation2 + $0x60] sm:$0x1] %vm80_vm2, %v22715_v0  ;;  %v13224_v37 = vld [vmem:[%s22704_s2 + $0x50] sm:$0xff]  ;;  %v13223_v40 = vld [vmem:[%s22704_s2 + $0x48] sm:$0xff] }
  0x2a   :  { %88 = vst.msk [vmem:[#allocation2 + $0x70] sm:$0x1] %vm80_vm2, %v22715_v0  ;;  %89 = vst.msk [vmem:[#allocation2 + $0x80] sm:$0x1] %vm80_vm2, %v22715_v0  ;;  %v182_v41 = vld [vmem:[#allocation2 + $0xa1] sm:$0xff]  ;;  %v13245_v46 = vld [vmem:[%s22704_s2 + $0x78] sm:$0xff] }
  0x2b   :  { %92 = vst.msk [vmem:[#allocation2 + $0xb0] sm:$0x1] %vm80_vm2, %v22715_v0  ;;  %93 = vst.msk [vmem:[#allocation2 + $0xc0] sm:$0x1] %vm80_vm2, %v22715_v0  ;;  %v13222_v43 = vld [vmem:[%s22704_s2 + $0x40] sm:$0xff]  ;;  %v13244_v49 = vld [vmem:[%s22704_s2 + $0x70] sm:$0xff] }
  0x2c   :  { %94 = vst.msk [vmem:[#allocation2 + $0xd0] sm:$0x1] %vm80_vm2, %v22715_v0  ;;  %95 = vst.msk [vmem:[#allocation2 + $0xe0] sm:$0x1] %vm80_vm2, %v22715_v0  ;;  %v13243_v52 = vld [vmem:[%s22704_s2 + $0x68] sm:$0xff]  ;;  %v128_v53 = vld [vmem:[%s22702_s0 + $0x38] sm:$0xff] }
  0x2d   :  { %96 = vst.msk [vmem:[#allocation2 + $0xf0] sm:$0x1] %vm80_vm2, %v22715_v0  ;;  %97 = vst.msk [vmem:[#allocation2 + $0x100] sm:$0x1] %vm80_vm2, %v22715_v0  ;;  %v136_v55 = vld [vmem:[%s22702_s0 + $0x78] sm:$0xff]  ;;  %v13242_v57 = vld [vmem:[%s22704_s2 + $0x60] sm:$0xff] }
  0x2e   :  { %98 = vst.msk [vmem:[#allocation2 + $0x110] sm:$0x1] %vm80_vm2, %v22715_v0  ;;  %99 = vst.msk [vmem:[#allocation2 + $0x120] sm:$0x1] %vm80_vm2, %v22715_v0  ;;  %v13265_v60 = vld [vmem:[%s22704_s2 + $0x98] sm:$0xff]  ;;  %v13264_v63 = vld [vmem:[%s22704_s2 + $0x90] sm:$0xff] }
  0x2f   :  { %102 = vst.msk [vmem:[#allocation2 + $0x19] sm:$0x1] %vm80_vm2, %v22715_v0  ;;  %103 = vst.msk [vmem:[#allocation2 + $0x29] sm:$0x1] %vm80_vm2, %v22715_v0  ;;  %v13263_v3 = vld [vmem:[%s22704_s2 + $0x88] sm:$0xff]  ;;  %v13305_v11 = vld [vmem:[%s22704_s2 + $0xd8] sm:$0xff] }
  0x30   :  { %104 = vst.msk [vmem:[#allocation2 + $0x39] sm:$0x1] %vm80_vm2, %v22715_v0  ;;  %105 = vst.msk [vmem:[#allocation2 + $0x49] sm:$0x1] %vm80_vm2, %v22715_v0 }
  0x31   :  { %106 = vst.msk [vmem:[#allocation2 + $0x59] sm:$0x1] %vm80_vm2, %v22715_v0  ;;  %107 = vst.msk [vmem:[#allocation2 + $0x69] sm:$0x1] %vm80_vm2, %v22715_v0 }
  0x32   :  { %108 = vst.msk [vmem:[#allocation2 + $0x79] sm:$0x1] %vm80_vm2, %v22715_v0  ;;  %109 = vst.msk [vmem:[#allocation2 + $0x89] sm:$0x1] %vm80_vm2, %v22715_v0 }
  0x33   :  { %112 = vst.msk [vmem:[#allocation2 + $0xb9] sm:$0x1] %vm80_vm2, %v22715_v0  ;;  %113 = vst.msk [vmem:[#allocation2 + $0xc9] sm:$0x1] %vm80_vm2, %v22715_v0 }
  0x34   :  { %114 = vst.msk [vmem:[#allocation2 + $0xd9] sm:$0x1] %vm80_vm2, %v22715_v0  ;;  %115 = vst.msk [vmem:[#allocation2 + $0xe9] sm:$0x1] %vm80_vm2, %v22715_v0 }
  0x35   :  { %116 = vst.msk [vmem:[#allocation2 + $0xf9] sm:$0x1] %vm80_vm2, %v22715_v0  ;;  %117 = vst.msk [vmem:[#allocation2 + $0x109] sm:$0x1] %vm80_vm2, %v22715_v0 }
  0x36   :  { %118 = vst.msk [vmem:[#allocation2 + $0x119] sm:$0x1] %vm80_vm2, %v22715_v0  ;;  %119 = vst.msk [vmem:[#allocation2 + $0x129] sm:$0x1] %vm80_vm2, %v22715_v0 }
  0x37   :  { %2229 = vst.msk [vmem:[#allocation3 + $0x18] sm:$0x1] %vm80_vm2, %v22715_v0  ;;  %2230 = vst.msk [vmem:[#allocation3 + $0x30] sm:$0x1] %vm80_vm2, %v22715_v0 }
  0x38   :  { %2231 = vst.msk [vmem:[#allocation3 + $0x48] sm:$0x1] %vm80_vm2, %v22715_v0  ;;  %2232 = vst.msk [vmem:[#allocation3 + $0x60] sm:$0x1] %vm80_vm2, %v22715_v0 }
  0x39   :  { %2233 = vst.msk [vmem:[#allocation3 + $0x78] sm:$0x1] %vm80_vm2, %v22715_v0  ;;  %2234 = vst.msk [vmem:[#allocation3 + $0x90] sm:$0x1] %vm80_vm2, %v22715_v0 }
  0x3a   :  { %2235 = vst.msk [vmem:[#allocation3 + $0xa8] sm:$0x1] %vm80_vm2, %v22715_v0  ;;  %2236 = vst.msk [vmem:[#allocation3 + $0xc0] sm:$0x1] %vm80_vm2, %v22715_v0 }
  0x3b   :  { %2237 = vst.msk [vmem:[#allocation3 + $0xd8] sm:$0x1] %vm80_vm2, %v22715_v0  ;;  %2238 = vst.msk [vmem:[#allocation3 + $0xf0] sm:$0x1] %vm80_vm2, %v22715_v0 }
  0x3c   :  { %2239 = vst.msk [vmem:[#allocation3 + $0x108] sm:$0x1] %vm80_vm2, %v22715_v0  ;;  %2240 = vst.msk [vmem:[#allocation3 + $0x120] sm:$0x1] %vm80_vm2, %v22715_v0 }
  0x3d   :  { %2241 = vst.msk [vmem:[#allocation3 + $0x138] sm:$0x1] %vm80_vm2, %v22715_v0  ;;  %2242 = vst.msk [vmem:[#allocation3 + $0x150] sm:$0x1] %vm80_vm2, %v22715_v0 }
  0x3e   :  { %2243 = vst.msk [vmem:[#allocation3 + $0x168] sm:$0x1] %vm80_vm2, %v22715_v0  ;;  %2244 = vst.msk [vmem:[#allocation3 + $0x180] sm:$0x1] %vm80_vm2, %v22715_v0 }
  0x3f   :  { %2247 = vst.msk [vmem:[#allocation3 + $0x1c8] sm:$0x1] %vm80_vm2, %v22715_v0  ;;  %2248 = vst.msk [vmem:[#allocation3 + $0x1e0] sm:$0x1] %vm80_vm2, %v22715_v0 }
  0x40   :  { %2249 = vst.msk [vmem:[#allocation3 + $0x1f8] sm:$0x1] %vm80_vm2, %v22715_v0  ;;  %2250 = vst.msk [vmem:[#allocation3 + $0x210] sm:$0x1] %vm80_vm2, %v22715_v0 }
  0x41   :  { %2251 = vst.msk [vmem:[#allocation3 + $0x228] sm:$0x1] %vm80_vm2, %v22715_v0  ;;  %2252 = vst.msk [vmem:[#allocation3 + $0x240] sm:$0x1] %vm80_vm2, %v22715_v0 }
  0x42   :  { %2253 = vst.msk [vmem:[#allocation3 + $0x258] sm:$0x1] %vm80_vm2, %v22715_v0  ;;  %2254 = vst.msk [vmem:[#allocation3 + $0x270] sm:$0x1] %vm80_vm2, %v22715_v0 }
  0x43   :  { %2255 = vst.msk [vmem:[#allocation3 + $0x288] sm:$0x1] %vm80_vm2, %v22715_v0  ;;  %2256 = vst.msk [vmem:[#allocation3 + $0x2a0] sm:$0x1] %vm80_vm2, %v22715_v0 }
  0x44   :  { %2257 = vst.msk [vmem:[#allocation3 + $0x2b8] sm:$0x1] %vm80_vm2, %v22715_v0  ;;  %2258 = vst.msk [vmem:[#allocation3 + $0x2d0] sm:$0x1] %vm80_vm2, %v22715_v0 }
  0x45   :  { %2259 = vst.msk [vmem:[#allocation3 + $0x2e8] sm:$0x1] %vm80_vm2, %v22715_v0  ;;  %2260 = vst.msk [vmem:[#allocation3 + $0x300] sm:$0x1] %vm80_vm2, %v22715_v0 }
  0x46   :  { %2261 = vst.msk [vmem:[#allocation3 + $0x318] sm:$0x1] %vm80_vm2, %v22715_v0  ;;  %2262 = vst.msk [vmem:[#allocation3 + $0x330] sm:$0x1] %vm80_vm2, %v22715_v0 }
  0x47   :  { %2265 = vst.msk [vmem:[#allocation3 + $0x29] sm:$0x1] %vm80_vm2, %v22715_v0  ;;  %2266 = vst.msk [vmem:[#allocation3 + $0x41] sm:$0x1] %vm80_vm2, %v22715_v0 }
  0x48   :  { %2267 = vst.msk [vmem:[#allocation3 + $0x59] sm:$0x1] %vm80_vm2, %v22715_v0  ;;  %2268 = vst.msk [vmem:[#allocation3 + $0x71] sm:$0x1] %vm80_vm2, %v22715_v0 }
  0x49   :  { %2269 = vst.msk [vmem:[#allocation3 + $0x89] sm:$0x1] %vm80_vm2, %v22715_v0  ;;  %2270 = vst.msk [vmem:[#allocation3 + $0xa1] sm:$0x1] %vm80_vm2, %v22715_v0 }
  0x4a   :  { %2271 = vst.msk [vmem:[#allocation3 + $0xb9] sm:$0x1] %vm80_vm2, %v22715_v0  ;;  %2272 = vst.msk [vmem:[#allocation3 + $0xd1] sm:$0x1] %vm80_vm2, %v22715_v0 }
  0x4b   :  { %2273 = vst.msk [vmem:[#allocation3 + $0xe9] sm:$0x1] %vm80_vm2, %v22715_v0  ;;  %2274 = vst.msk [vmem:[#allocation3 + $0x101] sm:$0x1] %vm80_vm2, %v22715_v0 }
  0x4c   :  { %2275 = vst.msk [vmem:[#allocation3 + $0x119] sm:$0x1] %vm80_vm2, %v22715_v0  ;;  %2276 = vst.msk [vmem:[#allocation3 + $0x131] sm:$0x1] %vm80_vm2, %v22715_v0 }
  0x4d   :  { %2277 = vst.msk [vmem:[#allocation3 + $0x149] sm:$0x1] %vm80_vm2, %v22715_v0  ;;  %2278 = vst.msk [vmem:[#allocation3 + $0x161] sm:$0x1] %vm80_vm2, %v22715_v0 }
  0x4e   :  { %2279 = vst.msk [vmem:[#allocation3 + $0x179] sm:$0x1] %vm80_vm2, %v22715_v0  ;;  %2280 = vst.msk [vmem:[#allocation3 + $0x191] sm:$0x1] %vm80_vm2, %v22715_v0 }
  0x4f   :  { %2283 = vst.msk [vmem:[#allocation3 + $0x1d9] sm:$0x1] %vm80_vm2, %v22715_v0  ;;  %2284 = vst.msk [vmem:[#allocation3 + $0x1f1] sm:$0x1] %vm80_vm2, %v22715_v0 }
  0x50   :  { %2285 = vst.msk [vmem:[#allocation3 + $0x209] sm:$0x1] %vm80_vm2, %v22715_v0  ;;  %2286 = vst.msk [vmem:[#allocation3 + $0x221] sm:$0x1] %vm80_vm2, %v22715_v0 }
  0x51   :  { %2287 = vst.msk [vmem:[#allocation3 + $0x239] sm:$0x1] %vm80_vm2, %v22715_v0  ;;  %2288 = vst.msk [vmem:[#allocation3 + $0x251] sm:$0x1] %vm80_vm2, %v22715_v0 }
  0x52   :  { %2289 = vst.msk [vmem:[#allocation3 + $0x269] sm:$0x1] %vm80_vm2, %v22715_v0  ;;  %2290 = vst.msk [vmem:[#allocation3 + $0x281] sm:$0x1] %vm80_vm2, %v22715_v0 }
  0x53   :  { %2291 = vst.msk [vmem:[#allocation3 + $0x299] sm:$0x1] %vm80_vm2, %v22715_v0  ;;  %2292 = vst.msk [vmem:[#allocation3 + $0x2b1] sm:$0x1] %vm80_vm2, %v22715_v0 }
  0x54   :  { %2293 = vst.msk [vmem:[#allocation3 + $0x2c9] sm:$0x1] %vm80_vm2, %v22715_v0  ;;  %2294 = vst.msk [vmem:[#allocation3 + $0x2e1] sm:$0x1] %vm80_vm2, %v22715_v0 }
  0x55   :  { %2295 = vst.msk [vmem:[#allocation3 + $0x2f9] sm:$0x1] %vm80_vm2, %v22715_v0  ;;  %2296 = vst.msk [vmem:[#allocation3 + $0x311] sm:$0x1] %vm80_vm2, %v22715_v0 }
  0x56   :  { %2297 = vst.msk [vmem:[#allocation3 + $0x329] sm:$0x1] %vm80_vm2, %v22715_v0  ;;  %2298 = vst.msk [vmem:[#allocation3 + $0x341] sm:$0x1] %vm80_vm2, %v22715_v0 }
  0x57   :  { %81 = vst.msk [vmem:[#allocation2] sm:$0x1] %vm80_vm2, %v22715_v0  ;;  %90 = vst.msk [vmem:[#allocation2 + $0x90] sm:$0x1] %vm80_vm2, %v22715_v0 }
  0x58   :  { %91 = vst.msk [vmem:[#allocation2 + $0xa0] sm:$0x1] %vm80_vm2, %v22715_v0  ;;  %100 = vst.msk [vmem:[#allocation2 + $0x130] sm:$0x1] %vm80_vm2, %v22715_v0 }
  0x59   :  { %101 = vst.msk [vmem:[#allocation2 + $0x9] sm:$0x1] %vm80_vm2, %v22715_v0  ;;  %110 = vst.msk [vmem:[#allocation2 + $0x99] sm:$0x1] %vm80_vm2, %v22715_v0 }
  0x5a   :  { %111 = vst.msk [vmem:[#allocation2 + $0xa9] sm:$0x1] %vm80_vm2, %v22715_v0  ;;  %120 = vst.msk [vmem:[#allocation2 + $0x139] sm:$0x1] %vm80_vm2, %v22715_v0 }
  0x5b   :  { %2228 = vst.msk [vmem:[#allocation3] sm:$0x1] %vm80_vm2, %v22715_v0  ;;  %2245 = vst.msk [vmem:[#allocation3 + $0x198] sm:$0x1] %vm80_vm2, %v22715_v0 }
  0x5c   :  { %2246 = vst.msk [vmem:[#allocation3 + $0x1b0] sm:$0x1] %vm80_vm2, %v22715_v0  ;;  %2263 = vst.msk [vmem:[#allocation3 + $0x348] sm:$0x1] %vm80_vm2, %v22715_v0 }
  0x5d   :  { %2264 = vst.msk [vmem:[#allocation3 + $0x11] sm:$0x1] %vm80_vm2, %v22715_v0  ;;  %2281 = vst.msk [vmem:[#allocation3 + $0x1a9] sm:$0x1] %vm80_vm2, %v22715_v0 }
  0x5e   :  { %2282 = vst.msk [vmem:[#allocation3 + $0x1c1] sm:$0x1] %vm80_vm2, %v22715_v0  ;;  %2299 = vst.msk [vmem:[#allocation3 + $0x359] sm:$0x1] %vm80_vm2, %v22715_v0  ;;  %v154_v38 = vld [vmem:[#allocation2] sm:$0xff] }
  0x5f   :  { %138 = vst.msk [vmem:[#allocation2 + $0x11] sm:$0xff] %vm69_vm0, %v121_v4  ;;  %147 = vst.msk [vmem:[#allocation2 + $0xc1] sm:$0xff] %vm69_vm0, %v130_v5  ;;  %v162_v1 = vld [vmem:[#allocation2 + $0xa0] sm:$0xff] }
  0x60   :  { %148 = vst.msk [vmem:[#allocation2 + $0xd1] sm:$0xff] %vm69_vm0, %v131_v6  ;;  %139 = vst.msk [vmem:[#allocation2 + $0x21] sm:$0xff] %vm69_vm0, %v122_v7  ;;  %v581_v47 = vld [vmem:[#allocation2 + $0x2] sm:$0xff] }
  0x61   :  { %140 = vst.msk [vmem:[#allocation2 + $0x31] sm:$0xff] %vm69_vm0, %v123_v8  ;;  %149 = vst.msk [vmem:[#allocation2 + $0xe1] sm:$0xff] %vm69_vm0, %v132_v9  ;;  %v13262_v6 = vld [vmem:[%s22704_s2 + $0x80] sm:$0xff]  ;;  %v13285_v9 = vld [vmem:[%s22704_s2 + $0xb8] sm:$0xff] }
  0x62   :  { %150 = vst.msk [vmem:[#allocation2 + $0xf1] sm:$0xff] %vm69_vm0, %v133_v10  ;;  %141 = vst.msk [vmem:[#allocation2 + $0x41] sm:$0xff] %vm69_vm0, %v124_v13  ;;  %v589_v10 = vld [vmem:[#allocation2 + $0xa2] sm:$0xff] }
  0x63   :  { %142 = vst.msk [vmem:[#allocation2 + $0x51] sm:$0xff] %vm69_vm0, %v125_v14  ;;  %151 = vst.msk [vmem:[#allocation2 + $0x101] sm:$0xff] %vm69_vm0, %v134_v15 }
  0x64   :  { %152 = vst.msk [vmem:[#allocation2 + $0x111] sm:$0xff] %vm69_vm0, %v135_v16  ;;  %143 = vst.msk [vmem:[#allocation2 + $0x61] sm:$0xff] %vm69_vm0, %v126_v17 }
  0x65   :  { %144 = vst.msk [vmem:[#allocation2 + $0x71] sm:$0xff] %vm69_vm0, %v127_v19  ;;  %146 = vst.msk [vmem:[#allocation2 + $0xb1] sm:$0xff] %vm69_vm0, %v129_v21 }
  0x66   :  { %v17984_v22 = vld [vmem:[#allocation2 + $0x11] sm:$0xff]  ;;  %v17989_v23 = vld [vmem:[#allocation2 + $0xc1] sm:$0xff]  ;;  %145 = vst.msk [vmem:[#allocation2 + $0x81] sm:$0xff] %vm69_vm0, %v128_v53  ;;  %153 = vst.msk [vmem:[#allocation2 + $0x121] sm:$0xff] %vm69_vm0, %v136_v55 }
  0x67   :  { %16104 = vmatmul.mubr.msk.f32.vlgmr.msra.gmra.mxu0 %vm69_vm0, %v17984_v22  ;;  %v17991_v24 = vld [vmem:[#allocation2 + $0xd1] sm:$0xff]  ;;  %v17993_v25 = vld [vmem:[#allocation2 + $0x21] sm:$0xff]  ;;  %16118 = vmatprep.mubr.msk.f32.mxu1 %vm69_vm0, %v17989_v23 }
  0x68   :  { %16106 = vmatprep.mubr.msk.f32.mxu0 %vm69_vm0, %v17993_v25  ;;  %v17999_v26 = vld [vmem:[#allocation2 + $0x31] sm:$0xff]  ;;  %v18001_v27 = vld [vmem:[#allocation2 + $0xe1] sm:$0xff]  ;;  %16119 = vmatmul.mubr.msk.f32.vlgmr.msra.gmra.mxu1 %vm69_vm0, %v17991_v24 }
  0x69   :  { %v18008_v29 = vld [vmem:[#allocation2 + $0x41] sm:$0xff]  ;;  %16160 = vmatpush3.msra.mxu0 %v13225_v20  ;;  %16121 = vmatprep.mubr.msk.f32.mxu1 %vm69_vm0, %v18001_v27  ;;  %v18012_v30 = vld [vmem:[#allocation2 + $0xf1] sm:$0xff] }
  0x6a   :  { %16128 = vmatpush3.msra.mxu1 %v173_v18  ;;  %v18019_v32 = vld [vmem:[#allocation2 + $0x101] sm:$0xff]  ;;  %v18023_v33 = vld [vmem:[#allocation2 + $0x51] sm:$0xff]  ;;  %16161 = vmatprep.subr.mxu0 %v13224_v37 }
  0x6b   :  { %16107 = vmatmul.mubr.msk.f32.gmra.mxu0 %vm69_vm0, %v17999_v26  ;;  %16129 = vmatprep.subr.mxu1 %v172_v28  ;;  %v18030_v35 = vld [vmem:[#allocation2 + $0x61] sm:$0xff]  ;;  %v18034_v36 = vld [vmem:[#allocation2 + $0x111] sm:$0xff] }
  0x6c   :  { %16109 = vmatprep.mubr.msk.f32.mxu0 %vm69_vm0, %v18008_v29  ;;  %16130 = vmatpush3.msra.mxu1 %v172_v28  ;;  %v18043_v39 = vld [vmem:[#allocation2 + $0x71] sm:$0xff]  ;;  %v18058_v44 = vld [vmem:[#allocation2 + $0x20] sm:$0xff] }
  0x6d   :  { %16122 = vmatmul.mubr.msk.f32.gmra.mxu1 %vm69_vm0, %v18012_v30  ;;  %16131 = vmatprep.subr.mxu1 %v171_v31  ;;  %v18051_v42 = vld [vmem:[#allocation2 + $0x10] sm:$0xff]  ;;  %v18077_v50 = vld [vmem:[#allocation2 + $0x40] sm:$0xff] }
  0x6e   :  { %16124 = vmatprep.mubr.msk.f32.mxu1 %vm69_vm0, %v18019_v32  ;;  %16132 = vmatpush3.msra.mxu1 %v171_v31  ;;  %v18061_v45 = vld [vmem:[#allocation2 + $0xb1] sm:$0xff]  ;;  %v18090_v54 = vld [vmem:[#allocation2 + $0x22] sm:$0xff] }
  0x6f   :  { %16110 = vmatmul.mubr.msk.f32.gmra.mxu0 %vm69_vm0, %v18023_v33  ;;  %16133 = vmatprep.subr.mxu1 %v170_v34  ;;  %v18070_v48 = vld [vmem:[#allocation2 + $0x30] sm:$0xff]  ;;  %v18106_v58 = vld [vmem:[#allocation2 + $0x60] sm:$0xff] }
  0x70   :  { %16112 = vmatprep.mubr.msk.f32.mxu0 %vm69_vm0, %v18030_v35  ;;  %16134 = vmatpush3.msra.mxu1 %v170_v34  ;;  %v18080_v51 = vld [vmem:[#allocation2 + $0x12] sm:$0xff]  ;;  %v18117_v61 = vld [vmem:[#allocation2 + $0x42] sm:$0xff] }
  0x71   :  { %16125 = vmatmul.mubr.msk.f32.gmra.mxu1 %vm69_vm0, %v18034_v36  ;;  %16162 = vmatpush3.msra.mxu0 %v13224_v37  ;;  %v18098_v56 = vld [vmem:[#allocation2 + $0x50] sm:$0xff]  ;;  %v18137_v4 = vld [vmem:[#allocation2 + $0x62] sm:$0xff] }
  0x72   :  { %16135 = vmatprep.mubr.msk.f32.mxu1 %vm69_vm0, %v154_v38  ;;  %16163 = vmatprep.subr.mxu0 %v13223_v40  ;;  %v18110_v59 = vld [vmem:[#allocation2 + $0x32] sm:$0xff]  ;;  %v18147_v7 = vld [vmem:[#allocation2 + $0xc0] sm:$0xff]  ;;  %v13283_v37 = vld [vmem:[%s22704_s2 + $0xa8] sm:$0xff] }
  0x73   :  { %16113 = vmatmul.mubr.msk.f32.gmra.mxu0 %vm69_vm0, %v18043_v39  ;;  %16191 = vmatprep.subr.mxu1 %v13245_v46  ;;  %v18121_v62 = vld [vmem:[#allocation2 + $0x70] sm:$0xff]  ;;  %v18167_v13 = vld [vmem:[#allocation2 + $0xe0] sm:$0xff] }
  0x74   :  { %16115 = vmatprep.mubr.msk.f32.mxu0 %vm69_vm0, %v182_v41  ;;  %16164 = vmatpush3.msra.mxu0 %v13223_v40  ;;  %v18130_v2 = vld [vmem:[#allocation2 + $0x52] sm:$0xff]  ;;  %v18174_v15 = vld [vmem:[#allocation2 + $0xc2] sm:$0xff] }
  0x75   :  { %16136 = vmatmul.mubr.msk.f32.vlgmr.msra.gmra.mxu1 %vm69_vm0, %v18051_v42  ;;  %16165 = vmatprep.subr.mxu0 %v13222_v43  ;;  %v18140_v5 = vld [vmem:[#allocation2 + $0xb0] sm:$0xff]  ;;  %v18182_v17 = vld [vmem:[#allocation2 + $0x100] sm:$0xff]  ;;  %v13325_v40 = vld [vmem:[%s22704_s2 + $0xf8] sm:$0xff] }
  0x76   :  { %16138 = vmatprep.mubr.msk.f32.mxu1 %vm69_vm0, %v18058_v44  ;;  %16166 = vmatpush3.msra.mxu0 %v13222_v43  ;;  %v18151_v8 = vld [vmem:[#allocation2 + $0x72] sm:$0xff]  ;;  %v18190_v19 = vld [vmem:[#allocation2 + $0xe2] sm:$0xff] }
  0x77   :  { %16116 = vmatmul.mubr.msk.f32.gmra.mxu0 %vm69_vm0, %v18061_v45  ;;  %16192 = vmatpush3.msra.mxu1 %v13245_v46  ;;  %v18163_v12 = vld [vmem:[#allocation2 + $0xd0] sm:$0xff]  ;;  %v18204_v28 = vld [vmem:[#allocation2 + $0x102] sm:$0xff]  ;;  %v13345_v46 = vld [vmem:[%s22704_s2 + $0x118] sm:$0xff] }
  0x78   :  { %16167 = vmatprep.mubr.msk.f32.mxu0 %vm69_vm0, %v581_v47  ;;  %16193 = vmatprep.subr.mxu1 %v13244_v49  ;;  %v18170_v14 = vld [vmem:[#allocation2 + $0xb2] sm:$0xff]  ;;  %v13282_v38 = vld [vmem:[%s22704_s2 + $0xa0] sm:$0xff] }
  0x79   :  { %16139 = vmatmul.mubr.msk.f32.gmra.mxu1 %vm69_vm0, %v18070_v48  ;;  %16223 = vmatprep.subr.mxu0 %v13265_v60  ;;  %v18178_v16 = vld [vmem:[#allocation2 + $0xf0] sm:$0xff]  ;;  %v18249_v41 = vld [vmem:[#allocation2 + $0x80] sm:$0xff] }
  0x7a   :  { %16141 = vmatprep.mubr.msk.f32.mxu1 %vm69_vm0, %v18077_v50  ;;  %16194 = vmatpush3.msra.mxu1 %v13244_v49  ;;  %v18186_v18 = vld [vmem:[#allocation2 + $0xd2] sm:$0xff]  ;;  %v13302_v43 = vld [vmem:[%s22704_s2 + $0xc0] sm:$0xff] }
  0x7b   :  { %16168 = vmatmul.mubr.msk.f32.vlgmr.msra.gmra.mxu0 %vm69_vm0, %v18080_v51  ;;  %16195 = vmatprep.subr.mxu1 %v13243_v52  ;;  %v18194_v20 = vld [vmem:[#allocation2 + $0x110] sm:$0xff]  ;;  %v18272_v47 = vld [vmem:[#allocation2 + $0x81] sm:$0xff] }
  0x7c   :  { %16170 = vmatprep.mubr.msk.f32.mxu0 %vm69_vm0, %v18090_v54  ;;  %16196 = vmatpush3.msra.mxu1 %v13243_v52  ;;  %v18200_v21 = vld [vmem:[#allocation2 + $0xf2] sm:$0xff]  ;;  %v826_v49 = vld [vmem:[#allocation2 + $0x120] sm:$0xff] }
  0x7d   :  { %16142 = vmatmul.mubr.msk.f32.gmra.mxu1 %vm69_vm0, %v18098_v56  ;;  %16197 = vmatprep.subr.mxu1 %v13242_v57  ;;  %v18212_v31 = vld [vmem:[#allocation2 + $0x112] sm:$0xff]  ;;  %v13322_v53 = vld [vmem:[%s22704_s2 + $0xe0] sm:$0xff] }
  0x7e   :  { %16144 = vmatprep.mubr.msk.f32.mxu1 %vm69_vm0, %v18106_v58  ;;  %16198 = vmatpush3.msra.mxu1 %v13242_v57  ;;  %v13284_v34 = vld [vmem:[%s22704_s2 + $0xb0] sm:$0xff]  ;;  %v1278_v55 = vld [vmem:[#allocation2 + $0x82] sm:$0xff] }
  0x7f   :  { %16171 = vmatmul.mubr.msk.f32.gmra.mxu0 %vm69_vm0, %v18110_v59  ;;  %16255 = vmatprep.subr.mxu1 %v13285_v9  ;;  %v13324_v52 = vld [vmem:[%s22704_s2 + $0xf0] sm:$0xff]  ;;  %v1286_v57 = vld [vmem:[#allocation2 + $0x122] sm:$0xff] }
  0x80   :  { %16173 = vmatprep.mubr.msk.f32.mxu0 %vm69_vm0, %v18117_v61  ;;  %16224 = vmatpush3.msra.mxu0 %v13265_v60 }
  0x81   :  { %16145 = vmatmul.mubr.msk.f32.gmra.mxu1 %vm69_vm0, %v18121_v62  ;;  %16225 = vmatprep.subr.mxu0 %v13264_v63 }
  0x82   :  { %16147 = vmatprep.mubr.msk.f32.mxu1 %vm69_vm0, %v162_v1  ;;  %16226 = vmatpush3.msra.mxu0 %v13264_v63 }
  0x83   :  { %16174 = vmatmul.mubr.msk.f32.gmra.mxu0 %vm69_vm0, %v18130_v2  ;;  %16227 = vmatprep.subr.mxu0 %v13263_v3 }
  0x84   :  { %16176 = vmatprep.mubr.msk.f32.mxu0 %vm69_vm0, %v18137_v4  ;;  %16228 = vmatpush3.msra.mxu0 %v13263_v3 }
  0x85   :  { %16148 = vmatmul.mubr.msk.f32.gmra.mxu1 %vm69_vm0, %v18140_v5  ;;  %16229 = vmatprep.subr.mxu0 %v13262_v6 }
  0x86   :  { %16150 = vmatprep.mubr.msk.f32.mxu1 %vm69_vm0, %v18147_v7  ;;  %16230 = vmatpush3.msra.mxu0 %v13262_v6 }
  0x87   :  { %16177 = vmatmul.mubr.msk.f32.gmra.mxu0 %vm69_vm0, %v18151_v8  ;;  %16287 = vmatprep.subr.mxu0 %v13305_v11 }
  0x88   :  { %16179 = vmatprep.mubr.msk.f32.mxu0 %vm69_vm0, %v589_v10  ;;  %v2300_v10 = vld [vmem:[%s22710_s8] sm:$0xff] }
  0x89   :  { %16151 = vmatmul.mubr.msk.f32.gmra.mxu1 %vm69_vm0, %v18163_v12 }
  0x8a   :  { %16153 = vmatprep.mubr.msk.f32.mxu1 %vm69_vm0, %v18167_v13 }
  0x8b   :  { %16180 = vmatmul.mubr.msk.f32.gmra.mxu0 %vm69_vm0, %v18170_v14 }
  0x8c   :  { %16182 = vmatprep.mubr.msk.f32.mxu0 %vm69_vm0, %v18174_v15 }
  0x8d   :  { %16154 = vmatmul.mubr.msk.f32.gmra.mxu1 %vm69_vm0, %v18178_v16 }
  0x8e   :  { %16156 = vmatprep.mubr.msk.f32.mxu1 %vm69_vm0, %v18182_v17 }
  0x8f   :  { %16183 = vmatmul.mubr.msk.f32.gmra.mxu0 %vm69_vm0, %v18186_v18 }
  0x90   :  { %16185 = vmatprep.mubr.msk.f32.mxu0 %vm69_vm0, %v18190_v19 }
  0x91   :  { %16157 = vmatmul.mubr.msk.f32.gmra.mxu1 %vm69_vm0, %v18194_v20 }
  0x92   :  { %16199 = vmatprep.mubr.msk.f32.mxu1 %vm69_vm0, %v18051_v42  ;;  %v13303_v42 = vld [vmem:[%s22704_s2 + $0xc8] sm:$0xff] }
  0x93   :  { %16186 = vmatmul.mubr.msk.f32.gmra.mxu0 %vm69_vm0, %v18200_v21 }
  0x94   :  { %16188 = vmatprep.mubr.msk.f32.mxu0 %vm69_vm0, %v18204_v28 }
  0x95   :  { %16200 = vmatmul.mubr.msk.f32.vlgmr.msra.gmra.mxu1 %vm69_vm0, %v18058_v44 }
  0x96   :  { %16202 = vmatprep.mubr.msk.f32.mxu1 %vm69_vm0, %v18070_v48  ;;  %16256 = vmatpush3.msra.mxu1 %v13285_v9 }
  0x97   :  { %16189 = vmatmul.mubr.msk.f32.gmra.mxu0 %vm69_vm0, %v18212_v31  ;;  %16257 = vmatprep.subr.mxu1 %v13284_v34 }
  0x98   :  { %16231 = vmatprep.mubr.msk.f32.mxu0 %vm69_vm0, %v17984_v22  ;;  %16258 = vmatpush3.msra.mxu1 %v13284_v34  ;;  %v13304_v22 = vld [vmem:[%s22704_s2 + $0xd0] sm:$0xff] }
  0x99   :  { %16203 = vmatmul.mubr.msk.f32.gmra.mxu1 %vm69_vm0, %v18077_v50  ;;  %16259 = vmatprep.subr.mxu1 %v13283_v37 }
  0x9a   :  { %16205 = vmatprep.mubr.msk.f32.mxu1 %vm69_vm0, %v18098_v56  ;;  %16260 = vmatpush3.msra.mxu1 %v13283_v37 }
  0x9b   :  { %16232 = vmatmul.mubr.msk.f32.vlgmr.msra.gmra.mxu0 %vm69_vm0, %v17993_v25  ;;  %16261 = vmatprep.subr.mxu1 %v13282_v38 }
  0x9c   :  { %16234 = vmatprep.mubr.msk.f32.mxu0 %vm69_vm0, %v17999_v26  ;;  %16262 = vmatpush3.msra.mxu1 %v13282_v38 }
  0x9d   :  { %16206 = vmatmul.mubr.msk.f32.gmra.mxu1 %vm69_vm0, %v18106_v58  ;;  %16288 = vmatpush3.msra.mxu0 %v13305_v11 }
  0x9e   :  { %16208 = vmatprep.mubr.msk.f32.mxu1 %vm69_vm0, %v18121_v62  ;;  %16289 = vmatprep.subr.mxu0 %v13304_v22 }
  0x9f   :  { %16235 = vmatmul.mubr.msk.f32.gmra.mxu0 %vm69_vm0, %v18008_v29  ;;  %16319 = vmatprep.subr.mxu1 %v13325_v40 }
  0xa0   :  { %16237 = vmatprep.mubr.msk.f32.mxu0 %vm69_vm0, %v18023_v33  ;;  %16290 = vmatpush3.msra.mxu0 %v13304_v22 }
  0xa1   :  { %16209 = vmatmul.mubr.msk.f32.gmra.mxu1 %vm69_vm0, %v18249_v41  ;;  %16291 = vmatprep.subr.mxu0 %v13303_v42 }
  0xa2   :  { %16211 = vmatprep.mubr.msk.f32.mxu1 %vm69_vm0, %v18140_v5  ;;  %16292 = vmatpush3.msra.mxu0 %v13303_v42 }
  0xa3   :  { %16238 = vmatmul.mubr.msk.f32.gmra.mxu0 %vm69_vm0, %v18030_v35  ;;  %16293 = vmatprep.subr.mxu0 %v13302_v43 }
  0xa4   :  { %16240 = vmatprep.mubr.msk.f32.mxu0 %vm69_vm0, %v18043_v39  ;;  %16294 = vmatpush3.msra.mxu0 %v13302_v43 }
  0xa5   :  { %16212 = vmatmul.mubr.msk.f32.gmra.mxu1 %vm69_vm0, %v18147_v7  ;;  %16351 = vmatprep.subr.mxu0 %v13345_v46 }
  0xa6   :  { %16214 = vmatprep.mubr.msk.f32.mxu1 %vm69_vm0, %v18163_v12 }
  0xa7   :  { %16241 = vmatmul.mubr.msk.f32.gmra.mxu0 %vm69_vm0, %v18272_v47 }
  0xa8   :  { %16243 = vmatprep.mubr.msk.f32.mxu0 %vm69_vm0, %v18061_v45  ;;  %v18305_v45 = vld [vmem:[#allocation2 + $0x121] sm:$0xff] }
  0xa9   :  { %16215 = vmatmul.mubr.msk.f32.gmra.mxu1 %vm69_vm0, %v18167_v13 }
  0xaa   :  { %16217 = vmatprep.mubr.msk.f32.mxu1 %vm69_vm0, %v18178_v16 }
  0xab   :  { %16244 = vmatmul.mubr.msk.f32.gmra.mxu0 %vm69_vm0, %v17989_v23 }
  0xac   :  { %16246 = vmatprep.mubr.msk.f32.mxu0 %vm69_vm0, %v17991_v24 }
  0xad   :  { %16218 = vmatmul.mubr.msk.f32.gmra.mxu1 %vm69_vm0, %v18182_v17 }
  0xae   :  { %16220 = vmatprep.mubr.msk.f32.mxu1 %vm69_vm0, %v18194_v20 }
  0xaf   :  { %16247 = vmatmul.mubr.msk.f32.gmra.mxu0 %vm69_vm0, %v18001_v27 }
  0xb0   :  { %16249 = vmatprep.mubr.msk.f32.mxu0 %vm69_vm0, %v18012_v30 }
  0xb1   :  { %16221 = vmatmul.mubr.msk.f32.gmra.mxu1 %vm69_vm0, %v826_v49 }
  0xb2   :  { %16263 = vmatprep.mubr.msk.f32.mxu1 %vm69_vm0, %v18080_v51  ;;  %v13323_v51 = vld [vmem:[%s22704_s2 + $0xe8] sm:$0xff] }
  0xb3   :  { %16250 = vmatmul.mubr.msk.f32.gmra.mxu0 %vm69_vm0, %v18019_v32 }
  0xb4   :  { %16252 = vmatprep.mubr.msk.f32.mxu0 %vm69_vm0, %v18034_v36 }
  0xb5   :  { %16264 = vmatmul.mubr.msk.f32.vlgmr.msra.gmra.mxu1 %vm69_vm0, %v18090_v54 }
  0xb6   :  { %16266 = vmatprep.mubr.msk.f32.mxu1 %vm69_vm0, %v18110_v59  ;;  %16320 = vmatpush3.msra.mxu1 %v13325_v40 }
  0xb7   :  { %16253 = vmatmul.mubr.msk.f32.gmra.mxu0 %vm69_vm0, %v18305_v45  ;;  %16321 = vmatprep.subr.mxu1 %v13324_v52 }
  0xb8   :  { %16295 = vmatprep.mubr.msk.f32.mxu0 %vm69_vm0, %v18058_v44  ;;  %16322 = vmatpush3.msra.mxu1 %v13324_v52  ;;  %v13344_v44 = vld [vmem:[%s22704_s2 + $0x110] sm:$0xff] }
  0xb9   :  { %16267 = vmatmul.mubr.msk.f32.gmra.mxu1 %vm69_vm0, %v18117_v61  ;;  %16323 = vmatprep.subr.mxu1 %v13323_v51 }
  0xba   :  { %16269 = vmatprep.mubr.msk.f32.mxu1 %vm69_vm0, %v18130_v2  ;;  %16324 = vmatpush3.msra.mxu1 %v13323_v51 }
  0xbb   :  { %16296 = vmatmul.mubr.msk.f32.vlgmr.msra.gmra.mxu0 %vm69_vm0, %v18070_v48  ;;  %16325 = vmatprep.subr.mxu1 %v13322_v53  ;;  %v13343_v48 = vld [vmem:[%s22704_s2 + $0x108] sm:$0xff] }
  0xbc   :  { %16298 = vmatprep.mubr.msk.f32.mxu0 %vm69_vm0, %v18077_v50  ;;  %16326 = vmatpush3.msra.mxu1 %v13322_v53  ;;  %v13342_v50 = vld [vmem:[%s22704_s2 + $0x100] sm:$0xff] }
  0xbd   :  { %16270 = vmatmul.mubr.msk.f32.gmra.mxu1 %vm69_vm0, %v18137_v4  ;;  %16352 = vmatpush3.msra.mxu0 %v13345_v46 }
  0xbe   :  { %16272 = vmatprep.mubr.msk.f32.mxu1 %vm69_vm0, %v18151_v8  ;;  %16353 = vmatprep.subr.mxu0 %v13344_v44 }
  0xbf   :  { %16299 = vmatmul.mubr.msk.f32.gmra.mxu0 %vm69_vm0, %v18098_v56  ;;  %v1509_v56 = vld [vmem:[#allocation2 + $0x90] sm:$0xff] }
  0xc0   :  { %16301 = vmatprep.mubr.msk.f32.mxu0 %vm69_vm0, %v18106_v58  ;;  %16354 = vmatpush3.msra.mxu0 %v13344_v44  ;;  %v1517_v58 = vld [vmem:[#allocation2 + $0x130] sm:$0xff] }
  0xc1   :  { %16273 = vmatmul.mubr.msk.f32.gmra.mxu1 %vm69_vm0, %v1278_v55  ;;  %16355 = vmatprep.subr.mxu0 %v13343_v48 }
  0xc2   :  { %16275 = vmatprep.mubr.msk.f32.mxu1 %vm69_vm0, %v18170_v14  ;;  %16356 = vmatpush3.msra.mxu0 %v13343_v48 }
  0xc3   :  { %16302 = vmatmul.mubr.msk.f32.gmra.mxu0 %vm69_vm0, %v18121_v62  ;;  %16357 = vmatprep.subr.mxu0 %v13342_v50 }
  0xc4   :  { %16304 = vmatprep.mubr.msk.f32.mxu0 %vm69_vm0, %v18249_v41  ;;  %16358 = vmatpush3.msra.mxu0 %v13342_v50 }
  0xc5   :  { %16276 = vmatmul.mubr.msk.f32.gmra.mxu1 %vm69_vm0, %v18174_v15 }
  0xc6   :  { %16278 = vmatprep.mubr.msk.f32.mxu1 %vm69_vm0, %v18186_v18 }
  0xc7   :  { %16305 = vmatmul.mubr.msk.f32.gmra.mxu0 %vm69_vm0, %v1509_v56 }
  0xc8   :  { %16307 = vmatprep.mubr.msk.f32.mxu0 %vm69_vm0, %v18147_v7 }
  0xc9   :  { %16279 = vmatmul.mubr.msk.f32.gmra.mxu1 %vm69_vm0, %v18190_v19 }
  0xca   :  { %16281 = vmatprep.mubr.msk.f32.mxu1 %vm69_vm0, %v18200_v21 }
  0xcb   :  { %16308 = vmatmul.mubr.msk.f32.gmra.mxu0 %vm69_vm0, %v18163_v12 }
  0xcc   :  { %16310 = vmatprep.mubr.msk.f32.mxu0 %vm69_vm0, %v18167_v13 }
  0xcd   :  { %16282 = vmatmul.mubr.msk.f32.gmra.mxu1 %vm69_vm0, %v18204_v28 }
  0xce   :  { %16284 = vmatprep.mubr.msk.f32.mxu1 %vm69_vm0, %v18212_v31 }
  0xcf   :  { %16311 = vmatmul.mubr.msk.f32.gmra.mxu0 %vm69_vm0, %v18178_v16 }
  0xd0   :  { %16313 = vmatprep.mubr.msk.f32.mxu0 %vm69_vm0, %v18182_v17 }
  0xd1   :  { %16285 = vmatmul.mubr.msk.f32.gmra.mxu1 %vm69_vm0, %v1286_v57 }
  0xd2   :  { %16327 = vmatprep.mubr.msk.f32.mxu1 %vm69_vm0, %v17993_v25  ;;  %v1739_v25 = vld [vmem:[#allocation2 + $0x91] sm:$0xff] }
  0xd3   :  { %16314 = vmatmul.mubr.msk.f32.gmra.mxu0 %vm69_vm0, %v18194_v20 }
  0xd4   :  { %16316 = vmatprep.mubr.msk.f32.mxu0 %vm69_vm0, %v826_v49 }
  0xd5   :  { %16328 = vmatmul.mubr.msk.f32.vlgmr.msra.gmra.mxu1 %vm69_vm0, %v17999_v26  ;;  %v1969_v26 = vld [vmem:[#allocation2 + $0x92] sm:$0xff] }
  0xd6   :  { %16330 = vmatprep.mubr.msk.f32.mxu1 %vm69_vm0, %v18008_v29 }
  0xd7   :  { %16317 = vmatmul.mubr.msk.f32.gmra.mxu0 %vm69_vm0, %v1517_v58 }
  0xd8   :  { %16359 = vmatprep.mubr.msk.f32.mxu0 %vm69_vm0, %v18090_v54 }
  0xd9   :  { %16331 = vmatmul.mubr.msk.f32.gmra.mxu1 %vm69_vm0, %v18023_v33 }
  0xda   :  { %16333 = vmatprep.mubr.msk.f32.mxu1 %vm69_vm0, %v18030_v35 }
  0xdb   :  { %16360 = vmatmul.mubr.msk.f32.vlgmr.msra.gmra.mxu0 %vm69_vm0, %v18110_v59 }
  0xdc   :  { %16362 = vmatprep.mubr.msk.f32.mxu0 %vm69_vm0, %v18117_v61 }
  0xdd   :  { %16334 = vmatmul.mubr.msk.f32.gmra.mxu1 %vm69_vm0, %v18043_v39 }
  0xde   :  { %16336 = vmatprep.mubr.msk.f32.mxu1 %vm69_vm0, %v18272_v47 }
  0xdf   :  { %16363 = vmatmul.mubr.msk.f32.gmra.mxu0 %vm69_vm0, %v18130_v2 }
  0xe0   :  { %16365 = vmatprep.mubr.msk.f32.mxu0 %vm69_vm0, %v18137_v4 }
  0xe1   :  { %16337 = vmatmul.mubr.msk.f32.gmra.mxu1 %vm69_vm0, %v1739_v25 }
  0xe2   :  { %16339 = vmatprep.mubr.msk.f32.mxu1 %vm69_vm0, %v17989_v23  ;;  %v1747_v23 = vld [vmem:[#allocation2 + $0x131] sm:$0xff] }
  0xe3   :  { %16366 = vmatmul.mubr.msk.f32.gmra.mxu0 %vm69_vm0, %v18151_v8 }
  0xe4   :  { %16368 = vmatprep.mubr.msk.f32.mxu0 %vm69_vm0, %v1278_v55 }
  0xe5   :  { %16340 = vmatmul.mubr.msk.f32.gmra.mxu1 %vm69_vm0, %v17991_v24  ;;  %v1977_v24 = vld [vmem:[#allocation2 + $0x132] sm:$0xff] }
  0xe6   :  { %16342 = vmatprep.mubr.msk.f32.mxu1 %vm69_vm0, %v18001_v27 }
  0xe7   :  { %16369 = vmatmul.mubr.msk.f32.gmra.mxu0 %vm69_vm0, %v1969_v26 }
  0xe8   :  { %16371 = vmatprep.mubr.msk.f32.mxu0 %vm69_vm0, %v18174_v15 }
  0xe9   :  { %16343 = vmatmul.mubr.msk.f32.gmra.mxu1 %vm69_vm0, %v18012_v30 }
  0xea   :  { %16345 = vmatprep.mubr.msk.f32.mxu1 %vm69_vm0, %v18019_v32 }
  0xeb   :  { %16372 = vmatmul.mubr.msk.f32.gmra.mxu0 %vm69_vm0, %v18186_v18 }
  0xec   :  { %16374 = vmatprep.mubr.msk.f32.mxu0 %vm69_vm0, %v18190_v19 }
  0xed   :  { %16346 = vmatmul.mubr.msk.f32.gmra.mxu1 %vm69_vm0, %v18034_v36 }
  0xee   :  { %16348 = vmatprep.mubr.msk.f32.mxu1 %vm69_vm0, %v18305_v45 }
  0xef   :  { %16375 = vmatmul.mubr.msk.f32.gmra.mxu0 %vm69_vm0, %v18200_v21 }
  0xf0   :  { %16377 = vmatprep.mubr.msk.f32.mxu0 %vm69_vm0, %v18204_v28 }
  0xf1   :  { %16349 = vmatmul.mubr.msk.f32.gmra.mxu1 %vm69_vm0, %v1747_v23 }
  0xf2   :  { %16399 = vmatprep.mubr.msk.f32.mxu1 %vm2332_vm3, %v2300_v10 }
  0xf3   :  { %16378 = vmatmul.mubr.msk.f32.gmra.mxu0 %vm69_vm0, %v18212_v31 }
  0xf4   :  { %16380 = vmatprep.mubr.msk.f32.mxu0 %vm69_vm0, %v1286_v57 }
  0xf7   :  { %16381 = vmatmul.mubr.msk.f32.gmra.mxu0 %vm69_vm0, %v1977_v24 }
  0xf8   :  { %16463 = vmatprep.mubr.msk.f32.mxu0 %vm2332_vm3, %v2300_v10 }
 0x127   :  { %v16105_v27 = vpop.f32.mrf.mxu0 }
 0x128   :  { %v16120_v29 = vpop.f32.mrf.mxu1 }
 0x129   :  { %v18442_v30 = vpop.f32.mrf.mxu0 }
 0x12a   :  { %v18444_v32 = vpop.f32.mrf.mxu1 }
 0x12b   :  { %22782 = vst [vmem:[#allocation13_spill] sm:$0xff] %v18444_v32  ;;  %v16108_v33 = vpop.f32.mrf.mxu0 }
 0x12d   :  { %v16123_v35 = vpop.f32.mrf.mxu1  ;;  %v18446_v36 = vpop.f32.mrf.mxu0 }
 0x12f   :  { %v18448_v39 = vpop.f32.mrf.mxu1  ;;  %v16111_v54 = vpop.f32.mrf.mxu0 }
 0x131   :  { %v16126_v59 = vpop.f32.mrf.mxu1  ;;  %v18450_v60 = vpop.f32.mrf.mxu0 }
 0x133   :  { %v18452_v61 = vpop.f32.mrf.mxu1  ;;  %v16114_v62 = vpop.f32.mrf.mxu0 }
 0x135   :  { %v16137_v63 = vpop.f32.mrf.mxu1  ;;  %v18454_v1 = vpop.f32.mrf.mxu0 }
 0x136   :  { %v508_v2 = vadd.f32 %v16137_v63, %v16105_v27 }
 0x137   :  { %v18456_v3 = vpop.f32.mrf.mxu1  ;;  %v16117_v4 = vpop.f32.mrf.mxu0 }
 0x139   :  { %v16140_v5 = vpop.f32.mrf.mxu1  ;;  %v18458_v6 = vpop.f32.mrf.mxu0 }
 0x13a   :  { %22783 = vst [vmem:[#allocation14_spill] sm:$0xff] %v18458_v6  ;;  %v518_v7 = vadd.f32 %v16140_v5, %v16108_v33 }
 0x13b   :  { %v18460_v8 = vpop.f32.mrf.mxu1  ;;  %v16169_v9 = vpop.f32.mrf.mxu0 }
 0x13c   :  { %v796_v11 = vadd.f32 %v16169_v9, %v508_v2 }
 0x13d   :  { %v16143_v12 = vpop.f32.mrf.mxu1  ;;  %v18467_v13 = vpop.f32.mrf.mxu0 }
 0x13e   :  { %v528_v14 = vadd.f32 %v16143_v12, %v16111_v54 }
 0x13f   :  { %v18469_v15 = vpop.f32.mrf.mxu1  ;;  %v16172_v16 = vpop.f32.mrf.mxu0 }
 0x140   :  { %v798_v17 = vadd.f32 %v16172_v16, %v518_v7 }
 0x141   :  { %v16146_v18 = vpop.f32.mrf.mxu1  ;;  %v18471_v19 = vpop.f32.mrf.mxu0 }
 0x142   :  { %v538_v20 = vadd.f32 %v16146_v18, %v16114_v62 }
 0x143   :  { %v18473_v21 = vpop.f32.mrf.mxu1  ;;  %v16175_v28 = vpop.f32.mrf.mxu0 }
 0x144   :  { %v800_v31 = vadd.f32 %v16175_v28, %v528_v14 }
 0x145   :  { %v16149_v34 = vpop.f32.mrf.mxu1  ;;  %v18475_v37 = vpop.f32.mrf.mxu0 }
 0x146   :  { %v548_v38 = vadd.f32 %v16149_v34, %v16117_v4 }
 0x147   :  { %v18477_v22 = vpop.f32.mrf.mxu1  ;;  %v16178_v40 = vpop.f32.mrf.mxu0 }
 0x148   :  { %22784 = vst [vmem:[#allocation15_spill] sm:$0xff] %v18477_v22  ;;  %v18479_v41 = vadd.f32 %v16178_v40, %v538_v20 }
 0x149   :  { %v16152_v42 = vpop.f32.mrf.mxu1  ;;  %v18481_v43 = vpop.f32.mrf.mxu0 }
 0x14a   :  { %v558_v46 = vadd.f32 %v16152_v42, %v16120_v29 }
 0x14b   :  { %v18483_v47 = vpop.f32.mrf.mxu1  ;;  %v16181_v49 = vpop.f32.mrf.mxu0 }
 0x14c   :  { %22785 = vst [vmem:[#allocation16_spill] sm:$0xff] %v18483_v47  ;;  %v804_v45 = vadd.f32 %v16181_v49, %v548_v38 }
 0x14d   :  { %v16155_v52 = vpop.f32.mrf.mxu1  ;;  %v18485_v51 = vpop.f32.mrf.mxu0 }
 0x14e   :  { %22786 = vst [vmem:[#allocation17_spill] sm:$0xff] %v18485_v51  ;;  %v568_v53 = vadd.f32 %v16155_v52, %v16123_v35 }
 0x14f   :  { %v18487_v44 = vpop.f32.mrf.mxu1  ;;  %v16184_v55 = vpop.f32.mrf.mxu0 }
 0x150   :  { %v806_v48 = vadd.f32 %v16184_v55, %v558_v46 }
 0x151   :  { %v16158_v50 = vpop.f32.mrf.mxu1  ;;  %v18489_v56 = vpop.f32.mrf.mxu0 }
 0x152   :  { %22787 = vst [vmem:[#allocation18_spill] sm:$0xff] %v18489_v56  ;;  %v578_v57 = vadd.f32 %v16158_v50, %v16126_v59 }
 0x153   :  { %v18491_v58 = vpop.f32.mrf.mxu1  ;;  %v16187_v25 = vpop.f32.mrf.mxu0 }
 0x154   :  { %v808_v26 = vadd.f32 %v16187_v25, %v568_v53 }
 0x155   :  { %v16201_v23 = vpop.f32.mrf.mxu1  ;;  %v18493_v24 = vpop.f32.mrf.mxu0 }
 0x156   :  { %v1026_v27 = vadd.f32 %v16201_v23, %v796_v11 }
 0x157   :  { %v18495_v29 = vpop.f32.mrf.mxu1  ;;  %v16190_v33 = vpop.f32.mrf.mxu0 }
 0x158   :  { %v18497_v35 = vadd.f32 %v16190_v33, %v578_v57 }
 0x159   :  { %v16204_v54 = vpop.f32.mrf.mxu1  ;;  %v18499_v62 = vpop.f32.mrf.mxu0 }
 0x15a   :  { %v1028_v63 = vadd.f32 %v16204_v54, %v798_v17 }
 0x15b   :  { %v18501_v2 = vpop.f32.mrf.mxu1  ;;  %v16233_v59 = vpop.f32.mrf.mxu0 }
 0x15c   :  { %v18503_v4 = vadd.f32 %v16233_v59, %v1026_v27 }
 0x15d   :  { %v16207_v5 = vpop.f32.mrf.mxu1  ;;  %v18505_v7 = vpop.f32.mrf.mxu0 }
 0x15e   :  { %v1030_v9 = vadd.f32 %v16207_v5, %v800_v31 }
 0x15f   :  { %v18507_v10 = vpop.f32.mrf.mxu1  ;;  %v16236_v11 = vpop.f32.mrf.mxu0 }
 0x160   :  { %v18509_v12 = vadd.f32 %v16236_v11, %v1028_v63 }
 0x161   :  { %v18511_v14 = vpop.f32.mrf.mxu1  ;;  %v18513_v16 = vpop.f32.mrf.mxu0 }
 0x163   :  { %v18515_v18 = vpop.f32.mrf.mxu1  ;;  %v16239_v17 = vpop.f32.mrf.mxu0 }
 0x164   :  { %v18517_v20 = vadd.f32 %v16239_v17, %v1030_v9 }
 0x165   :  { %v16213_v28 = vpop.f32.mrf.mxu1  ;;  %v18519_v34 = vpop.f32.mrf.mxu0 }
 0x166   :  { %v1034_v38 = vadd.f32 %v16213_v28, %v804_v45 }
 0x167   :  { %v18521_v40 = vpop.f32.mrf.mxu1  ;;  %v18523_v31 = vpop.f32.mrf.mxu0 }
 0x168   :  { %22788 = vst [vmem:[#allocation19_spill] sm:$0xff] %v18521_v40 }
 0x169   :  { %v16216_v42 = vpop.f32.mrf.mxu1  ;;  %v18525_v46 = vpop.f32.mrf.mxu0 }
 0x16a   :  { %v1036_v49 = vadd.f32 %v16216_v42, %v806_v48 }
 0x16b   :  { %v18527_v52 = vpop.f32.mrf.mxu1  ;;  %v16245_v53 = vpop.f32.mrf.mxu0 }
 0x16c   :  { %22789 = vst [vmem:[#allocation20_spill] sm:$0xff] %v18527_v52  ;;  %v18529_v55 = vadd.f32 %v16245_v53, %v1034_v38 }
 0x16d   :  { %v16219_v50 = vpop.f32.mrf.mxu1  ;;  %v18531_v57 = vpop.f32.mrf.mxu0 }
 0x16e   :  { %22790 = vst [vmem:[#allocation21_spill] sm:$0xff] %v18529_v55  ;;  %22791 = vst [vmem:[#allocation22_spill] sm:$0xff] %v18531_v57  ;;  %v1038_v25 = vadd.f32 %v16219_v50, %v808_v26 }
 0x16f   :  { %v18533_v23 = vpop.f32.mrf.mxu1  ;;  %v16248_v45 = vpop.f32.mrf.mxu0 }
 0x170   :  { %22792 = vst [vmem:[#allocation23_spill] sm:$0xff] %v18533_v23  ;;  %v18535_v27 = vadd.f32 %v16248_v45, %v1036_v49 }
 0x171   :  { %v18537_v33 = vpop.f32.mrf.mxu1  ;;  %v18539_v54 = vpop.f32.mrf.mxu0 }
 0x172   :  { %22793 = vst [vmem:[#allocation24_spill] sm:$0xff] %v18535_v27  ;;  %22794 = vst [vmem:[#allocation25_spill] sm:$0xff] %v18539_v54 }
 0x173   :  { %v18541_v63 = vpop.f32.mrf.mxu1  ;;  %v16251_v48 = vpop.f32.mrf.mxu0 }
 0x174   :  { %v18543_v59 = vadd.f32 %v16251_v48, %v1038_v25 }
 0x175   :  { %v18545_v5 = vpop.f32.mrf.mxu1  ;;  %v18547_v9 = vpop.f32.mrf.mxu0 }
 0x176   :  { %22795 = vst [vmem:[#allocation26_spill] sm:$0xff] %v18543_v59  ;;  %22796 = vst [vmem:[#allocation27_spill] sm:$0xff] %v18547_v9 }
 0x177   :  { %v18549_v11 = vpop.f32.mrf.mxu1  ;;  %v18551_v26 = vpop.f32.mrf.mxu0 }
 0x179   :  { %v18553_v17 = vpop.f32.mrf.mxu1  ;;  %v18555_v28 = vpop.f32.mrf.mxu0 }
 0x17a   :  { %22797 = vst [vmem:[#allocation28_spill] sm:$0xff] %v18555_v28 }
 0x17b   :  { %v18557_v38 = vpop.f32.mrf.mxu1  ;;  %v18559_v42 = vpop.f32.mrf.mxu0 }
 0x17d   :  { %v16271_v49 = vpop.f32.mrf.mxu1  ;;  %v18561_v53 = vpop.f32.mrf.mxu0 }
 0x17e   :  { %22798 = vst [vmem:[#allocation29_spill] sm:$0xff] %v18561_v53 }
 0x17f   :  { %v1426_v50 = vpop.f32.mrf.mxu1  ;;  %v18563_v25 = vpop.f32.mrf.mxu0 }
 0x181   :  { %v16274_v45 = vpop.f32.mrf.mxu1  ;;  %v18565_v48 = vpop.f32.mrf.mxu0 }
 0x183   :  { %v1436_v0 = vpop.f32.mrf.mxu1  ;;  %v16303_v55 = vpop.f32.mrf.mxu0 }
 0x185   :  { %v18567_v57 = vpop.f32.mrf.mxu1  ;;  %v1657_v40 = vpop.f32.mrf.mxu0 }
 0x186   :  { %22799 = vst [vmem:[#allocation30_spill] sm:$0xff] %v18567_v57 }
 0x187   :  { %v18569_v27 = vpop.f32.mrf.mxu1  ;;  %v16306_v54 = vpop.f32.mrf.mxu0 }
 0x188   :  { %22800 = vst [vmem:[#allocation31_spill] sm:$0xff] %v18569_v27 }
 0x189   :  { %v18571_v51 = vpop.f32.mrf.mxu1  ;;  %v1667_v52 = vpop.f32.mrf.mxu0 }
 0x18a   :  { %22801 = vst [vmem:[#allocation32_spill] sm:$0xff] %v18571_v51 }
 0x18b   :  { %v18573_v22 = vpop.f32.mrf.mxu1  ;;  %v18575_v6 = vpop.f32.mrf.mxu0 }
 0x18c   :  { %22802 = vst [vmem:[#allocation33_spill] sm:$0xff] %v18573_v22  ;;  %22803 = vst [vmem:[#allocation34_spill] sm:$0xff] %v18575_v6 }
 0x18d   :  { %v18577_v59 = vpop.f32.mrf.mxu1  ;;  %v18579_v9 = vpop.f32.mrf.mxu0 }
 0x18e   :  { %22804 = vst [vmem:[#allocation35_spill] sm:$0xff] %v18577_v59  ;;  %22805 = vst [vmem:[#allocation36_spill] sm:$0xff] %v18579_v9 }
 0x18f   :  { %v18581_v56 = vpop.f32.mrf.mxu1  ;;  %v18583_v28 = vpop.f32.mrf.mxu0 }
 0x190   :  { %22806 = vst [vmem:[#allocation37_spill] sm:$0xff] %v18581_v56  ;;  %22807 = vst [vmem:[#allocation38_spill] sm:$0xff] %v18583_v28 }
 0x191   :  { %v18585_v57 = vpop.f32.mrf.mxu1  ;;  %v18587_v23 = vpop.f32.mrf.mxu0 }
 0x192   :  { %22808 = vst [vmem:[#allocation39_spill] sm:$0xff] %v18585_v57  ;;  %22809 = vst [vmem:[#allocation40_spill] sm:$0xff] %v18587_v23  ;;  %v533_v23 = vadd.f32 %v18473_v21, %v18454_v1  ;;  %v513_v21 = vadd.f32 %v18460_v8, %v18446_v36  ;;  %v503_v36 = vadd.f32 %v18456_v3, %v18442_v30 }
 0x193   :  { %v18589_v27 = vpop.f32.mrf.mxu1  ;;  %v18591_v51 = vpop.f32.mrf.mxu0 }
 0x194   :  { %22810 = vst [vmem:[#allocation41_spill] sm:$0xff] %v18589_v27  ;;  %22811 = vst [vmem:[#allocation42_spill] sm:$0xff] %v18591_v51 }
 0x195   :  { %v18593_v47 = vpop.f32.mrf.mxu1  ;;  %v18595_v22 = vpop.f32.mrf.mxu0 }
 0x196   :  { %22812 = vst [vmem:[#allocation43_spill] sm:$0xff] %v18593_v47  ;;  %22813 = vst [vmem:[#allocation44_spill] sm:$0xff] %v18595_v22  ;;  %v523_v22 = vadd.f32 %v18469_v15, %v18450_v60 }
 0x197   :  { %v18597_v6 = vpop.f32.mrf.mxu1  ;;  %v18599_v59 = vpop.f32.mrf.mxu0 }
 0x198   :  { %22814 = vst [vmem:[#allocation45_spill] sm:$0xff] %v18597_v6  ;;  %22815 = vst [vmem:[#allocation46_spill] sm:$0xff] %v18599_v59  ;;  %v801_v6 = vadd.f32 %v18481_v43, %v533_v23  ;;  %v1032_v59 = vadd.f32 %v18511_v14, %v18479_v41  ;;  %v799_v47 = vadd.f32 %v18475_v37, %v523_v22 }
 0x199   :  { %v16332_v9 = vpop.f32.mrf.mxu1  ;;  %v18601_v56 = vpop.f32.mrf.mxu0  ;;  %v797_v43 = vadd.f32 %v18471_v19, %v513_v21 }
 0x19a   :  { %22816 = vst [vmem:[#allocation47_spill] sm:$0xff] %v18601_v56  ;;  %v1262_v1 = vadd.f32 %v18523_v31, %v1032_v59  ;;  %v1029_v60 = vadd.f32 %v18507_v10, %v799_v47  ;;  %v795_v59 = vadd.f32 %v18467_v13, %v503_v36  ;;  %v18647_v13 = vld [vmem:[%s22705_s3] ss:$0 sm:$0xff]  ;;  %v22824_v36 = vld [vmem:[#allocation28_spill] sm:$0xff] }
 0x19b   :  { %v18603_v28 = vpop.f32.mrf.mxu1  ;;  %v18605_v57 = vpop.f32.mrf.mxu0  ;;  %v1027_v8 = vadd.f32 %v18501_v2, %v797_v43 }
 0x19c   :  { %22817 = vst [vmem:[#allocation48_spill] sm:$0xff] %v18605_v57  ;;  %v1031_v57 = vadd.f32 %v18515_v18, %v801_v6  ;;  %v1492_v41 = vadd.f32 %v16274_v45, %v1262_v1  ;;  %v1259_v37 = vadd.f32 %v18519_v34, %v1029_v60  ;;  %v1490_v6 = vadd.f32 %v16271_v49, %v18517_v20 }
 0x19d   :  { %v16335_v27 = vpop.f32.mrf.mxu1  ;;  %v18609_v51 = vpop.f32.mrf.mxu0  ;;  %v1257_v34 = vadd.f32 %v18513_v16, %v1027_v8  ;;  %v1025_v45 = vadd.f32 %v18495_v29, %v795_v59  ;;  %v573_v29 = vadd.f32 %v18491_v58, %v18452_v61  ;;  %v1040_v58 = vadd.f32 %v18537_v33, %v18497_v35 }
 0x19e   :  { %22818 = vst [vmem:[#allocation49_spill] sm:$0xff] %v18609_v51  ;;  %v1261_v15 = vadd.f32 %v18525_v46, %v1031_v57  ;;  %v1723_v18 = vadd.f32 %v16306_v54, %v1492_v41  ;;  %v1489_v10 = vadd.f32 %v1426_v50, %v1259_v37  ;;  %v1721_v46 = vadd.f32 %v16303_v55, %v1490_v6  ;;  %v22821_v6 = vld [vmem:[#allocation13_spill] sm:$0xff] }
 0x19f   :  { %v1887_v32 = vpop.f32.mrf.mxu1  ;;  %v18616_v56 = vpop.f32.mrf.mxu0  ;;  %v1487_v55 = vadd.f32 %v18557_v38, %v1257_v34  ;;  %v1255_v38 = vadd.f32 %v18505_v7, %v1025_v45  ;;  %v1486_v50 = vadd.f32 %v18545_v5, %v18503_v4  ;;  %v563_v41 = vadd.f32 %v18487_v44, %v18448_v39 }
 0x1a0   :  { %v1491_v22 = vadd.f32 %v1436_v0, %v1261_v15  ;;  %v1488_v0 = vadd.f32 %v18553_v17, %v18509_v12  ;;  %v1720_v30 = vadd.f32 %v1657_v40, %v1489_v10  ;;  %v1951_v3 = vadd.f32 %v16335_v27, %v1721_v46  ;;  %v22825_v10 = vld [vmem:[#allocation39_spill] sm:$0xff] }
 0x1a1   :  { %v16338_v51 = vpop.f32.mrf.mxu1  ;;  %v18623_v53 = vpop.f32.mrf.mxu0  ;;  %v1718_v21 = vadd.f32 %v18565_v48, %v1487_v55  ;;  %v809_v61 = vadd.f32 %v18499_v62, %v573_v29  ;;  %v1485_v4 = vadd.f32 %v18549_v11, %v1255_v38  ;;  %v807_v39 = vadd.f32 %v18493_v24, %v563_v41  ;;  %v22819_v11 = vld [vmem:[#allocation29_spill] sm:$0xff]  ;;  %v22835_v38 = vld [vmem:[#allocation14_spill] sm:$0xff] }
 0x1a2   :  { %v1722_v57 = vadd.f32 %v1667_v52, %v1491_v22  ;;  %v1953_v19 = vadd.f32 %v16338_v51, %v1723_v18  ;;  %v1719_v51 = vadd.f32 %v18563_v25, %v1488_v0  ;;  %v1950_v52 = vadd.f32 %v1887_v32, %v1720_v30  ;;  %v22822_v22 = vld [vmem:[#allocation16_spill] sm:$0xff]  ;;  %v22823_v18 = vld [vmem:[#allocation23_spill] sm:$0xff]  ;;  %v22828_v0 = vld [vmem:[#allocation18_spill] sm:$0xff] }
 0x1a3   :  { %v1897_v14 = vpop.f32.mrf.mxu1  ;;  %v16367_v23 = vpop.f32.mrf.mxu0  ;;  %v1948_v48 = vadd.f32 %v18603_v28, %v1718_v21  ;;  %v1039_v44 = vadd.f32 %v18541_v63, %v809_v61  ;;  %v1270_v35 = vadd.f32 %v18551_v26, %v1040_v58  ;;  %v553_v24 = vadd.f32 %v22822_v22, %v22821_v6  ;;  %v22827_v59 = vld [vmem:[#allocation48_spill] sm:$0xff]  ;;  %v22829_v30 = vld [vmem:[#allocation27_spill] sm:$0xff] }
 0x1a4   :  { %v1952_v2 = vadd.f32 %v1897_v14, %v1722_v57  ;;  %v2181_v17 = vadd.f32 %v16367_v23, %v1951_v3  ;;  %v1949_v60 = vadd.f32 %v16332_v9, %v1719_v51  ;;  %v1717_v9 = vadd.f32 %v18559_v42, %v1486_v50  ;;  %v22820_v42 = vld [vmem:[#allocation43_spill] sm:$0xff]  ;;  %v22826_v57 = vld [vmem:[#allocation45_spill] sm:$0xff] }
 0x1a5   :  { %v18633_v31 = vpop.f32.mrf.mxu1  ;;  %v2117_v47 = vpop.f32.mrf.mxu0  ;;  %v1716_v23 = vadd.f32 %v22819_v11, %v1485_v4  ;;  %v2178_v28 = vadd.f32 %v18623_v53, %v1948_v48  ;;  %v1037_v63 = vadd.f32 %v22823_v18, %v807_v39  ;;  %v1269_v26 = vadd.f32 %v22824_v36, %v1039_v44  ;;  %v22832_v51 = vld [vmem:[#allocation41_spill] sm:$0xff]  ;;  %v22836_v50 = vld [vmem:[#allocation15_spill] sm:$0xff]  ;;  %v22839_v4 = vld [vmem:[#allocation42_spill] sm:$0xff] }
 0x1a6   :  { %v2180_v32 = vadd.f32 %v2117_v47, %v1950_v52  ;;  %v2179_v43 = vadd.f32 %v18616_v56, %v1949_v60  ;;  %v2204_v14 = vadd.f32 %v18647_v13, %v2181_v17  ;;  %v1947_v37 = vadd.f32 %v22820_v42, %v1717_v9  ;;  %v22833_v52 = vld [vmem:[#allocation46_spill] sm:$0xff]  ;;  %v22837_v60 = vld [vmem:[#allocation20_spill] sm:$0xff]  ;;  %v22840_v48 = vld [vmem:[#allocation47_spill] sm:$0xff] }
 0x1a7   :  { %v18639_v20 = vpop.f32.mrf.mxu1  ;;  %v16370_v54 = vpop.f32.mrf.mxu0  ;;  %v1500_v46 = vadd.f32 %v22825_v10, %v1270_v35  ;;  %v1267_v3 = vadd.f32 %v22829_v30, %v1037_v63  ;;  %v2201_v29 = vadd.f32 %v18647_v13, %v2178_v28  ;;  %v543_v21 = vadd.f32 %v22836_v50, %v22835_v38  ;;  %v22841_v44 = vld [vmem:[#allocation17_spill] sm:$0xff]  ;;  %v22843_v42 = vld [vmem:[#allocation24_spill] sm:$0xff]  ;;  %v22854_v38 = vld [vmem:[#allocation34_spill] sm:$0xff] }
 0x1a8   :  { %v2183_v49 = vadd.f32 %v16370_v54, %v1953_v19  ;;  %v2203_v56 = vadd.f32 %v18647_v13, %v2180_v32  ;;  %v1946_v19 = vadd.f32 %v22826_v57, %v1716_v23  ;;  %v2177_v53 = vadd.f32 %v22827_v59, %v1947_v37  ;;  %v22842_v11 = vld [vmem:[#allocation25_spill] sm:$0xff]  ;;  %v22844_v37 = vld [vmem:[#allocation32_spill] sm:$0xff]  ;;  %v22848_v57 = vld [vmem:[#allocation38_spill] sm:$0xff] }
 0x1a9   :  { %v18649_v16 = vpop.f32.mrf.mxu1  ;;  %v2127_v12 = vpop.f32.mrf.mxu0  ;;  %v2202_v34 = vadd.f32 %v18647_v13, %v2179_v43  ;;  %v805_v54 = vadd.f32 %v22828_v0, %v553_v24  ;;  %v1731_v17 = vadd.f32 %v22833_v52, %v1500_v46  ;;  %v803_v35 = vadd.f32 %v22841_v44, %v543_v21  ;;  %v22847_v10 = vld [vmem:[#allocation33_spill] sm:$0xff]  ;;  %v2303_v21 = vld [vmem:[%s22710_s8 + $0x18] sm:$0xff] }
 0x1aa   :  { %v2206_v40 = vadd.f32 %v18647_v13, %v2183_v49  ;;  %v2182_v27 = vadd.f32 %v2127_v12, %v1952_v2  ;;  %v22830_v2 = vld [vmem:[#allocation26_spill] sm:$0xff]  ;;  %v22831_v49 = vld [vmem:[#allocation35_spill] sm:$0xff]  ;;  %v1499_v12 = vadd.f32 %v22832_v51, %v1269_v26  ;;  %v1496_v28 = vadd.f32 %v22844_v37, %v22843_v42  ;;  %v2309_v44 = vld [vmem:[%s22710_s8 + $0x48] sm:$0xff] }
 0x1ab   :  { %v18657_v25 = vpop.f32.mrf.mxu1  ;;  %v18659_v1 = vpop.f32.mrf.mxu0  ;;  %v1498_v45 = vadd.f32 %v22831_v49, %v22830_v2  ;;  %v1035_v32 = vadd.f32 %v22837_v60, %v805_v54  ;;  %v22846_v26 = vld [vmem:[#allocation19_spill] sm:$0xff]  ;;  %v18727_v30 = vld [vmem:[%s22710_s8 + $0x10] sm:$0xff]  ;;  %v2313_v42 = vld [vmem:[%s22710_s8 + $0x68] sm:$0xff] }
 0x1ac   :  { %v2205_v15 = vadd.f32 %v18647_v13, %v2182_v27  ;;  %16383 = vmatprep.subr.mxu1 %v2206_v40  ;;  %v1730_v43 = vadd.f32 %v22840_v48, %v1499_v12  ;;  %v22850_v49 = vld [vmem:[#allocation21_spill] sm:$0xff]  ;;  %v22852_v12 = vld [vmem:[#allocation40_spill] sm:$0xff] }
 0x1ad   :  { %v16347_v7 = vpop.f32.mrf.mxu1  ;;  %v18669_v5 = vpop.f32.mrf.mxu0  ;;  %16384 = vmatpush3.msra.mxu1 %v2206_v40  ;;  %v22834_v40 = vld [vmem:[#allocation49_spill] sm:$0xff]  ;;  %v1729_v9 = vadd.f32 %v22839_v4, %v1498_v45  ;;  %v1265_v23 = vadd.f32 %v22842_v11, %v1035_v32  ;;  %v22851_v45 = vld [vmem:[#allocation30_spill] sm:$0xff] }
 0x1ae   :  { %16385 = vmatprep.subr.mxu1 %v2205_v15  ;;  %v2176_v27 = vadd.f32 %v22834_v40, %v1946_v19  ;;  %v1727_v19 = vadd.f32 %v22848_v57, %v1496_v28  ;;  %v1494_v51 = vadd.f32 %v22851_v45, %v22850_v49  ;;  %v3011_v11 = vld [vmem:[#allocation4 + $0x18] sm:$0xff]  ;;  %v2314_v37 = vld [vmem:[%s22710_s8 + $0x70] sm:$0xff]  ;;  %v3012_v49 = vld [vmem:[#allocation3 + $0x1] sm:$0xff] }
 0x1af   :  { %v1927_v62 = vpop.f32.mrf.mxu1  ;;  %v18678_v33 = vpop.f32.mrf.mxu0  ;;  %16386 = vmatpush3.msra.mxu1 %v2205_v15  ;;  %v22838_v15 = vld [vmem:[#allocation37_spill] sm:$0xff]  ;;  %v1959_v18 = vadd.f32 %v16347_v7, %v1729_v9  ;;  %v1495_v46 = vadd.f32 %v22847_v10, %v1265_v23  ;;  %v2312_v23 = vld [vmem:[%s22710_s8 + $0x60] sm:$0xff]  ;;  %v2315_v28 = vld [vmem:[%s22710_s8 + $0x78] sm:$0xff] }
 0x1b0   :  { %16387 = vmatprep.subr.mxu1 %v2204_v14  ;;  %v1497_v41 = vadd.f32 %v22838_v15, %v1267_v3  ;;  %v2199_v24 = vadd.f32 %v18647_v13, %v2176_v27  ;;  %v22849_v3 = vld [vmem:[#allocation22_spill] sm:$0xff]  ;;  %v22853_v27 = vld [vmem:[#allocation31_spill] sm:$0xff]  ;;  %v1725_v50 = vadd.f32 %v22854_v38, %v1494_v51  ;;  %v2325_v10 = vld [vmem:[%s22710_s8 + $0xc8] sm:$0xff] }
 0x1b1   :  { %v16350_v8 = vpop.f32.mrf.mxu1  ;;  %v18688_v47 = vpop.f32.mrf.mxu0  ;;  %16388 = vmatpush3.msra.mxu1 %v2204_v14  ;;  %v2200_v14 = vadd.f32 %v18647_v13, %v2177_v53  ;;  %v18721_v53 = vld [vmem:[%s22710_s8 + $0x8] sm:$0xff]  ;;  %v1726_v52 = vadd.f32 %v22852_v12, %v1495_v46  ;;  %v2304_v15 = vld [vmem:[%s22710_s8 + $0x20] sm:$0xff]  ;;  %v2326_v46 = vld [vmem:[%s22710_s8 + $0xd0] sm:$0xff] }
 0x1b2   :  { %16389 = vmatprep.subr.mxu1 %v2203_v56  ;;  %v1961_v39 = vadd.f32 %v16350_v8, %v1731_v17  ;;  %v1033_v8 = vadd.f32 %v22846_v26, %v803_v35  ;;  %v3080_v17 = vld [vmem:[#allocation4 + $0x38] sm:$0xff]  ;;  %v2310_v35 = vld [vmem:[%s22710_s8 + $0x50] sm:$0xff]  ;;  %v2944_v51 = vld [vmem:[#allocation3] sm:$0xff] }
 0x1b3   :  { %v16379_v55 = vpop.f32.mrf.mxu0  ;;  %16390 = vmatpush3.msra.mxu1 %v2203_v56  ;;  %v1937_v61 = vpop.f32.mrf.mxu1  ;;  %v22845_v56 = vld [vmem:[#allocation44_spill] sm:$0xff]  ;;  %v2323_v26 = vld [vmem:[%s22710_s8 + $0xb8] sm:$0xff] }
 0x1b4   :  { %16391 = vmatprep.subr.mxu1 %v2202_v34  ;;  %v1728_v6 = vadd.f32 %v22845_v56, %v1497_v41  ;;  %v1960_v63 = vadd.f32 %v1937_v61, %v1730_v43  ;;  %v2189_v0 = vadd.f32 %v16379_v55, %v1959_v18  ;;  %v1263_v2 = vadd.f32 %v22849_v3, %v1033_v8  ;;  %v22855_v41 = vld [vmem:[#allocation36_spill] sm:$0xff]  ;;  %v2327_v57 = vld [vmem:[%s22710_s8 + $0xd8] sm:$0xff] }
 0x1b5   :  { %v2157_v58 = vpop.f32.mrf.mxu0  ;;  %16392 = vmatpush3.msra.mxu1 %v2202_v34  ;;  %v2316_v56 = vld [vmem:[%s22710_s8 + $0x80] sm:$0xff]  ;;  %v3013_v45 = vld [vmem:[#allocation3 + $0x9] sm:$0xff] }
 0x1b6   :  { %16393 = vmatprep.subr.mxu1 %v2201_v29  ;;  %v1958_v34 = vadd.f32 %v1927_v62, %v1728_v6  ;;  %v1957_v62 = vadd.f32 %v18649_v16, %v1727_v19  ;;  %v1956_v16 = vadd.f32 %v18657_v25, %v1726_v52  ;;  %v2212_v32 = vadd.f32 %v18647_v13, %v2189_v0  ;;  %v2317_v6 = vld [vmem:[%s22710_s8 + $0x88] sm:$0xff]  ;;  %v2320_v18 = vld [vmem:[%s22710_s8 + $0xa0] sm:$0xff]  ;;  %v3079_v0 = vld [vmem:[#allocation4 + $0x30] sm:$0xff] }
 0x1b7   :  { %v16382_v22 = vpop.f32.mrf.mxu0  ;;  %16394 = vmatpush3.msra.mxu1 %v2201_v29  ;;  %v1493_v29 = vadd.f32 %v22853_v27, %v1263_v2  ;;  %v2324_v8 = vld [vmem:[%s22710_s8 + $0xc0] sm:$0xff]  ;;  %v2945_v12 = vld [vmem:[#allocation3 + $0x8] sm:$0xff]  ;;  %v4303_v52 = vld [vmem:[#allocation4 + $0x58] sm:$0xff] }
 0x1b8   :  { %v2191_v36 = vadd.f32 %v16382_v22, %v1961_v39  ;;  %16395 = vmatprep.subr.mxu1 %v2200_v14  ;;  %v2188_v55 = vadd.f32 %v2157_v58, %v1958_v34  ;;  %v2187_v60 = vadd.f32 %v18678_v33, %v1957_v62  ;;  %v1955_v58 = vadd.f32 %v18633_v31, %v1725_v50  ;;  %v2305_v33 = vld [vmem:[%s22710_s8 + $0x28] sm:$0xff]  ;;  %v2308_v39 = vld [vmem:[%s22710_s8 + $0x40] sm:$0xff]  ;;  %v2318_v22 = vld [vmem:[%s22710_s8 + $0x90] sm:$0xff] }
 0x1b9   :  { %v2167_v59 = vpop.f32.mrf.mxu0  ;;  %16396 = vmatpush3.msra.mxu1 %v2200_v14  ;;  %v1724_v61 = vadd.f32 %v22855_v41, %v1493_v29  ;;  %v2186_v4 = vadd.f32 %v18688_v47, %v1956_v16  ;;  %v2306_v47 = vld [vmem:[%s22710_s8 + $0x30] sm:$0xff]  ;;  %v2328_v19 = vld [vmem:[%s22710_s8 + $0xe0] sm:$0xff]  ;;  %v2331_v34 = vld [vmem:[%s22710_s8 + $0xf8] sm:$0xff] }
 0x1ba   :  { %v2214_v7 = vadd.f32 %v18647_v13, %v2191_v36  ;;  %v2190_v54 = vadd.f32 %v2167_v59, %v1960_v63  ;;  %16397 = vmatprep.subr.mxu1 %v2199_v24  ;;  %v2211_v25 = vadd.f32 %v18647_v13, %v2188_v55  ;;  %v2185_v48 = vadd.f32 %v18659_v1, %v1955_v58  ;;  %v2321_v63 = vld [vmem:[%s22710_s8 + $0xa8] sm:$0xff]  ;;  %v2322_v36 = vld [vmem:[%s22710_s8 + $0xb0] sm:$0xff]  ;;  %v3077_v3 = vld [vmem:[#allocation4 + $0x20] sm:$0xff] }
 0x1bb   :  { %16398 = vmatpush3.msra.mxu1 %v2199_v24  ;;  %v1954_v9 = vadd.f32 %v18639_v20, %v1724_v61  ;;  %v2210_v31 = vadd.f32 %v18647_v13, %v2187_v60  ;;  %v2209_v14 = vadd.f32 %v18647_v13, %v2186_v4  ;;  %v2307_v20 = vld [vmem:[%s22710_s8 + $0x38] sm:$0xff]  ;;  %v2329_v59 = vld [vmem:[%s22710_s8 + $0xe8] sm:$0xff]  ;;  %v3008_v2 = vld [vmem:[#allocation4] sm:$0xff] }
 0x1bc   :  { %v2213_v40 = vadd.f32 %v18647_v13, %v2190_v54  ;;  %16400 = vmatmul.mubr.msk.f32.vlgmr.msra.gmra.mxu1 %vm2332_vm3, %v18721_v53  ;;  %16447 = vmatprep.subr.mxu0 %v2214_v7  ;;  %v2208_v1 = vadd.f32 %v18647_v13, %v2185_v48  ;;  %v2319_v24 = vld [vmem:[%s22710_s8 + $0x98] sm:$0xff]  ;;  %v3078_v54 = vld [vmem:[#allocation4 + $0x28] sm:$0xff]  ;;  %v5010_v16 = vld [vmem:[#allocation4 + $0x60] sm:$0xff] }
 0x1bd   :  { %16448 = vmatpush3.msra.mxu0 %v2214_v7  ;;  %16402 = vmatprep.mubr.msk.f32.mxu1 %vm2332_vm3, %v18727_v30  ;;  %v2184_v43 = vadd.f32 %v18669_v5, %v1954_v9  ;;  %v3010_v7 = vld [vmem:[#allocation4 + $0x10] sm:$0xff]  ;;  %v5013_v55 = vld [vmem:[#allocation4 + $0x78] sm:$0xff]  ;;  %v4301_v38 = vld [vmem:[#allocation4 + $0x48] sm:$0xff] }
 0x1be   :  { %16449 = vmatprep.subr.mxu0 %v2213_v40  ;;  %16511 = vmatprep.subr.mxu1 %v3080_v17  ;;  %v5011_v50 = vld [vmem:[#allocation4 + $0x68] sm:$0xff] }
 0x1bf   :  { %16450 = vmatpush3.msra.mxu0 %v2213_v40  ;;  %16512 = vmatpush3.msra.mxu1 %v3080_v17  ;;  %v2207_v5 = vadd.f32 %v18647_v13, %v2184_v43  ;;  %v2311_v13 = vld [vmem:[%s22710_s8 + $0x58] sm:$0xff]  ;;  %v4302_v17 = vld [vmem:[#allocation4 + $0x50] sm:$0xff] }
 0x1c0   :  { %16403 = vmatmul.mubr.msk.f32.gmra.mxu1 %vm2332_vm3, %v2303_v21  ;;  %16451 = vmatprep.subr.mxu0 %v2212_v32  ;;  %v5012_v40 = vld [vmem:[#allocation4 + $0x70] sm:$0xff] }
 0x1c1   :  { %16452 = vmatpush3.msra.mxu0 %v2212_v32  ;;  %16405 = vmatprep.mubr.msk.f32.mxu1 %vm2332_vm3, %v2304_v15 }
 0x1c2   :  { %16453 = vmatprep.subr.mxu0 %v2211_v25  ;;  %16513 = vmatprep.subr.mxu1 %v3079_v0 }
 0x1c3   :  { %16454 = vmatpush3.msra.mxu0 %v2211_v25  ;;  %16514 = vmatpush3.msra.mxu1 %v3079_v0 }
 0x1c4   :  { %16406 = vmatmul.mubr.msk.f32.gmra.mxu1 %vm2332_vm3, %v2305_v33  ;;  %16455 = vmatprep.subr.mxu0 %v2210_v31 }
 0x1c5   :  { %16456 = vmatpush3.msra.mxu0 %v2210_v31  ;;  %16408 = vmatprep.mubr.msk.f32.mxu1 %vm2332_vm3, %v2306_v47 }
 0x1c6   :  { %16457 = vmatprep.subr.mxu0 %v2209_v14  ;;  %16515 = vmatprep.subr.mxu1 %v3078_v54 }
 0x1c7   :  { %16458 = vmatpush3.msra.mxu0 %v2209_v14  ;;  %16516 = vmatpush3.msra.mxu1 %v3078_v54 }
 0x1c8   :  { %16409 = vmatmul.mubr.msk.f32.gmra.mxu1 %vm2332_vm3, %v2307_v20  ;;  %16459 = vmatprep.subr.mxu0 %v2208_v1 }
 0x1c9   :  { %16460 = vmatpush3.msra.mxu0 %v2208_v1  ;;  %16411 = vmatprep.mubr.msk.f32.mxu1 %vm2332_vm3, %v2308_v39 }
 0x1ca   :  { %16461 = vmatprep.subr.mxu0 %v2207_v5  ;;  %16517 = vmatprep.subr.mxu1 %v3077_v3 }
 0x1cb   :  { %16462 = vmatpush3.msra.mxu0 %v2207_v5  ;;  %16518 = vmatpush3.msra.mxu1 %v3077_v3 }
 0x1cc   :  { %16412 = vmatmul.mubr.msk.f32.gmra.mxu1 %vm2332_vm3, %v2309_v44  ;;  %16464 = vmatmul.mubr.msk.f32.vlgmr.msra.gmra.mxu0 %vm2332_vm3, %v18721_v53  ;;  %v2330_v53 = vld [vmem:[%s22710_s8 + $0xf0] sm:$0xff] }
 0x1cd   :  { %16414 = vmatprep.mubr.msk.f32.mxu1 %vm2332_vm3, %v2310_v35  ;;  %16466 = vmatprep.mubr.msk.f32.mxu0 %vm2332_vm3, %v18727_v30  ;;  %v3009_v30 = vld [vmem:[#allocation4 + $0x8] sm:$0xff] }
 0x1ce   :  { %16615 = vmatprep.subr.mxu0 %v3011_v11  ;;  %16719 = vmatprep.subr.mxu1 %v4303_v52 }
 0x1cf   :  { %16616 = vmatpush3.msra.mxu0 %v3011_v11 }
 0x1d0   :  { %16415 = vmatmul.mubr.msk.f32.gmra.mxu1 %vm2332_vm3, %v2311_v13  ;;  %16467 = vmatmul.mubr.msk.f32.gmra.mxu0 %vm2332_vm3, %v2303_v21  ;;  %v4300_v21 = vld [vmem:[#allocation4 + $0x40] sm:$0xff] }
 0x1d1   :  { %16417 = vmatprep.mubr.msk.f32.mxu1 %vm2332_vm3, %v2312_v23  ;;  %16469 = vmatprep.mubr.msk.f32.mxu0 %vm2332_vm3, %v2304_v15 }
 0x1d2   :  { %16617 = vmatprep.subr.mxu0 %v3010_v7 }
 0x1d3   :  { %16618 = vmatpush3.msra.mxu0 %v3010_v7 }
 0x1d4   :  { %16418 = vmatmul.mubr.msk.f32.gmra.mxu1 %vm2332_vm3, %v2313_v42  ;;  %16470 = vmatmul.mubr.msk.f32.gmra.mxu0 %vm2332_vm3, %v2305_v33 }
 0x1d5   :  { %16420 = vmatprep.mubr.msk.f32.mxu1 %vm2332_vm3, %v2314_v37  ;;  %16472 = vmatprep.mubr.msk.f32.mxu0 %vm2332_vm3, %v2306_v47 }
 0x1d6   :  { %16619 = vmatprep.subr.mxu0 %v3009_v30 }
 0x1d7   :  { %16620 = vmatpush3.msra.mxu0 %v3009_v30 }
 0x1d8   :  { %16421 = vmatmul.mubr.msk.f32.gmra.mxu1 %vm2332_vm3, %v2315_v28  ;;  %16473 = vmatmul.mubr.msk.f32.gmra.mxu0 %vm2332_vm3, %v2307_v20 }
 0x1d9   :  { %16423 = vmatprep.mubr.msk.f32.mxu1 %vm2332_vm3, %v2316_v56  ;;  %16475 = vmatprep.mubr.msk.f32.mxu0 %vm2332_vm3, %v2308_v39 }
 0x1da   :  { %16621 = vmatprep.subr.mxu0 %v3008_v2 }
 0x1db   :  { %16622 = vmatpush3.msra.mxu0 %v3008_v2 }
 0x1dc   :  { %16424 = vmatmul.mubr.msk.f32.gmra.mxu1 %vm2332_vm3, %v2317_v6  ;;  %16476 = vmatmul.mubr.msk.f32.gmra.mxu0 %vm2332_vm3, %v2309_v44 }
 0x1dd   :  { %16426 = vmatprep.mubr.msk.f32.mxu1 %vm2332_vm3, %v2318_v22  ;;  %16478 = vmatprep.mubr.msk.f32.mxu0 %vm2332_vm3, %v2310_v35 }
 0x1de   :  { %16823 = vmatprep.subr.mxu0 %v5013_v55 }
 0x1e0   :  { %16427 = vmatmul.mubr.msk.f32.gmra.mxu1 %vm2332_vm3, %v2319_v24  ;;  %16479 = vmatmul.mubr.msk.f32.gmra.mxu0 %vm2332_vm3, %v2311_v13 }
 0x1e1   :  { %16429 = vmatprep.mubr.msk.f32.mxu1 %vm2332_vm3, %v2320_v18  ;;  %16481 = vmatprep.mubr.msk.f32.mxu0 %vm2332_vm3, %v2312_v23 }
 0x1e4   :  { %16430 = vmatmul.mubr.msk.f32.gmra.mxu1 %vm2332_vm3, %v2321_v63  ;;  %16482 = vmatmul.mubr.msk.f32.gmra.mxu0 %vm2332_vm3, %v2313_v42 }
 0x1e5   :  { %16432 = vmatprep.mubr.msk.f32.mxu1 %vm2332_vm3, %v2322_v36  ;;  %16484 = vmatprep.mubr.msk.f32.mxu0 %vm2332_vm3, %v2314_v37 }
 0x1e8   :  { %16433 = vmatmul.mubr.msk.f32.gmra.mxu1 %vm2332_vm3, %v2323_v26  ;;  %16485 = vmatmul.mubr.msk.f32.gmra.mxu0 %vm2332_vm3, %v2315_v28 }
 0x1e9   :  { %16435 = vmatprep.mubr.msk.f32.mxu1 %vm2332_vm3, %v2324_v8  ;;  %16487 = vmatprep.mubr.msk.f32.mxu0 %vm2332_vm3, %v2316_v56 }
 0x1ec   :  { %16436 = vmatmul.mubr.msk.f32.gmra.mxu1 %vm2332_vm3, %v2325_v10  ;;  %16488 = vmatmul.mubr.msk.f32.gmra.mxu0 %vm2332_vm3, %v2317_v6 }
 0x1ed   :  { %16438 = vmatprep.mubr.msk.f32.mxu1 %vm2332_vm3, %v2326_v46  ;;  %16490 = vmatprep.mubr.msk.f32.mxu0 %vm2332_vm3, %v2318_v22 }
 0x1f0   :  { %16439 = vmatmul.mubr.msk.f32.gmra.mxu1 %vm2332_vm3, %v2327_v57  ;;  %16491 = vmatmul.mubr.msk.f32.gmra.mxu0 %vm2332_vm3, %v2319_v24 }
 0x1f1   :  { %16441 = vmatprep.mubr.msk.f32.mxu1 %vm2332_vm3, %v2328_v19  ;;  %16493 = vmatprep.mubr.msk.f32.mxu0 %vm2332_vm3, %v2320_v18 }
 0x1f4   :  { %16442 = vmatmul.mubr.msk.f32.gmra.mxu1 %vm2332_vm3, %v2329_v59  ;;  %16494 = vmatmul.mubr.msk.f32.gmra.mxu0 %vm2332_vm3, %v2321_v63 }
 0x1f5   :  { %16496 = vmatprep.mubr.msk.f32.mxu0 %vm2332_vm3, %v2322_v36  ;;  %16444 = vmatprep.mubr.msk.f32.mxu1 %vm2332_vm3, %v2330_v53 }
 0x1f8   :  { %16497 = vmatmul.mubr.msk.f32.gmra.mxu0 %vm2332_vm3, %v2323_v26  ;;  %16445 = vmatmul.mubr.msk.f32.gmra.mxu1 %vm2332_vm3, %v2331_v34 }
 0x1f9   :  { %16499 = vmatprep.mubr.msk.f32.mxu0 %vm2332_vm3, %v2324_v8  ;;  %16519 = vmatprep.mubr.msk.f32.mxu1 %vm69_vm0, %v3012_v49 }
 0x1fc   :  { %16500 = vmatmul.mubr.msk.f32.gmra.mxu0 %vm2332_vm3, %v2325_v10  ;;  %16520 = vmatmul.mubr.msk.f32.vlgmr.msra.gmra.mxu1 %vm69_vm0, %v3013_v45 }
 0x1fd   :  { %16502 = vmatprep.mubr.msk.f32.mxu0 %vm2332_vm3, %v2326_v46  ;;  %16720 = vmatpush3.msra.mxu1 %v4303_v52 }
 0x1fe   :  { %16721 = vmatprep.subr.mxu1 %v4302_v17 }
 0x1ff   :  { %16722 = vmatpush3.msra.mxu1 %v4302_v17 }
 0x200   :  { %16503 = vmatmul.mubr.msk.f32.gmra.mxu0 %vm2332_vm3, %v2327_v57  ;;  %16723 = vmatprep.subr.mxu1 %v4301_v38 }
 0x201   :  { %16505 = vmatprep.mubr.msk.f32.mxu0 %vm2332_vm3, %v2328_v19  ;;  %16724 = vmatpush3.msra.mxu1 %v4301_v38 }
 0x202   :  { %16725 = vmatprep.subr.mxu1 %v4300_v21 }
 0x203   :  { %16726 = vmatpush3.msra.mxu1 %v4300_v21 }
 0x204   :  { %16506 = vmatmul.mubr.msk.f32.gmra.mxu0 %vm2332_vm3, %v2329_v59 }
 0x205   :  { %16508 = vmatprep.mubr.msk.f32.mxu0 %vm2332_vm3, %v2330_v53 }
 0x208   :  { %16509 = vmatmul.mubr.msk.f32.gmra.mxu0 %vm2332_vm3, %v2331_v34 }
 0x209   :  { %16623 = vmatprep.mubr.msk.f32.mxu0 %vm69_vm0, %v2944_v51 }
 0x20c   :  { %16624 = vmatmul.mubr.msk.f32.vlgmr.msra.gmra.mxu0 %vm69_vm0, %v2945_v12 }
 0x20d   :  { %16824 = vmatpush3.msra.mxu0 %v5013_v55 }
 0x20e   :  { %16825 = vmatprep.subr.mxu0 %v5012_v40 }
 0x20f   :  { %16826 = vmatpush3.msra.mxu0 %v5012_v40 }
 0x210   :  { %16827 = vmatprep.subr.mxu0 %v5011_v50 }
 0x211   :  { %16828 = vmatpush3.msra.mxu0 %v5011_v50 }
 0x212   :  { %16829 = vmatprep.subr.mxu0 %v5010_v16 }
 0x213   :  { %16830 = vmatpush3.msra.mxu0 %v5010_v16 }
 0x27c   :  { %v16401_v62 = vpop.f32.mrf.mxu1 }
 0x27d   :  { %2881 = vst.msk [vmem:[#allocation3 + $0x21] sm:$0xff] %vm69_vm0, %v16401_v62 }
 0x27e   :  { %v2495_v27 = vpop.f32.mrf.mxu1 }
 0x27f   :  { %2880 = vst.msk [vmem:[#allocation3 + $0x19] sm:$0xff] %vm69_vm0, %v2495_v27 }
 0x280   :  { %v16404_v29 = vpop.f32.mrf.mxu1 }
 0x281   :  { %2883 = vst.msk [vmem:[#allocation3 + $0x39] sm:$0xff] %vm69_vm0, %v16404_v29 }
 0x282   :  { %v2505_v60 = vpop.f32.mrf.mxu1 }
 0x283   :  { %2882 = vst.msk [vmem:[#allocation3 + $0x31] sm:$0xff] %vm69_vm0, %v2505_v60 }
 0x284   :  { %v16407_v32 = vpop.f32.mrf.mxu1  ;;  %v3015_v4 = vld [vmem:[#allocation3 + $0x21] sm:$0xff] }
 0x285   :  { %2885 = vst.msk [vmem:[#allocation3 + $0x51] sm:$0xff] %vm69_vm0, %v16407_v32 }
 0x286   :  { %v2515_v15 = vpop.f32.mrf.mxu1  ;;  %v3014_v41 = vld [vmem:[#allocation3 + $0x19] sm:$0xff] }
 0x287   :  { %v18913_v61 = vld [vmem:[#allocation3 + $0x18] sm:$0xff]  ;;  %v18915_v58 = vld [vmem:[#allocation3 + $0x20] sm:$0xff]  ;;  %2884 = vst.msk [vmem:[#allocation3 + $0x49] sm:$0xff] %vm69_vm0, %v2515_v15  ;;  %16522 = vmatprep.mubr.msk.f32.mxu1 %vm69_vm0, %v3014_v41 }
 0x288   :  { %16626 = vmatprep.mubr.msk.f32.mxu0 %vm69_vm0, %v18913_v61  ;;  %v16410_v25 = vpop.f32.mrf.mxu1  ;;  %16523 = vmatmul.mubr.msk.f32.gmra.mxu1 %vm69_vm0, %v3015_v4  ;;  %v3017_v47 = vld [vmem:[#allocation3 + $0x39] sm:$0xff] }
 0x289   :  { %16627 = vmatmul.mubr.msk.f32.gmra.mxu0 %vm69_vm0, %v18915_v58  ;;  %2887 = vst.msk [vmem:[#allocation3 + $0x69] sm:$0xff] %vm69_vm0, %v16410_v25 }
 0x28a   :  { %v2525_v33 = vpop.f32.mrf.mxu1  ;;  %v3016_v9 = vld [vmem:[#allocation3 + $0x31] sm:$0xff] }
 0x28b   :  { %v18925_v48 = vld [vmem:[#allocation3 + $0x30] sm:$0xff]  ;;  %v18927_v31 = vld [vmem:[#allocation3 + $0x38] sm:$0xff]  ;;  %2886 = vst.msk [vmem:[#allocation3 + $0x61] sm:$0xff] %vm69_vm0, %v2525_v33  ;;  %16525 = vmatprep.mubr.msk.f32.mxu1 %vm69_vm0, %v3016_v9 }
 0x28c   :  { %16629 = vmatprep.mubr.msk.f32.mxu0 %vm69_vm0, %v18925_v48  ;;  %v16413_v43 = vpop.f32.mrf.mxu1  ;;  %16526 = vmatmul.mubr.msk.f32.gmra.mxu1 %vm69_vm0, %v3017_v47  ;;  %v16465_v14 = vpop.f32.mrf.mxu0  ;;  %v3019_v35 = vld [vmem:[#allocation3 + $0x51] sm:$0xff] }
 0x28d   :  { %16630 = vmatmul.mubr.msk.f32.gmra.mxu0 %vm69_vm0, %v18927_v31  ;;  %2889 = vst.msk [vmem:[#allocation3 + $0x81] sm:$0xff] %vm69_vm0, %v16413_v43  ;;  %2913 = vst.msk [vmem:[#allocation3 + $0x1d1] sm:$0xff] %vm69_vm0, %v16465_v14 }
 0x28e   :  { %v2535_v20 = vpop.f32.mrf.mxu1  ;;  %v3018_v1 = vld [vmem:[#allocation3 + $0x49] sm:$0xff]  ;;  %v2720_v44 = vpop.f32.mrf.mxu0 }
 0x28f   :  { %v18938_v39 = vld [vmem:[#allocation3 + $0x48] sm:$0xff]  ;;  %v18940_v5 = vld [vmem:[#allocation3 + $0x50] sm:$0xff]  ;;  %2888 = vst.msk [vmem:[#allocation3 + $0x79] sm:$0xff] %vm69_vm0, %v2535_v20  ;;  %16528 = vmatprep.mubr.msk.f32.mxu1 %vm69_vm0, %v3018_v1  ;;  %2912 = vst.msk [vmem:[#allocation3 + $0x1c9] sm:$0xff] %vm69_vm0, %v2720_v44 }
 0x290   :  { %16632 = vmatprep.mubr.msk.f32.mxu0 %vm69_vm0, %v18938_v39  ;;  %v16416_v11 = vpop.f32.mrf.mxu1  ;;  %16529 = vmatmul.mubr.msk.f32.gmra.mxu1 %vm69_vm0, %v3019_v35  ;;  %v16468_v13 = vpop.f32.mrf.mxu0  ;;  %v3021_v6 = vld [vmem:[#allocation3 + $0x69] sm:$0xff] }
 0x291   :  { %16633 = vmatmul.mubr.msk.f32.gmra.mxu0 %vm69_vm0, %v18940_v5  ;;  %2891 = vst.msk [vmem:[#allocation3 + $0x99] sm:$0xff] %vm69_vm0, %v16416_v11  ;;  %2915 = vst.msk [vmem:[#allocation3 + $0x1e9] sm:$0xff] %vm69_vm0, %v16468_v13 }
 0x292   :  { %v2545_v23 = vpop.f32.mrf.mxu1  ;;  %v3020_v42 = vld [vmem:[#allocation3 + $0x61] sm:$0xff]  ;;  %v2730_v56 = vpop.f32.mrf.mxu0 }
 0x293   :  { %v18952_v37 = vld [vmem:[#allocation3 + $0x60] sm:$0xff]  ;;  %v18954_v28 = vld [vmem:[#allocation3 + $0x68] sm:$0xff]  ;;  %2890 = vst.msk [vmem:[#allocation3 + $0x91] sm:$0xff] %vm69_vm0, %v2545_v23  ;;  %16531 = vmatprep.mubr.msk.f32.mxu1 %vm69_vm0, %v3020_v42  ;;  %2914 = vst.msk [vmem:[#allocation3 + $0x1e1] sm:$0xff] %vm69_vm0, %v2730_v56 }
 0x294   :  { %16635 = vmatprep.mubr.msk.f32.mxu0 %vm69_vm0, %v18952_v37  ;;  %v16419_v22 = vpop.f32.mrf.mxu1  ;;  %16532 = vmatmul.mubr.msk.f32.gmra.mxu1 %vm69_vm0, %v3021_v6  ;;  %v16471_v24 = vpop.f32.mrf.mxu0  ;;  %v3023_v10 = vld [vmem:[#allocation3 + $0x81] sm:$0xff] }
 0x295   :  { %16636 = vmatmul.mubr.msk.f32.gmra.mxu0 %vm69_vm0, %v18954_v28  ;;  %2893 = vst.msk [vmem:[#allocation3 + $0xb1] sm:$0xff] %vm69_vm0, %v16419_v22  ;;  %2917 = vst.msk [vmem:[#allocation3 + $0x201] sm:$0xff] %vm69_vm0, %v16471_v24 }
 0x296   :  { %v2555_v18 = vpop.f32.mrf.mxu1  ;;  %v3022_v63 = vld [vmem:[#allocation3 + $0x79] sm:$0xff]  ;;  %v2740_v8 = vpop.f32.mrf.mxu0 }
 0x297   :  { %v18966_v36 = vld [vmem:[#allocation3 + $0x78] sm:$0xff]  ;;  %v18968_v26 = vld [vmem:[#allocation3 + $0x80] sm:$0xff]  ;;  %2892 = vst.msk [vmem:[#allocation3 + $0xa9] sm:$0xff] %vm69_vm0, %v2555_v18  ;;  %16534 = vmatprep.mubr.msk.f32.mxu1 %vm69_vm0, %v3022_v63  ;;  %2916 = vst.msk [vmem:[#allocation3 + $0x1f9] sm:$0xff] %vm69_vm0, %v2740_v8 }
 0x298   :  { %16638 = vmatprep.mubr.msk.f32.mxu0 %vm69_vm0, %v18966_v36  ;;  %v16422_v46 = vpop.f32.mrf.mxu1  ;;  %16535 = vmatmul.mubr.msk.f32.gmra.mxu1 %vm69_vm0, %v3023_v10  ;;  %v16474_v57 = vpop.f32.mrf.mxu0  ;;  %v3025_v7 = vld [vmem:[#allocation3 + $0x99] sm:$0xff] }
 0x299   :  { %16639 = vmatmul.mubr.msk.f32.gmra.mxu0 %vm69_vm0, %v18968_v26  ;;  %2895 = vst.msk [vmem:[#allocation3 + $0xc9] sm:$0xff] %vm69_vm0, %v16422_v46  ;;  %2919 = vst.msk [vmem:[#allocation3 + $0x219] sm:$0xff] %vm69_vm0, %v16474_v57 }
 0x29a   :  { %v2565_v19 = vpop.f32.mrf.mxu1  ;;  %v3024_v59 = vld [vmem:[#allocation3 + $0x91] sm:$0xff]  ;;  %v2750_v0 = vpop.f32.mrf.mxu0 }
 0x29b   :  { %v18980_v53 = vld [vmem:[#allocation3 + $0x90] sm:$0xff]  ;;  %v18982_v34 = vld [vmem:[#allocation3 + $0x98] sm:$0xff]  ;;  %2894 = vst.msk [vmem:[#allocation3 + $0xc1] sm:$0xff] %vm69_vm0, %v2565_v19  ;;  %16537 = vmatprep.mubr.msk.f32.mxu1 %vm69_vm0, %v3024_v59  ;;  %2918 = vst.msk [vmem:[#allocation3 + $0x211] sm:$0xff] %vm69_vm0, %v2750_v0 }
 0x29c   :  { %16641 = vmatprep.mubr.msk.f32.mxu0 %vm69_vm0, %v18980_v53  ;;  %v16425_v54 = vpop.f32.mrf.mxu1  ;;  %16538 = vmatmul.mubr.msk.f32.gmra.mxu1 %vm69_vm0, %v3025_v7  ;;  %v16477_v30 = vpop.f32.mrf.mxu0  ;;  %v3027_v12 = vld [vmem:[#allocation3 + $0xb1] sm:$0xff] }
 0x29d   :  { %16642 = vmatmul.mubr.msk.f32.gmra.mxu0 %vm69_vm0, %v18982_v34  ;;  %2897 = vst.msk [vmem:[#allocation3 + $0xe1] sm:$0xff] %vm69_vm0, %v16425_v54  ;;  %2921 = vst.msk [vmem:[#allocation3 + $0x231] sm:$0xff] %vm69_vm0, %v16477_v30 }
 0x29e   :  { %v2575_v3 = vpop.f32.mrf.mxu1  ;;  %v3026_v2 = vld [vmem:[#allocation3 + $0xa9] sm:$0xff]  ;;  %v2760_v51 = vpop.f32.mrf.mxu0 }
 0x29f   :  { %v18994_v49 = vld [vmem:[#allocation3 + $0xa8] sm:$0xff]  ;;  %v18996_v45 = vld [vmem:[#allocation3 + $0xb0] sm:$0xff]  ;;  %2896 = vst.msk [vmem:[#allocation3 + $0xd9] sm:$0xff] %vm69_vm0, %v2575_v3  ;;  %16540 = vmatprep.mubr.msk.f32.mxu1 %vm69_vm0, %v3026_v2  ;;  %2920 = vst.msk [vmem:[#allocation3 + $0x229] sm:$0xff] %vm69_vm0, %v2760_v51 }
 0x2a0   :  { %16644 = vmatprep.mubr.msk.f32.mxu0 %vm69_vm0, %v18994_v49  ;;  %v16428_v52 = vpop.f32.mrf.mxu1  ;;  %16541 = vmatmul.mubr.msk.f32.gmra.mxu1 %vm69_vm0, %v3027_v12  ;;  %v16480_v17 = vpop.f32.mrf.mxu0  ;;  %v3029_v38 = vld [vmem:[#allocation3 + $0xc9] sm:$0xff] }
 0x2a1   :  { %16645 = vmatmul.mubr.msk.f32.gmra.mxu0 %vm69_vm0, %v18996_v45  ;;  %2899 = vst.msk [vmem:[#allocation3 + $0xf9] sm:$0xff] %vm69_vm0, %v16428_v52  ;;  %2923 = vst.msk [vmem:[#allocation3 + $0x249] sm:$0xff] %vm69_vm0, %v16480_v17 }
 0x2a2   :  { %v2585_v62 = vpop.f32.mrf.mxu1  ;;  %v3028_v55 = vld [vmem:[#allocation3 + $0xc1] sm:$0xff]  ;;  %v2770_v29 = vpop.f32.mrf.mxu0 }
 0x2a3   :  { %v19008_v40 = vld [vmem:[#allocation3 + $0xc0] sm:$0xff]  ;;  %v19010_v27 = vld [vmem:[#allocation3 + $0xc8] sm:$0xff]  ;;  %2898 = vst.msk [vmem:[#allocation3 + $0xf1] sm:$0xff] %vm69_vm0, %v2585_v62  ;;  %16543 = vmatprep.mubr.msk.f32.mxu1 %vm69_vm0, %v3028_v55  ;;  %2922 = vst.msk [vmem:[#allocation3 + $0x241] sm:$0xff] %vm69_vm0, %v2770_v29 }
 0x2a4   :  { %16647 = vmatprep.mubr.msk.f32.mxu0 %vm69_vm0, %v19008_v40  ;;  %v16431_v50 = vpop.f32.mrf.mxu1  ;;  %16544 = vmatmul.mubr.msk.f32.gmra.mxu1 %vm69_vm0, %v3029_v38  ;;  %v16483_v21 = vpop.f32.mrf.mxu0  ;;  %v3031_v4 = vld [vmem:[#allocation3 + $0xe1] sm:$0xff] }
 0x2a5   :  { %16648 = vmatmul.mubr.msk.f32.gmra.mxu0 %vm69_vm0, %v19010_v27  ;;  %2901 = vst.msk [vmem:[#allocation3 + $0x111] sm:$0xff] %vm69_vm0, %v16431_v50  ;;  %2925 = vst.msk [vmem:[#allocation3 + $0x261] sm:$0xff] %vm69_vm0, %v16483_v21  ;;  %v3044_v21 = vld [vmem:[#allocation3 + $0x1b1] sm:$0xff] }
 0x2a6   :  { %v2595_v16 = vpop.f32.mrf.mxu1  ;;  %v3030_v60 = vld [vmem:[#allocation3 + $0xd9] sm:$0xff]  ;;  %v2780_v41 = vpop.f32.mrf.mxu0 }
 0x2a7   :  { %v19022_v32 = vld [vmem:[#allocation3 + $0xd8] sm:$0xff]  ;;  %v19024_v15 = vld [vmem:[#allocation3 + $0xe0] sm:$0xff]  ;;  %2900 = vst.msk [vmem:[#allocation3 + $0x109] sm:$0xff] %vm69_vm0, %v2595_v16  ;;  %16546 = vmatprep.mubr.msk.f32.mxu1 %vm69_vm0, %v3030_v60  ;;  %2924 = vst.msk [vmem:[#allocation3 + $0x259] sm:$0xff] %vm69_vm0, %v2780_v41 }
 0x2a8   :  { %16650 = vmatprep.mubr.msk.f32.mxu0 %vm69_vm0, %v19022_v32  ;;  %v16434_v25 = vpop.f32.mrf.mxu1  ;;  %16547 = vmatmul.mubr.msk.f32.gmra.mxu1 %vm69_vm0, %v3031_v4  ;;  %v16486_v33 = vpop.f32.mrf.mxu0  ;;  %v3033_v1 = vld [vmem:[#allocation3 + $0xf9] sm:$0xff]  ;;  %v2976_v16 = vld [vmem:[#allocation3 + $0x1b0] sm:$0xff] }
 0x2a9   :  { %16651 = vmatmul.mubr.msk.f32.gmra.mxu0 %vm69_vm0, %v19024_v15  ;;  %2903 = vst.msk [vmem:[#allocation3 + $0x129] sm:$0xff] %vm69_vm0, %v16434_v25  ;;  %2927 = vst.msk [vmem:[#allocation3 + $0x279] sm:$0xff] %vm69_vm0, %v16486_v33 }
 0x2aa   :  { %v2605_v9 = vpop.f32.mrf.mxu1  ;;  %v3032_v47 = vld [vmem:[#allocation3 + $0xf1] sm:$0xff]  ;;  %v2790_v20 = vpop.f32.mrf.mxu0 }
 0x2ab   :  { %v19036_v43 = vld [vmem:[#allocation3 + $0xf0] sm:$0xff]  ;;  %v19038_v14 = vld [vmem:[#allocation3 + $0xf8] sm:$0xff]  ;;  %2902 = vst.msk [vmem:[#allocation3 + $0x121] sm:$0xff] %vm69_vm0, %v2605_v9  ;;  %16549 = vmatprep.mubr.msk.f32.mxu1 %vm69_vm0, %v3032_v47  ;;  %2926 = vst.msk [vmem:[#allocation3 + $0x271] sm:$0xff] %vm69_vm0, %v2790_v20 }
 0x2ac   :  { %16653 = vmatprep.mubr.msk.f32.mxu0 %vm69_vm0, %v19036_v43  ;;  %v16437_v44 = vpop.f32.mrf.mxu1  ;;  %16550 = vmatmul.mubr.msk.f32.gmra.mxu1 %vm69_vm0, %v3033_v1  ;;  %v16489_v35 = vpop.f32.mrf.mxu0  ;;  %v3035_v6 = vld [vmem:[#allocation3 + $0x111] sm:$0xff]  ;;  %v3045_v47 = vld [vmem:[#allocation3 + $0x1b9] sm:$0xff] }
 0x2ad   :  { %16654 = vmatmul.mubr.msk.f32.gmra.mxu0 %vm69_vm0, %v19038_v14  ;;  %2905 = vst.msk [vmem:[#allocation3 + $0x141] sm:$0xff] %vm69_vm0, %v16437_v44  ;;  %2929 = vst.msk [vmem:[#allocation3 + $0x291] sm:$0xff] %vm69_vm0, %v16489_v35  ;;  %v2977_v20 = vld [vmem:[#allocation3 + $0x1b8] sm:$0xff]  ;;  %v3046_v44 = vld [vmem:[#allocation3 + $0x1c9] sm:$0xff] }
 0x2ae   :  { %v2615_v11 = vpop.f32.mrf.mxu1  ;;  %v3034_v13 = vld [vmem:[#allocation3 + $0x109] sm:$0xff]  ;;  %v2800_v56 = vpop.f32.mrf.mxu0  ;;  %v19119_v1 = vld [vmem:[#allocation4 + $0x98] sm:$0xff] }
 0x2af   :  { %v19050_v23 = vld [vmem:[#allocation3 + $0x108] sm:$0xff]  ;;  %v19052_v42 = vld [vmem:[#allocation3 + $0x110] sm:$0xff]  ;;  %2904 = vst.msk [vmem:[#allocation3 + $0x139] sm:$0xff] %vm69_vm0, %v2615_v11  ;;  %16552 = vmatprep.mubr.msk.f32.mxu1 %vm69_vm0, %v3034_v13  ;;  %2928 = vst.msk [vmem:[#allocation3 + $0x289] sm:$0xff] %vm69_vm0, %v2800_v56  ;;  %16927 = vmatprep.subr.mxu1 %v19119_v1 }
 0x2b0   :  { %16656 = vmatprep.mubr.msk.f32.mxu0 %vm69_vm0, %v19050_v23  ;;  %v16440_v22 = vpop.f32.mrf.mxu1  ;;  %16553 = vmatmul.mubr.msk.f32.gmra.mxu1 %vm69_vm0, %v3035_v6  ;;  %v16492_v24 = vpop.f32.mrf.mxu0  ;;  %v3037_v57 = vld [vmem:[#allocation3 + $0x129] sm:$0xff]  ;;  %v3048_v56 = vld [vmem:[#allocation3 + $0x1e1] sm:$0xff] }
 0x2b1   :  { %16657 = vmatmul.mubr.msk.f32.gmra.mxu0 %vm69_vm0, %v19052_v42  ;;  %2907 = vst.msk [vmem:[#allocation3 + $0x159] sm:$0xff] %vm69_vm0, %v16440_v22  ;;  %2931 = vst.msk [vmem:[#allocation3 + $0x2a9] sm:$0xff] %vm69_vm0, %v16492_v24  ;;  %v19121_v35 = vld [vmem:[#allocation3 + $0x1c8] sm:$0xff]  ;;  %v19131_v6 = vld [vmem:[#allocation3 + $0x1e0] sm:$0xff] }
 0x2b2   :  { %v2625_v18 = vpop.f32.mrf.mxu1  ;;  %v3036_v63 = vld [vmem:[#allocation3 + $0x121] sm:$0xff]  ;;  %v2810_v46 = vpop.f32.mrf.mxu0  ;;  %v3047_v24 = vld [vmem:[#allocation3 + $0x1d1] sm:$0xff] }
 0x2b3   :  { %v19064_v8 = vld [vmem:[#allocation3 + $0x120] sm:$0xff]  ;;  %v19066_v10 = vld [vmem:[#allocation3 + $0x128] sm:$0xff]  ;;  %2906 = vst.msk [vmem:[#allocation3 + $0x151] sm:$0xff] %vm69_vm0, %v2625_v18  ;;  %16555 = vmatprep.mubr.msk.f32.mxu1 %vm69_vm0, %v3036_v63  ;;  %2930 = vst.msk [vmem:[#allocation3 + $0x2a1] sm:$0xff] %vm69_vm0, %v2810_v46 }
 0x2b4   :  { %16659 = vmatprep.mubr.msk.f32.mxu0 %vm69_vm0, %v19064_v8  ;;  %v16443_v19 = vpop.f32.mrf.mxu1  ;;  %16556 = vmatmul.mubr.msk.f32.gmra.mxu1 %vm69_vm0, %v3037_v57  ;;  %v16495_v59 = vpop.f32.mrf.mxu0  ;;  %v3039_v2 = vld [vmem:[#allocation3 + $0x141] sm:$0xff]  ;;  %v19133_v18 = vld [vmem:[#allocation3 + $0x1d0] sm:$0xff]  ;;  %v3050_v46 = vld [vmem:[#allocation3 + $0x1f9] sm:$0xff] }
 0x2b5   :  { %16660 = vmatmul.mubr.msk.f32.gmra.mxu0 %vm69_vm0, %v19066_v10  ;;  %2909 = vst.msk [vmem:[#allocation3 + $0x171] sm:$0xff] %vm69_vm0, %v16443_v19  ;;  %2933 = vst.msk [vmem:[#allocation3 + $0x2c1] sm:$0xff] %vm69_vm0, %v16495_v59  ;;  %v19143_v57 = vld [vmem:[#allocation3 + $0x1f8] sm:$0xff]  ;;  %v3049_v59 = vld [vmem:[#allocation3 + $0x1e9] sm:$0xff] }
 0x2b6   :  { %v2635_v0 = vpop.f32.mrf.mxu1  ;;  %v3038_v7 = vld [vmem:[#allocation3 + $0x139] sm:$0xff]  ;;  %v2820_v3 = vpop.f32.mrf.mxu0 }
 0x2b7   :  { %v19078_v54 = vld [vmem:[#allocation3 + $0x138] sm:$0xff]  ;;  %v19080_v30 = vld [vmem:[#allocation3 + $0x140] sm:$0xff]  ;;  %2908 = vst.msk [vmem:[#allocation3 + $0x169] sm:$0xff] %vm69_vm0, %v2635_v0  ;;  %16558 = vmatprep.mubr.msk.f32.mxu1 %vm69_vm0, %v3038_v7  ;;  %2932 = vst.msk [vmem:[#allocation3 + $0x2b9] sm:$0xff] %vm69_vm0, %v2820_v3 }
 0x2b8   :  { %16662 = vmatprep.mubr.msk.f32.mxu0 %vm69_vm0, %v19078_v54  ;;  %16559 = vmatmul.mubr.msk.f32.gmra.mxu1 %vm69_vm0, %v3039_v2  ;;  %v16498_v51 = vpop.f32.mrf.mxu0  ;;  %v16446_v12 = vpop.f32.mrf.mxu1  ;;  %v3041_v38 = vld [vmem:[#allocation3 + $0x159] sm:$0xff]  ;;  %v19145_v0 = vld [vmem:[#allocation3 + $0x1e8] sm:$0xff] }
 0x2b9   :  { %16663 = vmatmul.mubr.msk.f32.gmra.mxu0 %vm69_vm0, %v19080_v30  ;;  %2935 = vst.msk [vmem:[#allocation3 + $0x2d9] sm:$0xff] %vm69_vm0, %v16498_v51  ;;  %2911 = vst.msk [vmem:[#allocation3 + $0x189] sm:$0xff] %vm69_vm0, %v16446_v12  ;;  %v3052_v51 = vld [vmem:[#allocation3 + $0x211] sm:$0xff] }
 0x2ba   :  { %v3040_v52 = vld [vmem:[#allocation3 + $0x151] sm:$0xff]  ;;  %v2830_v55 = vpop.f32.mrf.mxu0  ;;  %v2645_v29 = vpop.f32.mrf.mxu1 }
 0x2bb   :  { %v19092_v17 = vld [vmem:[#allocation3 + $0x150] sm:$0xff]  ;;  %v19094_v62 = vld [vmem:[#allocation3 + $0x158] sm:$0xff]  ;;  %16561 = vmatprep.mubr.msk.f32.mxu1 %vm69_vm0, %v3040_v52  ;;  %2934 = vst.msk [vmem:[#allocation3 + $0x2d1] sm:$0xff] %vm69_vm0, %v2830_v55  ;;  %2910 = vst.msk [vmem:[#allocation3 + $0x181] sm:$0xff] %vm69_vm0, %v2645_v29 }
 0x2bc   :  { %16665 = vmatprep.mubr.msk.f32.mxu0 %vm69_vm0, %v19092_v17  ;;  %16562 = vmatmul.mubr.msk.f32.gmra.mxu1 %vm69_vm0, %v3041_v38  ;;  %v16501_v50 = vpop.f32.mrf.mxu0  ;;  %v3043_v33 = vld [vmem:[#allocation3 + $0x171] sm:$0xff]  ;;  %v16521_v7 = vpop.f32.mrf.mxu1  ;;  %v3051_v52 = vld [vmem:[#allocation3 + $0x201] sm:$0xff]  ;;  %v3054_v29 = vld [vmem:[#allocation3 + $0x229] sm:$0xff] }
 0x2bd   :  { %16666 = vmatmul.mubr.msk.f32.gmra.mxu0 %vm69_vm0, %v19094_v62  ;;  %2937 = vst.msk [vmem:[#allocation3 + $0x2f1] sm:$0xff] %vm69_vm0, %v16501_v50  ;;  %v19156_v12 = vld [vmem:[#allocation3 + $0x210] sm:$0xff]  ;;  %v19158_v55 = vld [vmem:[#allocation3 + $0x200] sm:$0xff]  ;;  %v19166_v38 = vld [vmem:[#allocation3 + $0x228] sm:$0xff] }
 0x2be   :  { %v3042_v60 = vld [vmem:[#allocation3 + $0x169] sm:$0xff]  ;;  %v2840_v25 = vpop.f32.mrf.mxu0  ;;  %v3053_v50 = vld [vmem:[#allocation3 + $0x219] sm:$0xff] }
 0x2bf   :  { %v19105_v41 = vld [vmem:[#allocation3 + $0x168] sm:$0xff]  ;;  %v19107_v4 = vld [vmem:[#allocation3 + $0x170] sm:$0xff]  ;;  %16564 = vmatprep.mubr.msk.f32.mxu1 %vm69_vm0, %v3042_v60  ;;  %2936 = vst.msk [vmem:[#allocation3 + $0x2e9] sm:$0xff] %vm69_vm0, %v2840_v25  ;;  %v19176_v60 = vld [vmem:[#allocation3 + $0x240] sm:$0xff] }
 0x2c0   :  { %16668 = vmatprep.mubr.msk.f32.mxu0 %vm69_vm0, %v19105_v41  ;;  %16565 = vmatmul.mubr.msk.f32.gmra.mxu1 %vm69_vm0, %v3043_v33  ;;  %v16504_v9 = vpop.f32.mrf.mxu0  ;;  %v3055_v25 = vld [vmem:[#allocation3 + $0x231] sm:$0xff] }
 0x2c1   :  { %16669 = vmatmul.mubr.msk.f32.gmra.mxu0 %vm69_vm0, %v19107_v4  ;;  %16567 = vmatprep.mubr.msk.f32.mxu1 %vm69_vm0, %v3044_v21  ;;  %2939 = vst.msk [vmem:[#allocation3 + $0x309] sm:$0xff] %vm69_vm0, %v16504_v9  ;;  %v19168_v21 = vld [vmem:[#allocation3 + $0x218] sm:$0xff]  ;;  %v19178_v33 = vld [vmem:[#allocation3 + $0x230] sm:$0xff] }
 0x2c2   :  { %16671 = vmatprep.mubr.msk.f32.mxu0 %vm69_vm0, %v2976_v16  ;;  %v2850_v11 = vpop.f32.mrf.mxu0  ;;  %v3056_v16 = vld [vmem:[#allocation3 + $0x241] sm:$0xff]  ;;  %v3058_v9 = vld [vmem:[#allocation3 + $0x259] sm:$0xff] }
 0x2c3   :  { %2938 = vst.msk [vmem:[#allocation3 + $0x301] sm:$0xff] %vm69_vm0, %v2850_v11  ;;  %v3060_v11 = vld [vmem:[#allocation3 + $0x271] sm:$0xff] }
 0x2c4   :  { %16568 = vmatmul.mubr.msk.f32.gmra.mxu1 %vm69_vm0, %v3045_v47  ;;  %v16507_v13 = vpop.f32.mrf.mxu0  ;;  %v19186_v47 = vld [vmem:[#allocation3 + $0x258] sm:$0xff] }
 0x2c5   :  { %16672 = vmatmul.mubr.msk.f32.gmra.mxu0 %vm69_vm0, %v2977_v20  ;;  %16570 = vmatprep.mubr.msk.f32.mxu1 %vm69_vm0, %v3046_v44  ;;  %2941 = vst.msk [vmem:[#allocation3 + $0x321] sm:$0xff] %vm69_vm0, %v16507_v13  ;;  %v3057_v20 = vld [vmem:[#allocation3 + $0x249] sm:$0xff] }
 0x2c6   :  { %16674 = vmatprep.mubr.msk.f32.mxu0 %vm69_vm0, %v19121_v35  ;;  %v2860_v22 = vpop.f32.mrf.mxu0  ;;  %v19188_v44 = vld [vmem:[#allocation3 + $0x248] sm:$0xff]  ;;  %v19196_v13 = vld [vmem:[#allocation3 + $0x270] sm:$0xff] }
 0x2c7   :  { %2940 = vst.msk [vmem:[#allocation3 + $0x319] sm:$0xff] %vm69_vm0, %v2860_v22  ;;  %v19198_v22 = vld [vmem:[#allocation3 + $0x260] sm:$0xff] }
 0x2c8   :  { %16571 = vmatmul.mubr.msk.f32.gmra.mxu1 %vm69_vm0, %v3047_v24  ;;  %v16510_v63 = vpop.f32.mrf.mxu0  ;;  %v3062_v24 = vld [vmem:[#allocation3 + $0x289] sm:$0xff] }
 0x2c9   :  { %16675 = vmatmul.mubr.msk.f32.gmra.mxu0 %vm69_vm0, %v19133_v18  ;;  %16573 = vmatprep.mubr.msk.f32.mxu1 %vm69_vm0, %v3048_v56  ;;  %2943 = vst.msk [vmem:[#allocation3 + $0x339] sm:$0xff] %vm69_vm0, %v16510_v63  ;;  %v3059_v56 = vld [vmem:[#allocation3 + $0x261] sm:$0xff] }
 0x2ca   :  { %16677 = vmatprep.mubr.msk.f32.mxu0 %vm69_vm0, %v19131_v6  ;;  %v2870_v19 = vpop.f32.mrf.mxu0  ;;  %v19206_v63 = vld [vmem:[#allocation3 + $0x288] sm:$0xff] }
 0x2cb   :  { %2942 = vst.msk [vmem:[#allocation3 + $0x331] sm:$0xff] %vm69_vm0, %v2870_v19  ;;  %v19208_v19 = vld [vmem:[#allocation3 + $0x278] sm:$0xff] }
 0x2cc   :  { %16574 = vmatmul.mubr.msk.f32.gmra.mxu1 %vm69_vm0, %v3049_v59  ;;  %v16625_v3 = vpop.f32.mrf.mxu0  ;;  %v3064_v59 = vld [vmem:[#allocation3 + $0x2a1] sm:$0xff] }
 0x2cd   :  { %16678 = vmatmul.mubr.msk.f32.gmra.mxu0 %vm69_vm0, %v19145_v0  ;;  %16576 = vmatprep.mubr.msk.f32.mxu1 %vm69_vm0, %v3050_v46  ;;  %v19154_v2 = vadd.f32 %v16625_v3, %v16521_v7  ;;  %v3061_v46 = vld [vmem:[#allocation3 + $0x279] sm:$0xff]  ;;  %v3063_v3 = vld [vmem:[#allocation3 + $0x291] sm:$0xff] }
 0x2ce   :  { %16680 = vmatprep.mubr.msk.f32.mxu0 %vm69_vm0, %v19143_v57  ;;  %v19216_v7 = vld [vmem:[#allocation3 + $0x2a0] sm:$0xff] }
 0x2cf   :  { %22856 = vst [vmem:[#allocation29_spill] sm:$0xff] %v19154_v2  ;;  %v19268_v2 = vld [vmem:[#allocation3 + $0x308] sm:$0xff] }
 0x2d0   :  { %16577 = vmatmul.mubr.msk.f32.gmra.mxu1 %vm69_vm0, %v3051_v52  ;;  %v3066_v52 = vld [vmem:[#allocation3 + $0x2b9] sm:$0xff]  ;;  %22860 = vst [vmem:[#allocation23_spill] sm:$0xff] %v19268_v2 }
 0x2d1   :  { %16681 = vmatmul.mubr.msk.f32.gmra.mxu0 %vm69_vm0, %v19158_v55  ;;  %16579 = vmatprep.mubr.msk.f32.mxu1 %vm69_vm0, %v3052_v51  ;;  %v19218_v51 = vld [vmem:[#allocation3 + $0x290] sm:$0xff] }
 0x2d2   :  { %16683 = vmatprep.mubr.msk.f32.mxu0 %vm69_vm0, %v19156_v12 }
 0x2d4   :  { %16580 = vmatmul.mubr.msk.f32.gmra.mxu1 %vm69_vm0, %v3053_v50  ;;  %v3065_v50 = vld [vmem:[#allocation3 + $0x2a9] sm:$0xff] }
 0x2d5   :  { %16684 = vmatmul.mubr.msk.f32.gmra.mxu0 %vm69_vm0, %v19168_v21  ;;  %16582 = vmatprep.mubr.msk.f32.mxu1 %vm69_vm0, %v3054_v29  ;;  %v19226_v29 = vld [vmem:[#allocation3 + $0x2b8] sm:$0xff] }
 0x2d6   :  { %16686 = vmatprep.mubr.msk.f32.mxu0 %vm69_vm0, %v19166_v38 }
 0x2d8   :  { %16583 = vmatmul.mubr.msk.f32.gmra.mxu1 %vm69_vm0, %v3055_v25  ;;  %v3068_v25 = vld [vmem:[#allocation3 + $0x2d1] sm:$0xff] }
 0x2d9   :  { %16687 = vmatmul.mubr.msk.f32.gmra.mxu0 %vm69_vm0, %v19178_v33  ;;  %16585 = vmatprep.mubr.msk.f32.mxu1 %vm69_vm0, %v3056_v16  ;;  %v19228_v16 = vld [vmem:[#allocation3 + $0x2a8] sm:$0xff] }
 0x2da   :  { %16689 = vmatprep.mubr.msk.f32.mxu0 %vm69_vm0, %v19176_v60 }
 0x2dc   :  { %16586 = vmatmul.mubr.msk.f32.gmra.mxu1 %vm69_vm0, %v3057_v20  ;;  %v3067_v20 = vld [vmem:[#allocation3 + $0x2c1] sm:$0xff] }
 0x2dd   :  { %16690 = vmatmul.mubr.msk.f32.gmra.mxu0 %vm69_vm0, %v19188_v44  ;;  %16588 = vmatprep.mubr.msk.f32.mxu1 %vm69_vm0, %v3058_v9  ;;  %v19236_v9 = vld [vmem:[#allocation3 + $0x2d0] sm:$0xff] }
 0x2de   :  { %16692 = vmatprep.mubr.msk.f32.mxu0 %vm69_vm0, %v19186_v47 }
 0x2e0   :  { %16589 = vmatmul.mubr.msk.f32.gmra.mxu1 %vm69_vm0, %v3059_v56  ;;  %v3070_v56 = vld [vmem:[#allocation3 + $0x2e9] sm:$0xff] }
 0x2e1   :  { %16693 = vmatmul.mubr.msk.f32.gmra.mxu0 %vm69_vm0, %v19198_v22  ;;  %16591 = vmatprep.mubr.msk.f32.mxu1 %vm69_vm0, %v3060_v11  ;;  %v19238_v11 = vld [vmem:[#allocation3 + $0x2c0] sm:$0xff] }
 0x2e2   :  { %16695 = vmatprep.mubr.msk.f32.mxu0 %vm69_vm0, %v19196_v13 }
 0x2e4   :  { %16592 = vmatmul.mubr.msk.f32.gmra.mxu1 %vm69_vm0, %v3061_v46  ;;  %v3069_v46 = vld [vmem:[#allocation3 + $0x2d9] sm:$0xff] }
 0x2e5   :  { %16696 = vmatmul.mubr.msk.f32.gmra.mxu0 %vm69_vm0, %v19208_v19  ;;  %16594 = vmatprep.mubr.msk.f32.mxu1 %vm69_vm0, %v3062_v24  ;;  %v19246_v24 = vld [vmem:[#allocation3 + $0x2e8] sm:$0xff] }
 0x2e6   :  { %16698 = vmatprep.mubr.msk.f32.mxu0 %vm69_vm0, %v19206_v63 }
 0x2e8   :  { %16595 = vmatmul.mubr.msk.f32.gmra.mxu1 %vm69_vm0, %v3063_v3  ;;  %v3072_v3 = vld [vmem:[#allocation3 + $0x301] sm:$0xff] }
 0x2e9   :  { %16699 = vmatmul.mubr.msk.f32.gmra.mxu0 %vm69_vm0, %v19218_v51  ;;  %16597 = vmatprep.mubr.msk.f32.mxu1 %vm69_vm0, %v3064_v59  ;;  %v19248_v59 = vld [vmem:[#allocation3 + $0x2d8] sm:$0xff] }
 0x2ea   :  { %16701 = vmatprep.mubr.msk.f32.mxu0 %vm69_vm0, %v19216_v7 }
 0x2ec   :  { %16598 = vmatmul.mubr.msk.f32.gmra.mxu1 %vm69_vm0, %v3065_v50  ;;  %v3071_v50 = vld [vmem:[#allocation3 + $0x2f1] sm:$0xff] }
 0x2ed   :  { %16702 = vmatmul.mubr.msk.f32.gmra.mxu0 %vm69_vm0, %v19228_v16  ;;  %16600 = vmatprep.mubr.msk.f32.mxu1 %vm69_vm0, %v3066_v52  ;;  %v19256_v52 = vld [vmem:[#allocation3 + $0x300] sm:$0xff] }
 0x2ee   :  { %16704 = vmatprep.mubr.msk.f32.mxu0 %vm69_vm0, %v19226_v29  ;;  %22857 = vst [vmem:[#allocation43_spill] sm:$0xff] %v19256_v52 }
 0x2f0   :  { %16601 = vmatmul.mubr.msk.f32.gmra.mxu1 %vm69_vm0, %v3067_v20  ;;  %v3074_v20 = vld [vmem:[#allocation3 + $0x319] sm:$0xff] }
 0x2f1   :  { %16705 = vmatmul.mubr.msk.f32.gmra.mxu0 %vm69_vm0, %v19238_v11  ;;  %16603 = vmatprep.mubr.msk.f32.mxu1 %vm69_vm0, %v3068_v25  ;;  %v19258_v25 = vld [vmem:[#allocation3 + $0x2f0] sm:$0xff] }
 0x2f2   :  { %16707 = vmatprep.mubr.msk.f32.mxu0 %vm69_vm0, %v19236_v9  ;;  %22858 = vst [vmem:[#allocation13_spill] sm:$0xff] %v19258_v25 }
 0x2f4   :  { %16604 = vmatmul.mubr.msk.f32.gmra.mxu1 %vm69_vm0, %v3069_v46  ;;  %v3073_v46 = vld [vmem:[#allocation3 + $0x309] sm:$0xff] }
 0x2f5   :  { %16708 = vmatmul.mubr.msk.f32.gmra.mxu0 %vm69_vm0, %v19248_v59  ;;  %16606 = vmatprep.mubr.msk.f32.mxu1 %vm69_vm0, %v3070_v56  ;;  %v19266_v56 = vld [vmem:[#allocation3 + $0x318] sm:$0xff] }
 0x2f6   :  { %16710 = vmatprep.mubr.msk.f32.mxu0 %vm69_vm0, %v19246_v24  ;;  %22859 = vst [vmem:[#allocation16_spill] sm:$0xff] %v19266_v56 }
 0x2f8   :  { %16607 = vmatmul.mubr.msk.f32.gmra.mxu1 %vm69_vm0, %v3071_v50  ;;  %v4235_v50 = vld [vmem:[#allocation3 + $0x2] sm:$0xff] }
 0x2f9   :  { %16711 = vmatmul.mubr.msk.f32.gmra.mxu0 %vm69_vm0, %v19258_v25  ;;  %16609 = vmatprep.mubr.msk.f32.mxu1 %vm69_vm0, %v3072_v3  ;;  %v6433_v3 = vld [vmem:[#allocation4 + $0xb8] sm:$0xff]  ;;  %v19276_v25 = vld [vmem:[#allocation3 + $0x320] sm:$0xff] }
 0x2fa   :  { %16713 = vmatprep.mubr.msk.f32.mxu0 %vm69_vm0, %v19256_v52  ;;  %17031 = vmatprep.subr.mxu0 %v6433_v3  ;;  %v3075_v52 = vld [vmem:[#allocation3 + $0x321] sm:$0xff] }
 0x2fc   :  { %16610 = vmatmul.mubr.msk.f32.gmra.mxu1 %vm69_vm0, %v3073_v46  ;;  %v19287_v46 = vld [vmem:[#allocation3 + $0x1a] sm:$0xff] }
 0x2fd   :  { %16714 = vmatmul.mubr.msk.f32.gmra.mxu0 %vm69_vm0, %v19268_v2  ;;  %16612 = vmatprep.mubr.msk.f32.mxu1 %vm69_vm0, %v3074_v20  ;;  %v4236_v20 = vld [vmem:[#allocation3 + $0xa] sm:$0xff] }
 0x2fe   :  { %16716 = vmatprep.mubr.msk.f32.mxu0 %vm69_vm0, %v19266_v56  ;;  %v5722_v56 = vld [vmem:[#allocation4 + $0x90] sm:$0xff] }
 0x2ff   :  { %v6432_v2 = vld [vmem:[#allocation4 + $0xb0] sm:$0xff] }
 0x300   :  { %16613 = vmatmul.mubr.msk.f32.gmra.mxu1 %vm69_vm0, %v3075_v52  ;;  %v5721_v52 = vld [vmem:[#allocation4 + $0x88] sm:$0xff] }
 0x301   :  { %16717 = vmatmul.mubr.msk.f32.gmra.mxu0 %vm69_vm0, %v19276_v25  ;;  %16727 = vmatprep.mubr.msk.f32.mxu1 %vm69_vm0, %v4235_v50  ;;  %v6431_v50 = vld [vmem:[#allocation4 + $0xa8] sm:$0xff] }
 0x302   :  { %16831 = vmatprep.mubr.msk.f32.mxu0 %vm69_vm0, %v18913_v61  ;;  %v19294_v61 = vld [vmem:[#allocation3 + $0x22] sm:$0xff] }
 0x304   :  { %16728 = vmatmul.mubr.msk.f32.vlgmr.msra.gmra.mxu1 %vm69_vm0, %v4236_v20  ;;  %v4267_v20 = vld [vmem:[#allocation3 + $0x1b2] sm:$0xff] }
 0x305   :  { %16832 = vmatmul.mubr.msk.f32.vlgmr.msra.gmra.mxu0 %vm69_vm0, %v18915_v58  ;;  %16730 = vmatprep.mubr.msk.f32.mxu1 %vm69_vm0, %v19287_v46  ;;  %v19300_v58 = vld [vmem:[#allocation3 + $0x32] sm:$0xff] }
 0x306   :  { %16834 = vmatprep.mubr.msk.f32.mxu0 %vm69_vm0, %v18925_v48  ;;  %16928 = vmatpush3.msra.mxu1 %v19119_v1  ;;  %v19306_v48 = vld [vmem:[#allocation3 + $0x3a] sm:$0xff] }
 0x307   :  { %17032 = vmatpush3.msra.mxu0 %v6433_v3  ;;  %16929 = vmatprep.subr.mxu1 %v5722_v56  ;;  %v5720_v1 = vld [vmem:[#allocation4 + $0x80] sm:$0xff] }
 0x308   :  { %17033 = vmatprep.subr.mxu0 %v6432_v2  ;;  %16731 = vmatmul.mubr.msk.f32.gmra.mxu1 %vm69_vm0, %v19294_v61  ;;  %v6430_v3 = vld [vmem:[#allocation4 + $0xa0] sm:$0xff] }
 0x309   :  { %16835 = vmatmul.mubr.msk.f32.gmra.mxu0 %vm69_vm0, %v18927_v31  ;;  %16733 = vmatprep.mubr.msk.f32.mxu1 %vm69_vm0, %v19300_v58  ;;  %v19312_v31 = vld [vmem:[#allocation3 + $0x4a] sm:$0xff] }
 0x30a   :  { %16837 = vmatprep.mubr.msk.f32.mxu0 %vm69_vm0, %v18938_v39  ;;  %16930 = vmatpush3.msra.mxu1 %v5722_v56  ;;  %v19318_v39 = vld [vmem:[#allocation3 + $0x52] sm:$0xff]  ;;  %v19450_v56 = vld [vmem:[#allocation3 + $0x15a] sm:$0xff] }
 0x30b   :  { %17034 = vmatpush3.msra.mxu0 %v6432_v2  ;;  %16931 = vmatprep.subr.mxu1 %v5721_v52  ;;  %v19336_v2 = vld [vmem:[#allocation3 + $0x7a] sm:$0xff] }
 0x30c   :  { %17035 = vmatprep.subr.mxu0 %v6431_v50  ;;  %16734 = vmatmul.mubr.msk.f32.gmra.mxu1 %vm69_vm0, %v19306_v48 }
 0x30d   :  { %16838 = vmatmul.mubr.msk.f32.gmra.mxu0 %vm69_vm0, %v18940_v5  ;;  %16736 = vmatprep.mubr.msk.f32.mxu1 %vm69_vm0, %v19312_v31  ;;  %v19324_v5 = vld [vmem:[#allocation3 + $0x62] sm:$0xff] }
 0x30e   :  { %16840 = vmatprep.mubr.msk.f32.mxu0 %vm69_vm0, %v18952_v37  ;;  %16932 = vmatpush3.msra.mxu1 %v5721_v52  ;;  %v19330_v37 = vld [vmem:[#allocation3 + $0x6a] sm:$0xff]  ;;  %v19461_v52 = vld [vmem:[#allocation3 + $0x172] sm:$0xff] }
 0x30f   :  { %17036 = vmatpush3.msra.mxu0 %v6431_v50  ;;  %16933 = vmatprep.subr.mxu1 %v5720_v1  ;;  %v19474_v50 = vld [vmem:[#allocation3 + $0x1ca] sm:$0xff] }
 0x310   :  { %17037 = vmatprep.subr.mxu0 %v6430_v3  ;;  %16737 = vmatmul.mubr.msk.f32.gmra.mxu1 %vm69_vm0, %v19318_v39  ;;  %22861 = vst [vmem:[#allocation28_spill] sm:$0xff] %v19474_v50 }
 0x311   :  { %16841 = vmatmul.mubr.msk.f32.gmra.mxu0 %vm69_vm0, %v18954_v28  ;;  %16739 = vmatprep.mubr.msk.f32.mxu1 %vm69_vm0, %v19324_v5  ;;  %v19342_v28 = vld [vmem:[#allocation3 + $0x82] sm:$0xff] }
 0x312   :  { %16843 = vmatprep.mubr.msk.f32.mxu0 %vm69_vm0, %v18966_v36  ;;  %16934 = vmatpush3.msra.mxu1 %v5720_v1  ;;  %v19348_v36 = vld [vmem:[#allocation3 + $0x92] sm:$0xff]  ;;  %v19480_v1 = vpop.f32.mrf.mxu1 }
 0x313   :  { %17038 = vmatpush3.msra.mxu0 %v6430_v3  ;;  %22862 = vst [vmem:[#allocation39_spill] sm:$0xff] %v19480_v1  ;;  %v19485_v3 = vld [vmem:[#allocation3 + $0x1d2] sm:$0xff]  ;;  %v19501_v1 = vld [vmem:[#allocation3 + $0x1ea] sm:$0xff] }
 0x314   :  { %16740 = vmatmul.mubr.msk.f32.gmra.mxu1 %vm69_vm0, %v19330_v37  ;;  %22864 = vst [vmem:[#allocation48_spill] sm:$0xff] %v19485_v3 }
 0x315   :  { %16844 = vmatmul.mubr.msk.f32.gmra.mxu0 %vm69_vm0, %v18968_v26  ;;  %16742 = vmatprep.mubr.msk.f32.mxu1 %vm69_vm0, %v19336_v2  ;;  %v19354_v26 = vld [vmem:[#allocation3 + $0x9a] sm:$0xff] }
 0x316   :  { %16846 = vmatprep.mubr.msk.f32.mxu0 %vm69_vm0, %v18980_v53  ;;  %v19360_v53 = vld [vmem:[#allocation3 + $0xaa] sm:$0xff] }
 0x318   :  { %16743 = vmatmul.mubr.msk.f32.gmra.mxu1 %vm69_vm0, %v19342_v28 }
 0x319   :  { %16847 = vmatmul.mubr.msk.f32.gmra.mxu0 %vm69_vm0, %v18982_v34  ;;  %16745 = vmatprep.mubr.msk.f32.mxu1 %vm69_vm0, %v19348_v36  ;;  %v19366_v34 = vld [vmem:[#allocation3 + $0xb2] sm:$0xff] }
 0x31a   :  { %16849 = vmatprep.mubr.msk.f32.mxu0 %vm69_vm0, %v18994_v49  ;;  %v19372_v49 = vld [vmem:[#allocation3 + $0xc2] sm:$0xff] }
 0x31c   :  { %16746 = vmatmul.mubr.msk.f32.gmra.mxu1 %vm69_vm0, %v19354_v26 }
 0x31d   :  { %16850 = vmatmul.mubr.msk.f32.gmra.mxu0 %vm69_vm0, %v18996_v45  ;;  %16748 = vmatprep.mubr.msk.f32.mxu1 %vm69_vm0, %v19360_v53  ;;  %v19378_v45 = vld [vmem:[#allocation3 + $0xca] sm:$0xff] }
 0x31e   :  { %16852 = vmatprep.mubr.msk.f32.mxu0 %vm69_vm0, %v19008_v40  ;;  %v19384_v40 = vld [vmem:[#allocation3 + $0xda] sm:$0xff] }
 0x320   :  { %16749 = vmatmul.mubr.msk.f32.gmra.mxu1 %vm69_vm0, %v19366_v34 }
 0x321   :  { %16853 = vmatmul.mubr.msk.f32.gmra.mxu0 %vm69_vm0, %v19010_v27  ;;  %16751 = vmatprep.mubr.msk.f32.mxu1 %vm69_vm0, %v19372_v49  ;;  %v19390_v27 = vld [vmem:[#allocation3 + $0xe2] sm:$0xff] }
 0x322   :  { %16855 = vmatprep.mubr.msk.f32.mxu0 %vm69_vm0, %v19022_v32  ;;  %v19396_v32 = vld [vmem:[#allocation3 + $0xf2] sm:$0xff] }
 0x324   :  { %16752 = vmatmul.mubr.msk.f32.gmra.mxu1 %vm69_vm0, %v19378_v45 }
 0x325   :  { %16856 = vmatmul.mubr.msk.f32.gmra.mxu0 %vm69_vm0, %v19024_v15  ;;  %16754 = vmatprep.mubr.msk.f32.mxu1 %vm69_vm0, %v19384_v40  ;;  %v19402_v15 = vld [vmem:[#allocation3 + $0xfa] sm:$0xff] }
 0x326   :  { %16858 = vmatprep.mubr.msk.f32.mxu0 %vm69_vm0, %v19036_v43  ;;  %v19408_v43 = vld [vmem:[#allocation3 + $0x10a] sm:$0xff] }
 0x328   :  { %16755 = vmatmul.mubr.msk.f32.gmra.mxu1 %vm69_vm0, %v19390_v27 }
 0x329   :  { %16859 = vmatmul.mubr.msk.f32.gmra.mxu0 %vm69_vm0, %v19038_v14  ;;  %16757 = vmatprep.mubr.msk.f32.mxu1 %vm69_vm0, %v19396_v32  ;;  %v19414_v14 = vld [vmem:[#allocation3 + $0x112] sm:$0xff] }
 0x32a   :  { %16861 = vmatprep.mubr.msk.f32.mxu0 %vm69_vm0, %v19050_v23  ;;  %v19420_v23 = vld [vmem:[#allocation3 + $0x122] sm:$0xff] }
 0x32c   :  { %16758 = vmatmul.mubr.msk.f32.gmra.mxu1 %vm69_vm0, %v19402_v15 }
 0x32d   :  { %16862 = vmatmul.mubr.msk.f32.gmra.mxu0 %vm69_vm0, %v19052_v42  ;;  %16760 = vmatprep.mubr.msk.f32.mxu1 %vm69_vm0, %v19408_v43  ;;  %v19426_v42 = vld [vmem:[#allocation3 + $0x12a] sm:$0xff] }
 0x32e   :  { %16864 = vmatprep.mubr.msk.f32.mxu0 %vm69_vm0, %v19064_v8  ;;  %v19432_v8 = vld [vmem:[#allocation3 + $0x13a] sm:$0xff] }
 0x330   :  { %16761 = vmatmul.mubr.msk.f32.gmra.mxu1 %vm69_vm0, %v19414_v14 }
 0x331   :  { %16865 = vmatmul.mubr.msk.f32.gmra.mxu0 %vm69_vm0, %v19066_v10  ;;  %16763 = vmatprep.mubr.msk.f32.mxu1 %vm69_vm0, %v19420_v23  ;;  %v19438_v10 = vld [vmem:[#allocation3 + $0x142] sm:$0xff] }
 0x332   :  { %16867 = vmatprep.mubr.msk.f32.mxu0 %vm69_vm0, %v19078_v54  ;;  %v19444_v54 = vld [vmem:[#allocation3 + $0x152] sm:$0xff] }
 0x334   :  { %16764 = vmatmul.mubr.msk.f32.gmra.mxu1 %vm69_vm0, %v19426_v42 }
 0x335   :  { %16868 = vmatmul.mubr.msk.f32.gmra.mxu0 %vm69_vm0, %v19080_v30  ;;  %16766 = vmatprep.mubr.msk.f32.mxu1 %vm69_vm0, %v19432_v8  ;;  %v4975_v30 = vld [vmem:[#allocation3 + $0x180] sm:$0xff] }
 0x336   :  { %16870 = vmatprep.mubr.msk.f32.mxu0 %vm69_vm0, %v19092_v17  ;;  %v19456_v17 = vld [vmem:[#allocation3 + $0x16a] sm:$0xff] }
 0x338   :  { %16767 = vmatmul.mubr.msk.f32.gmra.mxu1 %vm69_vm0, %v19438_v10 }
 0x339   :  { %16871 = vmatmul.mubr.msk.f32.gmra.mxu0 %vm69_vm0, %v19094_v62  ;;  %16769 = vmatprep.mubr.msk.f32.mxu1 %vm69_vm0, %v19444_v54  ;;  %v4976_v62 = vld [vmem:[#allocation3 + $0x188] sm:$0xff] }
 0x33a   :  { %16873 = vmatprep.mubr.msk.f32.mxu0 %vm69_vm0, %v19105_v41  ;;  %v4268_v41 = vld [vmem:[#allocation3 + $0x1ba] sm:$0xff] }
 0x33c   :  { %16770 = vmatmul.mubr.msk.f32.gmra.mxu1 %vm69_vm0, %v19450_v56 }
 0x33d   :  { %16874 = vmatmul.mubr.msk.f32.gmra.mxu0 %vm69_vm0, %v19107_v4  ;;  %16772 = vmatprep.mubr.msk.f32.mxu1 %vm69_vm0, %v19456_v17  ;;  %v19469_v4 = vld [vmem:[#allocation4 + $0xd8] sm:$0xff] }
 0x33e   :  { %16876 = vmatprep.mubr.msk.f32.mxu0 %vm69_vm0, %v4975_v30  ;;  %17135 = vmatprep.subr.mxu1 %v19469_v4 }
 0x340   :  { %16773 = vmatmul.mubr.msk.f32.gmra.mxu1 %vm69_vm0, %v19461_v52 }
 0x341   :  { %16877 = vmatmul.mubr.msk.f32.gmra.mxu0 %vm69_vm0, %v4976_v62  ;;  %16775 = vmatprep.mubr.msk.f32.mxu1 %vm69_vm0, %v4267_v20 }
 0x342   :  { %16879 = vmatprep.mubr.msk.f32.mxu0 %vm69_vm0, %v19121_v35  ;;  %v19482_v35 = vpop.f32.mrf.mxu0 }
 0x343   :  { %22863 = vst [vmem:[#allocation45_spill] sm:$0xff] %v19482_v35 }
 0x344   :  { %16776 = vmatmul.mubr.msk.f32.gmra.mxu1 %vm69_vm0, %v4268_v41 }
 0x345   :  { %16880 = vmatmul.mubr.msk.f32.gmra.mxu0 %vm69_vm0, %v19133_v18  ;;  %16778 = vmatprep.mubr.msk.f32.mxu1 %vm69_vm0, %v19474_v50  ;;  %v19491_v18 = vld [vmem:[#allocation3 + $0x1e2] sm:$0xff] }
 0x346   :  { %16882 = vmatprep.mubr.msk.f32.mxu0 %vm69_vm0, %v19131_v6 }
 0x348   :  { %v16524_v30 = vpop.f32.mrf.mxu1  ;;  %16779 = vmatmul.mubr.msk.f32.gmra.mxu1 %vm69_vm0, %v19485_v3 }
 0x349   :  { %v16628_v62 = vpop.f32.mrf.mxu0  ;;  %16883 = vmatmul.mubr.msk.f32.gmra.mxu0 %vm69_vm0, %v19145_v0  ;;  %16781 = vmatprep.mubr.msk.f32.mxu1 %vm69_vm0, %v19491_v18  ;;  %v19507_v0 = vld [vmem:[#allocation3 + $0x1fa] sm:$0xff] }
 0x34a   :  { %v19493_v20 = vadd.f32 %v16628_v62, %v16524_v30  ;;  %16885 = vmatprep.mubr.msk.f32.mxu0 %vm69_vm0, %v19143_v57  ;;  %v3349_v6 = vpop.f32.mrf.mxu1 }
 0x34b   :  { %v3926_v41 = vpop.f32.mrf.mxu0 }
 0x34c   :  { %22865 = vst [vmem:[#allocation18_spill] sm:$0xff] %v19493_v20  ;;  %v19499_v35 = vadd.f32 %v3926_v41, %v3349_v6  ;;  %v16527_v3 = vpop.f32.mrf.mxu1  ;;  %16782 = vmatmul.mubr.msk.f32.gmra.mxu1 %vm69_vm0, %v19501_v1  ;;  %v19517_v41 = vld [vmem:[#allocation3 + $0x202] sm:$0xff] }
 0x34d   :  { %v16631_v50 = vpop.f32.mrf.mxu0  ;;  %16886 = vmatmul.mubr.msk.f32.gmra.mxu0 %vm69_vm0, %v19158_v55  ;;  %16784 = vmatprep.mubr.msk.f32.mxu1 %vm69_vm0, %v19507_v0  ;;  %v19523_v55 = vld [vmem:[#allocation3 + $0x212] sm:$0xff] }
 0x34e   :  { %22866 = vst [vmem:[#allocation27_spill] sm:$0xff] %v19499_v35  ;;  %v19509_v30 = vadd.f32 %v16631_v50, %v16527_v3  ;;  %16888 = vmatprep.mubr.msk.f32.mxu0 %vm69_vm0, %v19156_v12  ;;  %v3359_v57 = vpop.f32.mrf.mxu1 }
 0x34f   :  { %v3936_v62 = vpop.f32.mrf.mxu0 }
 0x350   :  { %22867 = vst [vmem:[#allocation26_spill] sm:$0xff] %v19509_v30  ;;  %v19515_v6 = vadd.f32 %v3936_v62, %v3359_v57  ;;  %v16530_v35 = vpop.f32.mrf.mxu1  ;;  %16785 = vmatmul.mubr.msk.f32.gmra.mxu1 %vm69_vm0, %v19517_v41  ;;  %v19533_v62 = vld [vmem:[#allocation3 + $0x21a] sm:$0xff] }
 0x351   :  { %v16634_v20 = vpop.f32.mrf.mxu0  ;;  %16889 = vmatmul.mubr.msk.f32.gmra.mxu0 %vm69_vm0, %v19168_v21  ;;  %16787 = vmatprep.mubr.msk.f32.mxu1 %vm69_vm0, %v19523_v55  ;;  %v19539_v21 = vld [vmem:[#allocation3 + $0x22a] sm:$0xff] }
 0x352   :  { %22868 = vst [vmem:[#allocation35_spill] sm:$0xff] %v19515_v6  ;;  %v19525_v50 = vadd.f32 %v16634_v20, %v16530_v35  ;;  %16891 = vmatprep.mubr.msk.f32.mxu0 %vm69_vm0, %v19166_v38  ;;  %v3369_v12 = vpop.f32.mrf.mxu1 }
 0x353   :  { %v3946_v3 = vpop.f32.mrf.mxu0 }
 0x354   :  { %22869 = vst [vmem:[#allocation41_spill] sm:$0xff] %v19525_v50  ;;  %v19531_v57 = vadd.f32 %v3946_v3, %v3369_v12  ;;  %v16533_v6 = vpop.f32.mrf.mxu1  ;;  %16788 = vmatmul.mubr.msk.f32.gmra.mxu1 %vm69_vm0, %v19533_v62  ;;  %v19549_v3 = vld [vmem:[#allocation3 + $0x232] sm:$0xff] }
 0x355   :  { %v16637_v30 = vpop.f32.mrf.mxu0  ;;  %16892 = vmatmul.mubr.msk.f32.gmra.mxu0 %vm69_vm0, %v19178_v33  ;;  %16790 = vmatprep.mubr.msk.f32.mxu1 %vm69_vm0, %v19539_v21  ;;  %v19555_v33 = vld [vmem:[#allocation3 + $0x242] sm:$0xff] }
 0x356   :  { %22870 = vst [vmem:[#allocation46_spill] sm:$0xff] %v19531_v57  ;;  %v19541_v35 = vadd.f32 %v16637_v30, %v16533_v6  ;;  %16894 = vmatprep.mubr.msk.f32.mxu0 %vm69_vm0, %v19176_v60  ;;  %v3379_v38 = vpop.f32.mrf.mxu1 }
 0x357   :  { %v3956_v20 = vpop.f32.mrf.mxu0 }
 0x358   :  { %22871 = vst [vmem:[#allocation49_spill] sm:$0xff] %v19541_v35  ;;  %v19547_v12 = vadd.f32 %v3956_v20, %v3379_v38  ;;  %v16536_v57 = vpop.f32.mrf.mxu1  ;;  %16791 = vmatmul.mubr.msk.f32.gmra.mxu1 %vm69_vm0, %v19549_v3  ;;  %v19565_v20 = vld [vmem:[#allocation3 + $0x24a] sm:$0xff] }
 0x359   :  { %v16640_v50 = vpop.f32.mrf.mxu0  ;;  %16895 = vmatmul.mubr.msk.f32.gmra.mxu0 %vm69_vm0, %v19188_v44  ;;  %16793 = vmatprep.mubr.msk.f32.mxu1 %vm69_vm0, %v19555_v33  ;;  %v19571_v44 = vld [vmem:[#allocation3 + $0x25a] sm:$0xff] }
 0x35a   :  { %22872 = vst [vmem:[#allocation14_spill] sm:$0xff] %v19547_v12  ;;  %v19557_v30 = vadd.f32 %v16640_v50, %v16536_v57  ;;  %16897 = vmatprep.mubr.msk.f32.mxu0 %vm69_vm0, %v19186_v47  ;;  %v3389_v60 = vpop.f32.mrf.mxu1 }
 0x35b   :  { %v3966_v6 = vpop.f32.mrf.mxu0 }
 0x35c   :  { %22873 = vst [vmem:[#allocation15_spill] sm:$0xff] %v19557_v30  ;;  %v19563_v38 = vadd.f32 %v3966_v6, %v3389_v60  ;;  %v16539_v12 = vpop.f32.mrf.mxu1  ;;  %16794 = vmatmul.mubr.msk.f32.gmra.mxu1 %vm69_vm0, %v19565_v20  ;;  %v19581_v6 = vld [vmem:[#allocation3 + $0x262] sm:$0xff] }
 0x35d   :  { %v16643_v35 = vpop.f32.mrf.mxu0  ;;  %16898 = vmatmul.mubr.msk.f32.gmra.mxu0 %vm69_vm0, %v19198_v22  ;;  %16796 = vmatprep.mubr.msk.f32.mxu1 %vm69_vm0, %v19571_v44  ;;  %v19587_v22 = vld [vmem:[#allocation3 + $0x272] sm:$0xff] }
 0x35e   :  { %22874 = vst [vmem:[#allocation20_spill] sm:$0xff] %v19563_v38  ;;  %v19573_v50 = vadd.f32 %v16643_v35, %v16539_v12  ;;  %16900 = vmatprep.mubr.msk.f32.mxu0 %vm69_vm0, %v19196_v13  ;;  %v3399_v47 = vpop.f32.mrf.mxu1 }
 0x35f   :  { %v3976_v57 = vpop.f32.mrf.mxu0 }
 0x360   :  { %22875 = vst [vmem:[#allocation37_spill] sm:$0xff] %v19573_v50  ;;  %v19579_v60 = vadd.f32 %v3976_v57, %v3399_v47  ;;  %v16542_v38 = vpop.f32.mrf.mxu1  ;;  %16797 = vmatmul.mubr.msk.f32.gmra.mxu1 %vm69_vm0, %v19581_v6  ;;  %v19597_v57 = vld [vmem:[#allocation3 + $0x27a] sm:$0xff] }
 0x361   :  { %v16646_v30 = vpop.f32.mrf.mxu0  ;;  %16901 = vmatmul.mubr.msk.f32.gmra.mxu0 %vm69_vm0, %v19208_v19  ;;  %16799 = vmatprep.mubr.msk.f32.mxu1 %vm69_vm0, %v19587_v22  ;;  %v19603_v19 = vld [vmem:[#allocation3 + $0x28a] sm:$0xff] }
 0x362   :  { %22876 = vst [vmem:[#allocation42_spill] sm:$0xff] %v19579_v60  ;;  %v19589_v35 = vadd.f32 %v16646_v30, %v16542_v38  ;;  %16903 = vmatprep.mubr.msk.f32.mxu0 %vm69_vm0, %v19206_v63  ;;  %v3409_v13 = vpop.f32.mrf.mxu1 }
 0x363   :  { %v3986_v12 = vpop.f32.mrf.mxu0 }
 0x364   :  { %22877 = vst [vmem:[#allocation47_spill] sm:$0xff] %v19589_v35  ;;  %v19595_v47 = vadd.f32 %v3986_v12, %v3409_v13  ;;  %v16545_v60 = vpop.f32.mrf.mxu1  ;;  %16800 = vmatmul.mubr.msk.f32.gmra.mxu1 %vm69_vm0, %v19597_v57  ;;  %v19613_v12 = vld [vmem:[#allocation3 + $0x292] sm:$0xff] }
 0x365   :  { %v16649_v50 = vpop.f32.mrf.mxu0  ;;  %16904 = vmatmul.mubr.msk.f32.gmra.mxu0 %vm69_vm0, %v19218_v51  ;;  %16802 = vmatprep.mubr.msk.f32.mxu1 %vm69_vm0, %v19603_v19  ;;  %v19619_v51 = vld [vmem:[#allocation3 + $0x2a2] sm:$0xff] }
 0x366   :  { %22878 = vst [vmem:[#allocation17_spill] sm:$0xff] %v19595_v47  ;;  %v19605_v30 = vadd.f32 %v16649_v50, %v16545_v60  ;;  %16906 = vmatprep.mubr.msk.f32.mxu0 %vm69_vm0, %v19216_v7  ;;  %v3419_v63 = vpop.f32.mrf.mxu1 }
 0x367   :  { %v3996_v38 = vpop.f32.mrf.mxu0 }
 0x368   :  { %22879 = vst [vmem:[#allocation25_spill] sm:$0xff] %v19605_v30  ;;  %v19611_v13 = vadd.f32 %v3996_v38, %v3419_v63  ;;  %v16548_v47 = vpop.f32.mrf.mxu1  ;;  %16803 = vmatmul.mubr.msk.f32.gmra.mxu1 %vm69_vm0, %v19613_v12  ;;  %v19629_v38 = vld [vmem:[#allocation3 + $0x2aa] sm:$0xff] }
 0x369   :  { %v16652_v35 = vpop.f32.mrf.mxu0  ;;  %16907 = vmatmul.mubr.msk.f32.gmra.mxu0 %vm69_vm0, %v19228_v16  ;;  %16805 = vmatprep.mubr.msk.f32.mxu1 %vm69_vm0, %v19619_v51  ;;  %v19635_v16 = vld [vmem:[#allocation3 + $0x2ba] sm:$0xff] }
 0x36a   :  { %22880 = vst [vmem:[#allocation24_spill] sm:$0xff] %v19611_v13  ;;  %v19621_v50 = vadd.f32 %v16652_v35, %v16548_v47  ;;  %16909 = vmatprep.mubr.msk.f32.mxu0 %vm69_vm0, %v19226_v29  ;;  %v3429_v7 = vpop.f32.mrf.mxu1 }
 0x36b   :  { %v4006_v60 = vpop.f32.mrf.mxu0 }
 0x36c   :  { %22881 = vst [vmem:[#allocation32_spill] sm:$0xff] %v19621_v50  ;;  %v19627_v63 = vadd.f32 %v4006_v60, %v3429_v7  ;;  %v16551_v13 = vpop.f32.mrf.mxu1  ;;  %16806 = vmatmul.mubr.msk.f32.gmra.mxu1 %vm69_vm0, %v19629_v38  ;;  %v19645_v60 = vld [vmem:[#allocation3 + $0x2c2] sm:$0xff] }
 0x36d   :  { %v16655_v30 = vpop.f32.mrf.mxu0  ;;  %16910 = vmatmul.mubr.msk.f32.gmra.mxu0 %vm69_vm0, %v19238_v11  ;;  %16808 = vmatprep.mubr.msk.f32.mxu1 %vm69_vm0, %v19635_v16  ;;  %22885 = vst [vmem:[#allocation38_spill] sm:$0xff] %v19645_v60  ;;  %v19651_v11 = vld [vmem:[#allocation3 + $0x2d2] sm:$0xff] }
 0x36e   :  { %22882 = vst [vmem:[#allocation44_spill] sm:$0xff] %v19627_v63  ;;  %v19637_v35 = vadd.f32 %v16655_v30, %v16551_v13  ;;  %16912 = vmatprep.mubr.msk.f32.mxu0 %vm69_vm0, %v19236_v9  ;;  %v3439_v29 = vpop.f32.mrf.mxu1  ;;  %22886 = vst [vmem:[#allocation22_spill] sm:$0xff] %v19651_v11 }
 0x36f   :  { %v4016_v47 = vpop.f32.mrf.mxu0 }
 0x370   :  { %22883 = vst [vmem:[#allocation19_spill] sm:$0xff] %v19637_v35  ;;  %v19643_v7 = vadd.f32 %v4016_v47, %v3439_v29  ;;  %v16554_v63 = vpop.f32.mrf.mxu1  ;;  %16809 = vmatmul.mubr.msk.f32.gmra.mxu1 %vm69_vm0, %v19645_v60  ;;  %v19661_v47 = vld [vmem:[#allocation3 + $0x2da] sm:$0xff] }
 0x371   :  { %v16658_v50 = vpop.f32.mrf.mxu0  ;;  %16913 = vmatmul.mubr.msk.f32.gmra.mxu0 %vm69_vm0, %v19248_v59  ;;  %16811 = vmatprep.mubr.msk.f32.mxu1 %vm69_vm0, %v19651_v11  ;;  %22889 = vst [vmem:[#allocation40_spill] sm:$0xff] %v19661_v47  ;;  %v22890_v59 = vld [vmem:[#allocation13_spill] sm:$0xff] }
 0x372   :  { %22884 = vst [vmem:[#allocation33_spill] sm:$0xff] %v19643_v7  ;;  %v19653_v30 = vadd.f32 %v16658_v50, %v16554_v63  ;;  %16915 = vmatprep.mubr.msk.f32.mxu0 %vm69_vm0, %v19246_v24  ;;  %v3449_v9 = vpop.f32.mrf.mxu1  ;;  %v19667_v50 = vld [vmem:[#allocation3 + $0x2ea] sm:$0xff]  ;;  %v22893_v24 = vld [vmem:[#allocation43_spill] sm:$0xff] }
 0x373   :  { %v4026_v13 = vpop.f32.mrf.mxu0  ;;  %22891 = vst [vmem:[#allocation31_spill] sm:$0xff] %v19667_v50 }
 0x374   :  { %22887 = vst [vmem:[#allocation21_spill] sm:$0xff] %v19653_v30  ;;  %v19659_v29 = vadd.f32 %v4026_v13, %v3449_v9  ;;  %v16557_v7 = vpop.f32.mrf.mxu1  ;;  %16812 = vmatmul.mubr.msk.f32.gmra.mxu1 %vm69_vm0, %v19661_v47  ;;  %v19677_v30 = vld [vmem:[#allocation3 + $0x2f2] sm:$0xff] }
 0x375   :  { %v16661_v35 = vpop.f32.mrf.mxu0  ;;  %16916 = vmatmul.mubr.msk.f32.gmra.mxu0 %vm69_vm0, %v22890_v59  ;;  %16814 = vmatprep.mubr.msk.f32.mxu1 %vm69_vm0, %v19667_v50  ;;  %22895 = vst [vmem:[#allocation13_spill] sm:$0xff] %v19677_v30  ;;  %v22896_v59 = vld [vmem:[#allocation23_spill] sm:$0xff]  ;;  %v19693_v50 = vld [vmem:[#allocation3 + $0x30a] sm:$0xff] }
 0x376   :  { %22888 = vst [vmem:[#allocation30_spill] sm:$0xff] %v19659_v29  ;;  %v19669_v63 = vadd.f32 %v16661_v35, %v16557_v7  ;;  %16918 = vmatprep.mubr.msk.f32.mxu0 %vm69_vm0, %v22893_v24  ;;  %v3459_v9 = vpop.f32.mrf.mxu1  ;;  %v19683_v35 = vld [vmem:[#allocation3 + $0x302] sm:$0xff]  ;;  %22901 = vst [vmem:[#allocation50_spill] sm:$0xff] %v19693_v50 }
 0x377   :  { %v4036_v13 = vpop.f32.mrf.mxu0  ;;  %22897 = vst [vmem:[#allocation43_spill] sm:$0xff] %v19683_v35  ;;  %v22899_v24 = vld [vmem:[#allocation16_spill] sm:$0xff] }
 0x378   :  { %22892 = vst [vmem:[#allocation34_spill] sm:$0xff] %v19669_v63  ;;  %v19675_v29 = vadd.f32 %v4036_v13, %v3459_v9  ;;  %v16560_v47 = vpop.f32.mrf.mxu1  ;;  %16815 = vmatmul.mubr.msk.f32.gmra.mxu1 %vm69_vm0, %v19677_v30 }
 0x379   :  { %v16664_v11 = vpop.f32.mrf.mxu0  ;;  %16919 = vmatmul.mubr.msk.f32.gmra.mxu0 %vm69_vm0, %v22896_v59  ;;  %16817 = vmatprep.mubr.msk.f32.mxu1 %vm69_vm0, %v19683_v35  ;;  %v5008_v59 = vld [vmem:[#allocation3 + $0x338] sm:$0xff] }
 0x37a   :  { %22894 = vst [vmem:[#allocation36_spill] sm:$0xff] %v19675_v29  ;;  %v19685_v7 = vadd.f32 %v16664_v11, %v16560_v47  ;;  %16921 = vmatprep.mubr.msk.f32.mxu0 %vm69_vm0, %v22899_v24  ;;  %v3469_v9 = vpop.f32.mrf.mxu1  ;;  %v5007_v29 = vld [vmem:[#allocation3 + $0x330] sm:$0xff]  ;;  %v19699_v11 = vld [vmem:[#allocation3 + $0x31a] sm:$0xff] }
 0x37b   :  { %v4046_v13 = vpop.f32.mrf.mxu0 }
 0x37c   :  { %22898 = vst [vmem:[#allocation23_spill] sm:$0xff] %v19685_v7  ;;  %v19691_v63 = vadd.f32 %v4046_v13, %v3469_v9  ;;  %v16563_v30 = vpop.f32.mrf.mxu1  ;;  %16818 = vmatmul.mubr.msk.f32.gmra.mxu1 %vm69_vm0, %v19693_v50  ;;  %v7854_v7 = vld [vmem:[#allocation4 + $0xf8] sm:$0xff] }
 0x37d   :  { %v16667_v60 = vpop.f32.mrf.mxu0  ;;  %16922 = vmatmul.mubr.msk.f32.gmra.mxu0 %vm69_vm0, %v19276_v25  ;;  %16820 = vmatprep.mubr.msk.f32.mxu1 %vm69_vm0, %v19699_v11  ;;  %v5655_v25 = vld [vmem:[#allocation3 + $0x19] sm:$0xff] }
 0x37e   :  { %22900 = vst [vmem:[#allocation16_spill] sm:$0xff] %v19691_v63  ;;  %v19701_v47 = vadd.f32 %v16667_v60, %v16563_v30  ;;  %16924 = vmatprep.mubr.msk.f32.mxu0 %vm69_vm0, %v5007_v29  ;;  %v3479_v24 = vpop.f32.mrf.mxu1  ;;  %v19708_v63 = vld [vmem:[#allocation3 + $0x322] sm:$0xff]  ;;  %17239 = vmatprep.subr.mxu0 %v7854_v7 }
 0x37f   :  { %v4056_v9 = vpop.f32.mrf.mxu0 }
 0x380   :  { %22902 = vst [vmem:[#allocation51_spill] sm:$0xff] %v19701_v47  ;;  %v19706_v13 = vadd.f32 %v4056_v9, %v3479_v24  ;;  %v16566_v50 = vpop.f32.mrf.mxu1  ;;  %16821 = vmatmul.mubr.msk.f32.gmra.mxu1 %vm69_vm0, %v19708_v63  ;;  %v5656_v9 = vld [vmem:[#allocation3 + $0x21] sm:$0xff] }
 0x381   :  { %v16670_v35 = vpop.f32.mrf.mxu0  ;;  %16925 = vmatmul.mubr.msk.f32.gmra.mxu0 %vm69_vm0, %v5008_v59  ;;  %16935 = vmatprep.mubr.msk.f32.mxu1 %vm69_vm0, %v5655_v25  ;;  %v7853_v59 = vld [vmem:[#allocation4 + $0xf0] sm:$0xff] }
 0x382   :  { %22903 = vst [vmem:[#allocation52_spill] sm:$0xff] %v19706_v13  ;;  %v19713_v60 = vadd.f32 %v16670_v35, %v16566_v50  ;;  %17039 = vmatprep.mubr.msk.f32.mxu0 %vm69_vm0, %v19287_v46  ;;  %v3489_v30 = vpop.f32.mrf.mxu1  ;;  %v19723_v50 = vld [vmem:[#allocation3 + $0x31] sm:$0xff] }
 0x383   :  { %v4066_v29 = vpop.f32.mrf.mxu0  ;;  %v7143_v35 = vld [vmem:[#allocation4 + $0xd0] sm:$0xff] }
 0x384   :  { %v19718_v24 = vadd.f32 %v4066_v29, %v3489_v30  ;;  %v16569_v13 = vpop.f32.mrf.mxu1  ;;  %16936 = vmatmul.mubr.msk.f32.vlgmr.msra.gmra.mxu1 %vm69_vm0, %v5656_v9 }
 0x385   :  { %v16673_v47 = vpop.f32.mrf.mxu0  ;;  %17040 = vmatmul.mubr.msk.f32.vlgmr.msra.gmra.mxu0 %vm69_vm0, %v19294_v61  ;;  %16938 = vmatprep.mubr.msk.f32.mxu1 %vm69_vm0, %v19723_v50  ;;  %v19734_v61 = vld [vmem:[#allocation3 + $0x39] sm:$0xff] }
 0x386   :  { %v19725_v25 = vadd.f32 %v16673_v47, %v16569_v13  ;;  %17042 = vmatprep.mubr.msk.f32.mxu0 %vm69_vm0, %v19300_v58  ;;  %v3499_v46 = vpop.f32.mrf.mxu1  ;;  %17136 = vmatpush3.msra.mxu1 %v19469_v4  ;;  %22906 = vst [vmem:[#allocation55_spill] sm:$0xff] %v19734_v61  ;;  %v19740_v58 = vld [vmem:[#allocation3 + $0x49] sm:$0xff] }
 0x387   :  { %v4076_v30 = vpop.f32.mrf.mxu0  ;;  %17240 = vmatpush3.msra.mxu0 %v7854_v7  ;;  %17137 = vmatprep.subr.mxu1 %v7143_v35  ;;  %v7142_v13 = vld [vmem:[#allocation4 + $0xc8] sm:$0xff] }
 0x388   :  { %22904 = vst [vmem:[#allocation53_spill] sm:$0xff] %v19725_v25  ;;  %v19732_v29 = vadd.f32 %v4076_v30, %v3499_v46  ;;  %17241 = vmatprep.subr.mxu0 %v7853_v59  ;;  %v16572_v9 = vpop.f32.mrf.mxu1  ;;  %16939 = vmatmul.mubr.msk.f32.gmra.mxu1 %vm69_vm0, %v19734_v61  ;;  %v7852_v25 = vld [vmem:[#allocation4 + $0xe8] sm:$0xff] }
 0x389   :  { %v16676_v47 = vpop.f32.mrf.mxu0  ;;  %17043 = vmatmul.mubr.msk.f32.gmra.mxu0 %vm69_vm0, %v19306_v48  ;;  %16941 = vmatprep.mubr.msk.f32.mxu1 %vm69_vm0, %v19740_v58 }
 0x38a   :  { %22905 = vst [vmem:[#allocation54_spill] sm:$0xff] %v19732_v29  ;;  %v19742_v4 = vadd.f32 %v16676_v47, %v16572_v9  ;;  %17045 = vmatprep.mubr.msk.f32.mxu0 %vm69_vm0, %v19312_v31  ;;  %v3509_v7 = vpop.f32.mrf.mxu1  ;;  %17138 = vmatpush3.msra.mxu1 %v7143_v35  ;;  %v19750_v29 = vld [vmem:[#allocation3 + $0x51] sm:$0xff]  ;;  %v19756_v9 = vld [vmem:[#allocation3 + $0x61] sm:$0xff] }
 0x38b   :  { %v4086_v46 = vpop.f32.mrf.mxu0  ;;  %17242 = vmatpush3.msra.mxu0 %v7853_v59  ;;  %17139 = vmatprep.subr.mxu1 %v7142_v13  ;;  %v7141_v31 = vld [vmem:[#allocation4 + $0xc0] sm:$0xff] }
 0x38c   :  { %22907 = vst [vmem:[#allocation56_spill] sm:$0xff] %v19742_v4  ;;  %v19748_v30 = vadd.f32 %v4086_v46, %v3509_v7  ;;  %17243 = vmatprep.subr.mxu0 %v7852_v25  ;;  %v16575_v48 = vpop.f32.mrf.mxu1  ;;  %16942 = vmatmul.mubr.msk.f32.gmra.mxu1 %vm69_vm0, %v19750_v29  ;;  %v7851_v47 = vld [vmem:[#allocation4 + $0xe0] sm:$0xff] }
 0x38d   :  { %v16679_v61 = vpop.f32.mrf.mxu0  ;;  %17046 = vmatmul.mubr.msk.f32.gmra.mxu0 %vm69_vm0, %v19318_v39  ;;  %16944 = vmatprep.mubr.msk.f32.mxu1 %vm69_vm0, %v19756_v9 }
 0x38e   :  { %22908 = vst [vmem:[#allocation57_spill] sm:$0xff] %v19748_v30  ;;  %v19758_v35 = vadd.f32 %v16679_v61, %v16575_v48  ;;  %17048 = vmatprep.mubr.msk.f32.mxu0 %vm69_vm0, %v19324_v5  ;;  %v3519_v59 = vpop.f32.mrf.mxu1  ;;  %17140 = vmatpush3.msra.mxu1 %v7142_v13  ;;  %v19766_v30 = vld [vmem:[#allocation3 + $0x69] sm:$0xff]  ;;  %v19772_v61 = vld [vmem:[#allocation3 + $0x79] sm:$0xff] }
 0x38f   :  { %v4096_v7 = vpop.f32.mrf.mxu0  ;;  %17244 = vmatpush3.msra.mxu0 %v7852_v25  ;;  %17141 = vmatprep.subr.mxu1 %v7141_v31 }
 0x390   :  { %v19764_v46 = vadd.f32 %v4096_v7, %v3519_v59  ;;  %17245 = vmatprep.subr.mxu0 %v7851_v47  ;;  %v16578_v39 = vpop.f32.mrf.mxu1  ;;  %16945 = vmatmul.mubr.msk.f32.gmra.mxu1 %vm69_vm0, %v19766_v30  ;;  %v19782_v59 = vld [vmem:[#allocation3 + $0x81] sm:$0xff] }
 0x391   :  { %v16682_v4 = vpop.f32.mrf.mxu0  ;;  %17049 = vmatmul.mubr.msk.f32.gmra.mxu0 %vm69_vm0, %v19330_v37  ;;  %16947 = vmatprep.mubr.msk.f32.mxu1 %vm69_vm0, %v19772_v61 }
 0x392   :  { %v19774_v5 = vadd.f32 %v16682_v4, %v16578_v39  ;;  %17051 = vmatprep.mubr.msk.f32.mxu0 %vm69_vm0, %v19336_v2  ;;  %v3529_v25 = vpop.f32.mrf.mxu1  ;;  %17142 = vmatpush3.msra.mxu1 %v7141_v31  ;;  %v19788_v4 = vld [vmem:[#allocation3 + $0x91] sm:$0xff] }
 0x393   :  { %v4106_v13 = vpop.f32.mrf.mxu0  ;;  %17246 = vmatpush3.msra.mxu0 %v7851_v47 }
 0x394   :  { %v19780_v48 = vadd.f32 %v4106_v13, %v3529_v25  ;;  %v16581_v7 = vpop.f32.mrf.mxu1  ;;  %16948 = vmatmul.mubr.msk.f32.gmra.mxu1 %vm69_vm0, %v19782_v59  ;;  %v19798_v25 = vld [vmem:[#allocation3 + $0x99] sm:$0xff] }
 0x395   :  { %v16685_v37 = vpop.f32.mrf.mxu0  ;;  %17052 = vmatmul.mubr.msk.f32.gmra.mxu0 %vm69_vm0, %v19342_v28  ;;  %16950 = vmatprep.mubr.msk.f32.mxu1 %vm69_vm0, %v19788_v4  ;;  %v19804_v28 = vld [vmem:[#allocation3 + $0xa9] sm:$0xff] }
 0x396   :  { %22909 = vst [vmem:[#allocation58_spill] sm:$0xff] %v19780_v48  ;;  %v19790_v39 = vadd.f32 %v16685_v37, %v16581_v7  ;;  %17054 = vmatprep.mubr.msk.f32.mxu0 %vm69_vm0, %v19348_v36  ;;  %v3539_v2 = vpop.f32.mrf.mxu1 }
 0x397   :  { %v4116_v31 = vpop.f32.mrf.mxu0 }
 0x398   :  { %22910 = vst [vmem:[#allocation59_spill] sm:$0xff] %v19790_v39  ;;  %v19796_v47 = vadd.f32 %v4116_v31, %v3539_v2  ;;  %v16584_v13 = vpop.f32.mrf.mxu1  ;;  %16951 = vmatmul.mubr.msk.f32.gmra.mxu1 %vm69_vm0, %v19798_v25  ;;  %v19814_v31 = vld [vmem:[#allocation3 + $0xb1] sm:$0xff] }
 0x399   :  { %v16688_v48 = vpop.f32.mrf.mxu0  ;;  %17055 = vmatmul.mubr.msk.f32.gmra.mxu0 %vm69_vm0, %v19354_v26  ;;  %16953 = vmatprep.mubr.msk.f32.mxu1 %vm69_vm0, %v19804_v28  ;;  %v19820_v26 = vld [vmem:[#allocation3 + $0xc1] sm:$0xff] }
 0x39a   :  { %22911 = vst [vmem:[#allocation60_spill] sm:$0xff] %v19796_v47  ;;  %v19806_v7 = vadd.f32 %v16688_v48, %v16584_v13  ;;  %17057 = vmatprep.mubr.msk.f32.mxu0 %vm69_vm0, %v19360_v53  ;;  %v3549_v36 = vpop.f32.mrf.mxu1 }
 0x39b   :  { %v4126_v37 = vpop.f32.mrf.mxu0 }
 0x39c   :  { %22912 = vst [vmem:[#allocation61_spill] sm:$0xff] %v19806_v7  ;;  %v19812_v2 = vadd.f32 %v4126_v37, %v3549_v36  ;;  %v16587_v47 = vpop.f32.mrf.mxu1  ;;  %16954 = vmatmul.mubr.msk.f32.gmra.mxu1 %vm69_vm0, %v19814_v31  ;;  %v19830_v37 = vld [vmem:[#allocation3 + $0xc9] sm:$0xff] }
 0x39d   :  { %v16691_v39 = vpop.f32.mrf.mxu0  ;;  %17058 = vmatmul.mubr.msk.f32.gmra.mxu0 %vm69_vm0, %v19366_v34  ;;  %16956 = vmatprep.mubr.msk.f32.mxu1 %vm69_vm0, %v19820_v26  ;;  %v19836_v34 = vld [vmem:[#allocation3 + $0xd9] sm:$0xff] }
 0x39e   :  { %22913 = vst [vmem:[#allocation62_spill] sm:$0xff] %v19812_v2  ;;  %v19822_v48 = vadd.f32 %v16691_v39, %v16587_v47  ;;  %17060 = vmatprep.mubr.msk.f32.mxu0 %vm69_vm0, %v19372_v49  ;;  %v3559_v53 = vpop.f32.mrf.mxu1 }
 0x39f   :  { %v4136_v13 = vpop.f32.mrf.mxu0 }
 0x3a0   :  { %22914 = vst [vmem:[#allocation63_spill] sm:$0xff] %v19822_v48  ;;  %v19828_v36 = vadd.f32 %v4136_v13, %v3559_v53  ;;  %v16590_v2 = vpop.f32.mrf.mxu1  ;;  %16957 = vmatmul.mubr.msk.f32.gmra.mxu1 %vm69_vm0, %v19830_v37  ;;  %v19846_v13 = vld [vmem:[#allocation3 + $0xe1] sm:$0xff] }
 0x3a1   :  { %v16694_v7 = vpop.f32.mrf.mxu0  ;;  %17061 = vmatmul.mubr.msk.f32.gmra.mxu0 %vm69_vm0, %v19378_v45  ;;  %16959 = vmatprep.mubr.msk.f32.mxu1 %vm69_vm0, %v19836_v34  ;;  %v19852_v45 = vld [vmem:[#allocation3 + $0xf1] sm:$0xff] }
 0x3a2   :  { %22915 = vst [vmem:[#allocation64_spill] sm:$0xff] %v19828_v36  ;;  %v19838_v39 = vadd.f32 %v16694_v7, %v16590_v2  ;;  %17063 = vmatprep.mubr.msk.f32.mxu0 %vm69_vm0, %v19384_v40  ;;  %v3569_v49 = vpop.f32.mrf.mxu1 }
 0x3a3   :  { %v4146_v47 = vpop.f32.mrf.mxu0 }
 0x3a4   :  { %22916 = vst [vmem:[#allocation65_spill] sm:$0xff] %v19838_v39  ;;  %v19844_v53 = vadd.f32 %v4146_v47, %v3569_v49  ;;  %v16593_v36 = vpop.f32.mrf.mxu1  ;;  %16960 = vmatmul.mubr.msk.f32.gmra.mxu1 %vm69_vm0, %v19846_v13  ;;  %v19862_v47 = vld [vmem:[#allocation3 + $0xf9] sm:$0xff] }
 0x3a5   :  { %v16697_v48 = vpop.f32.mrf.mxu0  ;;  %17064 = vmatmul.mubr.msk.f32.gmra.mxu0 %vm69_vm0, %v19390_v27  ;;  %16962 = vmatprep.mubr.msk.f32.mxu1 %vm69_vm0, %v19852_v45  ;;  %v19868_v27 = vld [vmem:[#allocation3 + $0x109] sm:$0xff] }
 0x3a6   :  { %22917 = vst [vmem:[#allocation66_spill] sm:$0xff] %v19844_v53  ;;  %v19854_v7 = vadd.f32 %v16697_v48, %v16593_v36  ;;  %17066 = vmatprep.mubr.msk.f32.mxu0 %vm69_vm0, %v19396_v32  ;;  %v3579_v40 = vpop.f32.mrf.mxu1 }
 0x3a7   :  { %v4156_v2 = vpop.f32.mrf.mxu0 }
 0x3a8   :  { %22918 = vst [vmem:[#allocation67_spill] sm:$0xff] %v19854_v7  ;;  %v19860_v49 = vadd.f32 %v4156_v2, %v3579_v40  ;;  %v16596_v53 = vpop.f32.mrf.mxu1  ;;  %16963 = vmatmul.mubr.msk.f32.gmra.mxu1 %vm69_vm0, %v19862_v47  ;;  %v19878_v2 = vld [vmem:[#allocation3 + $0x111] sm:$0xff] }
 0x3a9   :  { %v16700_v39 = vpop.f32.mrf.mxu0  ;;  %17067 = vmatmul.mubr.msk.f32.gmra.mxu0 %vm69_vm0, %v19402_v15  ;;  %16965 = vmatprep.mubr.msk.f32.mxu1 %vm69_vm0, %v19868_v27  ;;  %v19884_v15 = vld [vmem:[#allocation3 + $0x121] sm:$0xff] }
 0x3aa   :  { %22919 = vst [vmem:[#allocation68_spill] sm:$0xff] %v19860_v49  ;;  %v19870_v48 = vadd.f32 %v16700_v39, %v16596_v53  ;;  %17069 = vmatprep.mubr.msk.f32.mxu0 %vm69_vm0, %v19408_v43  ;;  %v3589_v32 = vpop.f32.mrf.mxu1 }
 0x3ab   :  { %v4166_v36 = vpop.f32.mrf.mxu0 }
 0x3ac   :  { %22920 = vst [vmem:[#allocation69_spill] sm:$0xff] %v19870_v48  ;;  %v19876_v40 = vadd.f32 %v4166_v36, %v3589_v32  ;;  %v16599_v49 = vpop.f32.mrf.mxu1  ;;  %16966 = vmatmul.mubr.msk.f32.gmra.mxu1 %vm69_vm0, %v19878_v2  ;;  %v5678_v36 = vld [vmem:[#allocation3 + $0x129] sm:$0xff] }
 0x3ad   :  { %v16703_v7 = vpop.f32.mrf.mxu0  ;;  %17070 = vmatmul.mubr.msk.f32.gmra.mxu0 %vm69_vm0, %v19414_v14  ;;  %16968 = vmatprep.mubr.msk.f32.mxu1 %vm69_vm0, %v19884_v15  ;;  %v5679_v14 = vld [vmem:[#allocation3 + $0x139] sm:$0xff] }
 0x3ae   :  { %22921 = vst [vmem:[#allocation70_spill] sm:$0xff] %v19876_v40  ;;  %v19886_v39 = vadd.f32 %v16703_v7, %v16599_v49  ;;  %17072 = vmatprep.mubr.msk.f32.mxu0 %vm69_vm0, %v19420_v23  ;;  %v3599_v43 = vpop.f32.mrf.mxu1 }
 0x3af   :  { %v4176_v53 = vpop.f32.mrf.mxu0 }
 0x3b0   :  { %22922 = vst [vmem:[#allocation71_spill] sm:$0xff] %v19886_v39  ;;  %v19892_v32 = vadd.f32 %v4176_v53, %v3599_v43  ;;  %v16602_v40 = vpop.f32.mrf.mxu1  ;;  %16969 = vmatmul.mubr.msk.f32.gmra.mxu1 %vm69_vm0, %v5678_v36  ;;  %v5680_v53 = vld [vmem:[#allocation3 + $0x141] sm:$0xff] }
 0x3b1   :  { %v16706_v48 = vpop.f32.mrf.mxu0  ;;  %17073 = vmatmul.mubr.msk.f32.gmra.mxu0 %vm69_vm0, %v19426_v42  ;;  %16971 = vmatprep.mubr.msk.f32.mxu1 %vm69_vm0, %v5679_v14  ;;  %v5681_v42 = vld [vmem:[#allocation3 + $0x151] sm:$0xff]  ;;  %v5682_v14 = vld [vmem:[#allocation3 + $0x159] sm:$0xff] }
 0x3b2   :  { %22923 = vst [vmem:[#allocation72_spill] sm:$0xff] %v19892_v32  ;;  %v19897_v7 = vadd.f32 %v16706_v48, %v16602_v40  ;;  %17075 = vmatprep.mubr.msk.f32.mxu0 %vm69_vm0, %v19432_v8  ;;  %v3609_v23 = vpop.f32.mrf.mxu1 }
 0x3b3   :  { %v4186_v49 = vpop.f32.mrf.mxu0 }
 0x3b4   :  { %v19902_v43 = vadd.f32 %v4186_v49, %v3609_v23  ;;  %v16605_v32 = vpop.f32.mrf.mxu1  ;;  %16972 = vmatmul.mubr.msk.f32.gmra.mxu1 %vm69_vm0, %v5680_v53 }
 0x3b5   :  { %v16709_v39 = vpop.f32.mrf.mxu0  ;;  %17076 = vmatmul.mubr.msk.f32.gmra.mxu0 %vm69_vm0, %v19438_v10  ;;  %16974 = vmatprep.mubr.msk.f32.mxu1 %vm69_vm0, %v5681_v42  ;;  %v5683_v10 = vld [vmem:[#allocation3 + $0x169] sm:$0xff]  ;;  %v5684_v42 = vld [vmem:[#allocation3 + $0x171] sm:$0xff] }
 0x3b6   :  { %v19907_v48 = vadd.f32 %v16709_v39, %v16605_v32  ;;  %17078 = vmatprep.mubr.msk.f32.mxu0 %vm69_vm0, %v19444_v54  ;;  %v3619_v8 = vpop.f32.mrf.mxu1 }
 0x3b7   :  { %v4196_v40 = vpop.f32.mrf.mxu0 }
 0x3b8   :  { %22924 = vst [vmem:[#allocation73_spill] sm:$0xff] %v19907_v48  ;;  %v19912_v36 = vadd.f32 %v4196_v40, %v3619_v8  ;;  %v16608_v23 = vpop.f32.mrf.mxu1  ;;  %16975 = vmatmul.mubr.msk.f32.gmra.mxu1 %vm69_vm0, %v5682_v14  ;;  %v6395_v14 = vld [vmem:[#allocation3 + $0x182] sm:$0xff] }
 0x3b9   :  { %v16712_v49 = vpop.f32.mrf.mxu0  ;;  %17079 = vmatmul.mubr.msk.f32.gmra.mxu0 %vm69_vm0, %v19450_v56  ;;  %16977 = vmatprep.mubr.msk.f32.mxu1 %vm69_vm0, %v5683_v10  ;;  %v5685_v56 = vld [vmem:[#allocation3 + $0x181] sm:$0xff] }
 0x3ba   :  { %22925 = vst [vmem:[#allocation74_spill] sm:$0xff] %v19912_v36  ;;  %v19917_v39 = vadd.f32 %v16712_v49, %v16608_v23  ;;  %17081 = vmatprep.mubr.msk.f32.mxu0 %vm69_vm0, %v19456_v17  ;;  %v3629_v54 = vpop.f32.mrf.mxu1 }
 0x3bb   :  { %v4206_v32 = vpop.f32.mrf.mxu0 }
 0x3bc   :  { %22926 = vst [vmem:[#allocation75_spill] sm:$0xff] %v19917_v39  ;;  %v19922_v53 = vadd.f32 %v4206_v32, %v3629_v54  ;;  %v16611_v8 = vpop.f32.mrf.mxu1  ;;  %16978 = vmatmul.mubr.msk.f32.gmra.mxu1 %vm69_vm0, %v5684_v42  ;;  %v5686_v54 = vld [vmem:[#allocation3 + $0x189] sm:$0xff] }
 0x3bd   :  { %v16715_v40 = vpop.f32.mrf.mxu0  ;;  %17082 = vmatmul.mubr.msk.f32.gmra.mxu0 %vm69_vm0, %v19461_v52  ;;  %16980 = vmatprep.mubr.msk.f32.mxu1 %vm69_vm0, %v5685_v56  ;;  %v6396_v32 = vld [vmem:[#allocation3 + $0x18a] sm:$0xff] }
 0x3be   :  { %22927 = vst [vmem:[#allocation76_spill] sm:$0xff] %v19922_v53  ;;  %v19927_v23 = vadd.f32 %v16715_v40, %v16611_v8  ;;  %17084 = vmatprep.mubr.msk.f32.mxu0 %vm69_vm0, %v6395_v14  ;;  %v3639_v17 = vpop.f32.mrf.mxu1  ;;  %v5687_v52 = vld [vmem:[#allocation3 + $0x1c9] sm:$0xff] }
 0x3bf   :  { %v4216_v49 = vpop.f32.mrf.mxu0  ;;  %v22931_v8 = vld [vmem:[#allocation28_spill] sm:$0xff] }
 0x3c0   :  { %22928 = vst [vmem:[#allocation77_spill] sm:$0xff] %v19927_v23  ;;  %v19931_v10 = vadd.f32 %v4216_v49, %v3639_v17  ;;  %v16614_v53 = vpop.f32.mrf.mxu1  ;;  %16981 = vmatmul.mubr.msk.f32.gmra.mxu1 %vm69_vm0, %v5686_v54  ;;  %v5688_v17 = vld [vmem:[#allocation3 + $0x1d1] sm:$0xff]  ;;  %v22933_v54 = vld [vmem:[#allocation48_spill] sm:$0xff] }
 0x3c1   :  { %v16718_v39 = vpop.f32.mrf.mxu0  ;;  %17085 = vmatmul.mubr.msk.f32.gmra.mxu0 %vm69_vm0, %v6396_v32  ;;  %16983 = vmatprep.mubr.msk.f32.mxu1 %vm69_vm0, %v5687_v52  ;;  %v5689_v32 = vld [vmem:[#allocation3 + $0x1e1] sm:$0xff]  ;;  %v22936_v52 = vld [vmem:[#allocation29_spill] sm:$0xff] }
 0x3c2   :  { %22929 = vst [vmem:[#allocation78_spill] sm:$0xff] %v19931_v10  ;;  %v19935_v42 = vadd.f32 %v16718_v39, %v16614_v53  ;;  %17087 = vmatprep.mubr.msk.f32.mxu0 %vm69_vm0, %v22931_v8  ;;  %v3649_v40 = vpop.f32.mrf.mxu1  ;;  %v22934_v39 = vld [vmem:[#allocation39_spill] sm:$0xff]  ;;  %v22935_v53 = vld [vmem:[#allocation45_spill] sm:$0xff] }
 0x3c3   :  { %v4226_v56 = vpop.f32.mrf.mxu0  ;;  %v19951_v8 = vld [vmem:[#allocation4 + $0x118] sm:$0xff] }
 0x3c4   :  { %22930 = vst [vmem:[#allocation79_spill] sm:$0xff] %v19935_v42  ;;  %v19940_v14 = vadd.f32 %v4226_v56, %v3649_v40  ;;  %v16729_v49 = vpop.f32.mrf.mxu1  ;;  %16984 = vmatmul.mubr.msk.f32.gmra.mxu1 %vm69_vm0, %v5688_v17  ;;  %v3917_v42 = vadd.f32 %v22935_v53, %v22934_v39  ;;  %17343 = vmatprep.subr.mxu1 %v19951_v8  ;;  %v22939_v53 = vld [vmem:[#allocation27_spill] sm:$0xff] }
 0x3c5   :  { %v16833_v10 = vpop.f32.mrf.mxu0  ;;  %17088 = vmatmul.mubr.msk.f32.gmra.mxu0 %vm69_vm0, %v22933_v54  ;;  %v4882_v23 = vadd.f32 %v16729_v49, %v22936_v52  ;;  %16986 = vmatprep.mubr.msk.f32.mxu1 %vm69_vm0, %v5689_v32  ;;  %v5691_v49 = vld [vmem:[#allocation3 + $0x1f9] sm:$0xff] }
 0x3c6   :  { %22932 = vst [vmem:[#allocation28_spill] sm:$0xff] %v19940_v14  ;;  %17090 = vmatprep.mubr.msk.f32.mxu0 %vm69_vm0, %v19491_v18  ;;  %v4562_v40 = vpop.f32.mrf.mxu1  ;;  %v5690_v14 = vld [vmem:[#allocation3 + $0x1e9] sm:$0xff]  ;;  %v22938_v18 = vld [vmem:[#allocation18_spill] sm:$0xff] }
 0x3c7   :  { %v5272_v56 = vpop.f32.mrf.mxu0  ;;  %v19954_v17 = vadd.f32 %v16833_v10, %v4882_v23  ;;  %v4881_v54 = vadd.f32 %v4562_v40, %v3917_v42 }
 0x3c8   :  { %v16732_v36 = vpop.f32.mrf.mxu1  ;;  %16987 = vmatmul.mubr.msk.f32.gmra.mxu1 %vm69_vm0, %v5690_v14  ;;  %v5692_v14 = vld [vmem:[#allocation3 + $0x201] sm:$0xff] }
 0x3c9   :  { %22937 = vst [vmem:[#allocation48_spill] sm:$0xff] %v19954_v17  ;;  %v16836_v48 = vpop.f32.mrf.mxu0  ;;  %17091 = vmatmul.mubr.msk.f32.gmra.mxu0 %vm69_vm0, %v19501_v1  ;;  %v19959_v32 = vadd.f32 %v5272_v56, %v4881_v54  ;;  %v4884_v39 = vadd.f32 %v16732_v36, %v22938_v18  ;;  %16989 = vmatprep.mubr.msk.f32.mxu1 %vm69_vm0, %v5691_v49  ;;  %v5693_v1 = vld [vmem:[#allocation3 + $0x211] sm:$0xff]  ;;  %v22941_v18 = vld [vmem:[#allocation35_spill] sm:$0xff] }
 0x3ca   :  { %17093 = vmatprep.mubr.msk.f32.mxu0 %vm69_vm0, %v19507_v0  ;;  %v4572_v23 = vpop.f32.mrf.mxu1  ;;  %v22940_v56 = vld [vmem:[#allocation26_spill] sm:$0xff] }
 0x3cb   :  { %v5282_v10 = vpop.f32.mrf.mxu0  ;;  %v19965_v42 = vadd.f32 %v16836_v48, %v4884_v39  ;;  %v4883_v52 = vadd.f32 %v4572_v23, %v22939_v53  ;;  %v5694_v23 = vld [vmem:[#allocation3 + $0x219] sm:$0xff] }
 0x3cc   :  { %v16735_v40 = vpop.f32.mrf.mxu1  ;;  %16990 = vmatmul.mubr.msk.f32.gmra.mxu1 %vm69_vm0, %v5692_v14 }
 0x3cd   :  { %v16839_v17 = vpop.f32.mrf.mxu0  ;;  %17094 = vmatmul.mubr.msk.f32.gmra.mxu0 %vm69_vm0, %v19517_v41  ;;  %v19971_v36 = vadd.f32 %v5282_v10, %v4883_v52  ;;  %v4886_v54 = vadd.f32 %v16735_v40, %v22940_v56  ;;  %16992 = vmatprep.mubr.msk.f32.mxu1 %vm69_vm0, %v5693_v1  ;;  %v5695_v41 = vld [vmem:[#allocation3 + $0x229] sm:$0xff]  ;;  %v22943_v56 = vld [vmem:[#allocation46_spill] sm:$0xff] }
 0x3ce   :  { %17096 = vmatprep.mubr.msk.f32.mxu0 %vm69_vm0, %v19523_v55  ;;  %v4582_v0 = vpop.f32.mrf.mxu1  ;;  %v22942_v52 = vld [vmem:[#allocation41_spill] sm:$0xff] }
 0x3cf   :  { %v5292_v48 = vpop.f32.mrf.mxu0  ;;  %v19977_v49 = vadd.f32 %v16839_v17, %v4886_v54  ;;  %v4885_v39 = vadd.f32 %v4582_v0, %v22941_v18  ;;  %v5696_v0 = vld [vmem:[#allocation3 + $0x231] sm:$0xff] }
 0x3d0   :  { %v16738_v53 = vpop.f32.mrf.mxu1  ;;  %16993 = vmatmul.mubr.msk.f32.gmra.mxu1 %vm69_vm0, %v5694_v23 }
 0x3d1   :  { %v16842_v14 = vpop.f32.mrf.mxu0  ;;  %17097 = vmatmul.mubr.msk.f32.gmra.mxu0 %vm69_vm0, %v19533_v62  ;;  %v19983_v10 = vadd.f32 %v5292_v48, %v4885_v39  ;;  %v4888_v40 = vadd.f32 %v16738_v53, %v22942_v52  ;;  %16995 = vmatprep.mubr.msk.f32.mxu1 %vm69_vm0, %v5695_v41  ;;  %v5697_v62 = vld [vmem:[#allocation3 + $0x241] sm:$0xff]  ;;  %v22944_v39 = vld [vmem:[#allocation49_spill] sm:$0xff]  ;;  %v22945_v52 = vld [vmem:[#allocation14_spill] sm:$0xff] }
 0x3d2   :  { %17099 = vmatprep.mubr.msk.f32.mxu0 %vm69_vm0, %v19539_v21  ;;  %v4592_v55 = vpop.f32.mrf.mxu1 }
 0x3d3   :  { %v5302_v17 = vpop.f32.mrf.mxu0  ;;  %v19989_v1 = vadd.f32 %v16842_v14, %v4888_v40  ;;  %v4887_v54 = vadd.f32 %v4592_v55, %v22943_v56  ;;  %v5698_v55 = vld [vmem:[#allocation3 + $0x249] sm:$0xff] }
 0x3d4   :  { %v16741_v18 = vpop.f32.mrf.mxu1  ;;  %16996 = vmatmul.mubr.msk.f32.gmra.mxu1 %vm69_vm0, %v5696_v0 }
 0x3d5   :  { %v16845_v23 = vpop.f32.mrf.mxu0  ;;  %17100 = vmatmul.mubr.msk.f32.gmra.mxu0 %vm69_vm0, %v19549_v3  ;;  %v19995_v48 = vadd.f32 %v5302_v17, %v4887_v54  ;;  %v4890_v53 = vadd.f32 %v16741_v18, %v22944_v39  ;;  %16998 = vmatprep.mubr.msk.f32.mxu1 %vm69_vm0, %v5697_v62  ;;  %v5699_v3 = vld [vmem:[#allocation3 + $0x259] sm:$0xff]  ;;  %v22947_v39 = vld [vmem:[#allocation20_spill] sm:$0xff] }
 0x3d6   :  { %17102 = vmatprep.mubr.msk.f32.mxu0 %vm69_vm0, %v19555_v33  ;;  %v4602_v21 = vpop.f32.mrf.mxu1  ;;  %v22946_v54 = vld [vmem:[#allocation15_spill] sm:$0xff] }
 0x3d7   :  { %v5312_v14 = vpop.f32.mrf.mxu0  ;;  %v20001_v41 = vadd.f32 %v16845_v23, %v4890_v53  ;;  %v4889_v40 = vadd.f32 %v4602_v21, %v22945_v52  ;;  %v5700_v21 = vld [vmem:[#allocation3 + $0x261] sm:$0xff] }
 0x3d8   :  { %v16744_v56 = vpop.f32.mrf.mxu1  ;;  %16999 = vmatmul.mubr.msk.f32.gmra.mxu1 %vm69_vm0, %v5698_v55 }
 0x3d9   :  { %v16848_v0 = vpop.f32.mrf.mxu0  ;;  %17103 = vmatmul.mubr.msk.f32.gmra.mxu0 %vm69_vm0, %v19565_v20  ;;  %v20007_v17 = vadd.f32 %v5312_v14, %v4889_v40  ;;  %v4892_v18 = vadd.f32 %v16744_v56, %v22946_v54  ;;  %17001 = vmatprep.mubr.msk.f32.mxu1 %vm69_vm0, %v5699_v3  ;;  %v5701_v20 = vld [vmem:[#allocation3 + $0x271] sm:$0xff] }
 0x3da   :  { %17105 = vmatprep.mubr.msk.f32.mxu0 %vm69_vm0, %v19571_v44  ;;  %v4612_v33 = vpop.f32.mrf.mxu1  ;;  %v22948_v40 = vld [vmem:[#allocation37_spill] sm:$0xff]  ;;  %v22949_v54 = vld [vmem:[#allocation42_spill] sm:$0xff] }
 0x3db   :  { %v5322_v23 = vpop.f32.mrf.mxu0  ;;  %v20013_v62 = vadd.f32 %v16848_v0, %v4892_v18  ;;  %v4891_v53 = vadd.f32 %v4612_v33, %v22947_v39  ;;  %v5702_v33 = vld [vmem:[#allocation3 + $0x279] sm:$0xff] }
 0x3dc   :  { %v16747_v52 = vpop.f32.mrf.mxu1  ;;  %17002 = vmatmul.mubr.msk.f32.gmra.mxu1 %vm69_vm0, %v5700_v21 }
 0x3dd   :  { %v16851_v55 = vpop.f32.mrf.mxu0  ;;  %17106 = vmatmul.mubr.msk.f32.gmra.mxu0 %vm69_vm0, %v19581_v6  ;;  %v20019_v14 = vadd.f32 %v5322_v23, %v4891_v53  ;;  %v4894_v56 = vadd.f32 %v16747_v52, %v22948_v40  ;;  %17004 = vmatprep.mubr.msk.f32.mxu1 %vm69_vm0, %v5701_v20  ;;  %v5703_v6 = vld [vmem:[#allocation3 + $0x289] sm:$0xff]  ;;  %v22950_v53 = vld [vmem:[#allocation47_spill] sm:$0xff] }
 0x3de   :  { %17108 = vmatprep.mubr.msk.f32.mxu0 %vm69_vm0, %v19587_v22  ;;  %v4622_v44 = vpop.f32.mrf.mxu1  ;;  %v22951_v40 = vld [vmem:[#allocation17_spill] sm:$0xff] }
 0x3df   :  { %v5332_v0 = vpop.f32.mrf.mxu0  ;;  %v20025_v3 = vadd.f32 %v16851_v55, %v4894_v56  ;;  %v4893_v18 = vadd.f32 %v4622_v44, %v22949_v54  ;;  %v5704_v44 = vld [vmem:[#allocation3 + $0x291] sm:$0xff] }
 0x3e0   :  { %v16750_v39 = vpop.f32.mrf.mxu1  ;;  %17005 = vmatmul.mubr.msk.f32.gmra.mxu1 %vm69_vm0, %v5702_v33 }
 0x3e1   :  { %v16854_v21 = vpop.f32.mrf.mxu0  ;;  %17109 = vmatmul.mubr.msk.f32.gmra.mxu0 %vm69_vm0, %v19597_v57  ;;  %v20031_v23 = vadd.f32 %v5332_v0, %v4893_v18  ;;  %v4896_v52 = vadd.f32 %v16750_v39, %v22950_v53  ;;  %17007 = vmatprep.mubr.msk.f32.mxu1 %vm69_vm0, %v5703_v6  ;;  %v5705_v57 = vld [vmem:[#allocation3 + $0x2a1] sm:$0xff]  ;;  %v22952_v18 = vld [vmem:[#allocation25_spill] sm:$0xff] }
 0x3e2   :  { %17111 = vmatprep.mubr.msk.f32.mxu0 %vm69_vm0, %v19603_v19  ;;  %v4632_v22 = vpop.f32.mrf.mxu1  ;;  %v22953_v53 = vld [vmem:[#allocation24_spill] sm:$0xff] }
 0x3e3   :  { %v5342_v55 = vpop.f32.mrf.mxu0  ;;  %v20037_v20 = vadd.f32 %v16854_v21, %v4896_v52  ;;  %v4895_v56 = vadd.f32 %v4632_v22, %v22951_v40  ;;  %v5706_v22 = vld [vmem:[#allocation3 + $0x2a9] sm:$0xff] }
 0x3e4   :  { %v16753_v54 = vpop.f32.mrf.mxu1  ;;  %17008 = vmatmul.mubr.msk.f32.gmra.mxu1 %vm69_vm0, %v5704_v44 }
 0x3e5   :  { %v16857_v33 = vpop.f32.mrf.mxu0  ;;  %17112 = vmatmul.mubr.msk.f32.gmra.mxu0 %vm69_vm0, %v19613_v12  ;;  %v20043_v0 = vadd.f32 %v5342_v55, %v4895_v56  ;;  %v4898_v39 = vadd.f32 %v16753_v54, %v22952_v18  ;;  %17010 = vmatprep.mubr.msk.f32.mxu1 %vm69_vm0, %v5705_v57  ;;  %v5707_v12 = vld [vmem:[#allocation3 + $0x2b9] sm:$0xff]  ;;  %v22955_v56 = vld [vmem:[#allocation32_spill] sm:$0xff] }
 0x3e6   :  { %17114 = vmatprep.mubr.msk.f32.mxu0 %vm69_vm0, %v19619_v51  ;;  %v4642_v19 = vpop.f32.mrf.mxu1  ;;  %v22957_v18 = vld [vmem:[#allocation44_spill] sm:$0xff] }
 0x3e7   :  { %v5352_v21 = vpop.f32.mrf.mxu0  ;;  %v20049_v6 = vadd.f32 %v16857_v33, %v4898_v39  ;;  %v4897_v52 = vadd.f32 %v4642_v19, %v22953_v53  ;;  %v5708_v19 = vld [vmem:[#allocation3 + $0x2c1] sm:$0xff] }
 0x3e8   :  { %v16756_v40 = vpop.f32.mrf.mxu1  ;;  %17011 = vmatmul.mubr.msk.f32.gmra.mxu1 %vm69_vm0, %v5706_v22 }
 0x3e9   :  { %v16860_v44 = vpop.f32.mrf.mxu0  ;;  %17115 = vmatmul.mubr.msk.f32.gmra.mxu0 %vm69_vm0, %v19629_v38  ;;  %v20055_v55 = vadd.f32 %v5352_v21, %v4897_v52  ;;  %v4900_v54 = vadd.f32 %v16756_v40, %v22955_v56  ;;  %17013 = vmatprep.mubr.msk.f32.mxu1 %vm69_vm0, %v5707_v12  ;;  %v22958_v38 = vld [vmem:[#allocation38_spill] sm:$0xff]  ;;  %v22960_v40 = vld [vmem:[#allocation19_spill] sm:$0xff] }
 0x3ea   :  { %17117 = vmatprep.mubr.msk.f32.mxu0 %vm69_vm0, %v19635_v16  ;;  %v4652_v51 = vpop.f32.mrf.mxu1  ;;  %v5709_v21 = vld [vmem:[#allocation3 + $0x2d1] sm:$0xff] }
 0x3eb   :  { %22954 = vst [vmem:[#allocation39_spill] sm:$0xff] %v20055_v55  ;;  %v5362_v33 = vpop.f32.mrf.mxu0  ;;  %v20061_v57 = vadd.f32 %v16860_v44, %v4900_v54  ;;  %v4899_v39 = vadd.f32 %v4652_v51, %v22957_v18  ;;  %v22961_v16 = vld [vmem:[#allocation22_spill] sm:$0xff]  ;;  %v22963_v51 = vld [vmem:[#allocation33_spill] sm:$0xff] }
 0x3ec   :  { %v16759_v53 = vpop.f32.mrf.mxu1  ;;  %17014 = vmatmul.mubr.msk.f32.gmra.mxu1 %vm69_vm0, %v5708_v19  ;;  %v5710_v19 = vld [vmem:[#allocation3 + $0x2d9] sm:$0xff] }
 0x3ed   :  { %22956 = vst [vmem:[#allocation45_spill] sm:$0xff] %v20061_v57  ;;  %v16863_v22 = vpop.f32.mrf.mxu0  ;;  %17118 = vmatmul.mubr.msk.f32.gmra.mxu0 %vm69_vm0, %v22958_v38  ;;  %v20067_v52 = vadd.f32 %v5362_v33, %v4899_v39  ;;  %v4902_v12 = vadd.f32 %v16759_v53, %v22960_v40  ;;  %17016 = vmatprep.mubr.msk.f32.mxu1 %vm69_vm0, %v5709_v21  ;;  %v22964_v33 = vld [vmem:[#allocation40_spill] sm:$0xff]  ;;  %v22966_v38 = vld [vmem:[#allocation21_spill] sm:$0xff]  ;;  %v22967_v40 = vld [vmem:[#allocation31_spill] sm:$0xff] }
 0x3ee   :  { %17120 = vmatprep.mubr.msk.f32.mxu0 %vm69_vm0, %v22961_v16  ;;  %v4662_v44 = vpop.f32.mrf.mxu1  ;;  %v5711_v39 = vld [vmem:[#allocation3 + $0x2e9] sm:$0xff] }
 0x3ef   :  { %22959 = vst [vmem:[#allocation29_spill] sm:$0xff] %v20067_v52  ;;  %v5372_v56 = vpop.f32.mrf.mxu0  ;;  %v20073_v54 = vadd.f32 %v16863_v22, %v4902_v12  ;;  %v4901_v18 = vadd.f32 %v4662_v44, %v22963_v51  ;;  %v22969_v44 = vld [vmem:[#allocation30_spill] sm:$0xff] }
 0x3f0   :  { %v16762_v57 = vpop.f32.mrf.mxu1  ;;  %17017 = vmatmul.mubr.msk.f32.gmra.mxu1 %vm69_vm0, %v5710_v19  ;;  %v5712_v19 = vld [vmem:[#allocation3 + $0x2f1] sm:$0xff] }
 0x3f1   :  { %22962 = vst [vmem:[#allocation18_spill] sm:$0xff] %v20073_v54  ;;  %v16866_v55 = vpop.f32.mrf.mxu0  ;;  %17121 = vmatmul.mubr.msk.f32.gmra.mxu0 %vm69_vm0, %v22964_v33  ;;  %v20079_v53 = vadd.f32 %v5372_v56, %v4901_v18  ;;  %v4904_v21 = vadd.f32 %v16762_v57, %v22966_v38  ;;  %17019 = vmatprep.mubr.msk.f32.mxu1 %vm69_vm0, %v5711_v39  ;;  %v22970_v56 = vld [vmem:[#allocation13_spill] sm:$0xff]  ;;  %v5713_v57 = vld [vmem:[#allocation3 + $0x301] sm:$0xff]  ;;  %v22971_v33 = vld [vmem:[#allocation34_spill] sm:$0xff] }
 0x3f2   :  { %17123 = vmatprep.mubr.msk.f32.mxu0 %vm69_vm0, %v22967_v40  ;;  %v4672_v22 = vpop.f32.mrf.mxu1  ;;  %v22972_v38 = vld [vmem:[#allocation43_spill] sm:$0xff] }
 0x3f3   :  { %22965 = vst [vmem:[#allocation27_spill] sm:$0xff] %v20079_v53  ;;  %v5382_v12 = vpop.f32.mrf.mxu0  ;;  %v20085_v16 = vadd.f32 %v16866_v55, %v4904_v21  ;;  %v4903_v51 = vadd.f32 %v4672_v22, %v22969_v44  ;;  %v22974_v22 = vld [vmem:[#allocation36_spill] sm:$0xff] }
 0x3f4   :  { %v16765_v54 = vpop.f32.mrf.mxu1  ;;  %17020 = vmatmul.mubr.msk.f32.gmra.mxu1 %vm69_vm0, %v5712_v19  ;;  %v5714_v19 = vld [vmem:[#allocation3 + $0x309] sm:$0xff] }
 0x3f5   :  { %22968 = vst [vmem:[#allocation26_spill] sm:$0xff] %v20085_v16  ;;  %v16869_v52 = vpop.f32.mrf.mxu0  ;;  %17124 = vmatmul.mubr.msk.f32.gmra.mxu0 %vm69_vm0, %v22970_v56  ;;  %v20091_v18 = vadd.f32 %v5382_v12, %v4903_v51  ;;  %v4906_v39 = vadd.f32 %v16765_v54, %v22971_v33  ;;  %17022 = vmatprep.mubr.msk.f32.mxu1 %vm69_vm0, %v5713_v57  ;;  %v22975_v12 = vld [vmem:[#allocation50_spill] sm:$0xff]  ;;  %v22976_v56 = vld [vmem:[#allocation23_spill] sm:$0xff] }
 0x3f6   :  { %17126 = vmatprep.mubr.msk.f32.mxu0 %vm69_vm0, %v22972_v38  ;;  %v4682_v55 = vpop.f32.mrf.mxu1  ;;  %v5715_v54 = vld [vmem:[#allocation3 + $0x319] sm:$0xff]  ;;  %v22978_v38 = vld [vmem:[#allocation16_spill] sm:$0xff] }
 0x3f7   :  { %v5392_v21 = vpop.f32.mrf.mxu0  ;;  %v20097_v40 = vadd.f32 %v16869_v52, %v4906_v39  ;;  %v4905_v44 = vadd.f32 %v4682_v55, %v22974_v22  ;;  %v5716_v22 = vld [vmem:[#allocation3 + $0x321] sm:$0xff] }
 0x3f8   :  { %v16768_v16 = vpop.f32.mrf.mxu1  ;;  %17023 = vmatmul.mubr.msk.f32.gmra.mxu1 %vm69_vm0, %v5714_v19 }
 0x3f9   :  { %22973 = vst [vmem:[#allocation35_spill] sm:$0xff] %v20097_v40  ;;  %v16872_v53 = vpop.f32.mrf.mxu0  ;;  %17127 = vmatmul.mubr.msk.f32.gmra.mxu0 %vm69_vm0, %v22975_v12  ;;  %v20103_v51 = vadd.f32 %v5392_v21, %v4905_v44  ;;  %v4908_v57 = vadd.f32 %v16768_v16, %v22976_v56  ;;  %17025 = vmatprep.mubr.msk.f32.mxu1 %vm69_vm0, %v5715_v54  ;;  %v5717_v16 = vld [vmem:[#allocation3 + $0x331] sm:$0xff]  ;;  %v22979_v12 = vld [vmem:[#allocation51_spill] sm:$0xff] }
 0x3fa   :  { %17129 = vmatprep.mubr.msk.f32.mxu0 %vm69_vm0, %v19699_v11  ;;  %v4692_v52 = vpop.f32.mrf.mxu1  ;;  %v6427_v21 = vld [vmem:[#allocation3 + $0x332] sm:$0xff] }
 0x3fb   :  { %v5402_v33 = vpop.f32.mrf.mxu0  ;;  %v20109_v39 = vadd.f32 %v16872_v53, %v4908_v57  ;;  %v4907_v55 = vadd.f32 %v4692_v52, %v22978_v38  ;;  %v22980_v57 = vld [vmem:[#allocation52_spill] sm:$0xff]  ;;  %v5718_v38 = vld [vmem:[#allocation3 + $0x339] sm:$0xff] }
 0x3fc   :  { %v16771_v19 = vpop.f32.mrf.mxu1  ;;  %17026 = vmatmul.mubr.msk.f32.gmra.mxu1 %vm69_vm0, %v5716_v22  ;;  %v6428_v22 = vld [vmem:[#allocation3 + $0x33a] sm:$0xff] }
 0x3fd   :  { %22977 = vst [vmem:[#allocation41_spill] sm:$0xff] %v20109_v39  ;;  %v16875_v40 = vpop.f32.mrf.mxu0  ;;  %17130 = vmatmul.mubr.msk.f32.gmra.mxu0 %vm69_vm0, %v19708_v63  ;;  %v20115_v44 = vadd.f32 %v5402_v33, %v4907_v55  ;;  %v4910_v11 = vadd.f32 %v16771_v19, %v22979_v12  ;;  %17028 = vmatprep.mubr.msk.f32.mxu1 %vm69_vm0, %v5717_v16  ;;  %v7076_v33 = vld [vmem:[#allocation3 + $0x30] sm:$0xff] }
 0x3fe   :  { %17132 = vmatprep.mubr.msk.f32.mxu0 %vm69_vm0, %v6427_v21  ;;  %v4702_v53 = vpop.f32.mrf.mxu1 }
 0x3ff   :  { %v5412_v54 = vpop.f32.mrf.mxu0  ;;  %v20120_v56 = vadd.f32 %v16875_v40, %v4910_v11  ;;  %v4909_v52 = vadd.f32 %v4702_v53, %v22980_v57  ;;  %v7077_v11 = vld [vmem:[#allocation3 + $0x38] sm:$0xff] }
 0x400   :  { %v16774_v39 = vpop.f32.mrf.mxu1  ;;  %17029 = vmatmul.mubr.msk.f32.gmra.mxu1 %vm69_vm0, %v5718_v38  ;;  %v22982_v38 = vld [vmem:[#allocation53_spill] sm:$0xff] }
 0x401   :  { %v16878_v63 = vpop.f32.mrf.mxu0  ;;  %17133 = vmatmul.mubr.msk.f32.gmra.mxu0 %vm69_vm0, %v6428_v22  ;;  %v20125_v55 = vadd.f32 %v5412_v54, %v4909_v52  ;;  %v4912_v19 = vadd.f32 %v16774_v39, %v19713_v60  ;;  %17143 = vmatprep.mubr.msk.f32.mxu1 %vm69_vm0, %v7076_v33  ;;  %v22981_v54 = vld [vmem:[#allocation55_spill] sm:$0xff]  ;;  %v7078_v60 = vld [vmem:[#allocation3 + $0x48] sm:$0xff]  ;;  %v8563_v39 = vld [vmem:[#allocation4 + $0x110] sm:$0xff] }
 0x402   :  { %17247 = vmatprep.mubr.msk.f32.mxu0 %vm69_vm0, %v19723_v50  ;;  %v4712_v40 = vpop.f32.mrf.mxu1  ;;  %v22983_v33 = vld [vmem:[#allocation54_spill] sm:$0xff] }
 0x403   :  { %v5422_v16 = vpop.f32.mrf.mxu0  ;;  %v20131_v21 = vadd.f32 %v16878_v63, %v4912_v19  ;;  %v4911_v12 = vadd.f32 %v4712_v40, %v19718_v24  ;;  %v7079_v40 = vld [vmem:[#allocation3 + $0x50] sm:$0xff] }
 0x404   :  { %v16777_v53 = vpop.f32.mrf.mxu1  ;;  %17144 = vmatmul.mubr.msk.f32.vlgmr.msra.gmra.mxu1 %vm69_vm0, %v7077_v11 }
 0x405   :  { %v16881_v57 = vpop.f32.mrf.mxu0  ;;  %17248 = vmatmul.mubr.msk.f32.vlgmr.msra.gmra.mxu0 %vm69_vm0, %v22981_v54  ;;  %v20137_v52 = vadd.f32 %v5422_v16, %v4911_v12  ;;  %v4914_v50 = vadd.f32 %v16777_v53, %v22982_v38  ;;  %17146 = vmatprep.mubr.msk.f32.mxu1 %vm69_vm0, %v7078_v60  ;;  %v7080_v12 = vld [vmem:[#allocation3 + $0x60] sm:$0xff]  ;;  %v8562_v53 = vld [vmem:[#allocation4 + $0x108] sm:$0xff] }
 0x406   :  { %17250 = vmatprep.mubr.msk.f32.mxu0 %vm69_vm0, %v19740_v58  ;;  %v4722_v24 = vpop.f32.mrf.mxu1  ;;  %17344 = vmatpush3.msra.mxu1 %v19951_v8  ;;  %v22984_v54 = vld [vmem:[#allocation56_spill] sm:$0xff] }
 0x407   :  { %v5432_v22 = vpop.f32.mrf.mxu0  ;;  %v20144_v63 = vadd.f32 %v16881_v57, %v4914_v50  ;;  %v4913_v19 = vadd.f32 %v4722_v24, %v22983_v33  ;;  %17345 = vmatprep.subr.mxu1 %v8563_v39  ;;  %v22985_v50 = vld [vmem:[#allocation57_spill] sm:$0xff] }
 0x408   :  { %v16780_v11 = vpop.f32.mrf.mxu1  ;;  %17147 = vmatmul.mubr.msk.f32.gmra.mxu1 %vm69_vm0, %v7079_v40  ;;  %v7081_v33 = vld [vmem:[#allocation3 + $0x68] sm:$0xff] }
 0x409   :  { %v16884_v16 = vpop.f32.mrf.mxu0  ;;  %17251 = vmatmul.mubr.msk.f32.gmra.mxu0 %vm69_vm0, %v19750_v29  ;;  %v20150_v58 = vadd.f32 %v5432_v22, %v4913_v19  ;;  %v4916_v60 = vadd.f32 %v16780_v11, %v22984_v54  ;;  %17149 = vmatprep.mubr.msk.f32.mxu1 %vm69_vm0, %v7080_v12  ;;  %v7082_v22 = vld [vmem:[#allocation3 + $0x78] sm:$0xff]  ;;  %v8561_v19 = vld [vmem:[#allocation4 + $0x100] sm:$0xff] }
 0x40a   :  { %17253 = vmatprep.mubr.msk.f32.mxu0 %vm69_vm0, %v19756_v9  ;;  %v4732_v8 = vpop.f32.mrf.mxu1  ;;  %17346 = vmatpush3.msra.mxu1 %v8563_v39 }
 0x40b   :  { %v5442_v57 = vpop.f32.mrf.mxu0  ;;  %v20156_v38 = vadd.f32 %v16884_v16, %v4916_v60  ;;  %v4915_v24 = vadd.f32 %v4732_v8, %v22985_v50  ;;  %17347 = vmatprep.subr.mxu1 %v8562_v53  ;;  %v7083_v60 = vld [vmem:[#allocation3 + $0x80] sm:$0xff] }
 0x40c   :  { %v16783_v29 = vpop.f32.mrf.mxu1  ;;  %17150 = vmatmul.mubr.msk.f32.gmra.mxu1 %vm69_vm0, %v7081_v33 }
 0x40d   :  { %v16887_v40 = vpop.f32.mrf.mxu0  ;;  %17254 = vmatmul.mubr.msk.f32.gmra.mxu0 %vm69_vm0, %v19766_v30  ;;  %v20162_v11 = vadd.f32 %v5442_v57, %v4915_v24  ;;  %v4918_v9 = vadd.f32 %v16783_v29, %v19758_v35  ;;  %17152 = vmatprep.mubr.msk.f32.mxu1 %vm69_vm0, %v7082_v22  ;;  %v7084_v35 = vld [vmem:[#allocation3 + $0x90] sm:$0xff]  ;;  %v7085_v29 = vld [vmem:[#allocation3 + $0x98] sm:$0xff] }
 0x40e   :  { %17256 = vmatprep.mubr.msk.f32.mxu0 %vm69_vm0, %v19772_v61  ;;  %v4742_v39 = vpop.f32.mrf.mxu1  ;;  %17348 = vmatpush3.msra.mxu1 %v8562_v53  ;;  %v22986_v24 = vld [vmem:[#allocation58_spill] sm:$0xff] }
 0x40f   :  { %v5452_v16 = vpop.f32.mrf.mxu0  ;;  %v20168_v12 = vadd.f32 %v16887_v40, %v4918_v9  ;;  %v4917_v54 = vadd.f32 %v4742_v39, %v19764_v46  ;;  %17349 = vmatprep.subr.mxu1 %v8561_v19  ;;  %v22987_v9 = vld [vmem:[#allocation59_spill] sm:$0xff] }
 0x410   :  { %v16786_v30 = vpop.f32.mrf.mxu1  ;;  %17153 = vmatmul.mubr.msk.f32.gmra.mxu1 %vm69_vm0, %v7083_v60 }
 0x411   :  { %v16890_v8 = vpop.f32.mrf.mxu0  ;;  %17257 = vmatmul.mubr.msk.f32.gmra.mxu0 %vm69_vm0, %v19782_v59  ;;  %v20174_v57 = vadd.f32 %v5452_v16, %v4917_v54  ;;  %v4920_v61 = vadd.f32 %v16786_v30, %v19774_v5  ;;  %17155 = vmatprep.mubr.msk.f32.mxu1 %vm69_vm0, %v7084_v35  ;;  %v7086_v5 = vld [vmem:[#allocation3 + $0xa8] sm:$0xff]  ;;  %v7087_v30 = vld [vmem:[#allocation3 + $0xb0] sm:$0xff] }
 0x412   :  { %17259 = vmatprep.mubr.msk.f32.mxu0 %vm69_vm0, %v19788_v4  ;;  %v4752_v46 = vpop.f32.mrf.mxu1  ;;  %17350 = vmatpush3.msra.mxu1 %v8561_v19  ;;  %v22988_v54 = vld [vmem:[#allocation60_spill] sm:$0xff] }
 0x413   :  { %v5462_v53 = vpop.f32.mrf.mxu0  ;;  %v20180_v50 = vadd.f32 %v16890_v8, %v4920_v61  ;;  %v4919_v33 = vadd.f32 %v4752_v46, %v22986_v24  ;;  %v22989_v46 = vld [vmem:[#allocation61_spill] sm:$0xff] }
 0x414   :  { %v16789_v40 = vpop.f32.mrf.mxu1  ;;  %17156 = vmatmul.mubr.msk.f32.gmra.mxu1 %vm69_vm0, %v7085_v29  ;;  %v22990_v29 = vld [vmem:[#allocation62_spill] sm:$0xff] }
 0x415   :  { %v16893_v59 = vpop.f32.mrf.mxu0  ;;  %17260 = vmatmul.mubr.msk.f32.gmra.mxu0 %vm69_vm0, %v19798_v25  ;;  %v20186_v22 = vadd.f32 %v5462_v53, %v4919_v33  ;;  %v4922_v4 = vadd.f32 %v16789_v40, %v22987_v9  ;;  %17158 = vmatprep.mubr.msk.f32.mxu1 %vm69_vm0, %v7086_v5  ;;  %v7088_v25 = vld [vmem:[#allocation3 + $0xc0] sm:$0xff] }
 0x416   :  { %17262 = vmatprep.mubr.msk.f32.mxu0 %vm69_vm0, %v19804_v28  ;;  %v4762_v19 = vpop.f32.mrf.mxu1 }
 0x417   :  { %v5472_v39 = vpop.f32.mrf.mxu0  ;;  %v20192_v16 = vadd.f32 %v16893_v59, %v4922_v4  ;;  %v4921_v60 = vadd.f32 %v4762_v19, %v22988_v54  ;;  %v7089_v59 = vld [vmem:[#allocation3 + $0xc8] sm:$0xff]  ;;  %v22991_v19 = vld [vmem:[#allocation63_spill] sm:$0xff] }
 0x418   :  { %v16792_v8 = vpop.f32.mrf.mxu1  ;;  %17159 = vmatmul.mubr.msk.f32.gmra.mxu1 %vm69_vm0, %v7087_v30  ;;  %v22992_v30 = vld [vmem:[#allocation64_spill] sm:$0xff] }
 0x419   :  { %v16896_v35 = vpop.f32.mrf.mxu0  ;;  %17263 = vmatmul.mubr.msk.f32.gmra.mxu0 %vm69_vm0, %v19814_v31  ;;  %v20198_v61 = vadd.f32 %v5472_v39, %v4921_v60  ;;  %v4924_v53 = vadd.f32 %v16792_v8, %v22989_v46  ;;  %17161 = vmatprep.mubr.msk.f32.mxu1 %vm69_vm0, %v7088_v25  ;;  %v7090_v31 = vld [vmem:[#allocation3 + $0xd8] sm:$0xff] }
 0x41a   :  { %17265 = vmatprep.mubr.msk.f32.mxu0 %vm69_vm0, %v19820_v26  ;;  %v4772_v28 = vpop.f32.mrf.mxu1 }
 0x41b   :  { %v5482_v24 = vpop.f32.mrf.mxu0  ;;  %v20204_v33 = vadd.f32 %v16896_v35, %v4924_v53  ;;  %v4923_v40 = vadd.f32 %v4772_v28, %v22990_v29  ;;  %v7091_v35 = vld [vmem:[#allocation3 + $0xe0] sm:$0xff]  ;;  %v22993_v28 = vld [vmem:[#allocation65_spill] sm:$0xff] }
 0x41c   :  { %v16795_v5 = vpop.f32.mrf.mxu1  ;;  %17162 = vmatmul.mubr.msk.f32.gmra.mxu1 %vm69_vm0, %v7089_v59  ;;  %v22994_v59 = vld [vmem:[#allocation66_spill] sm:$0xff] }
 0x41d   :  { %v16899_v9 = vpop.f32.mrf.mxu0  ;;  %17266 = vmatmul.mubr.msk.f32.gmra.mxu0 %vm69_vm0, %v19830_v37  ;;  %v20210_v4 = vadd.f32 %v5482_v24, %v4923_v40  ;;  %v4926_v39 = vadd.f32 %v16795_v5, %v22991_v19  ;;  %17164 = vmatprep.mubr.msk.f32.mxu1 %vm69_vm0, %v7090_v31  ;;  %v7092_v37 = vld [vmem:[#allocation3 + $0xf0] sm:$0xff] }
 0x41e   :  { %17268 = vmatprep.mubr.msk.f32.mxu0 %vm69_vm0, %v19836_v34  ;;  %v4782_v26 = vpop.f32.mrf.mxu1 }
 0x41f   :  { %v5492_v54 = vpop.f32.mrf.mxu0  ;;  %v20216_v60 = vadd.f32 %v16899_v9, %v4926_v39  ;;  %v4925_v8 = vadd.f32 %v4782_v26, %v22992_v30  ;;  %v7093_v9 = vld [vmem:[#allocation3 + $0xf8] sm:$0xff] }
 0x420   :  { %v16798_v25 = vpop.f32.mrf.mxu1  ;;  %17165 = vmatmul.mubr.msk.f32.gmra.mxu1 %vm69_vm0, %v7091_v35  ;;  %v22995_v26 = vld [vmem:[#allocation67_spill] sm:$0xff]  ;;  %v22996_v35 = vld [vmem:[#allocation68_spill] sm:$0xff] }
 0x421   :  { %v16902_v46 = vpop.f32.mrf.mxu0  ;;  %17269 = vmatmul.mubr.msk.f32.gmra.mxu0 %vm69_vm0, %v19846_v13  ;;  %v20222_v53 = vadd.f32 %v5492_v54, %v4925_v8  ;;  %v4928_v24 = vadd.f32 %v16798_v25, %v22993_v28  ;;  %17167 = vmatprep.mubr.msk.f32.mxu1 %vm69_vm0, %v7092_v37  ;;  %v7094_v13 = vld [vmem:[#allocation3 + $0x108] sm:$0xff] }
 0x422   :  { %17271 = vmatprep.mubr.msk.f32.mxu0 %vm69_vm0, %v19852_v45  ;;  %v4792_v34 = vpop.f32.mrf.mxu1 }
 0x423   :  { %v5502_v29 = vpop.f32.mrf.mxu0  ;;  %v20228_v40 = vadd.f32 %v16902_v46, %v4928_v24  ;;  %v4927_v5 = vadd.f32 %v4792_v34, %v22994_v59  ;;  %v7095_v46 = vld [vmem:[#allocation3 + $0x110] sm:$0xff] }
 0x424   :  { %v16801_v31 = vpop.f32.mrf.mxu1  ;;  %17168 = vmatmul.mubr.msk.f32.gmra.mxu1 %vm69_vm0, %v7093_v9  ;;  %v22997_v34 = vld [vmem:[#allocation69_spill] sm:$0xff]  ;;  %v22998_v9 = vld [vmem:[#allocation70_spill] sm:$0xff] }
 0x425   :  { %v16905_v19 = vpop.f32.mrf.mxu0  ;;  %17272 = vmatmul.mubr.msk.f32.gmra.mxu0 %vm69_vm0, %v19862_v47  ;;  %v20234_v39 = vadd.f32 %v5502_v29, %v4927_v5  ;;  %v4930_v54 = vadd.f32 %v16801_v31, %v22995_v26  ;;  %17170 = vmatprep.mubr.msk.f32.mxu1 %vm69_vm0, %v7094_v13  ;;  %v7096_v47 = vld [vmem:[#allocation3 + $0x120] sm:$0xff]  ;;  %v7807_v13 = vld [vmem:[#allocation3 + $0x129] sm:$0xff] }
 0x426   :  { %17274 = vmatprep.mubr.msk.f32.mxu0 %vm69_vm0, %v19868_v27  ;;  %v4802_v45 = vpop.f32.mrf.mxu1 }
 0x427   :  { %v5512_v30 = vpop.f32.mrf.mxu0  ;;  %v20240_v8 = vadd.f32 %v16905_v19, %v4930_v54  ;;  %v4929_v25 = vadd.f32 %v4802_v45, %v22996_v35  ;;  %v7097_v19 = vld [vmem:[#allocation3 + $0x128] sm:$0xff]  ;;  %v7098_v54 = vld [vmem:[#allocation3 + $0x138] sm:$0xff] }
 0x428   :  { %v16804_v37 = vpop.f32.mrf.mxu1  ;;  %17171 = vmatmul.mubr.msk.f32.gmra.mxu1 %vm69_vm0, %v7095_v46  ;;  %v7808_v45 = vld [vmem:[#allocation3 + $0x139] sm:$0xff] }
 0x429   :  { %v16908_v28 = vpop.f32.mrf.mxu0  ;;  %17275 = vmatmul.mubr.msk.f32.gmra.mxu0 %vm69_vm0, %v19878_v2  ;;  %v20246_v24 = vadd.f32 %v5512_v30, %v4929_v25  ;;  %v4932_v29 = vadd.f32 %v16804_v37, %v22997_v34  ;;  %17173 = vmatprep.mubr.msk.f32.mxu1 %vm69_vm0, %v7096_v47  ;;  %v22999_v35 = vld [vmem:[#allocation71_spill] sm:$0xff] }
 0x42a   :  { %17277 = vmatprep.mubr.msk.f32.mxu0 %vm69_vm0, %v19884_v15  ;;  %v4812_v27 = vpop.f32.mrf.mxu1  ;;  %v7099_v34 = vld [vmem:[#allocation3 + $0x140] sm:$0xff] }
 0x42b   :  { %v5522_v59 = vpop.f32.mrf.mxu0  ;;  %v20252_v5 = vadd.f32 %v16908_v28, %v4932_v29  ;;  %v4931_v31 = vadd.f32 %v4812_v27, %v22998_v9  ;;  %v23000_v28 = vld [vmem:[#allocation72_spill] sm:$0xff] }
 0x42c   :  { %v16807_v26 = vpop.f32.mrf.mxu1  ;;  %17174 = vmatmul.mubr.msk.f32.gmra.mxu1 %vm69_vm0, %v7097_v19  ;;  %v7809_v29 = vld [vmem:[#allocation3 + $0x141] sm:$0xff] }
 0x42d   :  { %v16911_v2 = vpop.f32.mrf.mxu0  ;;  %17278 = vmatmul.mubr.msk.f32.gmra.mxu0 %vm69_vm0, %v7807_v13  ;;  %v20257_v30 = vadd.f32 %v5522_v59, %v4931_v31  ;;  %v4934_v15 = vadd.f32 %v16807_v26, %v22999_v35  ;;  %17176 = vmatprep.mubr.msk.f32.mxu1 %vm69_vm0, %v7098_v54  ;;  %v7100_v59 = vld [vmem:[#allocation3 + $0x150] sm:$0xff]  ;;  %v7101_v35 = vld [vmem:[#allocation3 + $0x158] sm:$0xff] }
 0x42e   :  { %17280 = vmatprep.mubr.msk.f32.mxu0 %vm69_vm0, %v7808_v45  ;;  %v4822_v25 = vpop.f32.mrf.mxu1  ;;  %v7810_v31 = vld [vmem:[#allocation3 + $0x151] sm:$0xff] }
 0x42f   :  { %v5532_v46 = vpop.f32.mrf.mxu0  ;;  %v20262_v37 = vadd.f32 %v16911_v2, %v4934_v15  ;;  %v4933_v47 = vadd.f32 %v4822_v25, %v23000_v28  ;;  %v7811_v15 = vld [vmem:[#allocation3 + $0x159] sm:$0xff] }
 0x430   :  { %v16810_v27 = vpop.f32.mrf.mxu1  ;;  %17177 = vmatmul.mubr.msk.f32.gmra.mxu1 %vm69_vm0, %v7099_v34  ;;  %v23004_v34 = vld [vmem:[#allocation73_spill] sm:$0xff] }
 0x431   :  { %v16914_v9 = vpop.f32.mrf.mxu0  ;;  %17281 = vmatmul.mubr.msk.f32.gmra.mxu0 %vm69_vm0, %v7809_v29  ;;  %v20267_v19 = vadd.f32 %v5532_v46, %v4933_v47  ;;  %v4936_v13 = vadd.f32 %v16810_v27, %v19897_v7  ;;  %17179 = vmatprep.mubr.msk.f32.mxu1 %vm69_vm0, %v7100_v59  ;;  %v7102_v46 = vld [vmem:[#allocation3 + $0x168] sm:$0xff]  ;;  %v23006_v59 = vld [vmem:[#allocation74_spill] sm:$0xff] }
 0x432   :  { %17283 = vmatprep.mubr.msk.f32.mxu0 %vm69_vm0, %v7810_v31  ;;  %v4832_v26 = vpop.f32.mrf.mxu1  ;;  %v7812_v7 = vld [vmem:[#allocation3 + $0x169] sm:$0xff] }
 0x433   :  { %23001 = vst [vmem:[#allocation46_spill] sm:$0xff] %v20267_v19  ;;  %v5542_v2 = vpop.f32.mrf.mxu0  ;;  %v20272_v54 = vadd.f32 %v16914_v9, %v4936_v13  ;;  %v4935_v45 = vadd.f32 %v4832_v26, %v19902_v43  ;;  %v7103_v13 = vld [vmem:[#allocation3 + $0x170] sm:$0xff] }
 0x434   :  { %v16813_v25 = vpop.f32.mrf.mxu1  ;;  %17180 = vmatmul.mubr.msk.f32.gmra.mxu1 %vm69_vm0, %v7101_v35  ;;  %v7813_v26 = vld [vmem:[#allocation3 + $0x171] sm:$0xff] }
 0x435   :  { %23002 = vst [vmem:[#allocation49_spill] sm:$0xff] %v20272_v54  ;;  %v16917_v28 = vpop.f32.mrf.mxu0  ;;  %17284 = vmatmul.mubr.msk.f32.gmra.mxu0 %vm69_vm0, %v7811_v15  ;;  %v20277_v47 = vadd.f32 %v5542_v2, %v4935_v45  ;;  %v4938_v29 = vadd.f32 %v16813_v25, %v23004_v34  ;;  %17182 = vmatprep.mubr.msk.f32.mxu1 %vm69_vm0, %v7102_v46  ;;  %v7104_v2 = vld [vmem:[#allocation3 + $0x180] sm:$0xff] }
 0x436   :  { %17286 = vmatprep.mubr.msk.f32.mxu0 %vm69_vm0, %v7812_v7  ;;  %v4842_v27 = vpop.f32.mrf.mxu1  ;;  %v7814_v45 = vld [vmem:[#allocation3 + $0x181] sm:$0xff] }
 0x437   :  { %23003 = vst [vmem:[#allocation14_spill] sm:$0xff] %v20277_v47  ;;  %v5552_v43 = vpop.f32.mrf.mxu0  ;;  %v20282_v9 = vadd.f32 %v16917_v28, %v4938_v29  ;;  %v4937_v31 = vadd.f32 %v4842_v27, %v23006_v59  ;;  %v23007_v46 = vld [vmem:[#allocation75_spill] sm:$0xff]  ;;  %v7105_v47 = vld [vmem:[#allocation3 + $0x188] sm:$0xff] }
 0x438   :  { %v16816_v35 = vpop.f32.mrf.mxu1  ;;  %17183 = vmatmul.mubr.msk.f32.gmra.mxu1 %vm69_vm0, %v7103_v13  ;;  %v7106_v29 = vld [vmem:[#allocation3 + $0x198] sm:$0xff] }
 0x439   :  { %23005 = vst [vmem:[#allocation15_spill] sm:$0xff] %v20282_v9  ;;  %v16920_v15 = vpop.f32.mrf.mxu0  ;;  %17287 = vmatmul.mubr.msk.f32.gmra.mxu0 %vm69_vm0, %v7813_v26  ;;  %v20287_v25 = vadd.f32 %v5552_v43, %v4937_v31  ;;  %v4940_v7 = vadd.f32 %v16816_v35, %v23007_v46  ;;  %17185 = vmatprep.mubr.msk.f32.mxu1 %vm69_vm0, %v7104_v2  ;;  %v7816_v27 = vld [vmem:[#allocation3 + $0x199] sm:$0xff]  ;;  %v23009_v9 = vld [vmem:[#allocation76_spill] sm:$0xff]  ;;  %v23010_v31 = vld [vmem:[#allocation77_spill] sm:$0xff] }
 0x43a   :  { %17289 = vmatprep.mubr.msk.f32.mxu0 %vm69_vm0, %v7814_v45  ;;  %v4852_v28 = vpop.f32.mrf.mxu1  ;;  %v7815_v26 = vld [vmem:[#allocation3 + $0x189] sm:$0xff]  ;;  %v7817_v2 = vld [vmem:[#allocation3 + $0x1a1] sm:$0xff] }
 0x43b   :  { %v5562_v34 = vpop.f32.mrf.mxu0  ;;  %v20292_v59 = vadd.f32 %v16920_v15, %v4940_v7  ;;  %v4939_v13 = vadd.f32 %v4852_v28, %v23009_v9  ;;  %v7107_v15 = vld [vmem:[#allocation3 + $0x1a0] sm:$0xff]  ;;  %v23012_v7 = vld [vmem:[#allocation78_spill] sm:$0xff] }
 0x43c   :  { %v16819_v54 = vpop.f32.mrf.mxu1  ;;  %17186 = vmatmul.mubr.msk.f32.gmra.mxu1 %vm69_vm0, %v7105_v47 }
 0x43d   :  { %23008 = vst [vmem:[#allocation20_spill] sm:$0xff] %v20292_v59  ;;  %v16923_v19 = vpop.f32.mrf.mxu0  ;;  %17290 = vmatmul.mubr.msk.f32.gmra.mxu0 %vm69_vm0, %v7815_v26  ;;  %v20297_v43 = vadd.f32 %v5562_v34, %v4939_v13  ;;  %v4942_v35 = vadd.f32 %v16819_v54, %v23010_v31  ;;  %17188 = vmatprep.mubr.msk.f32.mxu1 %vm69_vm0, %v7106_v29  ;;  %v7108_v34 = vld [vmem:[#allocation3 + $0x1e0] sm:$0xff] }
 0x43e   :  { %17292 = vmatprep.mubr.msk.f32.mxu0 %vm69_vm0, %v7816_v27  ;;  %v4862_v45 = vpop.f32.mrf.mxu1  ;;  %v7818_v54 = vld [vmem:[#allocation3 + $0x1e1] sm:$0xff] }
 0x43f   :  { %v5572_v9 = vpop.f32.mrf.mxu0  ;;  %v20302_v46 = vadd.f32 %v16923_v19, %v4942_v35  ;;  %v4941_v28 = vadd.f32 %v4862_v45, %v23012_v7  ;;  %v23013_v29 = vld [vmem:[#allocation79_spill] sm:$0xff]  ;;  %v23015_v35 = vld [vmem:[#allocation28_spill] sm:$0xff] }
 0x440   :  { %v16822_v59 = vpop.f32.mrf.mxu1  ;;  %17189 = vmatmul.mubr.msk.f32.gmra.mxu1 %vm69_vm0, %v7107_v15  ;;  %v7109_v7 = vld [vmem:[#allocation3 + $0x1e8] sm:$0xff] }
 0x441   :  { %23011 = vst [vmem:[#allocation37_spill] sm:$0xff] %v20302_v46  ;;  %v16926_v47 = vpop.f32.mrf.mxu0  ;;  %17293 = vmatmul.mubr.msk.f32.gmra.mxu0 %vm69_vm0, %v7817_v2  ;;  %v20307_v13 = vadd.f32 %v5572_v9, %v4941_v28  ;;  %v4944_v27 = vadd.f32 %v16822_v59, %v23013_v29  ;;  %17191 = vmatprep.mubr.msk.f32.mxu1 %vm69_vm0, %v7108_v34  ;;  %v7819_v15 = vld [vmem:[#allocation3 + $0x1e9] sm:$0xff]  ;;  %v7110_v9 = vld [vmem:[#allocation3 + $0x1f8] sm:$0xff] }
 0x442   :  { %17295 = vmatprep.mubr.msk.f32.mxu0 %vm69_vm0, %v7818_v54  ;;  %v4872_v19 = vpop.f32.mrf.mxu1  ;;  %v7820_v59 = vld [vmem:[#allocation3 + $0x1f9] sm:$0xff]  ;;  %v23016_v34 = vld [vmem:[#allocation48_spill] sm:$0xff] }
 0x443   :  { %v5582_v26 = vpop.f32.mrf.mxu0  ;;  %v20312_v31 = vadd.f32 %v16926_v47, %v4944_v27  ;;  %v4943_v45 = vadd.f32 %v4872_v19, %v23015_v35  ;;  %v7111_v35 = vld [vmem:[#allocation3 + $0x200] sm:$0xff] }
 0x444   :  { %v16937_v46 = vpop.f32.mrf.mxu1  ;;  %17192 = vmatmul.mubr.msk.f32.gmra.mxu1 %vm69_vm0, %v7109_v7  ;;  %v7821_v7 = vld [vmem:[#allocation3 + $0x201] sm:$0xff] }
 0x445   :  { %23014 = vst [vmem:[#allocation42_spill] sm:$0xff] %v20312_v31  ;;  %v17041_v2 = vpop.f32.mrf.mxu0  ;;  %17296 = vmatmul.mubr.msk.f32.gmra.mxu0 %vm69_vm0, %v7819_v15  ;;  %v20317_v28 = vadd.f32 %v5582_v26, %v4943_v45  ;;  %v6302_v54 = vadd.f32 %v16937_v46, %v23016_v34  ;;  %17194 = vmatprep.mubr.msk.f32.mxu1 %vm69_vm0, %v7110_v9  ;;  %v7112_v26 = vld [vmem:[#allocation3 + $0x210] sm:$0xff] }
 0x446   :  { %17298 = vmatprep.mubr.msk.f32.mxu0 %vm69_vm0, %v7820_v59  ;;  %v5982_v47 = vpop.f32.mrf.mxu1  ;;  %v7822_v46 = vld [vmem:[#allocation3 + $0x211] sm:$0xff] }
 0x447   :  { %v6692_v29 = vpop.f32.mrf.mxu0  ;;  %v20322_v27 = vadd.f32 %v17041_v2, %v6302_v54  ;;  %v6301_v19 = vadd.f32 %v5982_v47, %v19959_v32  ;;  %v7113_v54 = vld [vmem:[#allocation3 + $0x218] sm:$0xff] }
 0x448   :  { %v16940_v31 = vpop.f32.mrf.mxu1  ;;  %17195 = vmatmul.mubr.msk.f32.gmra.mxu1 %vm69_vm0, %v7111_v35  ;;  %v7823_v47 = vld [vmem:[#allocation3 + $0x219] sm:$0xff] }
 0x449   :  { %v17044_v15 = vpop.f32.mrf.mxu0  ;;  %17299 = vmatmul.mubr.msk.f32.gmra.mxu0 %vm69_vm0, %v7821_v7  ;;  %v20327_v45 = vadd.f32 %v6692_v29, %v6301_v19  ;;  %v6304_v9 = vadd.f32 %v16940_v31, %v19965_v42  ;;  %17197 = vmatprep.mubr.msk.f32.mxu1 %vm69_vm0, %v7112_v26  ;;  %v7114_v29 = vld [vmem:[#allocation3 + $0x228] sm:$0xff] }
 0x44a   :  { %17301 = vmatprep.mubr.msk.f32.mxu0 %vm69_vm0, %v7822_v46  ;;  %v5992_v2 = vpop.f32.mrf.mxu1  ;;  %v7824_v42 = vld [vmem:[#allocation3 + $0x229] sm:$0xff] }
 0x44b   :  { %v6702_v32 = vpop.f32.mrf.mxu0  ;;  %v20332_v59 = vadd.f32 %v17044_v15, %v6304_v9  ;;  %v6303_v34 = vadd.f32 %v5992_v2, %v19971_v36  ;;  %v7115_v9 = vld [vmem:[#allocation3 + $0x230] sm:$0xff] }
 0x44c   :  { %v16943_v35 = vpop.f32.mrf.mxu1  ;;  %17198 = vmatmul.mubr.msk.f32.gmra.mxu1 %vm69_vm0, %v7113_v54  ;;  %v7825_v2 = vld [vmem:[#allocation3 + $0x231] sm:$0xff] }
 0x44d   :  { %v17047_v7 = vpop.f32.mrf.mxu0  ;;  %17302 = vmatmul.mubr.msk.f32.gmra.mxu0 %vm69_vm0, %v7823_v47  ;;  %v20337_v31 = vadd.f32 %v6702_v32, %v6303_v34  ;;  %v6306_v19 = vadd.f32 %v16943_v35, %v19977_v49  ;;  %17200 = vmatprep.mubr.msk.f32.mxu1 %vm69_vm0, %v7114_v29  ;;  %v7116_v32 = vld [vmem:[#allocation3 + $0x240] sm:$0xff] }
 0x44e   :  { %17304 = vmatprep.mubr.msk.f32.mxu0 %vm69_vm0, %v7824_v42  ;;  %v6002_v15 = vpop.f32.mrf.mxu1  ;;  %v7826_v49 = vld [vmem:[#allocation3 + $0x241] sm:$0xff] }
 0x44f   :  { %v6712_v36 = vpop.f32.mrf.mxu0  ;;  %v20342_v26 = vadd.f32 %v17047_v7, %v6306_v19  ;;  %v6305_v46 = vadd.f32 %v6002_v15, %v19983_v10  ;;  %v7117_v19 = vld [vmem:[#allocation3 + $0x248] sm:$0xff] }
 0x450   :  { %v16946_v54 = vpop.f32.mrf.mxu1  ;;  %17201 = vmatmul.mubr.msk.f32.gmra.mxu1 %vm69_vm0, %v7115_v9  ;;  %v7827_v15 = vld [vmem:[#allocation3 + $0x249] sm:$0xff] }
 0x451   :  { %v17050_v47 = vpop.f32.mrf.mxu0  ;;  %17305 = vmatmul.mubr.msk.f32.gmra.mxu0 %vm69_vm0, %v7825_v2  ;;  %v20347_v34 = vadd.f32 %v6712_v36, %v6305_v46  ;;  %v6308_v35 = vadd.f32 %v16946_v54, %v19989_v1  ;;  %17203 = vmatprep.mubr.msk.f32.mxu1 %vm69_vm0, %v7116_v32  ;;  %v7118_v36 = vld [vmem:[#allocation3 + $0x258] sm:$0xff] }
 0x452   :  { %17307 = vmatprep.mubr.msk.f32.mxu0 %vm69_vm0, %v7826_v49  ;;  %v6012_v7 = vpop.f32.mrf.mxu1  ;;  %v7828_v1 = vld [vmem:[#allocation3 + $0x259] sm:$0xff] }
 0x453   :  { %v6722_v10 = vpop.f32.mrf.mxu0  ;;  %v20352_v29 = vadd.f32 %v17050_v47, %v6308_v35  ;;  %v6307_v42 = vadd.f32 %v6012_v7, %v19995_v48  ;;  %v7119_v35 = vld [vmem:[#allocation3 + $0x260] sm:$0xff] }
 0x454   :  { %v16949_v9 = vpop.f32.mrf.mxu1  ;;  %17204 = vmatmul.mubr.msk.f32.gmra.mxu1 %vm69_vm0, %v7117_v19  ;;  %v7829_v7 = vld [vmem:[#allocation3 + $0x261] sm:$0xff] }
 0x455   :  { %v17053_v2 = vpop.f32.mrf.mxu0  ;;  %17308 = vmatmul.mubr.msk.f32.gmra.mxu0 %vm69_vm0, %v7827_v15  ;;  %v20357_v46 = vadd.f32 %v6722_v10, %v6307_v42  ;;  %v6310_v54 = vadd.f32 %v16949_v9, %v20001_v41  ;;  %17206 = vmatprep.mubr.msk.f32.mxu1 %vm69_vm0, %v7118_v36  ;;  %v7120_v10 = vld [vmem:[#allocation3 + $0x270] sm:$0xff] }
 0x456   :  { %17310 = vmatprep.mubr.msk.f32.mxu0 %vm69_vm0, %v7828_v1  ;;  %v6022_v47 = vpop.f32.mrf.mxu1  ;;  %v7830_v41 = vld [vmem:[#allocation3 + $0x271] sm:$0xff] }
 0x457   :  { %v6732_v48 = vpop.f32.mrf.mxu0  ;;  %v20362_v32 = vadd.f32 %v17053_v2, %v6310_v54  ;;  %v6309_v49 = vadd.f32 %v6022_v47, %v20007_v17  ;;  %v7121_v54 = vld [vmem:[#allocation3 + $0x278] sm:$0xff] }
 0x458   :  { %v16952_v19 = vpop.f32.mrf.mxu1  ;;  %17207 = vmatmul.mubr.msk.f32.gmra.mxu1 %vm69_vm0, %v7119_v35  ;;  %v7831_v47 = vld [vmem:[#allocation3 + $0x279] sm:$0xff] }
 0x459   :  { %v17056_v15 = vpop.f32.mrf.mxu0  ;;  %17311 = vmatmul.mubr.msk.f32.gmra.mxu0 %vm69_vm0, %v7829_v7  ;;  %v20367_v42 = vadd.f32 %v6732_v48, %v6309_v49  ;;  %v6312_v9 = vadd.f32 %v16952_v19, %v20013_v62  ;;  %17209 = vmatprep.mubr.msk.f32.mxu1 %vm69_vm0, %v7120_v10  ;;  %v7122_v48 = vld [vmem:[#allocation3 + $0x288] sm:$0xff] }
 0x45a   :  { %17313 = vmatprep.mubr.msk.f32.mxu0 %vm69_vm0, %v7830_v41  ;;  %v6032_v2 = vpop.f32.mrf.mxu1  ;;  %v7832_v62 = vld [vmem:[#allocation3 + $0x289] sm:$0xff] }
 0x45b   :  { %v6742_v17 = vpop.f32.mrf.mxu0  ;;  %v20372_v36 = vadd.f32 %v17056_v15, %v6312_v9  ;;  %v6311_v1 = vadd.f32 %v6032_v2, %v20019_v14  ;;  %v7123_v9 = vld [vmem:[#allocation3 + $0x290] sm:$0xff] }
 0x45c   :  { %v16955_v35 = vpop.f32.mrf.mxu1  ;;  %17210 = vmatmul.mubr.msk.f32.gmra.mxu1 %vm69_vm0, %v7121_v54  ;;  %v7833_v2 = vld [vmem:[#allocation3 + $0x291] sm:$0xff] }
 0x45d   :  { %v17059_v7 = vpop.f32.mrf.mxu0  ;;  %17314 = vmatmul.mubr.msk.f32.gmra.mxu0 %vm69_vm0, %v7831_v47  ;;  %v20377_v49 = vadd.f32 %v6742_v17, %v6311_v1  ;;  %v6314_v19 = vadd.f32 %v16955_v35, %v20025_v3  ;;  %17212 = vmatprep.mubr.msk.f32.mxu1 %vm69_vm0, %v7122_v48  ;;  %v7124_v17 = vld [vmem:[#allocation3 + $0x2a0] sm:$0xff] }
 0x45e   :  { %17316 = vmatprep.mubr.msk.f32.mxu0 %vm69_vm0, %v7832_v62  ;;  %v6042_v15 = vpop.f32.mrf.mxu1  ;;  %v7834_v3 = vld [vmem:[#allocation3 + $0x2a1] sm:$0xff] }
 0x45f   :  { %v6752_v14 = vpop.f32.mrf.mxu0  ;;  %v20382_v10 = vadd.f32 %v17059_v7, %v6314_v19  ;;  %v6313_v41 = vadd.f32 %v6042_v15, %v20031_v23  ;;  %v7125_v19 = vld [vmem:[#allocation3 + $0x2a8] sm:$0xff] }
 0x460   :  { %v16958_v54 = vpop.f32.mrf.mxu1  ;;  %17213 = vmatmul.mubr.msk.f32.gmra.mxu1 %vm69_vm0, %v7123_v9  ;;  %v7835_v15 = vld [vmem:[#allocation3 + $0x2a9] sm:$0xff] }
 0x461   :  { %v17062_v47 = vpop.f32.mrf.mxu0  ;;  %17317 = vmatmul.mubr.msk.f32.gmra.mxu0 %vm69_vm0, %v7833_v2  ;;  %v20387_v1 = vadd.f32 %v6752_v14, %v6313_v41  ;;  %v6316_v35 = vadd.f32 %v16958_v54, %v20037_v20  ;;  %17215 = vmatprep.mubr.msk.f32.mxu1 %vm69_vm0, %v7124_v17  ;;  %v7126_v14 = vld [vmem:[#allocation3 + $0x2b8] sm:$0xff] }
 0x462   :  { %17319 = vmatprep.mubr.msk.f32.mxu0 %vm69_vm0, %v7834_v3  ;;  %v6052_v7 = vpop.f32.mrf.mxu1  ;;  %v7836_v20 = vld [vmem:[#allocation3 + $0x2b9] sm:$0xff] }
 0x463   :  { %v6762_v23 = vpop.f32.mrf.mxu0  ;;  %v20392_v48 = vadd.f32 %v17062_v47, %v6316_v35  ;;  %v6315_v62 = vadd.f32 %v6052_v7, %v20043_v0  ;;  %v23019_v3 = vld [vmem:[#allocation39_spill] sm:$0xff] }
 0x464   :  { %v16961_v9 = vpop.f32.mrf.mxu1  ;;  %17216 = vmatmul.mubr.msk.f32.gmra.mxu1 %vm69_vm0, %v7125_v19  ;;  %v7127_v7 = vld [vmem:[#allocation3 + $0x2c0] sm:$0xff] }
 0x465   :  { %23017 = vst [vmem:[#allocation47_spill] sm:$0xff] %v20392_v48  ;;  %v17065_v2 = vpop.f32.mrf.mxu0  ;;  %17320 = vmatmul.mubr.msk.f32.gmra.mxu0 %vm69_vm0, %v7835_v15  ;;  %v20397_v41 = vadd.f32 %v6762_v23, %v6315_v62  ;;  %v6318_v54 = vadd.f32 %v16961_v9, %v20049_v6  ;;  %17218 = vmatprep.mubr.msk.f32.mxu1 %vm69_vm0, %v7126_v14  ;;  %v7837_v19 = vld [vmem:[#allocation3 + $0x2c1] sm:$0xff]  ;;  %v7128_v6 = vld [vmem:[#allocation3 + $0x2d0] sm:$0xff] }
 0x466   :  { %17322 = vmatprep.mubr.msk.f32.mxu0 %vm69_vm0, %v7836_v20  ;;  %v6062_v47 = vpop.f32.mrf.mxu1  ;;  %v7838_v23 = vld [vmem:[#allocation3 + $0x2d1] sm:$0xff] }
 0x467   :  { %v20402_v0 = vpop.f32.mrf.mxu0  ;;  %v20404_v17 = vadd.f32 %v17065_v2, %v6318_v54  ;;  %v20407_v35 = vadd.f32 %v6062_v47, %v23019_v3  ;;  %v23021_v62 = vld [vmem:[#allocation45_spill] sm:$0xff]  ;;  %v7129_v3 = vld [vmem:[#allocation3 + $0x2d8] sm:$0xff] }
 0x468   :  { %23018 = vst [vmem:[#allocation17_spill] sm:$0xff] %v20402_v0  ;;  %v16964_v15 = vpop.f32.mrf.mxu1  ;;  %17219 = vmatmul.mubr.msk.f32.gmra.mxu1 %vm69_vm0, %v7127_v7  ;;  %v23023_v54 = vld [vmem:[#allocation29_spill] sm:$0xff]  ;;  %v7839_v7 = vld [vmem:[#allocation3 + $0x2d9] sm:$0xff] }
 0x469   :  { %23020 = vst [vmem:[#allocation25_spill] sm:$0xff] %v20407_v35  ;;  %v17068_v48 = vpop.f32.mrf.mxu0  ;;  %17323 = vmatmul.mubr.msk.f32.gmra.mxu0 %vm69_vm0, %v7837_v19  ;;  %v6320_v9 = vadd.f32 %v16964_v15, %v23021_v62  ;;  %17221 = vmatprep.mubr.msk.f32.mxu1 %vm69_vm0, %v7128_v6  ;;  %v7130_v15 = vld [vmem:[#allocation3 + $0x2e8] sm:$0xff]  ;;  %v23025_v62 = vld [vmem:[#allocation18_spill] sm:$0xff] }
 0x46a   :  { %17325 = vmatprep.mubr.msk.f32.mxu0 %vm69_vm0, %v7838_v23  ;;  %v6072_v2 = vpop.f32.mrf.mxu1  ;;  %v7840_v6 = vld [vmem:[#allocation3 + $0x2e9] sm:$0xff] }
 0x46b   :  { %v20414_v14 = vpop.f32.mrf.mxu0  ;;  %v20416_v20 = vadd.f32 %v17068_v48, %v6320_v9  ;;  %v20419_v47 = vadd.f32 %v6072_v2, %v23023_v54  ;;  %v23027_v54 = vld [vmem:[#allocation27_spill] sm:$0xff] }
 0x46c   :  { %23022 = vst [vmem:[#allocation24_spill] sm:$0xff] %v20414_v14  ;;  %v16967_v0 = vpop.f32.mrf.mxu1  ;;  %17222 = vmatmul.mubr.msk.f32.gmra.mxu1 %vm69_vm0, %v7129_v3  ;;  %v7841_v3 = vld [vmem:[#allocation3 + $0x2f1] sm:$0xff] }
 0x46d   :  { %23024 = vst [vmem:[#allocation32_spill] sm:$0xff] %v20419_v47  ;;  %v17071_v19 = vpop.f32.mrf.mxu0  ;;  %17326 = vmatmul.mubr.msk.f32.gmra.mxu0 %vm69_vm0, %v7839_v7  ;;  %v6322_v23 = vadd.f32 %v16967_v0, %v23025_v62  ;;  %17224 = vmatprep.mubr.msk.f32.mxu1 %vm69_vm0, %v7130_v15  ;;  %v7131_v47 = vld [vmem:[#allocation3 + $0x2f0] sm:$0xff]  ;;  %v7132_v0 = vld [vmem:[#allocation3 + $0x300] sm:$0xff] }
 0x46e   :  { %17328 = vmatprep.mubr.msk.f32.mxu0 %vm69_vm0, %v7840_v6  ;;  %v6082_v48 = vpop.f32.mrf.mxu1  ;;  %v7842_v15 = vld [vmem:[#allocation3 + $0x301] sm:$0xff]  ;;  %v23029_v62 = vld [vmem:[#allocation26_spill] sm:$0xff] }
 0x46f   :  { %v20426_v9 = vpop.f32.mrf.mxu0  ;;  %v20428_v2 = vadd.f32 %v17071_v19, %v6322_v23  ;;  %v20431_v14 = vadd.f32 %v6082_v48, %v23027_v54 }
 0x470   :  { %23026 = vst [vmem:[#allocation44_spill] sm:$0xff] %v20426_v9  ;;  %v16970_v35 = vpop.f32.mrf.mxu1  ;;  %17225 = vmatmul.mubr.msk.f32.gmra.mxu1 %vm69_vm0, %v7131_v47  ;;  %v7133_v9 = vld [vmem:[#allocation3 + $0x308] sm:$0xff] }
 0x471   :  { %23028 = vst [vmem:[#allocation38_spill] sm:$0xff] %v20431_v14  ;;  %v17074_v7 = vpop.f32.mrf.mxu0  ;;  %17329 = vmatmul.mubr.msk.f32.gmra.mxu0 %vm69_vm0, %v7841_v3  ;;  %v6324_v6 = vadd.f32 %v16970_v35, %v23029_v62  ;;  %17227 = vmatprep.mubr.msk.f32.mxu1 %vm69_vm0, %v7132_v0  ;;  %v7843_v47 = vld [vmem:[#allocation3 + $0x309] sm:$0xff]  ;;  %v7134_v35 = vld [vmem:[#allocation3 + $0x318] sm:$0xff] }
 0x472   :  { %17331 = vmatprep.mubr.msk.f32.mxu0 %vm69_vm0, %v7842_v15  ;;  %v6092_v19 = vpop.f32.mrf.mxu1  ;;  %v7844_v0 = vld [vmem:[#allocation3 + $0x319] sm:$0xff] }
 0x473   :  { %v20438_v23 = vpop.f32.mrf.mxu0  ;;  %v20440_v48 = vadd.f32 %v17074_v7, %v6324_v6  ;;  %v20443_v54 = vadd.f32 %v6092_v19, %v20091_v18  ;;  %v23033_v62 = vld [vmem:[#allocation35_spill] sm:$0xff] }
 0x474   :  { %23030 = vst [vmem:[#allocation19_spill] sm:$0xff] %v20438_v23  ;;  %v16973_v14 = vpop.f32.mrf.mxu1  ;;  %17228 = vmatmul.mubr.msk.f32.gmra.mxu1 %vm69_vm0, %v7133_v9  ;;  %v7135_v23 = vld [vmem:[#allocation3 + $0x320] sm:$0xff] }
 0x475   :  { %23031 = vst [vmem:[#allocation22_spill] sm:$0xff] %v20440_v48  ;;  %23032 = vst [vmem:[#allocation33_spill] sm:$0xff] %v20443_v54  ;;  %v17077_v3 = vpop.f32.mrf.mxu0  ;;  %17332 = vmatmul.mubr.msk.f32.gmra.mxu0 %vm69_vm0, %v7843_v47  ;;  %v6326_v15 = vadd.f32 %v16973_v14, %v23033_v62  ;;  %17230 = vmatprep.mubr.msk.f32.mxu1 %vm69_vm0, %v7134_v35  ;;  %v7845_v9 = vld [vmem:[#allocation3 + $0x321] sm:$0xff]  ;;  %v7136_v14 = vld [vmem:[#allocation3 + $0x330] sm:$0xff] }
 0x476   :  { %17334 = vmatprep.mubr.msk.f32.mxu0 %vm69_vm0, %v7844_v0  ;;  %v6102_v7 = vpop.f32.mrf.mxu1  ;;  %v7846_v35 = vld [vmem:[#allocation3 + $0x331] sm:$0xff] }
 0x477   :  { %v20450_v6 = vpop.f32.mrf.mxu0  ;;  %v20452_v18 = vadd.f32 %v17077_v3, %v6326_v15  ;;  %v20455_v19 = vadd.f32 %v6102_v7, %v20103_v51  ;;  %v23037_v62 = vld [vmem:[#allocation41_spill] sm:$0xff] }
 0x478   :  { %23034 = vst [vmem:[#allocation40_spill] sm:$0xff] %v20450_v6  ;;  %v16976_v54 = vpop.f32.mrf.mxu1  ;;  %17231 = vmatmul.mubr.msk.f32.gmra.mxu1 %vm69_vm0, %v7135_v23  ;;  %v7138_v51 = vld [vmem:[#allocation3 + $0x348] sm:$0xff]  ;;  %v7137_v23 = vld [vmem:[#allocation3 + $0x338] sm:$0xff] }
 0x479   :  { %23035 = vst [vmem:[#allocation21_spill] sm:$0xff] %v20452_v18  ;;  %23036 = vst [vmem:[#allocation31_spill] sm:$0xff] %v20455_v19  ;;  %v17080_v47 = vpop.f32.mrf.mxu0  ;;  %17335 = vmatmul.mubr.msk.f32.gmra.mxu0 %vm69_vm0, %v7845_v9  ;;  %v6328_v0 = vadd.f32 %v16976_v54, %v23037_v62  ;;  %17233 = vmatprep.mubr.msk.f32.mxu1 %vm69_vm0, %v7136_v14  ;;  %v7848_v7 = vld [vmem:[#allocation3 + $0x349] sm:$0xff]  ;;  %v7847_v9 = vld [vmem:[#allocation3 + $0x339] sm:$0xff] }
 0x47a   :  { %17337 = vmatprep.mubr.msk.f32.mxu0 %vm69_vm0, %v7846_v35  ;;  %v6112_v3 = vpop.f32.mrf.mxu1  ;;  %v7139_v14 = vld [vmem:[#allocation3 + $0x350] sm:$0xff] }
 0x47b   :  { %v20462_v15 = vpop.f32.mrf.mxu0  ;;  %v20464_v6 = vadd.f32 %v17080_v47, %v6328_v0  ;;  %v20467_v19 = vadd.f32 %v6112_v3, %v20115_v44  ;;  %v7849_v47 = vld [vmem:[#allocation3 + $0x351] sm:$0xff] }
 0x47c   :  { %23038 = vst [vmem:[#allocation30_spill] sm:$0xff] %v20462_v15  ;;  %v16979_v18 = vpop.f32.mrf.mxu1  ;;  %17234 = vmatmul.mubr.msk.f32.gmra.mxu1 %vm69_vm0, %v7137_v23  ;;  %v8521_v15 = vld [vmem:[#allocation3 + $0x15a] sm:$0xff] }
 0x47d   :  { %23039 = vst [vmem:[#allocation13_spill] sm:$0xff] %v20467_v19  ;;  %v17083_v48 = vpop.f32.mrf.mxu0  ;;  %17338 = vmatmul.mubr.msk.f32.gmra.mxu0 %vm69_vm0, %v7847_v9  ;;  %v6330_v54 = vadd.f32 %v16979_v18, %v20120_v56  ;;  %17236 = vmatprep.mubr.msk.f32.mxu1 %vm69_vm0, %v7138_v51  ;;  %v8496_v9 = vld [vmem:[#allocation3 + $0x32] sm:$0xff]  ;;  %v8522_v19 = vld [vmem:[#allocation3 + $0x16a] sm:$0xff] }
 0x47e   :  { %17340 = vmatprep.mubr.msk.f32.mxu0 %vm69_vm0, %v7848_v7  ;;  %v6122_v35 = vpop.f32.mrf.mxu1 }
 0x47f   :  { %v20474_v62 = vpop.f32.mrf.mxu0  ;;  %v20476_v44 = vadd.f32 %v17083_v48, %v6330_v54  ;;  %v20479_v0 = vadd.f32 %v6122_v35, %v20125_v55  ;;  %v8497_v55 = vld [vmem:[#allocation3 + $0x3a] sm:$0xff] }
 0x480   :  { %23040 = vst [vmem:[#allocation34_spill] sm:$0xff] %v20474_v62  ;;  %v16982_v3 = vpop.f32.mrf.mxu1  ;;  %17237 = vmatmul.mubr.msk.f32.gmra.mxu1 %vm69_vm0, %v7139_v14  ;;  %v8498_v14 = vld [vmem:[#allocation3 + $0x4a] sm:$0xff] }
 0x481   :  { %23041 = vst [vmem:[#allocation43_spill] sm:$0xff] %v20479_v0  ;;  %v17086_v23 = vpop.f32.mrf.mxu0  ;;  %17341 = vmatmul.mubr.msk.f32.gmra.mxu0 %vm69_vm0, %v7849_v47  ;;  %v6332_v56 = vadd.f32 %v16982_v3, %v20131_v21  ;;  %17351 = vmatprep.mubr.msk.f32.mxu1 %vm69_vm0, %v8496_v9  ;;  %v8506_v62 = vld [vmem:[#allocation3 + $0xaa] sm:$0xff]  ;;  %v8520_v0 = vld [vmem:[#allocation3 + $0x152] sm:$0xff] }
 0x482   :  { %v6132_v18 = vpop.f32.mrf.mxu1 }
 0x483   :  { %v20485_v51 = vpop.f32.mrf.mxu0  ;;  %v20487_v7 = vadd.f32 %v17086_v23, %v6332_v56  ;;  %v20490_v48 = vadd.f32 %v6132_v18, %v20137_v52  ;;  %v8499_v52 = vld [vmem:[#allocation3 + $0x52] sm:$0xff] }
 0x484   :  { %23042 = vst [vmem:[#allocation36_spill] sm:$0xff] %v20485_v51  ;;  %v16985_v54 = vpop.f32.mrf.mxu1  ;;  %17352 = vmatmul.mubr.msk.f32.vlgmr.msra.gmra.mxu1 %vm69_vm0, %v8497_v55  ;;  %v8500_v51 = vld [vmem:[#allocation3 + $0x62] sm:$0xff] }
 0x485   :  { %23043 = vst [vmem:[#allocation50_spill] sm:$0xff] %v20490_v48  ;;  %v17089_v35 = vpop.f32.mrf.mxu0  ;;  %v6334_v47 = vadd.f32 %v16985_v54, %v20144_v63  ;;  %17354 = vmatprep.mubr.msk.f32.mxu1 %vm69_vm0, %v8498_v14 }
 0x486   :  { %v6142_v21 = vpop.f32.mrf.mxu1 }
 0x487   :  { %v20495_v3 = vpop.f32.mrf.mxu0  ;;  %v20497_v9 = vadd.f32 %v17089_v35, %v6334_v47  ;;  %v20500_v23 = vadd.f32 %v6142_v21, %v20150_v58  ;;  %v8501_v58 = vld [vmem:[#allocation3 + $0x6a] sm:$0xff] }
 0x488   :  { %23044 = vst [vmem:[#allocation23_spill] sm:$0xff] %v20495_v3  ;;  %v16988_v56 = vpop.f32.mrf.mxu1  ;;  %17355 = vmatmul.mubr.msk.f32.gmra.mxu1 %vm69_vm0, %v8499_v52  ;;  %v8502_v3 = vld [vmem:[#allocation3 + $0x7a] sm:$0xff] }
 0x489   :  { %23045 = vst [vmem:[#allocation16_spill] sm:$0xff] %v20500_v23  ;;  %v17092_v18 = vpop.f32.mrf.mxu0  ;;  %v6336_v55 = vadd.f32 %v16988_v56, %v20156_v38  ;;  %17357 = vmatprep.mubr.msk.f32.mxu1 %vm69_vm0, %v8500_v51 }
 0x48a   :  { %v6152_v63 = vpop.f32.mrf.mxu1 }
 0x48b   :  { %v20505_v54 = vpop.f32.mrf.mxu0  ;;  %v20507_v14 = vadd.f32 %v17092_v18, %v6336_v55  ;;  %v20510_v35 = vadd.f32 %v6152_v63, %v20162_v11  ;;  %v8503_v55 = vld [vmem:[#allocation3 + $0x82] sm:$0xff]  ;;  %v8504_v63 = vld [vmem:[#allocation3 + $0x92] sm:$0xff] }
 0x48c   :  { %v16991_v47 = vpop.f32.mrf.mxu1  ;;  %17358 = vmatmul.mubr.msk.f32.gmra.mxu1 %vm69_vm0, %v8501_v58 }
 0x48d   :  { %v17095_v21 = vpop.f32.mrf.mxu0  ;;  %v6338_v52 = vadd.f32 %v16991_v47, %v20168_v12  ;;  %17360 = vmatprep.mubr.msk.f32.mxu1 %vm69_vm0, %v8502_v3 }
 0x48e   :  { %v6162_v38 = vpop.f32.mrf.mxu1 }
 0x48f   :  { %v6872_v51 = vpop.f32.mrf.mxu0  ;;  %v20515_v56 = vadd.f32 %v17095_v21, %v6338_v52  ;;  %v6337_v18 = vadd.f32 %v6162_v38, %v20174_v57  ;;  %v8505_v52 = vld [vmem:[#allocation3 + $0x9a] sm:$0xff] }
 0x490   :  { %v16994_v23 = vpop.f32.mrf.mxu1  ;;  %17361 = vmatmul.mubr.msk.f32.gmra.mxu1 %vm69_vm0, %v8503_v55 }
 0x491   :  { %v17098_v11 = vpop.f32.mrf.mxu0  ;;  %v20519_v48 = vadd.f32 %v6872_v51, %v6337_v18  ;;  %v6340_v58 = vadd.f32 %v16994_v23, %v20180_v50  ;;  %17363 = vmatprep.mubr.msk.f32.mxu1 %vm69_vm0, %v8504_v63  ;;  %v8507_v63 = vld [vmem:[#allocation3 + $0xb2] sm:$0xff] }
 0x492   :  { %v6172_v12 = vpop.f32.mrf.mxu1 }
 0x493   :  { %v6882_v3 = vpop.f32.mrf.mxu0  ;;  %v20523_v47 = vadd.f32 %v17098_v11, %v6340_v58  ;;  %v6339_v21 = vadd.f32 %v6172_v12, %v20186_v22  ;;  %v8508_v12 = vld [vmem:[#allocation3 + $0xc2] sm:$0xff] }
 0x494   :  { %v16997_v57 = vpop.f32.mrf.mxu1  ;;  %17364 = vmatmul.mubr.msk.f32.gmra.mxu1 %vm69_vm0, %v8505_v52 }
 0x495   :  { %v17101_v38 = vpop.f32.mrf.mxu0  ;;  %v20527_v55 = vadd.f32 %v6882_v3, %v6339_v21  ;;  %v6342_v51 = vadd.f32 %v16997_v57, %v20192_v16  ;;  %17366 = vmatprep.mubr.msk.f32.mxu1 %vm69_vm0, %v8506_v62 }
 0x496   :  { %v6182_v50 = vpop.f32.mrf.mxu1 }
 0x497   :  { %v6892_v23 = vpop.f32.mrf.mxu0  ;;  %v20531_v18 = vadd.f32 %v17101_v38, %v6342_v51  ;;  %v6341_v11 = vadd.f32 %v6182_v50, %v20198_v61  ;;  %v8509_v38 = vld [vmem:[#allocation3 + $0xca] sm:$0xff]  ;;  %v8510_v50 = vld [vmem:[#allocation3 + $0xda] sm:$0xff] }
 0x498   :  { %v17000_v22 = vpop.f32.mrf.mxu1  ;;  %17367 = vmatmul.mubr.msk.f32.gmra.mxu1 %vm69_vm0, %v8507_v63 }
 0x499   :  { %v17104_v58 = vpop.f32.mrf.mxu0  ;;  %v20535_v52 = vadd.f32 %v6892_v23, %v6341_v11  ;;  %v6344_v3 = vadd.f32 %v17000_v22, %v20204_v33  ;;  %17369 = vmatprep.mubr.msk.f32.mxu1 %vm69_vm0, %v8508_v12  ;;  %v8511_v12 = vld [vmem:[#allocation3 + $0xe2] sm:$0xff] }
 0x49a   :  { %v6192_v16 = vpop.f32.mrf.mxu1 }
 0x49b   :  { %v6902_v62 = vpop.f32.mrf.mxu0  ;;  %v20539_v21 = vadd.f32 %v17104_v58, %v6344_v3  ;;  %v6343_v57 = vadd.f32 %v6192_v16, %v20210_v4  ;;  %v8512_v16 = vld [vmem:[#allocation3 + $0xf2] sm:$0xff] }
 0x49c   :  { %v17003_v61 = vpop.f32.mrf.mxu1  ;;  %17370 = vmatmul.mubr.msk.f32.gmra.mxu1 %vm69_vm0, %v8509_v38 }
 0x49d   :  { %v17107_v51 = vpop.f32.mrf.mxu0  ;;  %v20543_v63 = vadd.f32 %v6902_v62, %v6343_v57  ;;  %v6346_v23 = vadd.f32 %v17003_v61, %v20216_v60  ;;  %17372 = vmatprep.mubr.msk.f32.mxu1 %vm69_vm0, %v8510_v50  ;;  %v8513_v50 = vld [vmem:[#allocation3 + $0xfa] sm:$0xff] }
 0x49e   :  { %v6202_v33 = vpop.f32.mrf.mxu1 }
 0x49f   :  { %v6912_v11 = vpop.f32.mrf.mxu0  ;;  %v20547_v22 = vadd.f32 %v17107_v51, %v6346_v23  ;;  %v6345_v58 = vadd.f32 %v6202_v33, %v20222_v53  ;;  %v8514_v33 = vld [vmem:[#allocation3 + $0x10a] sm:$0xff] }
 0x4a0   :  { %v17006_v4 = vpop.f32.mrf.mxu1  ;;  %17373 = vmatmul.mubr.msk.f32.gmra.mxu1 %vm69_vm0, %v8511_v12 }
 0x4a1   :  { %v17110_v3 = vpop.f32.mrf.mxu0  ;;  %v20551_v38 = vadd.f32 %v6912_v11, %v6345_v58  ;;  %v6348_v62 = vadd.f32 %v17006_v4, %v20228_v40  ;;  %17375 = vmatprep.mubr.msk.f32.mxu1 %vm69_vm0, %v8512_v16  ;;  %v8515_v16 = vld [vmem:[#allocation3 + $0x112] sm:$0xff] }
 0x4a2   :  { %v6212_v60 = vpop.f32.mrf.mxu1 }
 0x4a3   :  { %v6922_v57 = vpop.f32.mrf.mxu0  ;;  %v20555_v61 = vadd.f32 %v17110_v3, %v6348_v62  ;;  %v6347_v51 = vadd.f32 %v6212_v60, %v20234_v39  ;;  %v8516_v60 = vld [vmem:[#allocation3 + $0x122] sm:$0xff] }
 0x4a4   :  { %v17009_v53 = vpop.f32.mrf.mxu1  ;;  %17376 = vmatmul.mubr.msk.f32.gmra.mxu1 %vm69_vm0, %v8513_v50 }
 0x4a5   :  { %v17113_v23 = vpop.f32.mrf.mxu0  ;;  %v20559_v12 = vadd.f32 %v6922_v57, %v6347_v51  ;;  %v6350_v11 = vadd.f32 %v17009_v53, %v20240_v8  ;;  %17378 = vmatprep.mubr.msk.f32.mxu1 %vm69_vm0, %v8514_v33  ;;  %v8517_v33 = vld [vmem:[#allocation3 + $0x12a] sm:$0xff] }
 0x4a6   :  { %v6222_v40 = vpop.f32.mrf.mxu1 }
 0x4a7   :  { %v6932_v58 = vpop.f32.mrf.mxu0  ;;  %v20563_v4 = vadd.f32 %v17113_v23, %v6350_v11  ;;  %v6349_v3 = vadd.f32 %v6222_v40, %v20246_v24  ;;  %v8518_v40 = vld [vmem:[#allocation3 + $0x13a] sm:$0xff] }
 0x4a8   :  { %v17012_v39 = vpop.f32.mrf.mxu1  ;;  %17379 = vmatmul.mubr.msk.f32.gmra.mxu1 %vm69_vm0, %v8515_v16 }
 0x4a9   :  { %v17116_v62 = vpop.f32.mrf.mxu0  ;;  %v20567_v50 = vadd.f32 %v6932_v58, %v6349_v3  ;;  %v6352_v57 = vadd.f32 %v17012_v39, %v20252_v5  ;;  %17381 = vmatprep.mubr.msk.f32.mxu1 %vm69_vm0, %v8516_v60 }
 0x4aa   :  { %v6232_v8 = vpop.f32.mrf.mxu1 }
 0x4ab   :  { %v6942_v51 = vpop.f32.mrf.mxu0  ;;  %v20571_v53 = vadd.f32 %v17116_v62, %v6352_v57  ;;  %v6351_v23 = vadd.f32 %v6232_v8, %v20257_v30  ;;  %v23046_v62 = vld [vmem:[#allocation46_spill] sm:$0xff]  ;;  %v8519_v57 = vld [vmem:[#allocation3 + $0x142] sm:$0xff] }
 0x4ac   :  { %v17015_v24 = vpop.f32.mrf.mxu1  ;;  %17382 = vmatmul.mubr.msk.f32.gmra.mxu1 %vm69_vm0, %v8517_v33 }
 0x4ad   :  { %v17119_v11 = vpop.f32.mrf.mxu0  ;;  %v20575_v16 = vadd.f32 %v6942_v51, %v6351_v23  ;;  %v6354_v58 = vadd.f32 %v17015_v24, %v20262_v37  ;;  %17384 = vmatprep.mubr.msk.f32.mxu1 %vm69_vm0, %v8518_v40  ;;  %v23047_v51 = vld [vmem:[#allocation49_spill] sm:$0xff] }
 0x4ae   :  { %v6242_v5 = vpop.f32.mrf.mxu1 }
 0x4af   :  { %v6952_v3 = vpop.f32.mrf.mxu0  ;;  %v20579_v39 = vadd.f32 %v17119_v11, %v6354_v58  ;;  %v6353_v60 = vadd.f32 %v6242_v5, %v23046_v62  ;;  %v23049_v11 = vld [vmem:[#allocation14_spill] sm:$0xff] }
 0x4b0   :  { %v17018_v30 = vpop.f32.mrf.mxu1  ;;  %17385 = vmatmul.mubr.msk.f32.gmra.mxu1 %vm69_vm0, %v8519_v57 }
 0x4b1   :  { %v17122_v8 = vpop.f32.mrf.mxu0  ;;  %v20583_v33 = vadd.f32 %v6952_v3, %v6353_v60  ;;  %v6356_v23 = vadd.f32 %v17018_v30, %v23047_v51  ;;  %17387 = vmatprep.mubr.msk.f32.mxu1 %vm69_vm0, %v8520_v0  ;;  %v23051_v3 = vld [vmem:[#allocation15_spill] sm:$0xff] }
 0x4b2   :  { %v6252_v37 = vpop.f32.mrf.mxu1 }
 0x4b3   :  { %v6962_v24 = vpop.f32.mrf.mxu0  ;;  %v20587_v40 = vadd.f32 %v17122_v8, %v6356_v23  ;;  %v6355_v58 = vadd.f32 %v6252_v37, %v23049_v11  ;;  %v8523_v23 = vld [vmem:[#allocation3 + $0x172] sm:$0xff] }
 0x4b4   :  { %v17021_v5 = vpop.f32.mrf.mxu1  ;;  %17388 = vmatmul.mubr.msk.f32.gmra.mxu1 %vm69_vm0, %v8521_v15 }
 0x4b5   :  { %23048 = vst [vmem:[#allocation51_spill] sm:$0xff] %v20587_v40  ;;  %v17125_v62 = vpop.f32.mrf.mxu0  ;;  %v20591_v57 = vadd.f32 %v6962_v24, %v6355_v58  ;;  %v6358_v60 = vadd.f32 %v17021_v5, %v23051_v3  ;;  %17390 = vmatprep.mubr.msk.f32.mxu1 %vm69_vm0, %v8522_v19  ;;  %v8524_v40 = vld [vmem:[#allocation3 + $0x182] sm:$0xff]  ;;  %v8526_v3 = vld [vmem:[#allocation3 + $0x19a] sm:$0xff] }
 0x4b6   :  { %v6262_v30 = vpop.f32.mrf.mxu1  ;;  %v23053_v24 = vld [vmem:[#allocation20_spill] sm:$0xff] }
 0x4b7   :  { %23050 = vst [vmem:[#allocation52_spill] sm:$0xff] %v20591_v57  ;;  %v6972_v0 = vpop.f32.mrf.mxu0  ;;  %v20595_v51 = vadd.f32 %v17125_v62, %v6358_v60  ;;  %v6357_v8 = vadd.f32 %v6262_v30, %v20287_v25  ;;  %v8525_v25 = vld [vmem:[#allocation3 + $0x18a] sm:$0xff] }
 0x4b8   :  { %v17024_v37 = vpop.f32.mrf.mxu1  ;;  %17391 = vmatmul.mubr.msk.f32.gmra.mxu1 %vm69_vm0, %v8523_v23 }
 0x4b9   :  { %v17128_v11 = vpop.f32.mrf.mxu0  ;;  %v20599_v15 = vadd.f32 %v6972_v0, %v6357_v8  ;;  %v6360_v58 = vadd.f32 %v17024_v37, %v23053_v24  ;;  %17393 = vmatprep.mubr.msk.f32.mxu1 %vm69_vm0, %v8524_v40  ;;  %v23055_v0 = vld [vmem:[#allocation37_spill] sm:$0xff]  ;;  %v8527_v37 = vld [vmem:[#allocation3 + $0x1a2] sm:$0xff] }
 0x4ba   :  { %v6272_v5 = vpop.f32.mrf.mxu1 }
 0x4bb   :  { %23052 = vst [vmem:[#allocation55_spill] sm:$0xff] %v20599_v15  ;;  %v6982_v19 = vpop.f32.mrf.mxu0  ;;  %v20603_v57 = vadd.f32 %v17128_v11, %v6360_v58  ;;  %v6359_v62 = vadd.f32 %v6272_v5, %v20297_v43  ;;  %v8528_v5 = vld [vmem:[#allocation3 + $0x1e2] sm:$0xff] }
 0x4bc   :  { %v17027_v60 = vpop.f32.mrf.mxu1  ;;  %17394 = vmatmul.mubr.msk.f32.gmra.mxu1 %vm69_vm0, %v8525_v25 }
 0x4bd   :  { %23054 = vst [vmem:[#allocation53_spill] sm:$0xff] %v20603_v57  ;;  %v17131_v30 = vpop.f32.mrf.mxu0  ;;  %v20607_v23 = vadd.f32 %v6982_v19, %v6359_v62  ;;  %v6362_v8 = vadd.f32 %v17027_v60, %v23055_v0  ;;  %17396 = vmatprep.mubr.msk.f32.mxu1 %vm69_vm0, %v8526_v3  ;;  %v23056_v19 = vld [vmem:[#allocation42_spill] sm:$0xff]  ;;  %v8529_v0 = vld [vmem:[#allocation3 + $0x1ea] sm:$0xff] }
 0x4be   :  { %v6282_v40 = vpop.f32.mrf.mxu1 }
 0x4bf   :  { %v6992_v24 = vpop.f32.mrf.mxu0  ;;  %v20611_v15 = vadd.f32 %v17131_v30, %v6362_v8  ;;  %v6361_v11 = vadd.f32 %v6282_v40, %v20307_v13 }
 0x4c0   :  { %v17030_v58 = vpop.f32.mrf.mxu1  ;;  %17397 = vmatmul.mubr.msk.f32.gmra.mxu1 %vm69_vm0, %v8527_v37  ;;  %v8530_v37 = vld [vmem:[#allocation3 + $0x1fa] sm:$0xff] }
 0x4c1   :  { %v17134_v43 = vpop.f32.mrf.mxu0  ;;  %v20615_v57 = vadd.f32 %v6992_v24, %v6361_v11  ;;  %v6364_v62 = vadd.f32 %v17030_v58, %v23056_v19  ;;  %17399 = vmatprep.mubr.msk.f32.mxu1 %vm69_vm0, %v8528_v5  ;;  %v8532_v19 = vld [vmem:[#allocation3 + $0x212] sm:$0xff] }
 0x4c2   :  { %v6292_v25 = vpop.f32.mrf.mxu1 }
 0x4c3   :  { %v7002_v3 = vpop.f32.mrf.mxu0  ;;  %v20619_v60 = vadd.f32 %v17134_v43, %v6364_v62  ;;  %v6363_v30 = vadd.f32 %v6292_v25, %v20317_v28  ;;  %v8531_v43 = vld [vmem:[#allocation3 + $0x202] sm:$0xff] }
 0x4c4   :  { %v17145_v8 = vpop.f32.mrf.mxu1  ;;  %17400 = vmatmul.mubr.msk.f32.gmra.mxu1 %vm69_vm0, %v8529_v0  ;;  %v8534_v0 = vld [vmem:[#allocation3 + $0x22a] sm:$0xff] }
 0x4c5   :  { %v20622_v13 = vpop.f32.mrf.mxu0  ;;  %v20625_v40 = vadd.f32 %v7002_v3, %v6363_v30  ;;  %v20628_v24 = vadd.f32 %v17145_v8, %v20322_v27  ;;  %17402 = vmatprep.mubr.msk.f32.mxu1 %vm69_vm0, %v8530_v37  ;;  %v8533_v3 = vld [vmem:[#allocation3 + $0x21a] sm:$0xff] }
 0x4c6   :  { %v7403_v11 = vpop.f32.mrf.mxu1 }
 0x4c7   :  { %v20632_v58 = vadd.f32 %v7403_v11, %v20327_v45  ;;  %v20634_v28 = vpop.f32.mrf.mxu0  ;;  %v8535_v11 = vld [vmem:[#allocation3 + $0x232] sm:$0xff] }
 0x4c8   :  { %v17148_v5 = vpop.f32.mrf.mxu1  ;;  %17403 = vmatmul.mubr.msk.f32.gmra.mxu1 %vm69_vm0, %v8531_v43 }
 0x4c9   :  { %v20638_v62 = vadd.f32 %v17148_v5, %v20332_v59  ;;  %17405 = vmatprep.mubr.msk.f32.mxu1 %vm69_vm0, %v8532_v19  ;;  %v20644_v30 = vpop.f32.mrf.mxu0  ;;  %v8536_v5 = vld [vmem:[#allocation3 + $0x242] sm:$0xff] }
 0x4ca   :  { %v7413_v27 = vpop.f32.mrf.mxu1 }
 0x4cb   :  { %v20642_v25 = vadd.f32 %v7413_v27, %v20337_v31  ;;  %v20654_v43 = vpop.f32.mrf.mxu0 }
 0x4cc   :  { %v17151_v45 = vpop.f32.mrf.mxu1  ;;  %17406 = vmatmul.mubr.msk.f32.gmra.mxu1 %vm69_vm0, %v8533_v3  ;;  %v8537_v3 = vld [vmem:[#allocation3 + $0x24a] sm:$0xff] }
 0x4cd   :  { %v20648_v8 = vadd.f32 %v17151_v45, %v20342_v26  ;;  %17408 = vmatprep.mubr.msk.f32.mxu1 %vm69_vm0, %v8534_v0  ;;  %v20664_v45 = vpop.f32.mrf.mxu0  ;;  %v8538_v0 = vld [vmem:[#allocation3 + $0x25a] sm:$0xff] }
 0x4ce   :  { %v7423_v59 = vpop.f32.mrf.mxu1 }
 0x4cf   :  { %v20652_v37 = vadd.f32 %v7423_v59, %v20347_v34 }
 0x4d0   :  { %v17154_v31 = vpop.f32.mrf.mxu1  ;;  %17409 = vmatmul.mubr.msk.f32.gmra.mxu1 %vm69_vm0, %v8535_v11 }
 0x4d1   :  { %v20658_v19 = vadd.f32 %v17154_v31, %v20352_v29  ;;  %17411 = vmatprep.mubr.msk.f32.mxu1 %vm69_vm0, %v8536_v5  ;;  %v8539_v31 = vld [vmem:[#allocation3 + $0x262] sm:$0xff]  ;;  %v20674_v5 = vpop.f32.mrf.mxu0 }
 0x4d2   :  { %v7433_v26 = vpop.f32.mrf.mxu1 }
 0x4d3   :  { %v20662_v27 = vadd.f32 %v7433_v26, %v20357_v46  ;;  %v8540_v26 = vld [vmem:[#allocation3 + $0x272] sm:$0xff] }
 0x4d4   :  { %v17157_v34 = vpop.f32.mrf.mxu1  ;;  %17412 = vmatmul.mubr.msk.f32.gmra.mxu1 %vm69_vm0, %v8537_v3 }
 0x4d5   :  { %23057 = vst [vmem:[#allocation54_spill] sm:$0xff] %v20662_v27  ;;  %v20668_v59 = vadd.f32 %v17157_v34, %v20362_v32  ;;  %17414 = vmatprep.mubr.msk.f32.mxu1 %vm69_vm0, %v8538_v0  ;;  %v8541_v34 = vld [vmem:[#allocation3 + $0x27a] sm:$0xff]  ;;  %v20684_v0 = vpop.f32.mrf.mxu0 }
 0x4d6   :  { %v7443_v29 = vpop.f32.mrf.mxu1 }
 0x4d7   :  { %v20672_v11 = vadd.f32 %v7443_v29, %v20367_v42  ;;  %v8542_v29 = vld [vmem:[#allocation3 + $0x28a] sm:$0xff] }
 0x4d8   :  { %v17160_v46 = vpop.f32.mrf.mxu1  ;;  %17415 = vmatmul.mubr.msk.f32.gmra.mxu1 %vm69_vm0, %v8539_v31 }
 0x4d9   :  { %23058 = vst [vmem:[#allocation56_spill] sm:$0xff] %v20672_v11  ;;  %v20678_v27 = vadd.f32 %v17160_v46, %v20372_v36  ;;  %17417 = vmatprep.mubr.msk.f32.mxu1 %vm69_vm0, %v8540_v26  ;;  %v8543_v46 = vld [vmem:[#allocation3 + $0x292] sm:$0xff]  ;;  %v20694_v26 = vpop.f32.mrf.mxu0 }
 0x4da   :  { %v7453_v32 = vpop.f32.mrf.mxu1 }
 0x4db   :  { %23059 = vst [vmem:[#allocation57_spill] sm:$0xff] %v20678_v27  ;;  %v20682_v3 = vadd.f32 %v7453_v32, %v20377_v49  ;;  %v8544_v32 = vld [vmem:[#allocation3 + $0x2a2] sm:$0xff] }
 0x4dc   :  { %v17163_v42 = vpop.f32.mrf.mxu1  ;;  %17418 = vmatmul.mubr.msk.f32.gmra.mxu1 %vm69_vm0, %v8541_v34 }
 0x4dd   :  { %23060 = vst [vmem:[#allocation58_spill] sm:$0xff] %v20682_v3  ;;  %v20688_v11 = vadd.f32 %v17163_v42, %v20382_v10  ;;  %17420 = vmatprep.mubr.msk.f32.mxu1 %vm69_vm0, %v8542_v29  ;;  %v23062_v3 = vld [vmem:[#allocation47_spill] sm:$0xff]  ;;  %v8545_v42 = vld [vmem:[#allocation3 + $0x2aa] sm:$0xff]  ;;  %v20704_v29 = vpop.f32.mrf.mxu0 }
 0x4de   :  { %v7463_v36 = vpop.f32.mrf.mxu1 }
 0x4df   :  { %v20692_v31 = vadd.f32 %v7463_v36, %v20387_v1  ;;  %v8546_v36 = vld [vmem:[#allocation3 + $0x2ba] sm:$0xff] }
 0x4e0   :  { %v17166_v49 = vpop.f32.mrf.mxu1  ;;  %17421 = vmatmul.mubr.msk.f32.gmra.mxu1 %vm69_vm0, %v8543_v46  ;;  %v8547_v46 = vld [vmem:[#allocation3 + $0x2c2] sm:$0xff] }
 0x4e1   :  { %23061 = vst [vmem:[#allocation59_spill] sm:$0xff] %v20692_v31  ;;  %v20698_v27 = vadd.f32 %v17166_v49, %v23062_v3  ;;  %17423 = vmatprep.mubr.msk.f32.mxu1 %vm69_vm0, %v8544_v32  ;;  %v20713_v49 = vpop.f32.mrf.mxu0 }
 0x4e2   :  { %v7473_v10 = vpop.f32.mrf.mxu1 }
 0x4e3   :  { %23063 = vst [vmem:[#allocation60_spill] sm:$0xff] %v20698_v27  ;;  %v20702_v34 = vadd.f32 %v7473_v10, %v20397_v41  ;;  %v8548_v41 = vld [vmem:[#allocation3 + $0x2d2] sm:$0xff] }
 0x4e4   :  { %v17169_v1 = vpop.f32.mrf.mxu1  ;;  %17424 = vmatmul.mubr.msk.f32.gmra.mxu1 %vm69_vm0, %v8545_v42 }
 0x4e5   :  { %23064 = vst [vmem:[#allocation61_spill] sm:$0xff] %v20702_v34  ;;  %v20708_v31 = vadd.f32 %v17169_v1, %v20404_v17  ;;  %17426 = vmatprep.mubr.msk.f32.mxu1 %vm69_vm0, %v8546_v36  ;;  %v8549_v17 = vld [vmem:[#allocation3 + $0x2da] sm:$0xff]  ;;  %v20722_v1 = vpop.f32.mrf.mxu0 }
 0x4e6   :  { %v20711_v3 = vpop.f32.mrf.mxu1 }
 0x4e7   :  { %23065 = vst [vmem:[#allocation62_spill] sm:$0xff] %v20708_v31  ;;  %23066 = vst [vmem:[#allocation63_spill] sm:$0xff] %v20711_v3  ;;  %v8550_v31 = vld [vmem:[#allocation3 + $0x2ea] sm:$0xff] }
 0x4e8   :  { %v17172_v32 = vpop.f32.mrf.mxu1  ;;  %17427 = vmatmul.mubr.msk.f32.gmra.mxu1 %vm69_vm0, %v8547_v46 }
 0x4e9   :  { %v20717_v10 = vadd.f32 %v17172_v32, %v20416_v20  ;;  %17429 = vmatprep.mubr.msk.f32.mxu1 %vm69_vm0, %v8548_v41  ;;  %v8551_v20 = vld [vmem:[#allocation3 + $0x2f2] sm:$0xff]  ;;  %v20731_v32 = vpop.f32.mrf.mxu0 }
 0x4ea   :  { %v20720_v42 = vpop.f32.mrf.mxu1 }
 0x4eb   :  { %23067 = vst [vmem:[#allocation64_spill] sm:$0xff] %v20717_v10  ;;  %23068 = vst [vmem:[#allocation65_spill] sm:$0xff] %v20720_v42  ;;  %v8552_v10 = vld [vmem:[#allocation3 + $0x302] sm:$0xff]  ;;  %v23071_v42 = vld [vmem:[#allocation22_spill] sm:$0xff] }
 0x4ec   :  { %v17175_v36 = vpop.f32.mrf.mxu1  ;;  %17430 = vmatmul.mubr.msk.f32.gmra.mxu1 %vm69_vm0, %v8549_v17 }
 0x4ed   :  { %v20726_v3 = vadd.f32 %v17175_v36, %v20428_v2  ;;  %17432 = vmatprep.mubr.msk.f32.mxu1 %vm69_vm0, %v8550_v31  ;;  %v8553_v2 = vld [vmem:[#allocation3 + $0x30a] sm:$0xff]  ;;  %v20740_v36 = vpop.f32.mrf.mxu0 }
 0x4ee   :  { %v20729_v46 = vpop.f32.mrf.mxu1 }
 0x4ef   :  { %23069 = vst [vmem:[#allocation66_spill] sm:$0xff] %v20726_v3  ;;  %23070 = vst [vmem:[#allocation67_spill] sm:$0xff] %v20729_v46  ;;  %v8554_v3 = vld [vmem:[#allocation3 + $0x31a] sm:$0xff]  ;;  %v23074_v46 = vld [vmem:[#allocation21_spill] sm:$0xff] }
 0x4f0   :  { %v17178_v41 = vpop.f32.mrf.mxu1  ;;  %17433 = vmatmul.mubr.msk.f32.gmra.mxu1 %vm69_vm0, %v8551_v20 }
 0x4f1   :  { %v20735_v34 = vadd.f32 %v17178_v41, %v23071_v42  ;;  %17435 = vmatprep.mubr.msk.f32.mxu1 %vm69_vm0, %v8552_v10  ;;  %v8555_v42 = vld [vmem:[#allocation3 + $0x322] sm:$0xff]  ;;  %v20749_v41 = vpop.f32.mrf.mxu0 }
 0x4f2   :  { %v20738_v17 = vpop.f32.mrf.mxu1  ;;  %23077 = vst [vmem:[#allocation72_spill] sm:$0xff] %v20749_v41 }
 0x4f3   :  { %23072 = vst [vmem:[#allocation68_spill] sm:$0xff] %v20735_v34  ;;  %23073 = vst [vmem:[#allocation69_spill] sm:$0xff] %v20738_v17  ;;  %v8556_v34 = vld [vmem:[#allocation3 + $0x332] sm:$0xff] }
 0x4f4   :  { %v17181_v31 = vpop.f32.mrf.mxu1  ;;  %17436 = vmatmul.mubr.msk.f32.gmra.mxu1 %vm69_vm0, %v8553_v2 }
 0x4f5   :  { %v20744_v27 = vadd.f32 %v17181_v31, %v23074_v46  ;;  %17438 = vmatprep.mubr.msk.f32.mxu1 %vm69_vm0, %v8554_v3  ;;  %v8558_v46 = vld [vmem:[#allocation3 + $0x34a] sm:$0xff]  ;;  %v8557_v31 = vld [vmem:[#allocation3 + $0x33a] sm:$0xff] }
 0x4f6   :  { %v20747_v20 = vpop.f32.mrf.mxu1 }
 0x4f7   :  { %23075 = vst [vmem:[#allocation70_spill] sm:$0xff] %v20744_v27  ;;  %23076 = vst [vmem:[#allocation71_spill] sm:$0xff] %v20747_v20  ;;  %v20758_v27 = vpop.f32.mrf.mxu0 }
 0x4f8   :  { %v17184_v10 = vpop.f32.mrf.mxu1  ;;  %17439 = vmatmul.mubr.msk.f32.gmra.mxu1 %vm69_vm0, %v8555_v42  ;;  %v8559_v42 = vld [vmem:[#allocation3 + $0x352] sm:$0xff] }
 0x4f9   :  { %v20753_v17 = vadd.f32 %v17184_v10, %v20464_v6  ;;  %17441 = vmatprep.mubr.msk.f32.mxu1 %vm69_vm0, %v8556_v34  ;;  %v20767_v6 = vpop.f32.mrf.mxu0 }
 0x4fa   :  { %v20756_v2 = vpop.f32.mrf.mxu1 }
 0x4fb   :  { %23078 = vst [vmem:[#allocation73_spill] sm:$0xff] %v20753_v17  ;;  %23079 = vst [vmem:[#allocation74_spill] sm:$0xff] %v20756_v2  ;;  %v20775_v2 = vpop.f32.mrf.mxu0 }
 0x4fc   :  { %v17187_v3 = vpop.f32.mrf.mxu1  ;;  %17442 = vmatmul.mubr.msk.f32.gmra.mxu1 %vm69_vm0, %v8557_v31 }
 0x4fd   :  { %v20762_v20 = vadd.f32 %v17187_v3, %v20476_v44  ;;  %17444 = vmatprep.mubr.msk.f32.mxu1 %vm69_vm0, %v8558_v46  ;;  %v20782_v3 = vpop.f32.mrf.mxu0 }
 0x4fe   :  { %v20765_v41 = vpop.f32.mrf.mxu1  ;;  %23086 = vst [vmem:[#allocation48_spill] sm:$0xff] %v20782_v3 }
 0x4ff   :  { %23080 = vst [vmem:[#allocation75_spill] sm:$0xff] %v20762_v20  ;;  %23081 = vst [vmem:[#allocation76_spill] sm:$0xff] %v20765_v41  ;;  %v7045_v41 = vadd.f32 %v20505_v54, %v20510_v35 }
 0x500   :  { %v17190_v34 = vpop.f32.mrf.mxu1  ;;  %17445 = vmatmul.mubr.msk.f32.gmra.mxu1 %vm69_vm0, %v8559_v42 }
 0x501   :  { %v20771_v10 = vadd.f32 %v17190_v34, %v20487_v7 }
 0x502   :  { %v20773_v17 = vpop.f32.mrf.mxu1 }
 0x503   :  { %23082 = vst [vmem:[#allocation77_spill] sm:$0xff] %v20771_v10  ;;  %23083 = vst [vmem:[#allocation78_spill] sm:$0xff] %v20773_v17  ;;  %v20791_v10 = vpop.f32.mrf.mxu0 }
 0x504   :  { %v17193_v31 = vpop.f32.mrf.mxu1 }
 0x505   :  { %v20778_v44 = vadd.f32 %v17193_v31, %v20497_v9 }
 0x506   :  { %v20780_v46 = vpop.f32.mrf.mxu1 }
 0x507   :  { %23084 = vst [vmem:[#allocation79_spill] sm:$0xff] %v20778_v44  ;;  %23085 = vst [vmem:[#allocation28_spill] sm:$0xff] %v20780_v46  ;;  %v20799_v46 = vpop.f32.mrf.mxu0 }
 0x508   :  { %v17196_v20 = vpop.f32.mrf.mxu1 }
 0x509   :  { %v20787_v42 = vadd.f32 %v17196_v20, %v20507_v14  ;;  %v20807_v20 = vpop.f32.mrf.mxu0 }
 0x50a   :  { %v7573_v7 = vpop.f32.mrf.mxu1 }
 0x50b   :  { %v20789_v34 = vadd.f32 %v7573_v7, %v7045_v41  ;;  %v20815_v7 = vpop.f32.mrf.mxu0 }
 0x50c   :  { %v17199_v17 = vpop.f32.mrf.mxu1 }
 0x50d   :  { %v20794_v9 = vadd.f32 %v17199_v17, %v20515_v56 }
 0x50e   :  { %v7583_v31 = vpop.f32.mrf.mxu1 }
 0x50f   :  { %v20797_v44 = vadd.f32 %v7583_v31, %v20519_v48 }
 0x510   :  { %v17202_v3 = vpop.f32.mrf.mxu1 }
 0x511   :  { %v20802_v54 = vadd.f32 %v17202_v3, %v20523_v47 }
 0x512   :  { %v7593_v14 = vpop.f32.mrf.mxu1 }
 0x513   :  { %v20805_v35 = vadd.f32 %v7593_v14, %v20527_v55  ;;  %v20823_v14 = vpop.f32.mrf.mxu0 }
 0x514   :  { %v17205_v41 = vpop.f32.mrf.mxu1 }
 0x515   :  { %23087 = vst [vmem:[#allocation39_spill] sm:$0xff] %v20805_v35  ;;  %v20810_v56 = vadd.f32 %v17205_v41, %v20531_v18 }
 0x516   :  { %v7603_v17 = vpop.f32.mrf.mxu1 }
 0x517   :  { %v20813_v48 = vadd.f32 %v7603_v17, %v20535_v52  ;;  %v20831_v17 = vpop.f32.mrf.mxu0 }
 0x518   :  { %v17208_v31 = vpop.f32.mrf.mxu1 }
 0x519   :  { %23088 = vst [vmem:[#allocation45_spill] sm:$0xff] %v20813_v48  ;;  %v20818_v47 = vadd.f32 %v17208_v31, %v20539_v21 }
 0x51a   :  { %v7613_v3 = vpop.f32.mrf.mxu1 }
 0x51b   :  { %v20821_v55 = vadd.f32 %v7613_v3, %v20543_v63  ;;  %v20839_v3 = vpop.f32.mrf.mxu0 }
 0x51c   :  { %v17211_v35 = vpop.f32.mrf.mxu1 }
 0x51d   :  { %23089 = vst [vmem:[#allocation29_spill] sm:$0xff] %v20821_v55  ;;  %v20826_v18 = vadd.f32 %v17211_v35, %v20547_v22 }
 0x51e   :  { %v7623_v41 = vpop.f32.mrf.mxu1 }
 0x51f   :  { %v20829_v52 = vadd.f32 %v7623_v41, %v20551_v38  ;;  %v20847_v41 = vpop.f32.mrf.mxu0 }
 0x520   :  { %v17214_v48 = vpop.f32.mrf.mxu1 }
 0x521   :  { %23090 = vst [vmem:[#allocation18_spill] sm:$0xff] %v20829_v52  ;;  %v20834_v21 = vadd.f32 %v17214_v48, %v20555_v61 }
 0x522   :  { %v7633_v31 = vpop.f32.mrf.mxu1 }
 0x523   :  { %23091 = vst [vmem:[#allocation27_spill] sm:$0xff] %v20834_v21  ;;  %v20837_v63 = vadd.f32 %v7633_v31, %v20559_v12  ;;  %v20855_v31 = vpop.f32.mrf.mxu0  ;;  %v23104_v21 = vld [vmem:[#allocation53_spill] sm:$0xff] }
 0x524   :  { %v17217_v55 = vpop.f32.mrf.mxu1 }
 0x525   :  { %23092 = vst [vmem:[#allocation26_spill] sm:$0xff] %v20837_v63  ;;  %v20842_v22 = vadd.f32 %v17217_v55, %v20563_v4 }
 0x526   :  { %v7643_v35 = vpop.f32.mrf.mxu1 }
 0x527   :  { %23093 = vst [vmem:[#allocation35_spill] sm:$0xff] %v20842_v22  ;;  %v20845_v38 = vadd.f32 %v7643_v35, %v20567_v50  ;;  %v20863_v35 = vpop.f32.mrf.mxu0  ;;  %v23099_v22 = vld [vmem:[#allocation51_spill] sm:$0xff] }
 0x528   :  { %v17220_v52 = vpop.f32.mrf.mxu1 }
 0x529   :  { %23094 = vst [vmem:[#allocation41_spill] sm:$0xff] %v20845_v38  ;;  %v20850_v61 = vadd.f32 %v17220_v52, %v20571_v53 }
 0x52a   :  { %v7653_v48 = vpop.f32.mrf.mxu1 }
 0x52b   :  { %23095 = vst [vmem:[#allocation46_spill] sm:$0xff] %v20850_v61  ;;  %v20853_v12 = vadd.f32 %v7653_v48, %v20575_v16  ;;  %v23100_v61 = vld [vmem:[#allocation52_spill] sm:$0xff]  ;;  %v20871_v48 = vpop.f32.mrf.mxu0 }
 0x52c   :  { %v17223_v63 = vpop.f32.mrf.mxu1 }
 0x52d   :  { %23096 = vst [vmem:[#allocation49_spill] sm:$0xff] %v20853_v12  ;;  %v20858_v4 = vadd.f32 %v17223_v63, %v20579_v39 }
 0x52e   :  { %v7663_v55 = vpop.f32.mrf.mxu1 }
 0x52f   :  { %23097 = vst [vmem:[#allocation14_spill] sm:$0xff] %v20858_v4  ;;  %v20861_v50 = vadd.f32 %v7663_v55, %v20583_v33  ;;  %v23102_v4 = vld [vmem:[#allocation55_spill] sm:$0xff]  ;;  %v20879_v55 = vpop.f32.mrf.mxu0 }
 0x530   :  { %v17226_v38 = vpop.f32.mrf.mxu1 }
 0x531   :  { %23098 = vst [vmem:[#allocation15_spill] sm:$0xff] %v20861_v50  ;;  %v20866_v53 = vadd.f32 %v17226_v38, %v23099_v22 }
 0x532   :  { %v7673_v52 = vpop.f32.mrf.mxu1 }
 0x533   :  { %v20869_v16 = vadd.f32 %v7673_v52, %v23100_v61  ;;  %v20887_v52 = vpop.f32.mrf.mxu0 }
 0x534   :  { %v17229_v12 = vpop.f32.mrf.mxu1 }
 0x535   :  { %23101 = vst [vmem:[#allocation20_spill] sm:$0xff] %v20869_v16  ;;  %v20874_v39 = vadd.f32 %v17229_v12, %v20595_v51 }
 0x536   :  { %v7683_v63 = vpop.f32.mrf.mxu1 }
 0x537   :  { %v20877_v33 = vadd.f32 %v7683_v63, %v23102_v4  ;;  %v20895_v63 = vpop.f32.mrf.mxu0 }
 0x538   :  { %v17232_v50 = vpop.f32.mrf.mxu1 }
 0x539   :  { %23103 = vst [vmem:[#allocation37_spill] sm:$0xff] %v20877_v33  ;;  %v20882_v22 = vadd.f32 %v17232_v50, %v23104_v21 }
 0x53a   :  { %v7693_v38 = vpop.f32.mrf.mxu1 }
 0x53b   :  { %v20885_v61 = vadd.f32 %v7693_v38, %v20607_v23  ;;  %v8433_v23 = vadd.f32 %v20622_v13, %v20628_v24 }
 0x53c   :  { %v17235_v16 = vpop.f32.mrf.mxu1 }
 0x53d   :  { %23105 = vst [vmem:[#allocation42_spill] sm:$0xff] %v20885_v61  ;;  %v20890_v51 = vadd.f32 %v17235_v16, %v20611_v15  ;;  %v20905_v61 = vpop.f32.mrf.mxu0  ;;  %v8432_v16 = vadd.f32 %v20634_v28, %v20632_v58 }
 0x53e   :  { %v7703_v12 = vpop.f32.mrf.mxu1 }
 0x53f   :  { %v20893_v4 = vadd.f32 %v7703_v12, %v20615_v57  ;;  %v20910_v57 = vld [vmem:[%s22707_s5] ss:$0 sm:$0xff]  ;;  %v8435_v12 = vadd.f32 %v20644_v30, %v20638_v62  ;;  %v20917_v24 = vpop.f32.mrf.mxu0  ;;  %v8437_v30 = vadd.f32 %v20664_v45, %v20648_v8  ;;  %v8439_v45 = vadd.f32 %v20684_v0, %v20658_v19 }
 0x540   :  { %v17238_v33 = vpop.f32.mrf.mxu1  ;;  %v8441_v19 = vadd.f32 %v20704_v29, %v20668_v59 }
 0x541   :  { %v20898_v21 = vadd.f32 %v17238_v33, %v20619_v60 }
 0x542   :  { %v7713_v50 = vpop.f32.mrf.mxu1 }
 0x543   :  { %23106 = vst [vmem:[#allocation47_spill] sm:$0xff] %v20898_v21  ;;  %v20903_v38 = vadd.f32 %v7713_v50, %v20625_v40  ;;  %v8434_v21 = vadd.f32 %v20654_v43, %v20642_v25  ;;  %v20933_v43 = vld [vmem:[#allocation7] sm:$0x1f] }
 0x544   :  { %v17353_v15 = vpop.f32.mrf.mxu1  ;;  %15578 = vmatprep.mubr.msk.f32.mxu1 %vm69_vm0, %v20933_v43 }
 0x545   :  { %23107 = vst [vmem:[#allocation22_spill] sm:$0xff] %v20903_v38  ;;  %v9143_v60 = vadd.f32 %v17353_v15, %v8433_v23  ;;  %v20919_v38 = vld [vmem:[#allocation7 + $0x8] sm:$0x1f] }
 0x546   :  { %v8823_v33 = vpop.f32.mrf.mxu1  ;;  %15510 = vmatprep.mubr.msk.f32.mxu0 %vm69_vm0, %v20919_v38 }
 0x547   :  { %v9214_v13 = vadd.f32 %v20910_v57, %v9143_v60  ;;  %v9142_v40 = vadd.f32 %v8823_v33, %v8432_v16  ;;  %v20931_v16 = vpop.f32.mrf.mxu0  ;;  %v8436_v60 = vadd.f32 %v20674_v5, %v20652_v37  ;;  %v23108_v5 = vld [vmem:[#allocation54_spill] sm:$0xff] }
 0x548   :  { %v17356_v50 = vpop.f32.mrf.mxu1 }
 0x549   :  { %9278 = vst.msk [vmem:[#allocation3 + $0x21] sm:$0xff] %vm69_vm0, %v9214_v13  ;;  %v9213_v58 = vadd.f32 %v20910_v57, %v9142_v40  ;;  %v9145_v28 = vadd.f32 %v17356_v50, %v8435_v12  ;;  %v20945_v40 = vpop.f32.mrf.mxu0  ;;  %v8438_v50 = vadd.f32 %v20694_v26, %v23108_v5 }
 0x54a   :  { %v8833_v62 = vpop.f32.mrf.mxu1 }
 0x54b   :  { %9277 = vst.msk [vmem:[#allocation3 + $0x19] sm:$0xff] %vm69_vm0, %v9213_v58  ;;  %v9216_v23 = vadd.f32 %v20910_v57, %v9145_v28  ;;  %v9144_v15 = vadd.f32 %v8833_v62, %v8434_v21 }
 0x54c   :  { %v17359_v25 = vpop.f32.mrf.mxu1 }
 0x54d   :  { %9280 = vst.msk [vmem:[#allocation3 + $0x39] sm:$0xff] %vm69_vm0, %v9216_v23  ;;  %v9215_v33 = vadd.f32 %v20910_v57, %v9144_v15  ;;  %v9147_v12 = vadd.f32 %v17359_v25, %v8437_v30  ;;  %v20955_v23 = vpop.f32.mrf.mxu0  ;;  %v23109_v25 = vld [vmem:[#allocation56_spill] sm:$0xff] }
 0x54e   :  { %v8843_v8 = vpop.f32.mrf.mxu1  ;;  %v8440_v26 = vadd.f32 %v20713_v49, %v23109_v25 }
 0x54f   :  { %9279 = vst.msk [vmem:[#allocation3 + $0x31] sm:$0xff] %vm69_vm0, %v9215_v33  ;;  %v9218_v21 = vadd.f32 %v20910_v57, %v9147_v12  ;;  %v9146_v13 = vadd.f32 %v8843_v8, %v8436_v60  ;;  %v23110_v8 = vld [vmem:[#allocation57_spill] sm:$0xff] }
 0x550   :  { %v17362_v37 = vpop.f32.mrf.mxu1  ;;  %v8443_v59 = vadd.f32 %v20722_v1, %v23110_v8  ;;  %v8445_v1 = vadd.f32 %v20740_v36, %v20688_v11  ;;  %v23116_v36 = vld [vmem:[#allocation60_spill] sm:$0xff] }
 0x551   :  { %9282 = vst.msk [vmem:[#allocation3 + $0x51] sm:$0xff] %vm69_vm0, %v9218_v21  ;;  %v9217_v58 = vadd.f32 %v20910_v57, %v9146_v13  ;;  %v9149_v28 = vadd.f32 %v17362_v37, %v8439_v45  ;;  %v20965_v21 = vpop.f32.mrf.mxu0  ;;  %v23111_v37 = vld [vmem:[#allocation58_spill] sm:$0xff]  ;;  %v8447_v8 = vadd.f32 %v20758_v27, %v23116_v36  ;;  %v23119_v27 = vld [vmem:[#allocation32_spill] sm:$0xff] }
 0x552   :  { %v8853_v62 = vpop.f32.mrf.mxu1  ;;  %v8442_v49 = vadd.f32 %v20731_v32, %v23111_v37  ;;  %v23117_v37 = vld [vmem:[#allocation61_spill] sm:$0xff] }
 0x553   :  { %9281 = vst.msk [vmem:[#allocation3 + $0x49] sm:$0xff] %vm69_vm0, %v9217_v58  ;;  %v9220_v0 = vadd.f32 %v20910_v57, %v9149_v28  ;;  %v9148_v30 = vadd.f32 %v8853_v62, %v8438_v50 }
 0x554   :  { %v17365_v15 = vpop.f32.mrf.mxu1 }
 0x555   :  { %9284 = vst.msk [vmem:[#allocation3 + $0x69] sm:$0xff] %vm69_vm0, %v9220_v0  ;;  %v9219_v60 = vadd.f32 %v20910_v57, %v9148_v30  ;;  %v9151_v33 = vadd.f32 %v17365_v15, %v8441_v19  ;;  %v20975_v19 = vpop.f32.mrf.mxu0  ;;  %v23112_v30 = vld [vmem:[#allocation59_spill] sm:$0xff]  ;;  %v23113_v15 = vld [vmem:[#allocation72_spill] sm:$0xff] }
 0x556   :  { %v8863_v12 = vpop.f32.mrf.mxu1  ;;  %v8444_v32 = vadd.f32 %v23113_v15, %v23112_v30  ;;  %v23121_v30 = vld [vmem:[#allocation62_spill] sm:$0xff] }
 0x557   :  { %9283 = vst.msk [vmem:[#allocation3 + $0x61] sm:$0xff] %vm69_vm0, %v9219_v60  ;;  %v9222_v29 = vadd.f32 %v20910_v57, %v9151_v33  ;;  %v9150_v45 = vadd.f32 %v8863_v12, %v8440_v26  ;;  %v23114_v33 = vld [vmem:[#allocation25_spill] sm:$0xff]  ;;  %v8449_v15 = vadd.f32 %v20775_v2, %v23121_v30  ;;  %v23125_v2 = vld [vmem:[#allocation44_spill] sm:$0xff] }
 0x558   :  { %v17368_v13 = vpop.f32.mrf.mxu1  ;;  %v23115_v12 = vld [vmem:[#allocation17_spill] sm:$0xff] }
 0x559   :  { %9286 = vst.msk [vmem:[#allocation3 + $0x81] sm:$0xff] %vm69_vm0, %v9222_v29  ;;  %v9221_v5 = vadd.f32 %v20910_v57, %v9150_v45  ;;  %v9153_v50 = vadd.f32 %v17368_v13, %v8443_v59  ;;  %v7027_v11 = vadd.f32 %v23115_v12, %v23114_v33  ;;  %v20987_v45 = vpop.f32.mrf.mxu0  ;;  %v23123_v12 = vld [vmem:[#allocation65_spill] sm:$0xff] }
 0x55a   :  { %v8873_v58 = vpop.f32.mrf.mxu1 }
 0x55b   :  { %9285 = vst.msk [vmem:[#allocation3 + $0x79] sm:$0xff] %vm69_vm0, %v9221_v5  ;;  %v9224_v28 = vadd.f32 %v20910_v57, %v9153_v50  ;;  %v9152_v62 = vadd.f32 %v8873_v58, %v8442_v49  ;;  %v8446_v49 = vadd.f32 %v20767_v6, %v23117_v37  ;;  %v23118_v5 = vld [vmem:[#allocation63_spill] sm:$0xff]  ;;  %v21000_v6 = vpop.f32.mrf.mxu0  ;;  %v23126_v37 = vld [vmem:[#allocation64_spill] sm:$0xff] }
 0x55c   :  { %v17371_v0 = vpop.f32.mrf.mxu1  ;;  %v7738_v50 = vadd.f32 %v23118_v5, %v7027_v11  ;;  %v8451_v5 = vadd.f32 %v20791_v10, %v23126_v37  ;;  %v23129_v10 = vld [vmem:[#allocation19_spill] sm:$0xff] }
 0x55d   :  { %9288 = vst.msk [vmem:[#allocation3 + $0x99] sm:$0xff] %vm69_vm0, %v9224_v28  ;;  %v9223_v25 = vadd.f32 %v20910_v57, %v9152_v62  ;;  %v9155_v26 = vadd.f32 %v17371_v0, %v8445_v1  ;;  %v23120_v62 = vld [vmem:[#allocation24_spill] sm:$0xff]  ;;  %v23132_v37 = vld [vmem:[#allocation31_spill] sm:$0xff] }
 0x55e   :  { %v8883_v60 = vpop.f32.mrf.mxu1  ;;  %v7029_v0 = vadd.f32 %v23120_v62, %v23119_v27  ;;  %v23127_v27 = vld [vmem:[#allocation67_spill] sm:$0xff] }
 0x55f   :  { %9287 = vst.msk [vmem:[#allocation3 + $0x91] sm:$0xff] %vm69_vm0, %v9223_v25  ;;  %v9226_v59 = vadd.f32 %v20910_v57, %v9155_v26  ;;  %v9154_v29 = vadd.f32 %v8883_v60, %v8444_v32  ;;  %v23122_v60 = vld [vmem:[#allocation48_spill] sm:$0xff] }
 0x560   :  { %v17374_v13 = vpop.f32.mrf.mxu1  ;;  %v8448_v33 = vadd.f32 %v23122_v60, %v7738_v50  ;;  %v7740_v11 = vadd.f32 %v23123_v12, %v7029_v0  ;;  %v21012_v50 = vpop.f32.mrf.mxu0 }
 0x561   :  { %9290 = vst.msk [vmem:[#allocation3 + $0xb1] sm:$0xff] %vm69_vm0, %v9226_v59  ;;  %v9225_v58 = vadd.f32 %v20910_v57, %v9154_v29  ;;  %v9157_v1 = vadd.f32 %v17374_v13, %v8447_v8  ;;  %v23124_v29 = vld [vmem:[#allocation38_spill] sm:$0xff] }
 0x562   :  { %v8893_v28 = vpop.f32.mrf.mxu1  ;;  %v7031_v13 = vadd.f32 %v23125_v2, %v23124_v29 }
 0x563   :  { %9289 = vst.msk [vmem:[#allocation3 + $0xa9] sm:$0xff] %vm69_vm0, %v9225_v58  ;;  %v9228_v32 = vadd.f32 %v20910_v57, %v9157_v1  ;;  %v9156_v25 = vadd.f32 %v8893_v28, %v8446_v49  ;;  %v8450_v28 = vadd.f32 %v20799_v46, %v7740_v11  ;;  %v21024_v46 = vpop.f32.mrf.mxu0 }
 0x564   :  { %v17377_v26 = vpop.f32.mrf.mxu1  ;;  %v7742_v62 = vadd.f32 %v23127_v27, %v7031_v13 }
 0x565   :  { %9292 = vst.msk [vmem:[#allocation3 + $0xc9] sm:$0xff] %vm69_vm0, %v9228_v32  ;;  %v9227_v36 = vadd.f32 %v20910_v57, %v9156_v25  ;;  %v9159_v8 = vadd.f32 %v17377_v26, %v8449_v15  ;;  %v23128_v32 = vld [vmem:[#allocation33_spill] sm:$0xff]  ;;  %v23130_v26 = vld [vmem:[#allocation66_spill] sm:$0xff] }
 0x566   :  { %v8903_v59 = vpop.f32.mrf.mxu1  ;;  %v7033_v25 = vadd.f32 %v23129_v10, %v23128_v32  ;;  %v8453_v60 = vadd.f32 %v20807_v20, %v23130_v26  ;;  %v23133_v20 = vld [vmem:[#allocation40_spill] sm:$0xff] }
 0x567   :  { %9291 = vst.msk [vmem:[#allocation3 + $0xc1] sm:$0xff] %vm69_vm0, %v9227_v36  ;;  %v9230_v49 = vadd.f32 %v20910_v57, %v9159_v8  ;;  %v9158_v58 = vadd.f32 %v8903_v59, %v8448_v33  ;;  %v8452_v36 = vadd.f32 %v20815_v7, %v7742_v62  ;;  %v23131_v8 = vld [vmem:[#allocation69_spill] sm:$0xff]  ;;  %v21036_v7 = vpop.f32.mrf.mxu0 }
 0x568   :  { %v17380_v1 = vpop.f32.mrf.mxu1  ;;  %v7744_v59 = vadd.f32 %v23131_v8, %v7033_v25  ;;  %v23136_v25 = vld [vmem:[#allocation13_spill] sm:$0xff] }
 0x569   :  { %9294 = vst.msk [vmem:[#allocation3 + $0xe1] sm:$0xff] %vm69_vm0, %v9230_v49  ;;  %v9229_v0 = vadd.f32 %v20910_v57, %v9158_v58  ;;  %v9161_v30 = vadd.f32 %v17380_v1, %v8451_v5  ;;  %v7035_v5 = vadd.f32 %v23133_v20, %v23132_v37  ;;  %v23134_v49 = vld [vmem:[#allocation68_spill] sm:$0xff]  ;;  %v23140_v20 = vld [vmem:[#allocation43_spill] sm:$0xff] }
 0x56a   :  { %v8913_v15 = vpop.f32.mrf.mxu1  ;;  %v8455_v58 = vadd.f32 %v20823_v14, %v23134_v49  ;;  %v8454_v62 = vadd.f32 %v20831_v17, %v7744_v59  ;;  %v23137_v14 = vld [vmem:[#allocation30_spill] sm:$0xff]  ;;  %v21048_v17 = vpop.f32.mrf.mxu0  ;;  %v23142_v49 = vld [vmem:[#allocation73_spill] sm:$0xff] }
 0x56b   :  { %9293 = vst.msk [vmem:[#allocation3 + $0xd9] sm:$0xff] %vm69_vm0, %v9229_v0  ;;  %v9232_v33 = vadd.f32 %v20910_v57, %v9161_v30  ;;  %v9160_v12 = vadd.f32 %v8913_v15, %v8450_v28  ;;  %v23135_v0 = vld [vmem:[#allocation71_spill] sm:$0xff]  ;;  %v7037_v26 = vadd.f32 %v23137_v14, %v23136_v25  ;;  %v23139_v59 = vld [vmem:[#allocation74_spill] sm:$0xff] }
 0x56c   :  { %v17383_v11 = vpop.f32.mrf.mxu1  ;;  %v7746_v30 = vadd.f32 %v23135_v0, %v7035_v5  ;;  %v23143_v0 = vld [vmem:[#allocation76_spill] sm:$0xff]  ;;  %v23144_v25 = vld [vmem:[#allocation50_spill] sm:$0xff] }
 0x56d   :  { %9296 = vst.msk [vmem:[#allocation3 + $0xf9] sm:$0xff] %vm69_vm0, %v9232_v33  ;;  %v9231_v29 = vadd.f32 %v20910_v57, %v9160_v12  ;;  %v9163_v2 = vadd.f32 %v17383_v11, %v8453_v60  ;;  %v23138_v60 = vld [vmem:[#allocation70_spill] sm:$0xff] }
 0x56e   :  { %v8923_v13 = vpop.f32.mrf.mxu1  ;;  %v8457_v33 = vadd.f32 %v20839_v3, %v23138_v60  ;;  %v8456_v8 = vadd.f32 %v20847_v41, %v7746_v30  ;;  %v23141_v3 = vld [vmem:[#allocation34_spill] sm:$0xff]  ;;  %v21060_v41 = vpop.f32.mrf.mxu0 }
 0x56f   :  { %9295 = vst.msk [vmem:[#allocation3 + $0xf1] sm:$0xff] %vm69_vm0, %v9231_v29  ;;  %v9234_v1 = vadd.f32 %v20910_v57, %v9163_v2  ;;  %v9162_v28 = vadd.f32 %v8923_v13, %v8452_v36  ;;  %v7748_v29 = vadd.f32 %v23139_v59, %v7037_v26  ;;  %v7039_v5 = vadd.f32 %v23141_v3, %v23140_v20  ;;  %v23146_v26 = vld [vmem:[#allocation75_spill] sm:$0xff]  ;;  %v23150_v3 = vld [vmem:[#allocation77_spill] sm:$0xff] }
 0x570   :  { %v17386_v27 = vpop.f32.mrf.mxu1  ;;  %v8461_v60 = vadd.f32 %v20871_v48, %v23146_v26  ;;  %v23149_v48 = vld [vmem:[#allocation23_spill] sm:$0xff] }
 0x571   :  { %9298 = vst.msk [vmem:[#allocation3 + $0x111] sm:$0xff] %vm69_vm0, %v9234_v1  ;;  %v9233_v15 = vadd.f32 %v20910_v57, %v9162_v28  ;;  %v9165_v32 = vadd.f32 %v17386_v27, %v8455_v58  ;;  %v8459_v58 = vadd.f32 %v20855_v31, %v23142_v49  ;;  %v7750_v30 = vadd.f32 %v23143_v0, %v7039_v5  ;;  %v23145_v31 = vld [vmem:[#allocation36_spill] sm:$0xff] }
 0x572   :  { %v8933_v10 = vpop.f32.mrf.mxu1  ;;  %v7041_v14 = vadd.f32 %v23145_v31, %v23144_v25  ;;  %v8463_v5 = vadd.f32 %v20887_v52, %v23150_v3 }
 0x573   :  { %9297 = vst.msk [vmem:[#allocation3 + $0x109] sm:$0xff] %vm69_vm0, %v9233_v15  ;;  %v9236_v12 = vadd.f32 %v20910_v57, %v9165_v32  ;;  %v9164_v11 = vadd.f32 %v8933_v10, %v8454_v62  ;;  %v8458_v62 = vadd.f32 %v20863_v35, %v7748_v29  ;;  %v21072_v35 = vpop.f32.mrf.mxu0 }
 0x574   :  { %v17389_v36 = vpop.f32.mrf.mxu1 }
 0x575   :  { %9300 = vst.msk [vmem:[#allocation3 + $0x129] sm:$0xff] %vm69_vm0, %v9236_v12  ;;  %v9235_v2 = vadd.f32 %v20910_v57, %v9164_v11  ;;  %v9167_v13 = vadd.f32 %v17389_v36, %v8457_v33  ;;  %v8460_v36 = vadd.f32 %v20879_v55, %v7750_v30  ;;  %v21084_v55 = vpop.f32.mrf.mxu0 }
 0x576   :  { %v8943_v37 = vpop.f32.mrf.mxu1 }
 0x577   :  { %9299 = vst.msk [vmem:[#allocation3 + $0x121] sm:$0xff] %vm69_vm0, %v9235_v2  ;;  %v9238_v1 = vadd.f32 %v20910_v57, %v9167_v13  ;;  %v9166_v28 = vadd.f32 %v8943_v37, %v8456_v8  ;;  %v23147_v8 = vld [vmem:[#allocation78_spill] sm:$0xff]  ;;  %v23148_v37 = vld [vmem:[#allocation16_spill] sm:$0xff]  ;;  %v21094_v31 = vpop.f32.mrf.mxu0 }
 0x578   :  { %v17392_v27 = vpop.f32.mrf.mxu1  ;;  %v7752_v59 = vadd.f32 %v23147_v8, %v7041_v14  ;;  %v7043_v20 = vadd.f32 %v23149_v48, %v23148_v37  ;;  %v8469_v48 = vadd.f32 %v20955_v23, %v20794_v9  ;;  %v8468_v9 = vadd.f32 %v20965_v21, %v20797_v44 }
 0x579   :  { %9302 = vst.msk [vmem:[#allocation3 + $0x141] sm:$0xff] %vm69_vm0, %v9238_v1  ;;  %v9237_v15 = vadd.f32 %v20910_v57, %v9166_v28  ;;  %v9169_v32 = vadd.f32 %v17392_v27, %v8459_v58  ;;  %v23151_v27 = vld [vmem:[#allocation28_spill] sm:$0xff] }
 0x57a   :  { %v8953_v10 = vpop.f32.mrf.mxu1  ;;  %v8462_v28 = vadd.f32 %v20895_v63, %v7752_v59 }
 0x57b   :  { %9301 = vst.msk [vmem:[#allocation3 + $0x139] sm:$0xff] %vm69_vm0, %v9237_v15  ;;  %v9240_v33 = vadd.f32 %v20910_v57, %v9169_v32  ;;  %v9168_v12 = vadd.f32 %v8953_v10, %v8458_v62  ;;  %v7754_v62 = vadd.f32 %v23151_v27, %v7043_v20  ;;  %v23152_v32 = vld [vmem:[#allocation79_spill] sm:$0xff]  ;;  %v21120_v20 = vld [vmem:[#allocation3 + $0xb0] sm:$0xff] }
 0x57c   :  { %v17395_v11 = vpop.f32.mrf.mxu1  ;;  %v8465_v52 = vadd.f32 %v20905_v61, %v23152_v32 }
 0x57d   :  { %9304 = vst.msk [vmem:[#allocation3 + $0x159] sm:$0xff] %vm69_vm0, %v9240_v33  ;;  %v9239_v29 = vadd.f32 %v20910_v57, %v9168_v12  ;;  %v9171_v2 = vadd.f32 %v17395_v11, %v8461_v60  ;;  %v8464_v63 = vadd.f32 %v20917_v24, %v7754_v62  ;;  %v8467_v12 = vadd.f32 %v20931_v16, %v20787_v42  ;;  %v9421_v42 = vld [vmem:[#allocation3 + $0xb1] sm:$0xff] }
 0x57e   :  { %v8963_v13 = vpop.f32.mrf.mxu1  ;;  %v8466_v24 = vadd.f32 %v20945_v40, %v20789_v34  ;;  %v8471_v62 = vadd.f32 %v20975_v19, %v20802_v54 }
 0x57f   :  { %9303 = vst.msk [vmem:[#allocation3 + $0x151] sm:$0xff] %vm69_vm0, %v9239_v29  ;;  %v9242_v49 = vadd.f32 %v20910_v57, %v9171_v2  ;;  %v9170_v58 = vadd.f32 %v8963_v13, %v8460_v36  ;;  %v21103_v36 = vpop.f32.mrf.mxu0 }
 0x580   :  { %v17398_v1 = vpop.f32.mrf.mxu1 }
 0x581   :  { %9306 = vst.msk [vmem:[#allocation3 + $0x171] sm:$0xff] %vm69_vm0, %v9242_v49  ;;  %v9241_v0 = vadd.f32 %v20910_v57, %v9170_v58  ;;  %v9173_v30 = vadd.f32 %v17398_v1, %v8463_v5  ;;  %v21122_v3 = vpop.f32.mrf.mxu0  ;;  %v9420_v1 = vld [vmem:[#allocation3 + $0xa9] sm:$0xff] }
 0x582   :  { %v8973_v15 = vpop.f32.mrf.mxu1 }
 0x583   :  { %9305 = vst.msk [vmem:[#allocation3 + $0x169] sm:$0xff] %vm69_vm0, %v9241_v0  ;;  %v9244_v10 = vadd.f32 %v20910_v57, %v9173_v30  ;;  %v9172_v25 = vadd.f32 %v8973_v15, %v8462_v28  ;;  %v21140_v0 = vld [vmem:[#allocation3 + $0xa8] sm:$0xff]  ;;  %v21142_v30 = vpop.f32.mrf.mxu0 }
 0x584   :  { %v17401_v14 = vpop.f32.mrf.mxu1  ;;  %v9435_v27 = vld [vmem:[#allocation3 + $0x159] sm:$0xff] }
 0x585   :  { %9308 = vst.msk [vmem:[#allocation3 + $0x189] sm:$0xff] %vm69_vm0, %v9244_v10  ;;  %v9243_v26 = vadd.f32 %v20910_v57, %v9172_v25  ;;  %v9175_v60 = vadd.f32 %v17401_v14, %v8465_v52  ;;  %v23153_v52 = vld [vmem:[#allocation39_spill] sm:$0xff] }
 0x586   :  { %v8983_v33 = vpop.f32.mrf.mxu1  ;;  %v21146_v32 = vld [vmem:[#allocation3 + $0x158] sm:$0xff]  ;;  %v8470_v54 = vadd.f32 %v20987_v45, %v23153_v52 }
 0x587   :  { %9307 = vst.msk [vmem:[#allocation3 + $0x181] sm:$0xff] %vm69_vm0, %v9243_v26  ;;  %v9246_v61 = vadd.f32 %v20910_v57, %v9175_v60  ;;  %v9174_v11 = vadd.f32 %v8983_v33, %v8464_v63  ;;  %v9419_v25 = vld [vmem:[#allocation3 + $0x99] sm:$0xff]  ;;  %v9434_v63 = vld [vmem:[#allocation3 + $0x151] sm:$0xff]  ;;  %v8473_v26 = vadd.f32 %v21000_v6, %v20810_v56 }
 0x588   :  { %v17404_v8 = vpop.f32.mrf.mxu1  ;;  %v9437_v59 = vld [vmem:[#allocation3 + $0x171] sm:$0xff] }
 0x589   :  { %9310 = vst.msk [vmem:[#allocation3 + $0x1d1] sm:$0xff] %vm69_vm0, %v9246_v61  ;;  %v9245_v29 = vadd.f32 %v20910_v57, %v9174_v11  ;;  %v9177_v2 = vadd.f32 %v17404_v8, %v8467_v12  ;;  %15478 = vmatprep.subr.msk.mxu0 %vm69_vm0, %v9437_v59  ;;  %v21160_v33 = vld [vmem:[#allocation3 + $0x98] sm:$0xff]  ;;  %v21162_v12 = vpop.f32.mrf.mxu0  ;;  %v21166_v11 = vld [vmem:[#allocation3 + $0x150] sm:$0xff] }
 0x58a   :  { %v8993_v16 = vpop.f32.mrf.mxu1  ;;  %15479 = vmatpush3.xpose.msk.msra.mxu0 %vm69_vm0, %v9421_v42  ;;  %v9436_v13 = vld [vmem:[#allocation3 + $0x169] sm:$0xff]  ;;  %v8475_v42 = vadd.f32 %v21024_v46, %v20818_v47  ;;  %v23156_v52 = vld [vmem:[#allocation18_spill] sm:$0xff] }
 0x58b   :  { %v21111_v37 = vld [vmem:[#allocation3 + $0x170] sm:$0xff]  ;;  %9309 = vst.msk [vmem:[#allocation3 + $0x1c9] sm:$0xff] %vm69_vm0, %v9245_v29  ;;  %v9248_v34 = vadd.f32 %v20910_v57, %v9177_v2  ;;  %v9176_v40 = vadd.f32 %v8993_v16, %v8466_v24  ;;  %15480 = vmatprep.subr.msk.mxu0 %vm69_vm0, %v9436_v13  ;;  %v21126_v49 = vld [vmem:[#allocation3 + $0x168] sm:$0xff] }
 0x58c   :  { %15546 = vmatprep.subr.msk.mxu1 %vm69_vm0, %v21111_v37  ;;  %v17407_v5 = vpop.f32.mrf.mxu1  ;;  %v23154_v8 = vld [vmem:[#allocation45_spill] sm:$0xff]  ;;  %v9433_v2 = vld [vmem:[#allocation3 + $0x141] sm:$0xff] }
 0x58d   :  { %15547 = vmatpush3.xpose.msk.msra.mxu1 %vm69_vm0, %v21120_v20  ;;  %9312 = vst.msk [vmem:[#allocation3 + $0x1e9] sm:$0xff] %vm69_vm0, %v9248_v34  ;;  %v9247_v23 = vadd.f32 %v20910_v57, %v9176_v40  ;;  %v9179_v58 = vadd.f32 %v17407_v5, %v8469_v48  ;;  %v8472_v56 = vadd.f32 %v21012_v50, %v23154_v8  ;;  %v9418_v24 = vld [vmem:[#allocation3 + $0x91] sm:$0xff]  ;;  %v21182_v48 = vpop.f32.mrf.mxu0  ;;  %v21186_v40 = vld [vmem:[#allocation3 + $0x140] sm:$0xff]  ;;  %v21238_v8 = vld [vmem:[#allocation3 + $0x128] sm:$0xff] }
 0x58e   :  { %15548 = vmatprep.subr.msk.mxu1 %vm69_vm0, %v21126_v49  ;;  %v9003_v28 = vpop.f32.mrf.mxu1  ;;  %15481 = vmatpush3.xpose.msk.msra.mxu0 %vm69_vm0, %v9420_v1  ;;  %v21180_v13 = vld [vmem:[#allocation3 + $0x90] sm:$0xff]  ;;  %v21198_v1 = vld [vmem:[#allocation3 + $0x139] sm:$0xff] }
 0x58f   :  { %9311 = vst.msk [vmem:[#allocation3 + $0x1e1] sm:$0xff] %vm69_vm0, %v9247_v23  ;;  %v9250_v44 = vadd.f32 %v20910_v57, %v9179_v58  ;;  %v9178_v21 = vadd.f32 %v9003_v28, %v8468_v9  ;;  %15482 = vmatprep.subr.msk.mxu0 %vm69_vm0, %v9435_v27  ;;  %v23155_v5 = vld [vmem:[#allocation29_spill] sm:$0xff]  ;;  %v21194_v23 = vld [vmem:[#allocation3 + $0x81] sm:$0xff]  ;;  %v8477_v28 = vadd.f32 %v21048_v17, %v20826_v18 }
 0x590   :  { %v17410_v15 = vpop.f32.mrf.mxu1  ;;  %v8474_v47 = vadd.f32 %v21036_v7, %v23155_v5  ;;  %v8476_v18 = vadd.f32 %v21060_v41, %v23156_v52  ;;  %v23161_v52 = vld [vmem:[#allocation46_spill] sm:$0xff] }
 0x591   :  { %15549 = vmatpush3.xpose.msk.msra.mxu1 %vm69_vm0, %v21140_v0  ;;  %9314 = vst.msk [vmem:[#allocation3 + $0x201] sm:$0xff] %vm69_vm0, %v9250_v44  ;;  %v9249_v19 = vadd.f32 %v20910_v57, %v9178_v21  ;;  %v9181_v10 = vadd.f32 %v17410_v15, %v8471_v62  ;;  %v21206_v62 = vld [vmem:[#allocation3 + $0x80] sm:$0xff]  ;;  %v21208_v44 = vpop.f32.mrf.mxu0  ;;  %v21212_v15 = vld [vmem:[#allocation3 + $0x138] sm:$0xff] }
 0x592   :  { %15550 = vmatprep.subr.msk.mxu1 %vm69_vm0, %v21146_v32  ;;  %v9013_v14 = vpop.f32.mrf.mxu1  ;;  %15483 = vmatpush3.xpose.msk.msra.mxu0 %vm69_vm0, %v9419_v25  ;;  %v21224_v25 = vld [vmem:[#allocation3 + $0x129] sm:$0xff] }
 0x593   :  { %9313 = vst.msk [vmem:[#allocation3 + $0x1f9] sm:$0xff] %vm69_vm0, %v9249_v19  ;;  %v9252_v45 = vadd.f32 %v20910_v57, %v9181_v10  ;;  %v9180_v60 = vadd.f32 %v9013_v14, %v8470_v54  ;;  %15484 = vmatprep.subr.msk.mxu0 %vm69_vm0, %v9434_v63  ;;  %v21220_v19 = vld [vmem:[#allocation3 + $0x79] sm:$0xff] }
 0x594   :  { %v17413_v61 = vpop.f32.mrf.mxu1  ;;  %v23157_v14 = vld [vmem:[#allocation27_spill] sm:$0xff] }
 0x595   :  { %15551 = vmatpush3.xpose.msk.msra.mxu1 %vm69_vm0, %v21160_v33  ;;  %9316 = vst.msk [vmem:[#allocation3 + $0x219] sm:$0xff] %vm69_vm0, %v9252_v45  ;;  %v9251_v6 = vadd.f32 %v20910_v57, %v9180_v60  ;;  %v9183_v59 = vadd.f32 %v17413_v61, %v8473_v26  ;;  %v8479_v63 = vadd.f32 %v21072_v35, %v23157_v14  ;;  %v21232_v45 = vld [vmem:[#allocation3 + $0x78] sm:$0xff]  ;;  %v21234_v60 = vpop.f32.mrf.mxu0 }
 0x596   :  { %15552 = vmatprep.subr.msk.mxu1 %vm69_vm0, %v21166_v11  ;;  %v9023_v29 = vpop.f32.mrf.mxu1  ;;  %15485 = vmatpush3.xpose.msk.msra.mxu0 %vm69_vm0, %v9418_v24  ;;  %v21246_v24 = vld [vmem:[#allocation3 + $0x69] sm:$0xff] }
 0x597   :  { %9315 = vst.msk [vmem:[#allocation3 + $0x211] sm:$0xff] %vm69_vm0, %v9251_v6  ;;  %v9254_v50 = vadd.f32 %v20910_v57, %v9183_v59  ;;  %v9182_v16 = vadd.f32 %v9023_v29, %v8472_v56  ;;  %15486 = vmatprep.subr.msk.mxu0 %vm69_vm0, %v9433_v2  ;;  %v23158_v56 = vld [vmem:[#allocation26_spill] sm:$0xff]  ;;  %v21250_v2 = vld [vmem:[#allocation3 + $0x121] sm:$0xff]  ;;  %v21260_v5 = vpop.f32.mrf.mxu0 }
 0x598   :  { %v17416_v34 = vpop.f32.mrf.mxu1  ;;  %v8478_v35 = vadd.f32 %v21084_v55, %v23158_v56  ;;  %v21296_v56 = vld [vmem:[#allocation3 + $0x51] sm:$0xff] }
 0x599   :  { %15553 = vmatpush3.xpose.msk.msra.mxu1 %vm69_vm0, %v21180_v13  ;;  %9318 = vst.msk [vmem:[#allocation3 + $0x231] sm:$0xff] %vm69_vm0, %v9254_v50  ;;  %v9253_v46 = vadd.f32 %v20910_v57, %v9182_v16  ;;  %v9185_v9 = vadd.f32 %v17416_v34, %v8475_v42  ;;  %v23159_v42 = vld [vmem:[#allocation35_spill] sm:$0xff]  ;;  %v21258_v34 = vld [vmem:[#allocation3 + $0x68] sm:$0xff] }
 0x59a   :  { %15554 = vmatprep.subr.msk.mxu1 %vm69_vm0, %v21186_v40  ;;  %v9033_v58 = vpop.f32.mrf.mxu1  ;;  %15487 = vmatpush3.xpose.msk.msra.mxu0 %vm69_vm0, %v21194_v23  ;;  %v8481_v50 = vadd.f32 %v21094_v31, %v23159_v42 }
 0x59b   :  { %9317 = vst.msk [vmem:[#allocation3 + $0x229] sm:$0xff] %vm69_vm0, %v9253_v46  ;;  %v9256_v7 = vadd.f32 %v20910_v57, %v9185_v9  ;;  %v9184_v27 = vadd.f32 %v9033_v58, %v8474_v47  ;;  %15488 = vmatprep.subr.msk.mxu0 %vm69_vm0, %v21198_v1  ;;  %v21264_v46 = vld [vmem:[#allocation3 + $0x120] sm:$0xff]  ;;  %v23160_v9 = vld [vmem:[#allocation41_spill] sm:$0xff] }
 0x59c   :  { %v17419_v21 = vpop.f32.mrf.mxu1  ;;  %v8480_v31 = vadd.f32 %v21103_v36, %v23160_v9  ;;  %v23164_v9 = vld [vmem:[#allocation15_spill] sm:$0xff] }
 0x59d   :  { %15555 = vmatpush3.xpose.msk.msra.mxu1 %vm69_vm0, %v21206_v62  ;;  %9320 = vst.msk [vmem:[#allocation3 + $0x249] sm:$0xff] %vm69_vm0, %v9256_v7  ;;  %v9255_v17 = vadd.f32 %v20910_v57, %v9184_v27  ;;  %v9187_v54 = vadd.f32 %v17419_v21, %v8477_v28  ;;  %v21272_v7 = vld [vmem:[#allocation3 + $0x61] sm:$0xff]  ;;  %v21276_v21 = vld [vmem:[#allocation3 + $0x111] sm:$0xff] }
 0x59e   :  { %15556 = vmatprep.subr.msk.mxu1 %vm69_vm0, %v21212_v15  ;;  %v9043_v10 = vpop.f32.mrf.mxu1  ;;  %15489 = vmatpush3.xpose.msk.msra.mxu0 %vm69_vm0, %v21220_v19 }
 0x59f   :  { %9319 = vst.msk [vmem:[#allocation3 + $0x241] sm:$0xff] %vm69_vm0, %v9255_v17  ;;  %v9258_v41 = vadd.f32 %v20910_v57, %v9187_v54  ;;  %v9186_v26 = vadd.f32 %v9043_v10, %v8476_v18  ;;  %15490 = vmatprep.subr.msk.mxu0 %vm69_vm0, %v21224_v25  ;;  %v8483_v18 = vadd.f32 %v21122_v3, %v23161_v52  ;;  %v21284_v54 = vld [vmem:[#allocation3 + $0x60] sm:$0xff]  ;;  %v8393_v10 = vpop.f32.mrf.mxu0 }
 0x5a0   :  { %v17422_v61 = vpop.f32.mrf.mxu1  ;;  %v21324_v52 = vld [vmem:[#allocation3 + $0xf9] sm:$0xff] }
 0x5a1   :  { %15557 = vmatpush3.xpose.msk.msra.mxu1 %vm69_vm0, %v21232_v45  ;;  %9322 = vst.msk [vmem:[#allocation3 + $0x261] sm:$0xff] %vm69_vm0, %v9258_v41  ;;  %v9257_v6 = vadd.f32 %v20910_v57, %v9186_v26  ;;  %v9189_v59 = vadd.f32 %v17422_v61, %v8479_v63  ;;  %v21288_v63 = vld [vmem:[#allocation3 + $0x110] sm:$0xff] }
 0x5a2   :  { %15558 = vmatprep.subr.msk.mxu1 %vm69_vm0, %v21238_v8  ;;  %v9053_v29 = vpop.f32.mrf.mxu1  ;;  %15491 = vmatpush3.xpose.msk.msra.mxu0 %vm69_vm0, %v21246_v24  ;;  %v23162_v41 = vld [vmem:[#allocation49_spill] sm:$0xff] }
 0x5a3   :  { %9321 = vst.msk [vmem:[#allocation3 + $0x259] sm:$0xff] %vm69_vm0, %v9257_v6  ;;  %v9260_v55 = vadd.f32 %v20910_v57, %v9189_v59  ;;  %v9188_v16 = vadd.f32 %v9053_v29, %v8478_v35  ;;  %15492 = vmatprep.subr.msk.mxu0 %vm69_vm0, %v21250_v2  ;;  %v8482_v3 = vadd.f32 %v21142_v30, %v23162_v41  ;;  %v21300_v6 = vld [vmem:[#allocation3 + $0x109] sm:$0xff]  ;;  %v23163_v59 = vld [vmem:[#allocation14_spill] sm:$0xff] }
 0x5a4   :  { %v17425_v47 = vpop.f32.mrf.mxu1  ;;  %v8485_v29 = vadd.f32 %v21162_v12, %v23163_v59  ;;  %v8484_v12 = vadd.f32 %v21182_v48, %v23164_v9 }
 0x5a5   :  { %15559 = vmatpush3.xpose.msk.msra.mxu1 %vm69_vm0, %v21258_v34  ;;  %9324 = vst.msk [vmem:[#allocation3 + $0x279] sm:$0xff] %vm69_vm0, %v9260_v55  ;;  %v9259_v58 = vadd.f32 %v20910_v57, %v9188_v16  ;;  %v9191_v28 = vadd.f32 %v17425_v47, %v8481_v50  ;;  %v21308_v50 = vld [vmem:[#allocation3 + $0x50] sm:$0xff]  ;;  %v17336_v55 = vpop.f32.mrf.mxu0  ;;  %v21312_v47 = vld [vmem:[#allocation3 + $0x108] sm:$0xff] }
 0x5a6   :  { %15560 = vmatprep.subr.msk.mxu1 %vm69_vm0, %v21264_v46  ;;  %v9063_v27 = vpop.f32.mrf.mxu1  ;;  %15493 = vmatpush3.xpose.msk.msra.mxu0 %vm69_vm0, %v21272_v7 }
 0x5a7   :  { %9323 = vst.msk [vmem:[#allocation3 + $0x271] sm:$0xff] %vm69_vm0, %v9259_v58  ;;  %v9262_v36 = vadd.f32 %v20910_v57, %v9191_v28  ;;  %v9190_v17 = vadd.f32 %v9063_v27, %v8480_v31  ;;  %15494 = vmatprep.subr.msk.mxu0 %vm69_vm0, %v21276_v21  ;;  %v21320_v28 = vld [vmem:[#allocation3 + $0x49] sm:$0xff] }
 0x5a8   :  { %v17428_v14 = vpop.f32.mrf.mxu1 }
 0x5a9   :  { %15561 = vmatpush3.xpose.msk.msra.mxu1 %vm69_vm0, %v21284_v54  ;;  %9326 = vst.msk [vmem:[#allocation3 + $0x291] sm:$0xff] %vm69_vm0, %v9262_v36  ;;  %v9261_v26 = vadd.f32 %v20910_v57, %v9190_v17  ;;  %v9193_v61 = vadd.f32 %v17428_v14, %v8483_v18  ;;  %v8487_v18 = vadd.f32 %v21208_v44, %v20866_v53  ;;  %v21332_v17 = vld [vmem:[#allocation3 + $0x48] sm:$0xff]  ;;  %v8403_v14 = vpop.f32.mrf.mxu0 }
 0x5aa   :  { %15562 = vmatprep.subr.msk.mxu1 %vm69_vm0, %v21288_v63  ;;  %v9073_v35 = vpop.f32.mrf.mxu1  ;;  %15495 = vmatpush3.xpose.msk.msra.mxu0 %vm69_vm0, %v21296_v56 }
 0x5ab   :  { %9325 = vst.msk [vmem:[#allocation3 + $0x289] sm:$0xff] %vm69_vm0, %v9261_v26  ;;  %v9264_v30 = vadd.f32 %v20910_v57, %v9193_v61  ;;  %v9192_v42 = vadd.f32 %v9073_v35, %v8482_v3  ;;  %15496 = vmatprep.subr.msk.mxu0 %vm69_vm0, %v21300_v6  ;;  %v21336_v3 = vld [vmem:[#allocation3 + $0xf8] sm:$0xff]  ;;  %v23165_v26 = vld [vmem:[#allocation20_spill] sm:$0xff]  ;;  %v17339_v9 = vpop.f32.mrf.mxu0 }
 0x5ac   :  { %v17431_v16 = vpop.f32.mrf.mxu1  ;;  %v8486_v53 = vadd.f32 %v21234_v60, %v23165_v26  ;;  %v21344_v35 = vld [vmem:[#allocation3 + $0x39] sm:$0xff] }
 0x5ad   :  { %15563 = vmatpush3.xpose.msk.msra.mxu1 %vm69_vm0, %v21308_v50  ;;  %9328 = vst.msk [vmem:[#allocation3 + $0x2a9] sm:$0xff] %vm69_vm0, %v9264_v30  ;;  %v9263_v31 = vadd.f32 %v20910_v57, %v9192_v42  ;;  %v9195_v58 = vadd.f32 %v17431_v16, %v8485_v29  ;;  %v21348_v29 = vld [vmem:[#allocation3 + $0xf1] sm:$0xff]  ;;  %v8489_v30 = vadd.f32 %v21260_v5, %v20874_v39 }
 0x5ae   :  { %15564 = vmatprep.subr.msk.mxu1 %vm69_vm0, %v21312_v47  ;;  %v9083_v27 = vpop.f32.mrf.mxu1  ;;  %15497 = vmatpush3.xpose.msk.msra.mxu0 %vm69_vm0, %v21320_v28  ;;  %v21356_v16 = vld [vmem:[#allocation3 + $0x38] sm:$0xff] }
 0x5af   :  { %9327 = vst.msk [vmem:[#allocation3 + $0x2a1] sm:$0xff] %vm69_vm0, %v9263_v31  ;;  %v9266_v48 = vadd.f32 %v20910_v57, %v9195_v58  ;;  %v9194_v36 = vadd.f32 %v9083_v27, %v8484_v12  ;;  %15498 = vmatprep.subr.msk.mxu0 %vm69_vm0, %v21324_v52  ;;  %v21360_v31 = vld [vmem:[#allocation3 + $0xf0] sm:$0xff] }
 0x5b0   :  { %v17434_v41 = vpop.f32.mrf.mxu1  ;;  %v23166_v58 = vld [vmem:[#allocation37_spill] sm:$0xff] }
 0x5b1   :  { %15565 = vmatpush3.xpose.msk.msra.mxu1 %vm69_vm0, %v21332_v17  ;;  %9330 = vst.msk [vmem:[#allocation3 + $0x2c1] sm:$0xff] %vm69_vm0, %v9266_v48  ;;  %v9265_v44 = vadd.f32 %v20910_v57, %v9194_v36  ;;  %v9197_v61 = vadd.f32 %v17434_v41, %v8487_v18  ;;  %v8488_v27 = vadd.f32 %v8393_v10, %v23166_v58  ;;  %v21367_v18 = vld [vmem:[#allocation3 + $0x31] sm:$0xff]  ;;  %v21371_v36 = vld [vmem:[#allocation3 + $0xe1] sm:$0xff] }
 0x5b2   :  { %15566 = vmatprep.subr.msk.mxu1 %vm69_vm0, %v21336_v3  ;;  %v9093_v59 = vpop.f32.mrf.mxu1  ;;  %15499 = vmatpush3.xpose.msk.msra.mxu0 %vm69_vm0, %v21344_v35  ;;  %v8491_v41 = vadd.f32 %v17336_v55, %v20882_v22 }
 0x5b3   :  { %9329 = vst.msk [vmem:[#allocation3 + $0x2b9] sm:$0xff] %vm69_vm0, %v9265_v44  ;;  %v9268_v60 = vadd.f32 %v20910_v57, %v9197_v61  ;;  %v9196_v42 = vadd.f32 %v9093_v59, %v8486_v53  ;;  %15500 = vmatprep.subr.msk.mxu0 %vm69_vm0, %v21348_v29  ;;  %v21378_v53 = vld [vmem:[#allocation3 + $0x30] sm:$0xff]  ;;  %v8413_v44 = vpop.f32.mrf.mxu0  ;;  %v21382_v59 = vld [vmem:[#allocation3 + $0xe0] sm:$0xff] }
 0x5b4   :  { %v17437_v12 = vpop.f32.mrf.mxu1 }
 0x5b5   :  { %15567 = vmatpush3.xpose.msk.msra.mxu1 %vm69_vm0, %v21356_v16  ;;  %9332 = vst.msk [vmem:[#allocation3 + $0x2d9] sm:$0xff] %vm69_vm0, %v9268_v60  ;;  %v9267_v39 = vadd.f32 %v20910_v57, %v9196_v42  ;;  %v9199_v5 = vadd.f32 %v17437_v12, %v8489_v30  ;;  %v23167_v30 = vld [vmem:[#allocation42_spill] sm:$0xff]  ;;  %v21389_v42 = vld [vmem:[#allocation3 + $0x21] sm:$0xff]  ;;  %v17342_v12 = vpop.f32.mrf.mxu0 }
 0x5b6   :  { %15568 = vmatprep.subr.msk.mxu1 %vm69_vm0, %v21360_v31  ;;  %v9103_v48 = vpop.f32.mrf.mxu1  ;;  %15501 = vmatpush3.xpose.msk.msra.mxu0 %vm69_vm0, %v21367_v18  ;;  %v8490_v60 = vadd.f32 %v8403_v14, %v23167_v30  ;;  %23168 = vst [vmem:[#allocation21_spill] sm:$0xff] %v21389_v42 }
 0x5b7   :  { %9331 = vst.msk [vmem:[#allocation3 + $0x2d1] sm:$0xff] %vm69_vm0, %v9267_v39  ;;  %v9270_v10 = vadd.f32 %v20910_v57, %v9199_v5  ;;  %v9198_v26 = vadd.f32 %v9103_v48, %v8488_v27  ;;  %15502 = vmatprep.subr.msk.mxu0 %vm69_vm0, %v21371_v36  ;;  %v21393_v27 = vld [vmem:[#allocation3 + $0xd9] sm:$0xff]  ;;  %v8493_v39 = vadd.f32 %v17339_v9, %v20890_v51  ;;  %v8423_v30 = vpop.f32.mrf.mxu0 }
 0x5b8   :  { %v17440_v61 = vpop.f32.mrf.mxu1  ;;  %23169 = vst [vmem:[#allocation51_spill] sm:$0xff] %v21393_v27  ;;  %v21400_v48 = vld [vmem:[#allocation3 + $0x20] sm:$0xff] }
 0x5b9   :  { %15569 = vmatpush3.xpose.msk.msra.mxu1 %vm69_vm0, %v21378_v53  ;;  %9334 = vst.msk [vmem:[#allocation3 + $0x2f1] sm:$0xff] %vm69_vm0, %v9270_v10  ;;  %v9269_v22 = vadd.f32 %v20910_v57, %v9198_v26  ;;  %v9201_v55 = vadd.f32 %v17440_v61, %v8491_v41  ;;  %v21404_v10 = vld [vmem:[#allocation3 + $0xd8] sm:$0xff]  ;;  %v8492_v26 = vadd.f32 %v8413_v44, %v20893_v4 }
 0x5ba   :  { %15570 = vmatprep.subr.msk.mxu1 %vm69_vm0, %v21382_v59  ;;  %v9113_v58 = vpop.f32.mrf.mxu1  ;;  %15503 = vmatpush3.xpose.msk.msra.mxu0 %vm69_vm0, %v21389_v42  ;;  %v21411_v61 = vld [vmem:[#allocation3 + $0x19] sm:$0xff] }
 0x5bb   :  { %9333 = vst.msk [vmem:[#allocation3 + $0x2e9] sm:$0xff] %vm69_vm0, %v9269_v22  ;;  %v9272_v14 = vadd.f32 %v20910_v57, %v9201_v55  ;;  %v9200_v5 = vadd.f32 %v9113_v58, %v8490_v60  ;;  %15504 = vmatprep.subr.msk.mxu0 %vm69_vm0, %v21393_v27  ;;  %23170 = vst [vmem:[#allocation52_spill] sm:$0xff] %v21411_v61  ;;  %v21415_v22 = vld [vmem:[#allocation3 + $0xc9] sm:$0xff]  ;;  %v23171_v55 = vld [vmem:[#allocation47_spill] sm:$0xff] }
 0x5bc   :  { %v17443_v41 = vpop.f32.mrf.mxu1  ;;  %v8495_v58 = vadd.f32 %v17342_v12, %v23171_v55 }
 0x5bd   :  { %15571 = vmatpush3.xpose.msk.msra.mxu1 %vm69_vm0, %v21400_v48  ;;  %9336 = vst.msk [vmem:[#allocation3 + $0x309] sm:$0xff] %vm69_vm0, %v9272_v14  ;;  %v9271_v51 = vadd.f32 %v20910_v57, %v9200_v5  ;;  %v9203_v9 = vadd.f32 %v17443_v41, %v8493_v39  ;;  %v21422_v39 = vld [vmem:[#allocation3 + $0x18] sm:$0xff]  ;;  %v9407_v14 = vld [vmem:[#allocation3 + $0x9] sm:$0xff] }
 0x5be   :  { %15572 = vmatprep.subr.msk.mxu1 %vm69_vm0, %v21404_v10  ;;  %v9123_v60 = vpop.f32.mrf.mxu1  ;;  %15505 = vmatpush3.xpose.msk.msra.mxu0 %vm69_vm0, %v21411_v61  ;;  %v21426_v41 = vld [vmem:[#allocation3 + $0xc8] sm:$0xff]  ;;  %v23172_v61 = vld [vmem:[#allocation22_spill] sm:$0xff] }
 0x5bf   :  { %9335 = vst.msk [vmem:[#allocation3 + $0x301] sm:$0xff] %vm69_vm0, %v9271_v51  ;;  %v9274_v4 = vadd.f32 %v20910_v57, %v9203_v9  ;;  %v9202_v44 = vadd.f32 %v9123_v60, %v8492_v26  ;;  %15506 = vmatprep.subr.msk.mxu0 %vm69_vm0, %v21415_v22  ;;  %v8494_v27 = vadd.f32 %v8423_v30, %v23172_v61  ;;  %v9342_v26 = vld [vmem:[#allocation3 + $0x8] sm:$0xff]  ;;  %v21441_v30 = vld [vmem:[#allocation3 + $0xc0] sm:$0xff] }
 0x5c0   :  { %v17446_v5 = vpop.f32.mrf.mxu1  ;;  %v21434_v60 = vld [vmem:[#allocation3 + $0xc1] sm:$0xff] }
 0x5c1   :  { %15573 = vmatpush3.xpose.msk.msra.mxu1 %vm69_vm0, %v21422_v39  ;;  %9338 = vst.msk [vmem:[#allocation3 + $0x321] sm:$0xff] %vm69_vm0, %v9274_v4  ;;  %v9273_v12 = vadd.f32 %v20910_v57, %v9202_v44  ;;  %v9205_v51 = vadd.f32 %v17446_v5, %v8495_v58  ;;  %v9406_v61 = vld [vmem:[#allocation3 + $0x1] sm:$0xff]  ;;  %v21450_v44 = vld [vmem:[#allocation3 + $0x172] sm:$0xff] }
 0x5c2   :  { %15574 = vmatprep.subr.msk.mxu1 %vm69_vm0, %v21426_v41  ;;  %v9133_v9 = vpop.f32.mrf.mxu1  ;;  %15507 = vmatpush3.xpose.msk.msra.mxu0 %vm69_vm0, %v9407_v14  ;;  %v9341_v4 = vld [vmem:[#allocation3] sm:$0xff]  ;;  %v21460_v14 = vld [vmem:[#allocation3 + $0xb2] sm:$0xff] }
 0x5c3   :  { %9337 = vst.msk [vmem:[#allocation3 + $0x319] sm:$0xff] %vm69_vm0, %v9273_v12  ;;  %v9276_v55 = vadd.f32 %v20910_v57, %v9205_v51  ;;  %v9204_v42 = vadd.f32 %v9133_v9, %v8494_v27  ;;  %15508 = vmatprep.subr.msk.mxu0 %vm69_vm0, %v21434_v60  ;;  %v21462_v5 = vld [vmem:[#allocation7 + $0x10] sm:$0x1f]  ;;  %v9452_v51 = vld [vmem:[#allocation3 + $0x259] sm:$0xff] }
 0x5c4   :  { %v21467_v12 = vld [vmem:[#allocation3 + $0x16a] sm:$0xff]  ;;  %v21481_v9 = vld [vmem:[#allocation3 + $0x15a] sm:$0xff] }
 0x5c5   :  { %15575 = vmatpush3.xpose.msk.msra.mxu1 %vm69_vm0, %v9342_v26  ;;  %9340 = vst.msk [vmem:[#allocation3 + $0x339] sm:$0xff] %vm69_vm0, %v9276_v55  ;;  %v9275_v58 = vadd.f32 %v20910_v57, %v9204_v42  ;;  %v9453_v57 = vld [vmem:[#allocation3 + $0x261] sm:$0xff]  ;;  %v21476_v26 = vld [vmem:[#allocation3 + $0xaa] sm:$0xff] }
 0x5c6   :  { %15576 = vmatprep.subr.msk.mxu1 %vm69_vm0, %v21441_v30  ;;  %15509 = vmatpush3.xpose.msk.msra.mxu0 %vm69_vm0, %v9406_v61  ;;  %v9466_v55 = vld [vmem:[#allocation3 + $0x301] sm:$0xff] }
 0x5c7   :  { %9339 = vst.msk [vmem:[#allocation3 + $0x331] sm:$0xff] %vm69_vm0, %v9275_v58  ;;  %v21486_v61 = vld [vmem:[#allocation3 + $0x9a] sm:$0xff]  ;;  %v21491_v58 = vld [vmem:[#allocation3 + $0x152] sm:$0xff] }
 0x5c8   :  { %v9469_v27 = vld [vmem:[#allocation3 + $0x321] sm:$0xff]  ;;  %23173 = vst [vmem:[#allocation55_spill] sm:$0xff] %v21486_v61  ;;  %23174 = vst [vmem:[#allocation53_spill] sm:$0xff] %v21491_v58 }
 0x5c9   :  { %15577 = vmatpush3.xpose.msk.msra.mxu1 %vm69_vm0, %v9341_v4  ;;  %15512 = vmatprep.subr.msk.mxu0 %vm69_vm0, %v9469_v27  ;;  %v9450_v4 = vld [vmem:[#allocation3 + $0x241] sm:$0xff]  ;;  %v9465_v27 = vld [vmem:[#allocation3 + $0x2f1] sm:$0xff] }
 0x5ca   :  { %15614 = vmatprep.subr.msk.mxu1 %vm69_vm0, %v21450_v44  ;;  %15511 = vmatmul.mubr.msk.f32.vlgmr.msra.gmra.mxu0 %vm69_vm0, %v20919_v38  ;;  %v9468_v42 = vld [vmem:[#allocation3 + $0x319] sm:$0xff] }
 0x5cb   :  { %15513 = vmatpush3.xpose.msk.msra.mxu0 %vm69_vm0, %v9453_v57  ;;  %15544 = vmatprep.mubr.msk.f32.mxu0 %vm69_vm0, %v20919_v38  ;;  %v9451_v38 = vld [vmem:[#allocation3 + $0x249] sm:$0xff]  ;;  %v21496_v57 = vld [vmem:[#allocation3 + $0x92] sm:$0xff] }
 0x5cc   :  { %15579 = vmatmul.mubr.msk.f32.vlgmr.msra.gmra.mxu1 %vm69_vm0, %v20933_v43  ;;  %15514 = vmatprep.subr.msk.mxu0 %vm69_vm0, %v9468_v42  ;;  %v9467_v43 = vld [vmem:[#allocation3 + $0x309] sm:$0xff]  ;;  %23175 = vst [vmem:[#allocation54_spill] sm:$0xff] %v21496_v57 }
 0x5cd   :  { %15615 = vmatpush3.xpose.msk.msra.mxu1 %vm69_vm0, %v21460_v14  ;;  %15646 = vmatprep.mubr.msk.f32.mxu1 %vm69_vm0, %v21462_v5  ;;  %v21501_v42 = vld [vmem:[#allocation3 + $0x142] sm:$0xff] }
 0x5ce   :  { %15616 = vmatprep.subr.msk.mxu1 %vm69_vm0, %v21467_v12  ;;  %23176 = vst [vmem:[#allocation56_spill] sm:$0xff] %v21501_v42 }
 0x5cf   :  { %15515 = vmatpush3.xpose.msk.msra.mxu0 %vm69_vm0, %v9452_v51  ;;  %v9449_v51 = vld [vmem:[#allocation3 + $0x231] sm:$0xff] }
 0x5d0   :  { %15516 = vmatprep.subr.msk.mxu0 %vm69_vm0, %v9467_v43  ;;  %v9464_v43 = vld [vmem:[#allocation3 + $0x2e9] sm:$0xff] }
 0x5d1   :  { %15617 = vmatpush3.xpose.msk.msra.mxu1 %vm69_vm0, %v21476_v26 }
 0x5d2   :  { %15618 = vmatprep.subr.msk.mxu1 %vm69_vm0, %v21481_v9 }
 0x5d3   :  { %15517 = vmatpush3.xpose.msk.msra.mxu0 %vm69_vm0, %v9451_v38  ;;  %v21506_v38 = vld [vmem:[#allocation3 + $0x82] sm:$0xff] }
 0x5d4   :  { %15518 = vmatprep.subr.msk.mxu0 %vm69_vm0, %v9466_v55  ;;  %23177 = vst [vmem:[#allocation57_spill] sm:$0xff] %v21506_v38  ;;  %v21511_v55 = vld [vmem:[#allocation3 + $0x13a] sm:$0xff] }
 0x5d5   :  { %15619 = vmatpush3.xpose.msk.msra.mxu1 %vm69_vm0, %v21486_v61  ;;  %23178 = vst [vmem:[#allocation58_spill] sm:$0xff] %v21511_v55  ;;  %v21657_v61 = vld [vmem:[#allocation3 + $0x308] sm:$0xff] }
 0x5d6   :  { %15620 = vmatprep.subr.msk.mxu1 %vm69_vm0, %v21491_v58  ;;  %v21637_v58 = vld [vmem:[#allocation7 + $0x18] sm:$0x1f] }
 0x5d7   :  { %15519 = vmatpush3.xpose.msk.msra.mxu0 %vm69_vm0, %v9450_v4  ;;  %v9448_v4 = vld [vmem:[#allocation3 + $0x229] sm:$0xff] }
 0x5d8   :  { %15520 = vmatprep.subr.msk.mxu0 %vm69_vm0, %v9465_v27  ;;  %v9463_v27 = vld [vmem:[#allocation3 + $0x2d9] sm:$0xff] }
 0x5d9   :  { %15621 = vmatpush3.xpose.msk.msra.mxu1 %vm69_vm0, %v21496_v57  ;;  %v21619_v57 = vld [vmem:[#allocation3 + $0x320] sm:$0xff] }
 0x5da   :  { %15622 = vmatprep.subr.msk.mxu1 %vm69_vm0, %v21501_v42  ;;  %v21516_v42 = vld [vmem:[#allocation3 + $0x7a] sm:$0xff] }
 0x5db   :  { %15521 = vmatpush3.xpose.msk.msra.mxu0 %vm69_vm0, %v9449_v51  ;;  %23179 = vst [vmem:[#allocation59_spill] sm:$0xff] %v21516_v42  ;;  %v21521_v51 = vld [vmem:[#allocation3 + $0x12a] sm:$0xff] }
 0x5dc   :  { %15522 = vmatprep.subr.msk.mxu0 %vm69_vm0, %v9464_v43  ;;  %23180 = vst [vmem:[#allocation72_spill] sm:$0xff] %v21521_v51  ;;  %v9447_v43 = vld [vmem:[#allocation3 + $0x219] sm:$0xff] }
 0x5dd   :  { %15623 = vmatpush3.xpose.msk.msra.mxu1 %vm69_vm0, %v21506_v38  ;;  %v21526_v38 = vld [vmem:[#allocation3 + $0x6a] sm:$0xff] }
 0x5de   :  { %15624 = vmatprep.subr.msk.mxu1 %vm69_vm0, %v21511_v55  ;;  %v9462_v55 = vld [vmem:[#allocation3 + $0x2d1] sm:$0xff]  ;;  %23181 = vst [vmem:[#allocation25_spill] sm:$0xff] %v21526_v38 }
 0x5df   :  { %15523 = vmatpush3.xpose.msk.msra.mxu0 %vm69_vm0, %v9448_v4  ;;  %v21531_v4 = vld [vmem:[#allocation3 + $0x122] sm:$0xff] }
 0x5e0   :  { %15524 = vmatprep.subr.msk.mxu0 %vm69_vm0, %v9463_v27  ;;  %23182 = vst [vmem:[#allocation17_spill] sm:$0xff] %v21531_v4  ;;  %v9446_v27 = vld [vmem:[#allocation3 + $0x211] sm:$0xff] }
 0x5e1   :  { %15625 = vmatpush3.xpose.msk.msra.mxu1 %vm69_vm0, %v21516_v42  ;;  %v21536_v42 = vld [vmem:[#allocation3 + $0x62] sm:$0xff] }
 0x5e2   :  { %15626 = vmatprep.subr.msk.mxu1 %vm69_vm0, %v21521_v51  ;;  %v9461_v51 = vld [vmem:[#allocation3 + $0x2c1] sm:$0xff]  ;;  %23183 = vst [vmem:[#allocation60_spill] sm:$0xff] %v21536_v42 }
 0x5e3   :  { %15525 = vmatpush3.xpose.msk.msra.mxu0 %vm69_vm0, %v9447_v43  ;;  %v9445_v43 = vld [vmem:[#allocation3 + $0x201] sm:$0xff] }
 0x5e4   :  { %15526 = vmatprep.subr.msk.mxu0 %vm69_vm0, %v9462_v55  ;;  %v21541_v55 = vld [vmem:[#allocation3 + $0x112] sm:$0xff] }
 0x5e5   :  { %15627 = vmatpush3.xpose.msk.msra.mxu1 %vm69_vm0, %v21526_v38  ;;  %23184 = vst [vmem:[#allocation61_spill] sm:$0xff] %v21541_v55  ;;  %v21546_v38 = vld [vmem:[#allocation3 + $0x52] sm:$0xff] }
 0x5e6   :  { %15628 = vmatprep.subr.msk.mxu1 %vm69_vm0, %v21531_v4  ;;  %v9460_v4 = vld [vmem:[#allocation3 + $0x2b9] sm:$0xff]  ;;  %23185 = vst [vmem:[#allocation63_spill] sm:$0xff] %v21546_v38 }
 0x5e7   :  { %15527 = vmatpush3.xpose.msk.msra.mxu0 %vm69_vm0, %v9446_v27  ;;  %v9444_v27 = vld [vmem:[#allocation3 + $0x1f9] sm:$0xff] }
 0x5e8   :  { %15528 = vmatprep.subr.msk.mxu0 %vm69_vm0, %v9461_v51  ;;  %v21551_v51 = vld [vmem:[#allocation3 + $0x10a] sm:$0xff] }
 0x5e9   :  { %15629 = vmatpush3.xpose.msk.msra.mxu1 %vm69_vm0, %v21536_v42  ;;  %23186 = vst [vmem:[#allocation32_spill] sm:$0xff] %v21551_v51  ;;  %v21556_v42 = vld [vmem:[#allocation3 + $0x4a] sm:$0xff] }
 0x5ea   :  { %15630 = vmatprep.subr.msk.mxu1 %vm69_vm0, %v21541_v55  ;;  %v9459_v55 = vld [vmem:[#allocation3 + $0x2a9] sm:$0xff]  ;;  %23187 = vst [vmem:[#allocation24_spill] sm:$0xff] %v21556_v42 }
 0x5eb   :  { %15529 = vmatpush3.xpose.msk.msra.mxu0 %vm69_vm0, %v9445_v43  ;;  %v9443_v43 = vld [vmem:[#allocation3 + $0x1e9] sm:$0xff] }
 0x5ec   :  { %15530 = vmatprep.subr.msk.mxu0 %vm69_vm0, %v9460_v4  ;;  %v21561_v4 = vld [vmem:[#allocation3 + $0xfa] sm:$0xff] }
 0x5ed   :  { %15631 = vmatpush3.xpose.msk.msra.mxu1 %vm69_vm0, %v21546_v38  ;;  %23188 = vst [vmem:[#allocation62_spill] sm:$0xff] %v21561_v4  ;;  %v21566_v38 = vld [vmem:[#allocation3 + $0x3a] sm:$0xff] }
 0x5ee   :  { %15632 = vmatprep.subr.msk.mxu1 %vm69_vm0, %v21551_v51  ;;  %v9458_v51 = vld [vmem:[#allocation3 + $0x2a1] sm:$0xff]  ;;  %23189 = vst [vmem:[#allocation48_spill] sm:$0xff] %v21566_v38 }
 0x5ef   :  { %15531 = vmatpush3.xpose.msk.msra.mxu0 %vm69_vm0, %v9444_v27  ;;  %v9442_v27 = vld [vmem:[#allocation3 + $0x1e1] sm:$0xff] }
 0x5f0   :  { %15532 = vmatprep.subr.msk.mxu0 %vm69_vm0, %v9459_v55  ;;  %v21571_v55 = vld [vmem:[#allocation3 + $0xf2] sm:$0xff] }
 0x5f1   :  { %15633 = vmatpush3.xpose.msk.msra.mxu1 %vm69_vm0, %v21556_v42  ;;  %23190 = vst [vmem:[#allocation65_spill] sm:$0xff] %v21571_v55  ;;  %v21576_v42 = vld [vmem:[#allocation3 + $0x32] sm:$0xff] }
 0x5f2   :  { %15634 = vmatprep.subr.msk.mxu1 %vm69_vm0, %v21561_v4  ;;  %v9457_v4 = vld [vmem:[#allocation3 + $0x291] sm:$0xff]  ;;  %23191 = vst [vmem:[#allocation38_spill] sm:$0xff] %v21576_v42 }
 0x5f3   :  { %15533 = vmatpush3.xpose.msk.msra.mxu0 %vm69_vm0, %v9443_v43  ;;  %v9441_v43 = vld [vmem:[#allocation3 + $0x1d1] sm:$0xff] }
 0x5f4   :  { %15534 = vmatprep.subr.msk.mxu0 %vm69_vm0, %v9458_v51  ;;  %v21581_v51 = vld [vmem:[#allocation3 + $0xe2] sm:$0xff] }
 0x5f5   :  { %15635 = vmatpush3.xpose.msk.msra.mxu1 %vm69_vm0, %v21566_v38  ;;  %23192 = vst [vmem:[#allocation44_spill] sm:$0xff] %v21581_v51  ;;  %v21586_v38 = vld [vmem:[#allocation3 + $0x22] sm:$0xff] }
 0x5f6   :  { %15636 = vmatprep.subr.msk.mxu1 %vm69_vm0, %v21571_v55  ;;  %v9456_v55 = vld [vmem:[#allocation3 + $0x289] sm:$0xff]  ;;  %23193 = vst [vmem:[#allocation64_spill] sm:$0xff] %v21586_v38 }
 0x5f7   :  { %15535 = vmatpush3.xpose.msk.msra.mxu0 %vm69_vm0, %v9442_v27  ;;  %v9440_v27 = vld [vmem:[#allocation3 + $0x1c9] sm:$0xff] }
 0x5f8   :  { %15536 = vmatprep.subr.msk.mxu0 %vm69_vm0, %v9457_v4  ;;  %v21591_v4 = vld [vmem:[#allocation3 + $0xda] sm:$0xff] }
 0x5f9   :  { %15637 = vmatpush3.xpose.msk.msra.mxu1 %vm69_vm0, %v21576_v42  ;;  %23194 = vst [vmem:[#allocation67_spill] sm:$0xff] %v21591_v4  ;;  %v21598_v42 = vld [vmem:[#allocation3 + $0x1a] sm:$0xff] }
 0x5fa   :  { %15638 = vmatprep.subr.msk.mxu1 %vm69_vm0, %v21581_v51  ;;  %v21596_v51 = vld [vmem:[#allocation3 + $0x279] sm:$0xff]  ;;  %23196 = vst [vmem:[#allocation19_spill] sm:$0xff] %v21598_v42 }
 0x5fb   :  { %15537 = vmatpush3.xpose.msk.msra.mxu0 %vm69_vm0, %v9441_v43  ;;  %23195 = vst [vmem:[#allocation33_spill] sm:$0xff] %v21596_v51  ;;  %v9439_v43 = vld [vmem:[#allocation3 + $0x1b9] sm:$0xff] }
 0x5fc   :  { %15538 = vmatprep.subr.msk.mxu0 %vm69_vm0, %v9456_v55  ;;  %v21604_v55 = vld [vmem:[#allocation3 + $0xca] sm:$0xff] }
 0x5fd   :  { %15639 = vmatpush3.xpose.msk.msra.mxu1 %vm69_vm0, %v21586_v38  ;;  %v9438_v38 = vld [vmem:[#allocation3 + $0x1b1] sm:$0xff] }
 0x5fe   :  { %15640 = vmatprep.subr.msk.mxu1 %vm69_vm0, %v21591_v4  ;;  %v10147_v4 = vld [vmem:[#allocation3 + $0xa] sm:$0xff] }
 0x5ff   :  { %15539 = vmatpush3.xpose.msk.msra.mxu0 %vm69_vm0, %v9440_v27  ;;  %v21609_v27 = vld [vmem:[#allocation3 + $0x271] sm:$0xff] }
 0x600   :  { %15540 = vmatprep.subr.msk.mxu0 %vm69_vm0, %v21596_v51  ;;  %23197 = vst [vmem:[#allocation66_spill] sm:$0xff] %v21609_v27  ;;  %v21614_v51 = vld [vmem:[#allocation3 + $0xc2] sm:$0xff] }
 0x601   :  { %15641 = vmatpush3.xpose.msk.msra.mxu1 %vm69_vm0, %v21598_v42  ;;  %v10146_v42 = vld [vmem:[#allocation3 + $0x2] sm:$0xff] }
 0x602   :  { %15642 = vmatprep.subr.msk.mxu1 %vm69_vm0, %v21604_v55 }
 0x603   :  { %15541 = vmatpush3.xpose.msk.msra.mxu0 %vm69_vm0, %v9439_v43  ;;  %v21624_v43 = vld [vmem:[#allocation3 + $0x188] sm:$0xff] }
 0x604   :  { %15542 = vmatprep.subr.msk.mxu0 %vm69_vm0, %v21609_v27  ;;  %23198 = vst [vmem:[#allocation69_spill] sm:$0xff] %v21624_v43  ;;  %v21629_v27 = vld [vmem:[#allocation3 + $0x260] sm:$0xff] }
 0x605   :  { %15643 = vmatpush3.xpose.msk.msra.mxu1 %vm69_vm0, %v10147_v4  ;;  %v17494_v4 = vld [vmem:[#allocation7 + $0x8] sm:$0x1f] }
 0x606   :  { %15644 = vmatprep.subr.msk.mxu1 %vm69_vm0, %v21614_v51 }
 0x607   :  { %15543 = vmatpush3.xpose.msk.msra.mxu0 %vm69_vm0, %v9438_v38  ;;  %v21633_v38 = vld [vmem:[#allocation3 + $0x318] sm:$0xff] }
 0x608   :  { %15580 = vmatprep.subr.msk.mxu0 %vm69_vm0, %v21619_v57 }
 0x609   :  { %15645 = vmatpush3.xpose.msk.msra.mxu1 %vm69_vm0, %v10146_v42  ;;  %v21643_v42 = vld [vmem:[#allocation3 + $0x180] sm:$0xff] }
 0x60a   :  { %15682 = vmatprep.subr.msk.mxu1 %vm69_vm0, %v21624_v43  ;;  %15545 = vmatmul.mubr.msk.f32.vlgmr.msra.gmra.mxu0 %vm69_vm0, %v17494_v4  ;;  %23199 = vst [vmem:[#allocation31_spill] sm:$0xff] %v21643_v42  ;;  %v21647_v4 = vld [vmem:[#allocation7] sm:$0x1f]  ;;  %v21651_v43 = vld [vmem:[#allocation3 + $0x258] sm:$0xff] }
 0x60b   :  { %15581 = vmatpush3.xpose.msk.msra.mxu0 %vm69_vm0, %v21629_v27  ;;  %15612 = vmatprep.mubr.msk.f32.mxu0 %vm69_vm0, %v21647_v4 }
 0x60c   :  { %15647 = vmatmul.mubr.msk.f32.vlgmr.msra.gmra.mxu1 %vm69_vm0, %v21462_v5  ;;  %15582 = vmatprep.subr.msk.mxu0 %vm69_vm0, %v21633_v38 }
 0x60d   :  { %15683 = vmatpush3.xpose.msk.msra.mxu1 %vm69_vm0, %v21426_v41  ;;  %15714 = vmatprep.mubr.msk.f32.mxu1 %vm69_vm0, %v21637_v58  ;;  %v21665_v41 = vld [vmem:[#allocation3 + $0x248] sm:$0xff] }
 0x60e   :  { %15684 = vmatprep.subr.msk.mxu1 %vm69_vm0, %v21643_v42  ;;  %v21669_v42 = vld [vmem:[#allocation3 + $0x300] sm:$0xff] }
 0x60f   :  { %15583 = vmatpush3.xpose.msk.msra.mxu0 %vm69_vm0, %v21651_v43 }
 0x610   :  { %15584 = vmatprep.subr.msk.mxu0 %vm69_vm0, %v21657_v61 }
 0x611   :  { %15685 = vmatpush3.xpose.msk.msra.mxu1 %vm69_vm0, %v21441_v30  ;;  %v21677_v30 = vld [vmem:[#allocation3 + $0x240] sm:$0xff] }
 0x612   :  { %15686 = vmatprep.subr.msk.mxu1 %vm69_vm0, %v21111_v37  ;;  %v21681_v37 = vld [vmem:[#allocation3 + $0x2f0] sm:$0xff] }
 0x613   :  { %15585 = vmatpush3.xpose.msk.msra.mxu0 %vm69_vm0, %v21665_v41 }
 0x614   :  { %15586 = vmatprep.subr.msk.mxu0 %vm69_vm0, %v21669_v42 }
 0x615   :  { %15687 = vmatpush3.xpose.msk.msra.mxu1 %vm69_vm0, %v21120_v20  ;;  %v21689_v20 = vld [vmem:[#allocation3 + $0x230] sm:$0xff] }
 0x616   :  { %15688 = vmatprep.subr.msk.mxu1 %vm69_vm0, %v21126_v49  ;;  %v21693_v49 = vld [vmem:[#allocation3 + $0x2e8] sm:$0xff] }
 0x617   :  { %15587 = vmatpush3.xpose.msk.msra.mxu0 %vm69_vm0, %v21677_v30 }
 0x618   :  { %15588 = vmatprep.subr.msk.mxu0 %vm69_vm0, %v21681_v37 }
 0x619   :  { %15689 = vmatpush3.xpose.msk.msra.mxu1 %vm69_vm0, %v21140_v0  ;;  %v21701_v0 = vld [vmem:[#allocation3 + $0x228] sm:$0xff] }
 0x61a   :  { %15690 = vmatprep.subr.msk.mxu1 %vm69_vm0, %v21146_v32  ;;  %v21705_v32 = vld [vmem:[#allocation3 + $0x2d8] sm:$0xff] }
 0x61b   :  { %15589 = vmatpush3.xpose.msk.msra.mxu0 %vm69_vm0, %v21689_v20 }
 0x61c   :  { %15590 = vmatprep.subr.msk.mxu0 %vm69_vm0, %v21693_v49 }
 0x61d   :  { %15691 = vmatpush3.xpose.msk.msra.mxu1 %vm69_vm0, %v21160_v33  ;;  %v21713_v33 = vld [vmem:[#allocation3 + $0x218] sm:$0xff] }
 0x61e   :  { %15692 = vmatprep.subr.msk.mxu1 %vm69_vm0, %v21166_v11  ;;  %v21717_v11 = vld [vmem:[#allocation3 + $0x2d0] sm:$0xff] }
 0x61f   :  { %15591 = vmatpush3.xpose.msk.msra.mxu0 %vm69_vm0, %v21701_v0 }
 0x620   :  { %15592 = vmatprep.subr.msk.mxu0 %vm69_vm0, %v21705_v32 }
 0x621   :  { %15693 = vmatpush3.xpose.msk.msra.mxu1 %vm69_vm0, %v21180_v13  ;;  %v21725_v13 = vld [vmem:[#allocation3 + $0x210] sm:$0xff] }
 0x622   :  { %15694 = vmatprep.subr.msk.mxu1 %vm69_vm0, %v21186_v40  ;;  %v21729_v40 = vld [vmem:[#allocation3 + $0x2c0] sm:$0xff] }
 0x623   :  { %15593 = vmatpush3.xpose.msk.msra.mxu0 %vm69_vm0, %v21713_v33 }
 0x624   :  { %15594 = vmatprep.subr.msk.mxu0 %vm69_vm0, %v21717_v11 }
 0x625   :  { %15695 = vmatpush3.xpose.msk.msra.mxu1 %vm69_vm0, %v21206_v62  ;;  %v21737_v62 = vld [vmem:[#allocation3 + $0x200] sm:$0xff] }
 0x626   :  { %15696 = vmatprep.subr.msk.mxu1 %vm69_vm0, %v21212_v15  ;;  %v21741_v15 = vld [vmem:[#allocation3 + $0x2b8] sm:$0xff] }
 0x627   :  { %15595 = vmatpush3.xpose.msk.msra.mxu0 %vm69_vm0, %v21725_v13 }
 0x628   :  { %15596 = vmatprep.subr.msk.mxu0 %vm69_vm0, %v21729_v40 }
 0x629   :  { %15697 = vmatpush3.xpose.msk.msra.mxu1 %vm69_vm0, %v21232_v45  ;;  %v21749_v45 = vld [vmem:[#allocation3 + $0x1f8] sm:$0xff] }
 0x62a   :  { %15698 = vmatprep.subr.msk.mxu1 %vm69_vm0, %v21238_v8  ;;  %v21753_v8 = vld [vmem:[#allocation3 + $0x2a8] sm:$0xff] }
 0x62b   :  { %15597 = vmatpush3.xpose.msk.msra.mxu0 %vm69_vm0, %v21737_v62 }
 0x62c   :  { %15598 = vmatprep.subr.msk.mxu0 %vm69_vm0, %v21741_v15 }
 0x62d   :  { %15699 = vmatpush3.xpose.msk.msra.mxu1 %vm69_vm0, %v21258_v34  ;;  %v21761_v34 = vld [vmem:[#allocation3 + $0x1e8] sm:$0xff] }
 0x62e   :  { %15700 = vmatprep.subr.msk.mxu1 %vm69_vm0, %v21264_v46  ;;  %v21765_v46 = vld [vmem:[#allocation3 + $0x2a0] sm:$0xff] }
 0x62f   :  { %15599 = vmatpush3.xpose.msk.msra.mxu0 %vm69_vm0, %v21749_v45 }
 0x630   :  { %15600 = vmatprep.subr.msk.mxu0 %vm69_vm0, %v21753_v8 }
 0x631   :  { %15701 = vmatpush3.xpose.msk.msra.mxu1 %vm69_vm0, %v21284_v54  ;;  %v21773_v54 = vld [vmem:[#allocation3 + $0x1e0] sm:$0xff] }
 0x632   :  { %15702 = vmatprep.subr.msk.mxu1 %vm69_vm0, %v21288_v63  ;;  %v21777_v63 = vld [vmem:[#allocation3 + $0x290] sm:$0xff] }
 0x633   :  { %15601 = vmatpush3.xpose.msk.msra.mxu0 %vm69_vm0, %v21761_v34 }
 0x634   :  { %15602 = vmatprep.subr.msk.mxu0 %vm69_vm0, %v21765_v46 }
 0x635   :  { %15703 = vmatpush3.xpose.msk.msra.mxu1 %vm69_vm0, %v21308_v50  ;;  %v21785_v50 = vld [vmem:[#allocation3 + $0x1d0] sm:$0xff] }
 0x636   :  { %15704 = vmatprep.subr.msk.mxu1 %vm69_vm0, %v21312_v47  ;;  %v21789_v47 = vld [vmem:[#allocation3 + $0x288] sm:$0xff] }
 0x637   :  { %15603 = vmatpush3.xpose.msk.msra.mxu0 %vm69_vm0, %v21773_v54  ;;  %23200 = vst [vmem:[#allocation40_spill] sm:$0xff] %v21789_v47 }
 0x638   :  { %15604 = vmatprep.subr.msk.mxu0 %vm69_vm0, %v21777_v63 }
 0x639   :  { %15705 = vmatpush3.xpose.msk.msra.mxu1 %vm69_vm0, %v21332_v17  ;;  %v21797_v17 = vld [vmem:[#allocation3 + $0x1c8] sm:$0xff] }
 0x63a   :  { %15706 = vmatprep.subr.msk.mxu1 %vm69_vm0, %v21336_v3  ;;  %v21801_v3 = vld [vmem:[#allocation3 + $0x278] sm:$0xff] }
 0x63b   :  { %15605 = vmatpush3.xpose.msk.msra.mxu0 %vm69_vm0, %v21785_v50 }
 0x63c   :  { %15606 = vmatprep.subr.msk.mxu0 %vm69_vm0, %v21789_v47  ;;  %v9374_v47 = vld [vmem:[#allocation3 + $0x1b8] sm:$0xff] }
 0x63d   :  { %15707 = vmatpush3.xpose.msk.msra.mxu1 %vm69_vm0, %v21356_v16  ;;  %v21810_v16 = vld [vmem:[#allocation3 + $0x270] sm:$0xff] }
 0x63e   :  { %15708 = vmatprep.subr.msk.mxu1 %vm69_vm0, %v21360_v31  ;;  %v9373_v31 = vld [vmem:[#allocation3 + $0x1b0] sm:$0xff] }
 0x63f   :  { %15607 = vmatpush3.xpose.msk.msra.mxu0 %vm69_vm0, %v21797_v17 }
 0x640   :  { %15608 = vmatprep.subr.msk.mxu0 %vm69_vm0, %v21801_v3 }
 0x641   :  { %15709 = vmatpush3.xpose.msk.msra.mxu1 %vm69_vm0, %v21378_v53  ;;  %v21819_v53 = vld [vmem:[#allocation3 + $0x322] sm:$0xff] }
 0x642   :  { %15710 = vmatprep.subr.msk.mxu1 %vm69_vm0, %v21382_v59  ;;  %v21825_v59 = vld [vmem:[#allocation3 + $0x189] sm:$0xff] }
 0x643   :  { %15609 = vmatpush3.xpose.msk.msra.mxu0 %vm69_vm0, %v9374_v47  ;;  %v21839_v47 = vld [vmem:[#allocation7 + $0x20] sm:$0x1f] }
 0x644   :  { %15610 = vmatprep.subr.msk.mxu0 %vm69_vm0, %v21810_v16 }
 0x645   :  { %15711 = vmatpush3.xpose.msk.msra.mxu1 %vm69_vm0, %v21400_v48  ;;  %v21831_v48 = vld [vmem:[#allocation3 + $0x262] sm:$0xff] }
 0x646   :  { %15712 = vmatprep.subr.msk.mxu1 %vm69_vm0, %v21404_v10  ;;  %v21835_v10 = vld [vmem:[#allocation3 + $0x31a] sm:$0xff] }
 0x647   :  { %15611 = vmatpush3.xpose.msk.msra.mxu0 %vm69_vm0, %v9373_v31  ;;  %23201 = vst [vmem:[#allocation68_spill] sm:$0xff] %v21835_v10  ;;  %v21857_v31 = vld [vmem:[#allocation3 + $0x30a] sm:$0xff] }
 0x648   :  { %15648 = vmatprep.subr.msk.mxu0 %vm69_vm0, %v21819_v53  ;;  %23204 = vst [vmem:[#allocation30_spill] sm:$0xff] %v21857_v31 }
 0x649   :  { %15713 = vmatpush3.xpose.msk.msra.mxu1 %vm69_vm0, %v21422_v39  ;;  %v21845_v39 = vld [vmem:[#allocation3 + $0x181] sm:$0xff] }
 0x64a   :  { %15750 = vmatprep.subr.msk.mxu1 %vm69_vm0, %v21825_v59  ;;  %15613 = vmatmul.mubr.msk.f32.vlgmr.msra.gmra.mxu0 %vm69_vm0, %v21647_v4  ;;  %23202 = vst [vmem:[#allocation71_spill] sm:$0xff] %v21845_v39  ;;  %v21851_v4 = vld [vmem:[#allocation3 + $0x25a] sm:$0xff] }
 0x64b   :  { %15649 = vmatpush3.xpose.msk.msra.mxu0 %vm69_vm0, %v21831_v48  ;;  %15680 = vmatprep.mubr.msk.f32.mxu0 %vm69_vm0, %v21462_v5  ;;  %23203 = vst [vmem:[#allocation13_spill] sm:$0xff] %v21851_v4 }
 0x64c   :  { %15715 = vmatmul.mubr.msk.f32.vlgmr.msra.gmra.mxu1 %vm69_vm0, %v21637_v58  ;;  %15650 = vmatprep.subr.msk.mxu0 %vm69_vm0, %v21835_v10  ;;  %v21871_v10 = vld [vmem:[#allocation3 + $0x302] sm:$0xff] }
 0x64d   :  { %15751 = vmatpush3.xpose.msk.msra.mxu1 %vm69_vm0, %v21415_v22  ;;  %15782 = vmatprep.mubr.msk.f32.mxu1 %vm69_vm0, %v21839_v47  ;;  %v21863_v22 = vld [vmem:[#allocation3 + $0x171] sm:$0xff]  ;;  %23207 = vst [vmem:[#allocation43_spill] sm:$0xff] %v21871_v10 }
 0x64e   :  { %15752 = vmatprep.subr.msk.mxu1 %vm69_vm0, %v21845_v39  ;;  %23205 = vst [vmem:[#allocation70_spill] sm:$0xff] %v21863_v22  ;;  %v21867_v39 = vld [vmem:[#allocation3 + $0x24a] sm:$0xff] }
 0x64f   :  { %15651 = vmatpush3.xpose.msk.msra.mxu0 %vm69_vm0, %v21851_v4  ;;  %23206 = vst [vmem:[#allocation74_spill] sm:$0xff] %v21867_v39  ;;  %v21873_v4 = vld [vmem:[#allocation3 + $0xb1] sm:$0xff] }
 0x650   :  { %15652 = vmatprep.subr.msk.mxu0 %vm69_vm0, %v21857_v31  ;;  %23208 = vst [vmem:[#allocation34_spill] sm:$0xff] %v21873_v4  ;;  %v21889_v31 = vld [vmem:[#allocation3 + $0xa9] sm:$0xff] }
 0x651   :  { %15753 = vmatpush3.xpose.msk.msra.mxu1 %vm69_vm0, %v21434_v60  ;;  %v21879_v60 = vld [vmem:[#allocation3 + $0x169] sm:$0xff]  ;;  %23212 = vst [vmem:[#allocation36_spill] sm:$0xff] %v21889_v31 }
 0x652   :  { %15754 = vmatprep.subr.msk.mxu1 %vm69_vm0, %v21863_v22  ;;  %23209 = vst [vmem:[#allocation73_spill] sm:$0xff] %v21879_v60  ;;  %v21883_v22 = vld [vmem:[#allocation3 + $0x242] sm:$0xff] }
 0x653   :  { %15653 = vmatpush3.xpose.msk.msra.mxu0 %vm69_vm0, %v21867_v39  ;;  %23210 = vst [vmem:[#allocation76_spill] sm:$0xff] %v21883_v22  ;;  %v21887_v39 = vld [vmem:[#allocation3 + $0x2f2] sm:$0xff] }
 0x654   :  { %15654 = vmatprep.subr.msk.mxu0 %vm69_vm0, %v21871_v10  ;;  %23211 = vst [vmem:[#allocation50_spill] sm:$0xff] %v21887_v39  ;;  %v21905_v10 = vld [vmem:[#allocation3 + $0x99] sm:$0xff] }
 0x655   :  { %15755 = vmatpush3.xpose.msk.msra.mxu1 %vm69_vm0, %v21873_v4  ;;  %v21895_v4 = vld [vmem:[#allocation3 + $0x159] sm:$0xff]  ;;  %23216 = vst [vmem:[#allocation23_spill] sm:$0xff] %v21905_v10 }
 0x656   :  { %15756 = vmatprep.subr.msk.mxu1 %vm69_vm0, %v21879_v60  ;;  %23213 = vst [vmem:[#allocation75_spill] sm:$0xff] %v21895_v4  ;;  %v21899_v60 = vld [vmem:[#allocation3 + $0x232] sm:$0xff] }
 0x657   :  { %15655 = vmatpush3.xpose.msk.msra.mxu0 %vm69_vm0, %v21883_v22  ;;  %23214 = vst [vmem:[#allocation78_spill] sm:$0xff] %v21899_v60  ;;  %v21903_v22 = vld [vmem:[#allocation3 + $0x2ea] sm:$0xff] }
 0x658   :  { %15656 = vmatprep.subr.msk.mxu0 %vm69_vm0, %v21887_v39  ;;  %23215 = vst [vmem:[#allocation16_spill] sm:$0xff] %v21903_v22  ;;  %v17496_v39 = vld [vmem:[#allocation3 + $0x91] sm:$0xff] }
 0x659   :  { %15757 = vmatpush3.xpose.msk.msra.mxu1 %vm69_vm0, %v21889_v31  ;;  %v21911_v31 = vld [vmem:[#allocation3 + $0x151] sm:$0xff] }
 0x65a   :  { %15758 = vmatprep.subr.msk.mxu1 %vm69_vm0, %v21895_v4  ;;  %23217 = vst [vmem:[#allocation77_spill] sm:$0xff] %v21911_v31  ;;  %v21915_v4 = vld [vmem:[#allocation3 + $0x22a] sm:$0xff] }
 0x65b   :  { %15657 = vmatpush3.xpose.msk.msra.mxu0 %vm69_vm0, %v21899_v60  ;;  %v21919_v60 = vld [vmem:[#allocation3 + $0x2da] sm:$0xff] }
 0x65c   :  { %15658 = vmatprep.subr.msk.mxu0 %vm69_vm0, %v21903_v22  ;;  %v17497_v22 = vld [vmem:[#allocation3 + $0x141] sm:$0xff] }
 0x65d   :  { %15759 = vmatpush3.xpose.msk.msra.mxu1 %vm69_vm0, %v21905_v10  ;;  %v21925_v10 = vld [vmem:[#allocation3 + $0x21a] sm:$0xff] }
 0x65e   :  { %15760 = vmatprep.subr.msk.mxu1 %vm69_vm0, %v21911_v31  ;;  %v21929_v31 = vld [vmem:[#allocation3 + $0x2d2] sm:$0xff] }
 0x65f   :  { %15659 = vmatpush3.xpose.msk.msra.mxu0 %vm69_vm0, %v21915_v4 }
 0x660   :  { %15660 = vmatprep.subr.msk.mxu0 %vm69_vm0, %v21919_v60 }
 0x661   :  { %15761 = vmatpush3.xpose.msk.msra.mxu1 %vm69_vm0, %v17496_v39  ;;  %v21937_v39 = vld [vmem:[#allocation3 + $0x212] sm:$0xff] }
 0x662   :  { %15762 = vmatprep.subr.msk.mxu1 %vm69_vm0, %v17497_v22  ;;  %v21941_v22 = vld [vmem:[#allocation3 + $0x2c2] sm:$0xff] }
 0x663   :  { %15661 = vmatpush3.xpose.msk.msra.mxu0 %vm69_vm0, %v21925_v10 }
 0x664   :  { %15662 = vmatprep.subr.msk.mxu0 %vm69_vm0, %v21929_v31 }
 0x665   :  { %15763 = vmatpush3.xpose.msk.msra.mxu1 %vm69_vm0, %v21194_v23  ;;  %v21949_v23 = vld [vmem:[#allocation3 + $0x202] sm:$0xff] }
 0x666   :  { %15764 = vmatprep.subr.msk.mxu1 %vm69_vm0, %v21198_v1  ;;  %v21953_v1 = vld [vmem:[#allocation3 + $0x2ba] sm:$0xff] }
 0x667   :  { %15663 = vmatpush3.xpose.msk.msra.mxu0 %vm69_vm0, %v21937_v39 }
 0x668   :  { %15664 = vmatprep.subr.msk.mxu0 %vm69_vm0, %v21941_v22 }
 0x669   :  { %15765 = vmatpush3.xpose.msk.msra.mxu1 %vm69_vm0, %v21220_v19  ;;  %v21961_v19 = vld [vmem:[#allocation3 + $0x1fa] sm:$0xff] }
 0x66a   :  { %15766 = vmatprep.subr.msk.mxu1 %vm69_vm0, %v21224_v25  ;;  %v21965_v25 = vld [vmem:[#allocation3 + $0x2aa] sm:$0xff] }
 0x66b   :  { %15665 = vmatpush3.xpose.msk.msra.mxu0 %vm69_vm0, %v21949_v23 }
 0x66c   :  { %15666 = vmatprep.subr.msk.mxu0 %vm69_vm0, %v21953_v1 }
 0x66d   :  { %15767 = vmatpush3.xpose.msk.msra.mxu1 %vm69_vm0, %v21246_v24  ;;  %v21973_v24 = vld [vmem:[#allocation3 + $0x1ea] sm:$0xff] }
 0x66e   :  { %15768 = vmatprep.subr.msk.mxu1 %vm69_vm0, %v21250_v2  ;;  %v21977_v2 = vld [vmem:[#allocation3 + $0x2a2] sm:$0xff] }
 0x66f   :  { %15667 = vmatpush3.xpose.msk.msra.mxu0 %vm69_vm0, %v21961_v19 }
 0x670   :  { %15668 = vmatprep.subr.msk.mxu0 %vm69_vm0, %v21965_v25 }
 0x671   :  { %15769 = vmatpush3.xpose.msk.msra.mxu1 %vm69_vm0, %v21272_v7  ;;  %v21985_v7 = vld [vmem:[#allocation3 + $0x1e2] sm:$0xff] }
 0x672   :  { %15770 = vmatprep.subr.msk.mxu1 %vm69_vm0, %v21276_v21  ;;  %v21989_v21 = vld [vmem:[#allocation3 + $0x292] sm:$0xff] }
 0x673   :  { %15669 = vmatpush3.xpose.msk.msra.mxu0 %vm69_vm0, %v21973_v24 }
 0x674   :  { %15670 = vmatprep.subr.msk.mxu0 %vm69_vm0, %v21977_v2 }
 0x675   :  { %15771 = vmatpush3.xpose.msk.msra.mxu1 %vm69_vm0, %v21296_v56  ;;  %v21997_v56 = vld [vmem:[#allocation3 + $0x1d2] sm:$0xff] }
 0x676   :  { %15772 = vmatprep.subr.msk.mxu1 %vm69_vm0, %v21300_v6  ;;  %23218 = vst [vmem:[#allocation28_spill] sm:$0xff] %v21997_v56  ;;  %v22001_v6 = vld [vmem:[#allocation3 + $0x28a] sm:$0xff] }
 0x677   :  { %15671 = vmatpush3.xpose.msk.msra.mxu0 %vm69_vm0, %v21985_v7  ;;  %23219 = vst [vmem:[#allocation79_spill] sm:$0xff] %v22001_v6 }
 0x678   :  { %15672 = vmatprep.subr.msk.mxu0 %vm69_vm0, %v21989_v21 }
 0x679   :  { %15773 = vmatpush3.xpose.msk.msra.mxu1 %vm69_vm0, %v21320_v28  ;;  %v22009_v28 = vld [vmem:[#allocation3 + $0x1ca] sm:$0xff] }
 0x67a   :  { %15774 = vmatprep.subr.msk.mxu1 %vm69_vm0, %v21324_v52  ;;  %23220 = vst [vmem:[#allocation39_spill] sm:$0xff] %v22009_v28  ;;  %v22013_v52 = vld [vmem:[#allocation3 + $0x27a] sm:$0xff] }
 0x67b   :  { %15673 = vmatpush3.xpose.msk.msra.mxu0 %vm69_vm0, %v21997_v56  ;;  %v23222_v56 = vld [vmem:[#allocation51_spill] sm:$0xff] }
 0x67c   :  { %15674 = vmatprep.subr.msk.mxu0 %vm69_vm0, %v22001_v6  ;;  %v10179_v6 = vld [vmem:[#allocation3 + $0x1ba] sm:$0xff] }
 0x67d   :  { %15775 = vmatpush3.xpose.msk.msra.mxu1 %vm69_vm0, %v21344_v35  ;;  %v22022_v35 = vld [vmem:[#allocation3 + $0x272] sm:$0xff] }
 0x67e   :  { %15776 = vmatprep.subr.msk.mxu1 %vm69_vm0, %v21348_v29  ;;  %v23221_v29 = vld [vmem:[#allocation21_spill] sm:$0xff] }
 0x67f   :  { %15675 = vmatpush3.xpose.msk.msra.mxu0 %vm69_vm0, %v22009_v28  ;;  %v10178_v28 = vld [vmem:[#allocation3 + $0x1b2] sm:$0xff] }
 0x680   :  { %15676 = vmatprep.subr.msk.mxu0 %vm69_vm0, %v22013_v52 }
 0x681   :  { %15777 = vmatpush3.xpose.msk.msra.mxu1 %vm69_vm0, %v21367_v18  ;;  %v22031_v18 = vld [vmem:[#allocation3 + $0x338] sm:$0xff] }
 0x682   :  { %15778 = vmatprep.subr.msk.mxu1 %vm69_vm0, %v21371_v36  ;;  %v23223_v36 = vld [vmem:[#allocation52_spill] sm:$0xff] }
 0x683   :  { %15677 = vmatpush3.xpose.msk.msra.mxu0 %vm69_vm0, %v10179_v6  ;;  %v22037_v6 = vld [vmem:[#allocation3 + $0x18a] sm:$0xff] }
 0x684   :  { %15678 = vmatprep.subr.msk.mxu0 %vm69_vm0, %v22022_v35 }
 0x685   :  { %15779 = vmatpush3.xpose.msk.msra.mxu1 %vm69_vm0, %v23221_v29  ;;  %v22055_v29 = vld [vmem:[#allocation3 + $0x182] sm:$0xff] }
 0x686   :  { %15780 = vmatprep.subr.msk.mxu1 %vm69_vm0, %v23222_v56  ;;  %v22045_v56 = vld [vmem:[#allocation3 + $0x330] sm:$0xff] }
 0x687   :  { %15679 = vmatpush3.xpose.msk.msra.mxu0 %vm69_vm0, %v10178_v28  ;;  %v22049_v28 = vld [vmem:[#allocation7 + $0x28] sm:$0x1f] }
 0x688   :  { %15716 = vmatprep.subr.msk.mxu0 %vm69_vm0, %v22031_v18 }
 0x689   :  { %15781 = vmatpush3.xpose.msk.msra.mxu1 %vm69_vm0, %v23223_v36  ;;  %v23251_v36 = vld [vmem:[#allocation31_spill] sm:$0xff] }
 0x68a   :  { %15818 = vmatprep.subr.msk.mxu1 %vm69_vm0, %v22037_v6  ;;  %15681 = vmatmul.mubr.msk.f32.vlgmr.msra.gmra.mxu0 %vm69_vm0, %v21462_v5  ;;  %v23226_v5 = vld [vmem:[#allocation54_spill] sm:$0xff] }
 0x68b   :  { %15717 = vmatpush3.xpose.msk.msra.mxu0 %vm69_vm0, %v21801_v3  ;;  %15748 = vmatprep.mubr.msk.f32.mxu0 %vm69_vm0, %v21637_v58  ;;  %v22215_v3 = vld [vmem:[#allocation3 + $0x319] sm:$0xff] }
 0x68c   :  { %15783 = vmatmul.mubr.msk.f32.vlgmr.msra.gmra.mxu1 %vm69_vm0, %v21839_v47  ;;  %15718 = vmatprep.subr.msk.mxu0 %vm69_vm0, %v22045_v56 }
 0x68d   :  { %15819 = vmatpush3.xpose.msk.msra.mxu1 %vm69_vm0, %v21604_v55  ;;  %15850 = vmatprep.mubr.msk.f32.mxu1 %vm69_vm0, %v22049_v28  ;;  %v23233_v55 = vld [vmem:[#allocation17_spill] sm:$0xff] }
 0x68e   :  { %15820 = vmatprep.subr.msk.mxu1 %vm69_vm0, %v22055_v29 }
 0x68f   :  { %15719 = vmatpush3.xpose.msk.msra.mxu0 %vm69_vm0, %v21810_v16  ;;  %v11787_v16 = vld [vmem:[#allocation3 + $0xc8] sm:$0xff] }
 0x690   :  { %15720 = vmatprep.subr.msk.mxu0 %vm69_vm0, %v21619_v57  ;;  %v23231_v57 = vld [vmem:[#allocation72_spill] sm:$0xff] }
 0x691   :  { %15821 = vmatpush3.xpose.msk.msra.mxu1 %vm69_vm0, %v21614_v51  ;;  %v23232_v51 = vld [vmem:[#allocation25_spill] sm:$0xff] }
 0x692   :  { %15822 = vmatprep.subr.msk.mxu1 %vm69_vm0, %v21450_v44  ;;  %v23224_v44 = vld [vmem:[#allocation55_spill] sm:$0xff] }
 0x693   :  { %15721 = vmatpush3.xpose.msk.msra.mxu0 %vm69_vm0, %v21629_v27  ;;  %v23234_v27 = vld [vmem:[#allocation60_spill] sm:$0xff] }
 0x694   :  { %15722 = vmatprep.subr.msk.mxu0 %vm69_vm0, %v21633_v38  ;;  %v23236_v38 = vld [vmem:[#allocation63_spill] sm:$0xff] }
 0x695   :  { %15823 = vmatpush3.xpose.msk.msra.mxu1 %vm69_vm0, %v21460_v14  ;;  %v23225_v14 = vld [vmem:[#allocation53_spill] sm:$0xff] }
 0x696   :  { %15824 = vmatprep.subr.msk.mxu1 %vm69_vm0, %v21467_v12  ;;  %v23227_v12 = vld [vmem:[#allocation56_spill] sm:$0xff] }
 0x697   :  { %15723 = vmatpush3.xpose.msk.msra.mxu0 %vm69_vm0, %v21651_v43  ;;  %v23235_v43 = vld [vmem:[#allocation61_spill] sm:$0xff] }
 0x698   :  { %15724 = vmatprep.subr.msk.mxu0 %vm69_vm0, %v21657_v61  ;;  %v23230_v61 = vld [vmem:[#allocation59_spill] sm:$0xff] }
 0x699   :  { %15825 = vmatpush3.xpose.msk.msra.mxu1 %vm69_vm0, %v21476_v26  ;;  %v23228_v26 = vld [vmem:[#allocation57_spill] sm:$0xff] }
 0x69a   :  { %15826 = vmatprep.subr.msk.mxu1 %vm69_vm0, %v21481_v9  ;;  %v23229_v9 = vld [vmem:[#allocation58_spill] sm:$0xff] }
 0x69b   :  { %15725 = vmatpush3.xpose.msk.msra.mxu0 %vm69_vm0, %v21665_v41  ;;  %v23238_v41 = vld [vmem:[#allocation24_spill] sm:$0xff] }
 0x69c   :  { %15726 = vmatprep.subr.msk.mxu0 %vm69_vm0, %v21669_v42  ;;  %v23237_v42 = vld [vmem:[#allocation32_spill] sm:$0xff] }
 0x69d   :  { %15827 = vmatpush3.xpose.msk.msra.mxu1 %vm69_vm0, %v23224_v44  ;;  %v22222_v44 = vld [vmem:[#allocation3 + $0x259] sm:$0xff] }
 0x69e   :  { %15828 = vmatprep.subr.msk.mxu1 %vm69_vm0, %v23225_v14  ;;  %v22226_v14 = vld [vmem:[#allocation3 + $0x309] sm:$0xff] }
 0x69f   :  { %15727 = vmatpush3.xpose.msk.msra.mxu0 %vm69_vm0, %v21677_v30  ;;  %v23239_v30 = vld [vmem:[#allocation62_spill] sm:$0xff] }
 0x6a0   :  { %15728 = vmatprep.subr.msk.mxu0 %vm69_vm0, %v21681_v37  ;;  %v23240_v37 = vld [vmem:[#allocation48_spill] sm:$0xff] }
 0x6a1   :  { %15829 = vmatpush3.xpose.msk.msra.mxu1 %vm69_vm0, %v23226_v5  ;;  %v11786_v5 = vld [vmem:[#allocation3 + $0xc0] sm:$0xff] }
 0x6a2   :  { %15830 = vmatprep.subr.msk.mxu1 %vm69_vm0, %v23227_v12  ;;  %v11801_v12 = vld [vmem:[#allocation3 + $0x170] sm:$0xff] }
 0x6a3   :  { %15729 = vmatpush3.xpose.msk.msra.mxu0 %vm69_vm0, %v21689_v20  ;;  %v23241_v20 = vld [vmem:[#allocation65_spill] sm:$0xff] }
 0x6a4   :  { %15730 = vmatprep.subr.msk.mxu0 %vm69_vm0, %v21693_v49  ;;  %v23242_v49 = vld [vmem:[#allocation38_spill] sm:$0xff] }
 0x6a5   :  { %15831 = vmatpush3.xpose.msk.msra.mxu1 %vm69_vm0, %v23228_v26  ;;  %v22232_v26 = vld [vmem:[#allocation3 + $0x249] sm:$0xff] }
 0x6a6   :  { %15832 = vmatprep.subr.msk.mxu1 %vm69_vm0, %v23229_v9  ;;  %v22236_v9 = vld [vmem:[#allocation3 + $0x301] sm:$0xff] }
 0x6a7   :  { %15731 = vmatpush3.xpose.msk.msra.mxu0 %vm69_vm0, %v21701_v0  ;;  %v23243_v0 = vld [vmem:[#allocation44_spill] sm:$0xff] }
 0x6a8   :  { %15732 = vmatprep.subr.msk.mxu0 %vm69_vm0, %v21705_v32  ;;  %v23244_v32 = vld [vmem:[#allocation40_spill] sm:$0xff] }
 0x6a9   :  { %15833 = vmatpush3.xpose.msk.msra.mxu1 %vm69_vm0, %v23230_v61  ;;  %v11785_v61 = vld [vmem:[#allocation3 + $0xb0] sm:$0xff] }
 0x6aa   :  { %15834 = vmatprep.subr.msk.mxu1 %vm69_vm0, %v23231_v57  ;;  %v11800_v57 = vld [vmem:[#allocation3 + $0x168] sm:$0xff] }
 0x6ab   :  { %15733 = vmatpush3.xpose.msk.msra.mxu0 %vm69_vm0, %v21713_v33  ;;  %v23245_v33 = vld [vmem:[#allocation64_spill] sm:$0xff] }
 0x6ac   :  { %15734 = vmatprep.subr.msk.mxu0 %vm69_vm0, %v21717_v11  ;;  %v23246_v11 = vld [vmem:[#allocation67_spill] sm:$0xff] }
 0x6ad   :  { %15835 = vmatpush3.xpose.msk.msra.mxu1 %vm69_vm0, %v23232_v51  ;;  %v22242_v51 = vld [vmem:[#allocation3 + $0x241] sm:$0xff] }
 0x6ae   :  { %15836 = vmatprep.subr.msk.mxu1 %vm69_vm0, %v23233_v55  ;;  %v22246_v55 = vld [vmem:[#allocation3 + $0x2f1] sm:$0xff] }
 0x6af   :  { %15735 = vmatpush3.xpose.msk.msra.mxu0 %vm69_vm0, %v21725_v13  ;;  %v11805_v13 = vld [vmem:[#allocation3 + $0x1a0] sm:$0xff] }
 0x6b0   :  { %15736 = vmatprep.subr.msk.mxu0 %vm69_vm0, %v21729_v40  ;;  %v22177_v40 = vld [vmem:[#allocation3 + $0x339] sm:$0xff] }
 0x6b1   :  { %15837 = vmatpush3.xpose.msk.msra.mxu1 %vm69_vm0, %v23234_v27  ;;  %v11784_v27 = vld [vmem:[#allocation3 + $0xa8] sm:$0xff] }
 0x6b2   :  { %15838 = vmatprep.subr.msk.mxu1 %vm69_vm0, %v23235_v43  ;;  %v11799_v43 = vld [vmem:[#allocation3 + $0x158] sm:$0xff] }
 0x6b3   :  { %15737 = vmatpush3.xpose.msk.msra.mxu0 %vm69_vm0, %v21737_v62  ;;  %v23247_v62 = vld [vmem:[#allocation19_spill] sm:$0xff] }
 0x6b4   :  { %15738 = vmatprep.subr.msk.mxu0 %vm69_vm0, %v21741_v15  ;;  %v11804_v15 = vld [vmem:[#allocation3 + $0x198] sm:$0xff] }
 0x6b5   :  { %15839 = vmatpush3.xpose.msk.msra.mxu1 %vm69_vm0, %v23236_v38  ;;  %v22252_v38 = vld [vmem:[#allocation3 + $0x231] sm:$0xff] }
 0x6b6   :  { %15840 = vmatprep.subr.msk.mxu1 %vm69_vm0, %v23237_v42  ;;  %v22256_v42 = vld [vmem:[#allocation3 + $0x2e9] sm:$0xff] }
 0x6b7   :  { %15739 = vmatpush3.xpose.msk.msra.mxu0 %vm69_vm0, %v21749_v45  ;;  %v23248_v45 = vld [vmem:[#allocation33_spill] sm:$0xff] }
 0x6b8   :  { %15740 = vmatprep.subr.msk.mxu0 %vm69_vm0, %v21753_v8  ;;  %v22188_v8 = vld [vmem:[#allocation3 + $0x331] sm:$0xff] }
 0x6b9   :  { %15841 = vmatpush3.xpose.msk.msra.mxu1 %vm69_vm0, %v23238_v41  ;;  %v11783_v41 = vld [vmem:[#allocation3 + $0x98] sm:$0xff] }
 0x6ba   :  { %15842 = vmatprep.subr.msk.mxu1 %vm69_vm0, %v23239_v30  ;;  %v11798_v30 = vld [vmem:[#allocation3 + $0x150] sm:$0xff] }
 0x6bb   :  { %15741 = vmatpush3.xpose.msk.msra.mxu0 %vm69_vm0, %v21761_v34  ;;  %v11789_v34 = vld [vmem:[#allocation3 + $0xe0] sm:$0xff] }
 0x6bc   :  { %15742 = vmatprep.subr.msk.mxu0 %vm69_vm0, %v21765_v46  ;;  %v22192_v46 = vld [vmem:[#allocation7 + $0x30] sm:$0x1f] }
 0x6bd   :  { %15843 = vmatpush3.xpose.msk.msra.mxu1 %vm69_vm0, %v23240_v37  ;;  %v22262_v37 = vld [vmem:[#allocation3 + $0x229] sm:$0xff] }
 0x6be   :  { %15844 = vmatprep.subr.msk.mxu1 %vm69_vm0, %v23241_v20  ;;  %v22266_v20 = vld [vmem:[#allocation3 + $0x2d9] sm:$0xff] }
 0x6bf   :  { %15743 = vmatpush3.xpose.msk.msra.mxu0 %vm69_vm0, %v21773_v54  ;;  %v22204_v54 = vld [vmem:[#allocation3 + $0x321] sm:$0xff] }
 0x6c0   :  { %15744 = vmatprep.subr.msk.mxu0 %vm69_vm0, %v21777_v63  ;;  %v11788_v63 = vld [vmem:[#allocation3 + $0xd8] sm:$0xff] }
 0x6c1   :  { %15845 = vmatpush3.xpose.msk.msra.mxu1 %vm69_vm0, %v23242_v49  ;;  %v11782_v49 = vld [vmem:[#allocation3 + $0x90] sm:$0xff] }
 0x6c2   :  { %15846 = vmatprep.subr.msk.mxu1 %vm69_vm0, %v23243_v0  ;;  %v11797_v0 = vld [vmem:[#allocation3 + $0x140] sm:$0xff] }
 0x6c3   :  { %15745 = vmatpush3.xpose.msk.msra.mxu0 %vm69_vm0, %v21785_v50  ;;  %v23250_v50 = vld [vmem:[#allocation69_spill] sm:$0xff] }
 0x6c4   :  { %15746 = vmatprep.subr.msk.mxu0 %vm69_vm0, %v23244_v32  ;;  %v22272_v32 = vld [vmem:[#allocation3 + $0x219] sm:$0xff] }
 0x6c5   :  { %15847 = vmatpush3.xpose.msk.msra.mxu1 %vm69_vm0, %v23245_v33  ;;  %v22276_v33 = vld [vmem:[#allocation3 + $0x2d1] sm:$0xff] }
 0x6c6   :  { %15848 = vmatprep.subr.msk.mxu1 %vm69_vm0, %v23246_v11  ;;  %v11781_v11 = vld [vmem:[#allocation3 + $0x80] sm:$0xff] }
 0x6c7   :  { %15747 = vmatpush3.xpose.msk.msra.mxu0 %vm69_vm0, %v21797_v17  ;;  %v22211_v17 = vld [vmem:[#allocation3 + $0x261] sm:$0xff] }
 0x6c8   :  { %15784 = vmatprep.subr.msk.mxu0 %vm69_vm0, %v22177_v40 }
 0x6c9   :  { %15849 = vmatpush3.xpose.msk.msra.mxu1 %vm69_vm0, %v23247_v62  ;;  %v22282_v62 = vld [vmem:[#allocation3 + $0x211] sm:$0xff] }
 0x6ca   :  { %15886 = vmatprep.subr.msk.mxu1 %vm69_vm0, %v11805_v13  ;;  %15749 = vmatmul.mubr.msk.f32.vlgmr.msra.gmra.mxu0 %vm69_vm0, %v21637_v58  ;;  %v23249_v58 = vld [vmem:[#allocation66_spill] sm:$0xff] }
 0x6cb   :  { %15785 = vmatpush3.xpose.msk.msra.mxu0 %vm69_vm0, %v23248_v45  ;;  %15816 = vmatprep.mubr.msk.f32.mxu0 %vm69_vm0, %v21839_v47  ;;  %v11796_v13 = vld [vmem:[#allocation3 + $0x138] sm:$0xff] }
 0x6cc   :  { %15851 = vmatmul.mubr.msk.f32.vlgmr.msra.gmra.mxu1 %vm69_vm0, %v22049_v28  ;;  %15786 = vmatprep.subr.msk.mxu0 %vm69_vm0, %v22188_v8  ;;  %v11780_v45 = vld [vmem:[#allocation3 + $0x78] sm:$0xff] }
 0x6cd   :  { %15887 = vmatpush3.xpose.msk.msra.mxu1 %vm69_vm0, %v11789_v34  ;;  %15918 = vmatprep.mubr.msk.f32.mxu1 %vm69_vm0, %v22192_v46  ;;  %v11795_v34 = vld [vmem:[#allocation3 + $0x128] sm:$0xff] }
 0x6ce   :  { %15888 = vmatprep.subr.msk.mxu1 %vm69_vm0, %v11804_v15  ;;  %v22286_v15 = vld [vmem:[#allocation3 + $0x2c1] sm:$0xff] }
 0x6cf   :  { %15787 = vmatpush3.xpose.msk.msra.mxu0 %vm69_vm0, %v23249_v58  ;;  %v22292_v58 = vld [vmem:[#allocation3 + $0x201] sm:$0xff] }
 0x6d0   :  { %15788 = vmatprep.subr.msk.mxu0 %vm69_vm0, %v22204_v54 }
 0x6d1   :  { %15889 = vmatpush3.xpose.msk.msra.mxu1 %vm69_vm0, %v11788_v63  ;;  %v22296_v63 = vld [vmem:[#allocation3 + $0x2b9] sm:$0xff] }
 0x6d2   :  { %15890 = vmatprep.subr.msk.mxu1 %vm69_vm0, %v23250_v50  ;;  %v11779_v50 = vld [vmem:[#allocation3 + $0x68] sm:$0xff] }
 0x6d3   :  { %15789 = vmatpush3.xpose.msk.msra.mxu0 %vm69_vm0, %v22211_v17 }
 0x6d4   :  { %15790 = vmatprep.subr.msk.mxu0 %vm69_vm0, %v22215_v3 }
 0x6d5   :  { %15891 = vmatpush3.xpose.msk.msra.mxu1 %vm69_vm0, %v11787_v16  ;;  %v11794_v16 = vld [vmem:[#allocation3 + $0x120] sm:$0xff] }
 0x6d6   :  { %15892 = vmatprep.subr.msk.mxu1 %vm69_vm0, %v23251_v36  ;;  %v22302_v36 = vld [vmem:[#allocation3 + $0x1f9] sm:$0xff] }
 0x6d7   :  { %15791 = vmatpush3.xpose.msk.msra.mxu0 %vm69_vm0, %v22222_v44 }
 0x6d8   :  { %15792 = vmatprep.subr.msk.mxu0 %vm69_vm0, %v22226_v14 }
 0x6d9   :  { %15893 = vmatpush3.xpose.msk.msra.mxu1 %vm69_vm0, %v11786_v5  ;;  %v22306_v5 = vld [vmem:[#allocation3 + $0x2a9] sm:$0xff] }
 0x6da   :  { %15894 = vmatprep.subr.msk.mxu1 %vm69_vm0, %v11801_v12  ;;  %v11778_v12 = vld [vmem:[#allocation3 + $0x60] sm:$0xff] }
 0x6db   :  { %15793 = vmatpush3.xpose.msk.msra.mxu0 %vm69_vm0, %v22232_v26 }
 0x6dc   :  { %15794 = vmatprep.subr.msk.mxu0 %vm69_vm0, %v22236_v9 }
 0x6dd   :  { %15895 = vmatpush3.xpose.msk.msra.mxu1 %vm69_vm0, %v11785_v61  ;;  %v11793_v61 = vld [vmem:[#allocation3 + $0x110] sm:$0xff] }
 0x6de   :  { %15896 = vmatprep.subr.msk.mxu1 %vm69_vm0, %v11800_v57  ;;  %v22312_v57 = vld [vmem:[#allocation3 + $0x1e9] sm:$0xff] }
 0x6df   :  { %15795 = vmatpush3.xpose.msk.msra.mxu0 %vm69_vm0, %v22242_v51 }
 0x6e0   :  { %15796 = vmatprep.subr.msk.mxu0 %vm69_vm0, %v22246_v55 }
 0x6e1   :  { %15897 = vmatpush3.xpose.msk.msra.mxu1 %vm69_vm0, %v11784_v27  ;;  %v22316_v27 = vld [vmem:[#allocation3 + $0x2a1] sm:$0xff] }
 0x6e2   :  { %15898 = vmatprep.subr.msk.mxu1 %vm69_vm0, %v11799_v43  ;;  %v11777_v43 = vld [vmem:[#allocation3 + $0x50] sm:$0xff] }
 0x6e3   :  { %15797 = vmatpush3.xpose.msk.msra.mxu0 %vm69_vm0, %v22252_v38 }
 0x6e4   :  { %15798 = vmatprep.subr.msk.mxu0 %vm69_vm0, %v22256_v42 }
 0x6e5   :  { %15899 = vmatpush3.xpose.msk.msra.mxu1 %vm69_vm0, %v11783_v41  ;;  %v11792_v41 = vld [vmem:[#allocation3 + $0x108] sm:$0xff] }
 0x6e6   :  { %15900 = vmatprep.subr.msk.mxu1 %vm69_vm0, %v11798_v30  ;;  %v22322_v30 = vld [vmem:[#allocation3 + $0x1e1] sm:$0xff] }
 0x6e7   :  { %15799 = vmatpush3.xpose.msk.msra.mxu0 %vm69_vm0, %v22262_v37 }
 0x6e8   :  { %15800 = vmatprep.subr.msk.mxu0 %vm69_vm0, %v22266_v20 }
 0x6e9   :  { %15901 = vmatpush3.xpose.msk.msra.mxu1 %vm69_vm0, %v11782_v49  ;;  %v22326_v49 = vld [vmem:[#allocation3 + $0x291] sm:$0xff] }
 0x6ea   :  { %15902 = vmatprep.subr.msk.mxu1 %vm69_vm0, %v11797_v0  ;;  %v11776_v0 = vld [vmem:[#allocation3 + $0x48] sm:$0xff] }
 0x6eb   :  { %15801 = vmatpush3.xpose.msk.msra.mxu0 %vm69_vm0, %v22272_v32 }
 0x6ec   :  { %15802 = vmatprep.subr.msk.mxu0 %vm69_vm0, %v22276_v33 }
 0x6ed   :  { %15903 = vmatpush3.xpose.msk.msra.mxu1 %vm69_vm0, %v11781_v11  ;;  %v11791_v11 = vld [vmem:[#allocation3 + $0xf8] sm:$0xff] }
 0x6ee   :  { %15904 = vmatprep.subr.msk.mxu1 %vm69_vm0, %v11796_v13  ;;  %v10993_v13 = vld [vmem:[#allocation3 + $0x1d1] sm:$0xff] }
 0x6ef   :  { %15803 = vmatpush3.xpose.msk.msra.mxu0 %vm69_vm0, %v22282_v62 }
 0x6f0   :  { %15804 = vmatprep.subr.msk.mxu0 %vm69_vm0, %v22286_v15 }
 0x6f1   :  { %15905 = vmatpush3.xpose.msk.msra.mxu1 %vm69_vm0, %v11780_v45  ;;  %v22333_v45 = vld [vmem:[#allocation3 + $0x289] sm:$0xff] }
 0x6f2   :  { %15906 = vmatprep.subr.msk.mxu1 %vm69_vm0, %v11795_v34  ;;  %v11775_v34 = vld [vmem:[#allocation3 + $0x38] sm:$0xff] }
 0x6f3   :  { %15805 = vmatpush3.xpose.msk.msra.mxu0 %vm69_vm0, %v22292_v58 }
 0x6f4   :  { %15806 = vmatprep.subr.msk.mxu0 %vm69_vm0, %v22296_v63 }
 0x6f5   :  { %15907 = vmatpush3.xpose.msk.msra.mxu1 %vm69_vm0, %v11779_v50  ;;  %v11790_v50 = vld [vmem:[#allocation3 + $0xf0] sm:$0xff] }
 0x6f6   :  { %15908 = vmatprep.subr.msk.mxu1 %vm69_vm0, %v11794_v16  ;;  %v10992_v16 = vld [vmem:[#allocation3 + $0x1c9] sm:$0xff] }
 0x6f7   :  { %15807 = vmatpush3.xpose.msk.msra.mxu0 %vm69_vm0, %v22302_v36 }
 0x6f8   :  { %15808 = vmatprep.subr.msk.mxu0 %vm69_vm0, %v22306_v5 }
 0x6f9   :  { %15909 = vmatpush3.xpose.msk.msra.mxu1 %vm69_vm0, %v11778_v12  ;;  %v12212_v12 = vld [vmem:[#allocation3 + $0x1a1] sm:$0xff] }
 0x6fa   :  { %15910 = vmatprep.subr.msk.mxu1 %vm69_vm0, %v11793_v61  ;;  %v22340_v61 = vld [vmem:[#allocation3 + $0x33a] sm:$0xff] }
 0x6fb   :  { %15809 = vmatpush3.xpose.msk.msra.mxu0 %vm69_vm0, %v22312_v57 }
 0x6fc   :  { %15810 = vmatprep.subr.msk.mxu0 %vm69_vm0, %v22316_v27 }
 0x6fd   :  { %15911 = vmatpush3.xpose.msk.msra.mxu1 %vm69_vm0, %v11777_v43  ;;  %v11774_v43 = vld [vmem:[#allocation3 + $0x30] sm:$0xff] }
 0x6fe   :  { %15912 = vmatprep.subr.msk.mxu1 %vm69_vm0, %v11792_v41  ;;  %v12211_v41 = vld [vmem:[#allocation3 + $0x199] sm:$0xff] }
 0x6ff   :  { %15811 = vmatpush3.xpose.msk.msra.mxu0 %vm69_vm0, %v22322_v30 }
 0x700   :  { %15812 = vmatprep.subr.msk.mxu0 %vm69_vm0, %v22326_v49 }
 0x701   :  { %15913 = vmatpush3.xpose.msk.msra.mxu1 %vm69_vm0, %v11776_v0  ;;  %v22350_v0 = vld [vmem:[#allocation3 + $0x332] sm:$0xff] }
 0x702   :  { %15914 = vmatprep.subr.msk.mxu1 %vm69_vm0, %v11791_v11  ;;  %v12196_v11 = vld [vmem:[#allocation3 + $0xe1] sm:$0xff] }
 0x703   :  { %15813 = vmatpush3.xpose.msk.msra.mxu0 %vm69_vm0, %v10993_v13  ;;  %v22354_v13 = vld [vmem:[#allocation7 + $0x38] sm:$0x1f] }
 0x704   :  { %15814 = vmatprep.subr.msk.mxu0 %vm69_vm0, %v22333_v45 }
 0x705   :  { %15915 = vmatpush3.xpose.msk.msra.mxu1 %vm69_vm0, %v11775_v34  ;;  %v23252_v34 = vld [vmem:[#allocation68_spill] sm:$0xff] }
 0x706   :  { %15916 = vmatprep.subr.msk.mxu1 %vm69_vm0, %v11790_v50  ;;  %v23253_v50 = vld [vmem:[#allocation71_spill] sm:$0xff] }
 0x707   :  { %15815 = vmatpush3.xpose.msk.msra.mxu0 %vm69_vm0, %v10992_v16  ;;  %v23255_v16 = vld [vmem:[#allocation30_spill] sm:$0xff] }
 0x708   :  { %15852 = vmatprep.subr.msk.mxu0 %vm69_vm0, %v22340_v61 }
 0x709   :  { %15917 = vmatpush3.xpose.msk.msra.mxu1 %vm69_vm0, %v11774_v43  ;;  %v23259_v43 = vld [vmem:[#allocation34_spill] sm:$0xff] }
 0x70a   :  { %15954 = vmatprep.subr.msk.mxu1 %vm69_vm0, %v12212_v12  ;;  %15817 = vmatmul.mubr.msk.f32.vlgmr.msra.gmra.mxu0 %vm69_vm0, %v21839_v47  ;;  %v12195_v47 = vld [vmem:[#allocation3 + $0xd9] sm:$0xff] }
 0x70b   :  { %15853 = vmatpush3.xpose.msk.msra.mxu0 %vm69_vm0, %v22013_v52  ;;  %15884 = vmatprep.mubr.msk.f32.mxu0 %vm69_vm0, %v22049_v28  ;;  %v12194_v52 = vld [vmem:[#allocation3 + $0xc9] sm:$0xff]  ;;  %v23258_v12 = vld [vmem:[#allocation43_spill] sm:$0xff] }
 0x70c   :  { %15919 = vmatmul.mubr.msk.f32.vlgmr.msra.gmra.mxu1 %vm69_vm0, %v22192_v46  ;;  %15854 = vmatprep.subr.msk.mxu0 %vm69_vm0, %v22350_v0 }
 0x70d   :  { %15955 = vmatpush3.xpose.msk.msra.mxu1 %vm69_vm0, %v12196_v11  ;;  %15986 = vmatprep.mubr.msk.f32.mxu1 %vm69_vm0, %v22354_v13  ;;  %v23261_v11 = vld [vmem:[#allocation76_spill] sm:$0xff] }
 0x70e   :  { %15956 = vmatprep.subr.msk.mxu1 %vm69_vm0, %v12211_v41  ;;  %v23260_v41 = vld [vmem:[#allocation73_spill] sm:$0xff] }
 0x70f   :  { %15855 = vmatpush3.xpose.msk.msra.mxu0 %vm69_vm0, %v22022_v35  ;;  %v23254_v35 = vld [vmem:[#allocation13_spill] sm:$0xff] }
 0x710   :  { %15856 = vmatprep.subr.msk.mxu0 %vm69_vm0, %v21819_v53  ;;  %v12193_v53 = vld [vmem:[#allocation3 + $0xc1] sm:$0xff] }
 0x711   :  { %15957 = vmatpush3.xpose.msk.msra.mxu1 %vm69_vm0, %v12195_v47  ;;  %v23262_v47 = vld [vmem:[#allocation50_spill] sm:$0xff] }
 0x712   :  { %15958 = vmatprep.subr.msk.mxu1 %vm69_vm0, %v21825_v59  ;;  %v23256_v59 = vld [vmem:[#allocation70_spill] sm:$0xff] }
 0x713   :  { %15857 = vmatpush3.xpose.msk.msra.mxu0 %vm69_vm0, %v21831_v48  ;;  %v23257_v48 = vld [vmem:[#allocation74_spill] sm:$0xff] }
 0x714   :  { %15858 = vmatprep.subr.msk.mxu0 %vm69_vm0, %v23252_v34  ;;  %v23264_v34 = vld [vmem:[#allocation75_spill] sm:$0xff] }
 0x715   :  { %15959 = vmatpush3.xpose.msk.msra.mxu1 %vm69_vm0, %v12194_v52  ;;  %v23263_v52 = vld [vmem:[#allocation36_spill] sm:$0xff] }
 0x716   :  { %15960 = vmatprep.subr.msk.mxu1 %vm69_vm0, %v23253_v50  ;;  %v23265_v50 = vld [vmem:[#allocation78_spill] sm:$0xff] }
 0x717   :  { %15859 = vmatpush3.xpose.msk.msra.mxu0 %vm69_vm0, %v23254_v35  ;;  %v23266_v35 = vld [vmem:[#allocation16_spill] sm:$0xff] }
 0x718   :  { %15860 = vmatprep.subr.msk.mxu0 %vm69_vm0, %v23255_v16  ;;  %v23268_v16 = vld [vmem:[#allocation77_spill] sm:$0xff] }
 0x719   :  { %15961 = vmatpush3.xpose.msk.msra.mxu1 %vm69_vm0, %v12193_v53  ;;  %v23267_v53 = vld [vmem:[#allocation23_spill] sm:$0xff] }
 0x71a   :  { %15962 = vmatprep.subr.msk.mxu1 %vm69_vm0, %v23256_v59  ;;  %v12189_v59 = vld [vmem:[#allocation3 + $0x91] sm:$0xff] }
 0x71b   :  { %15861 = vmatpush3.xpose.msk.msra.mxu0 %vm69_vm0, %v23257_v48  ;;  %v12204_v48 = vld [vmem:[#allocation3 + $0x141] sm:$0xff] }
 0x71c   :  { %15862 = vmatprep.subr.msk.mxu0 %vm69_vm0, %v23258_v12  ;;  %v12188_v12 = vld [vmem:[#allocation3 + $0x81] sm:$0xff] }
 0x71d   :  { %15963 = vmatpush3.xpose.msk.msra.mxu1 %vm69_vm0, %v23259_v43  ;;  %v12203_v43 = vld [vmem:[#allocation3 + $0x139] sm:$0xff] }
 0x71e   :  { %15964 = vmatprep.subr.msk.mxu1 %vm69_vm0, %v23260_v41  ;;  %v23270_v41 = vld [vmem:[#allocation79_spill] sm:$0xff] }
 0x71f   :  { %15863 = vmatpush3.xpose.msk.msra.mxu0 %vm69_vm0, %v23261_v11  ;;  %v12197_v11 = vld [vmem:[#allocation3 + $0xf1] sm:$0xff] }
 0x720   :  { %15864 = vmatprep.subr.msk.mxu0 %vm69_vm0, %v23262_v47  ;;  %v12619_v47 = vld [vmem:[#allocation3 + $0x1a2] sm:$0xff] }
 0x721   :  { %15965 = vmatpush3.xpose.msk.msra.mxu1 %vm69_vm0, %v23263_v52  ;;  %v12181_v52 = vld [vmem:[#allocation3 + $0x31] sm:$0xff] }
 0x722   :  { %15966 = vmatprep.subr.msk.mxu1 %vm69_vm0, %v23264_v34  ;;  %v11836_v34 = vld [vmem:[#allocation3 + $0x348] sm:$0xff] }
 0x723   :  { %15865 = vmatpush3.xpose.msk.msra.mxu0 %vm69_vm0, %v23265_v50  ;;  %v11821_v50 = vld [vmem:[#allocation3 + $0x290] sm:$0xff] }
 0x724   :  { %15866 = vmatprep.subr.msk.mxu0 %vm69_vm0, %v23266_v35  ;;  %v12618_v35 = vld [vmem:[#allocation3 + $0x19a] sm:$0xff] }
 0x725   :  { %15967 = vmatpush3.xpose.msk.msra.mxu1 %vm69_vm0, %v23267_v53  ;;  %v12603_v53 = vld [vmem:[#allocation3 + $0xe2] sm:$0xff] }
 0x726   :  { %15968 = vmatprep.subr.msk.mxu1 %vm69_vm0, %v23268_v16  ;;  %v22467_v16 = vld [vmem:[#allocation7 + $0x40] sm:$0x1f] }
 0x727   :  { %15867 = vmatpush3.xpose.msk.msra.mxu0 %vm69_vm0, %v21915_v4  ;;  %v12187_v4 = vld [vmem:[#allocation3 + $0x79] sm:$0xff] }
 0x728   :  { %15868 = vmatprep.subr.msk.mxu0 %vm69_vm0, %v21919_v60  ;;  %v12202_v60 = vld [vmem:[#allocation3 + $0x129] sm:$0xff] }
 0x729   :  { %15969 = vmatpush3.xpose.msk.msra.mxu1 %vm69_vm0, %v12189_v59  ;;  %v12602_v59 = vld [vmem:[#allocation3 + $0xda] sm:$0xff] }
 0x72a   :  { %15970 = vmatprep.subr.msk.mxu1 %vm69_vm0, %v12204_v48  ;;  %v12995_v48 = vld [vmem:[%s22709_s7] sm:$0x1f] }
 0x72b   :  { %15869 = vmatpush3.xpose.msk.msra.mxu0 %vm69_vm0, %v21925_v10  ;;  %v12186_v10 = vld [vmem:[#allocation3 + $0x69] sm:$0xff] }
 0x72c   :  { %15870 = vmatprep.subr.msk.mxu0 %vm69_vm0, %v21929_v31  ;;  %v12201_v31 = vld [vmem:[#allocation3 + $0x121] sm:$0xff] }
 0x72d   :  { %15971 = vmatpush3.xpose.msk.msra.mxu1 %vm69_vm0, %v12188_v12  ;;  %v17569_v12 = vmov 0  }
 0x72e   :  { %15972 = vmatprep.subr.msk.mxu1 %vm69_vm0, %v12203_v43  ;;  %17477 = vset.pattern.permute.xlu0 %v17569_v12  ;;  %v11819_v43 = vld [vmem:[#allocation3 + $0x278] sm:$0xff] }
 0x72f   :  { %15871 = vmatpush3.xpose.msk.msra.mxu0 %vm69_vm0, %v21937_v39  ;;  %v12185_v39 = vld [vmem:[#allocation3 + $0x61] sm:$0xff]  ;;  %12998 = vperm.xlu0 %17477, %v12995_v48   ;;  %v12609_v48 = vld [vmem:[#allocation3 + $0x12a] sm:$0xff]  ;;  %v11811_v12 = vld [vmem:[#allocation3 + $0x218] sm:$0xff] }
 0x730   :  { %15872 = vmatprep.subr.msk.mxu0 %vm69_vm0, %v21941_v22  ;;  %v12200_v22 = vld [vmem:[#allocation3 + $0x111] sm:$0xff] }
 0x731   :  { %15973 = vmatpush3.xpose.msk.msra.mxu1 %vm69_vm0, %v12187_v4  ;;  %v12601_v4 = vld [vmem:[#allocation3 + $0xca] sm:$0xff] }
 0x732   :  { %15974 = vmatprep.subr.msk.mxu1 %vm69_vm0, %v12202_v60  ;;  %v11833_v60 = vld [vmem:[#allocation3 + $0x320] sm:$0xff] }
 0x733   :  { %15873 = vmatpush3.xpose.msk.msra.mxu0 %vm69_vm0, %v21949_v23  ;;  %v12184_v23 = vld [vmem:[#allocation3 + $0x51] sm:$0xff] }
 0x734   :  { %15874 = vmatprep.subr.msk.mxu0 %vm69_vm0, %v21953_v1  ;;  %v12199_v1 = vld [vmem:[#allocation3 + $0x109] sm:$0xff] }
 0x735   :  { %15975 = vmatpush3.xpose.msk.msra.mxu1 %vm69_vm0, %v12186_v10  ;;  %v12615_v10 = vld [vmem:[#allocation3 + $0x172] sm:$0xff] }
 0x736   :  { %15976 = vmatprep.subr.msk.mxu1 %vm69_vm0, %v12201_v31  ;;  %v11817_v31 = vld [vmem:[#allocation3 + $0x260] sm:$0xff] }
 0x737   :  { %15875 = vmatpush3.xpose.msk.msra.mxu0 %vm69_vm0, %v21961_v19  ;;  %v12183_v19 = vld [vmem:[#allocation3 + $0x49] sm:$0xff] }
 0x738   :  { %15876 = vmatprep.subr.msk.mxu0 %vm69_vm0, %v21965_v25  ;;  %v12198_v25 = vld [vmem:[#allocation3 + $0xf9] sm:$0xff] }
 0x739   :  { %15977 = vmatpush3.xpose.msk.msra.mxu1 %vm69_vm0, %v12185_v39  ;;  %v12599_v39 = vld [vmem:[#allocation3 + $0xb2] sm:$0xff] }
 0x73a   :  { %15978 = vmatprep.subr.msk.mxu1 %vm69_vm0, %v12200_v22  ;;  %v11816_v22 = vld [vmem:[#allocation3 + $0x258] sm:$0xff] }
 0x73b   :  { %15877 = vmatpush3.xpose.msk.msra.mxu0 %vm69_vm0, %v21973_v24  ;;  %v23269_v24 = vld [vmem:[#allocation28_spill] sm:$0xff] }
 0x73c   :  { %15878 = vmatprep.subr.msk.mxu0 %vm69_vm0, %v21977_v2  ;;  %v12182_v2 = vld [vmem:[#allocation3 + $0x39] sm:$0xff] }
 0x73d   :  { %15979 = vmatpush3.xpose.msk.msra.mxu1 %vm69_vm0, %v12184_v23  ;;  %v11831_v23 = vld [vmem:[#allocation3 + $0x308] sm:$0xff] }
 0x73e   :  { %15980 = vmatprep.subr.msk.mxu1 %vm69_vm0, %v12199_v1  ;;  %v12598_v1 = vld [vmem:[#allocation3 + $0xaa] sm:$0xff] }
 0x73f   :  { %15879 = vmatpush3.xpose.msk.msra.mxu0 %vm69_vm0, %v21985_v7  ;;  %v11837_v7 = vld [vmem:[#allocation3 + $0x350] sm:$0xff] }
 0x740   :  { %15880 = vmatprep.subr.msk.mxu0 %vm69_vm0, %v21989_v21  ;;  %v23271_v21 = vld [vmem:[#allocation39_spill] sm:$0xff] }
 0x741   :  { %15981 = vmatpush3.xpose.msk.msra.mxu1 %vm69_vm0, %v12183_v19  ;;  %v12613_v19 = vld [vmem:[#allocation3 + $0x15a] sm:$0xff] }
 0x742   :  { %15982 = vmatprep.subr.msk.mxu1 %vm69_vm0, %v12198_v25  ;;  %v11815_v25 = vld [vmem:[#allocation3 + $0x248] sm:$0xff] }
 0x743   :  { %15881 = vmatpush3.xpose.msk.msra.mxu0 %vm69_vm0, %v23269_v24  ;;  %v11830_v24 = vld [vmem:[#allocation3 + $0x300] sm:$0xff] }
 0x744   :  { %15882 = vmatprep.subr.msk.mxu0 %vm69_vm0, %v23270_v41  ;;  %v12612_v41 = vld [vmem:[#allocation3 + $0x152] sm:$0xff] }
 0x745   :  { %15983 = vmatpush3.xpose.msk.msra.mxu1 %vm69_vm0, %v12182_v2  ;;  %v12597_v2 = vld [vmem:[#allocation3 + $0x9a] sm:$0xff] }
 0x746   :  { %15984 = vmatprep.subr.msk.mxu1 %vm69_vm0, %v12197_v11  ;;  %v11814_v11 = vld [vmem:[#allocation3 + $0x240] sm:$0xff] }
 0x747   :  { %15883 = vmatpush3.xpose.msk.msra.mxu0 %vm69_vm0, %v23271_v21  ;;  %v12611_v21 = vld [vmem:[#allocation3 + $0x142] sm:$0xff] }
 0x748   :  { %15920 = vmatprep.subr.msk.mxu0 %vm69_vm0, %v11837_v7  ;;  %v11829_v7 = vld [vmem:[#allocation3 + $0x2f0] sm:$0xff] }
 0x749   :  { %15985 = vmatpush3.xpose.msk.msra.mxu1 %vm69_vm0, %v12181_v52  ;;  %v11813_v52 = vld [vmem:[#allocation3 + $0x230] sm:$0xff] }
 0x74a   :  { %16022 = vmatprep.subr.msk.mxu1 %vm69_vm0, %v12619_v47  ;;  %15885 = vmatmul.mubr.msk.f32.vlgmr.msra.gmra.mxu0 %vm69_vm0, %v22049_v28  ;;  %v11820_v28 = vld [vmem:[#allocation3 + $0x288] sm:$0xff]  ;;  %v12596_v47 = vld [vmem:[#allocation3 + $0x92] sm:$0xff] }
 0x74b   :  { %15921 = vmatpush3.xpose.msk.msra.mxu0 %vm69_vm0, %v11821_v50  ;;  %15952 = vmatprep.mubr.msk.f32.mxu0 %vm69_vm0, %v22192_v46  ;;  %v12595_v50 = vld [vmem:[#allocation3 + $0x82] sm:$0xff] }
 0x74c   :  { %15987 = vmatmul.mubr.msk.f32.vlgmr.msra.gmra.mxu1 %vm69_vm0, %v22354_v13  ;;  %15922 = vmatprep.subr.msk.mxu0 %vm69_vm0, %v11836_v34  ;;  %v11828_v34 = vld [vmem:[#allocation3 + $0x2e8] sm:$0xff] }
 0x74d   :  { %16023 = vmatpush3.xpose.msk.msra.mxu1 %vm69_vm0, %v12603_v53  ;;  %16054 = vmatprep.mubr.msk.f32.mxu1 %vm69_vm0, %v22467_v16  ;;  %v11812_v53 = vld [vmem:[#allocation3 + $0x228] sm:$0xff] }
 0x74e   :  { %16024 = vmatprep.subr.msk.mxu1 %vm69_vm0, %v12618_v35  ;;  %v12610_v35 = vld [vmem:[#allocation3 + $0x13a] sm:$0xff] }
 0x74f   :  { %15923 = vmatpush3.xpose.msk.msra.mxu0 %vm69_vm0, %v11820_v28  ;;  %v11827_v28 = vld [vmem:[#allocation3 + $0x2d8] sm:$0xff] }
 0x750   :  { %15924 = vmatprep.subr.msk.mxu0 %vm69_vm0, %v22031_v18  ;;  %v11818_v18 = vld [vmem:[#allocation3 + $0x270] sm:$0xff] }
 0x751   :  { %16025 = vmatpush3.xpose.msk.msra.mxu1 %vm69_vm0, %v12602_v59  ;;  %v12594_v59 = vld [vmem:[#allocation3 + $0x7a] sm:$0xff] }
 0x752   :  { %16026 = vmatprep.subr.msk.mxu1 %vm69_vm0, %v22037_v6  ;;  %v12600_v6 = vld [vmem:[#allocation3 + $0xc2] sm:$0xff] }
 0x753   :  { %15925 = vmatpush3.xpose.msk.msra.mxu0 %vm69_vm0, %v11819_v43  ;;  %v11826_v43 = vld [vmem:[#allocation3 + $0x2d0] sm:$0xff] }
 0x754   :  { %15926 = vmatprep.subr.msk.mxu0 %vm69_vm0, %v22045_v56  ;;  %v11832_v56 = vld [vmem:[#allocation3 + $0x318] sm:$0xff] }
 0x755   :  { %16027 = vmatpush3.xpose.msk.msra.mxu1 %vm69_vm0, %v12601_v4  ;;  %v12593_v4 = vld [vmem:[#allocation3 + $0x6a] sm:$0xff] }
 0x756   :  { %16028 = vmatprep.subr.msk.mxu1 %vm69_vm0, %v22055_v29  ;;  %v12614_v29 = vld [vmem:[#allocation3 + $0x16a] sm:$0xff] }
 0x757   :  { %15927 = vmatpush3.xpose.msk.msra.mxu0 %vm69_vm0, %v11818_v18  ;;  %v12608_v18 = vld [vmem:[#allocation3 + $0x122] sm:$0xff] }
 0x758   :  { %15928 = vmatprep.subr.msk.mxu0 %vm69_vm0, %v11833_v60  ;;  %v11810_v60 = vld [vmem:[#allocation3 + $0x210] sm:$0xff] }
 0x759   :  { %16029 = vmatpush3.xpose.msk.msra.mxu1 %vm69_vm0, %v12600_v6  ;;  %v11825_v6 = vld [vmem:[#allocation3 + $0x2c0] sm:$0xff] }
 0x75a   :  { %16030 = vmatprep.subr.msk.mxu1 %vm69_vm0, %v12615_v10  ;;  %v12592_v10 = vld [vmem:[#allocation3 + $0x62] sm:$0xff] }
 0x75b   :  { %15929 = vmatpush3.xpose.msk.msra.mxu0 %vm69_vm0, %v11817_v31  ;;  %v12607_v31 = vld [vmem:[#allocation3 + $0x112] sm:$0xff] }
 0x75c   :  { %15930 = vmatprep.subr.msk.mxu0 %vm69_vm0, %v11832_v56  ;;  %v11809_v56 = vld [vmem:[#allocation3 + $0x200] sm:$0xff] }
 0x75d   :  { %16031 = vmatpush3.xpose.msk.msra.mxu1 %vm69_vm0, %v12599_v39  ;;  %v11824_v39 = vld [vmem:[#allocation3 + $0x2b8] sm:$0xff] }
 0x75e   :  { %16032 = vmatprep.subr.msk.mxu1 %vm69_vm0, %v12614_v29  ;;  %v12591_v29 = vld [vmem:[#allocation3 + $0x52] sm:$0xff] }
 0x75f   :  { %15931 = vmatpush3.xpose.msk.msra.mxu0 %vm69_vm0, %v11816_v22  ;;  %v12606_v22 = vld [vmem:[#allocation3 + $0x10a] sm:$0xff] }
 0x760   :  { %15932 = vmatprep.subr.msk.mxu0 %vm69_vm0, %v11831_v23  ;;  %v11808_v23 = vld [vmem:[#allocation3 + $0x1f8] sm:$0xff] }
 0x761   :  { %16033 = vmatpush3.xpose.msk.msra.mxu1 %vm69_vm0, %v12598_v1  ;;  %v11823_v1 = vld [vmem:[#allocation3 + $0x2a8] sm:$0xff] }
 0x762   :  { %16034 = vmatprep.subr.msk.mxu1 %vm69_vm0, %v12613_v19  ;;  %v12590_v19 = vld [vmem:[#allocation3 + $0x4a] sm:$0xff] }
 0x763   :  { %15933 = vmatpush3.xpose.msk.msra.mxu0 %vm69_vm0, %v11815_v25  ;;  %v12605_v25 = vld [vmem:[#allocation3 + $0xfa] sm:$0xff] }
 0x764   :  { %15934 = vmatprep.subr.msk.mxu0 %vm69_vm0, %v11830_v24  ;;  %v11807_v24 = vld [vmem:[#allocation3 + $0x1e8] sm:$0xff] }
 0x765   :  { %16035 = vmatpush3.xpose.msk.msra.mxu1 %vm69_vm0, %v12597_v2  ;;  %v11822_v2 = vld [vmem:[#allocation3 + $0x2a0] sm:$0xff] }
 0x766   :  { %16036 = vmatprep.subr.msk.mxu1 %vm69_vm0, %v12612_v41  ;;  %v12589_v41 = vld [vmem:[#allocation3 + $0x3a] sm:$0xff] }
 0x767   :  { %15935 = vmatpush3.xpose.msk.msra.mxu0 %vm69_vm0, %v11814_v11  ;;  %v12604_v11 = vld [vmem:[#allocation3 + $0xf2] sm:$0xff] }
 0x768   :  { %15936 = vmatprep.subr.msk.mxu0 %vm69_vm0, %v11829_v7  ;;  %v12244_v7 = vld [vmem:[#allocation3 + $0x351] sm:$0xff] }
 0x769   :  { %16037 = vmatpush3.xpose.msk.msra.mxu1 %vm69_vm0, %v12596_v47  ;;  %v11806_v47 = vld [vmem:[#allocation3 + $0x1e0] sm:$0xff] }
 0x76a   :  { %16038 = vmatprep.subr.msk.mxu1 %vm69_vm0, %v12611_v21  ;;  %v12588_v21 = vld [vmem:[#allocation3 + $0x32] sm:$0xff] }
 0x76b   :  { %15937 = vmatpush3.xpose.msk.msra.mxu0 %vm69_vm0, %v11813_v52  ;;  %v12243_v52 = vld [vmem:[#allocation3 + $0x349] sm:$0xff] }
 0x76c   :  { %15938 = vmatprep.subr.msk.mxu0 %vm69_vm0, %v11828_v34  ;;  %v23272_v34 = vmov 0.0  }
 0x76d   :  { %16039 = vmatpush3.xpose.msk.msra.mxu1 %vm69_vm0, %v12595_v50  ;;  %v12226_v50 = vld [vmem:[#allocation3 + $0x279] sm:$0xff] }
 0x76e   :  { %16040 = vmatprep.subr.msk.mxu1 %vm69_vm0, %v12610_v35 }
 0x76f   :  { %15939 = vmatpush3.xpose.msk.msra.mxu0 %vm69_vm0, %v11812_v53  ;;  %v12624_v53 = vld [vmem:[#allocation3 + $0x212] sm:$0xff] }
 0x770   :  { %15940 = vmatprep.subr.msk.mxu0 %vm69_vm0, %v11827_v28  ;;  %v13036_v28 = vld [vmem:[%s22711_s9] sm:$0xff] }
 0x771   :  { %16041 = vmatpush3.xpose.msk.msra.mxu1 %vm69_vm0, %v12594_v59  ;;  %v12639_v59 = vld [vmem:[#allocation3 + $0x2c2] sm:$0xff] }
 0x772   :  { %16042 = vmatprep.subr.msk.mxu1 %vm69_vm0, %v12609_v48 }
 0x773   :  { %15941 = vmatpush3.xpose.msk.msra.mxu0 %vm69_vm0, %v11811_v12 }
 0x774   :  { %15942 = vmatprep.subr.msk.mxu0 %vm69_vm0, %v11826_v43  ;;  %v12623_v43 = vld [vmem:[#allocation3 + $0x202] sm:$0xff] }
 0x775   :  { %16043 = vmatpush3.xpose.msk.msra.mxu1 %vm69_vm0, %v12593_v4  ;;  %v12638_v4 = vld [vmem:[#allocation3 + $0x2ba] sm:$0xff] }
 0x776   :  { %16044 = vmatprep.subr.msk.mxu1 %vm69_vm0, %v12608_v18 }
 0x777   :  { %15943 = vmatpush3.xpose.msk.msra.mxu0 %vm69_vm0, %v11810_v60  ;;  %v12622_v60 = vld [vmem:[#allocation3 + $0x1fa] sm:$0xff] }
 0x778   :  { %15944 = vmatprep.subr.msk.mxu0 %vm69_vm0, %v11825_v6  ;;  %v12637_v6 = vld [vmem:[#allocation3 + $0x2aa] sm:$0xff] }
 0x779   :  { %16045 = vmatpush3.xpose.msk.msra.mxu1 %vm69_vm0, %v12592_v10  ;;  %v12621_v10 = vld [vmem:[#allocation3 + $0x1ea] sm:$0xff] }
 0x77a   :  { %16046 = vmatprep.subr.msk.mxu1 %vm69_vm0, %v12607_v31  ;;  %v12636_v31 = vld [vmem:[#allocation3 + $0x2a2] sm:$0xff] }
 0x77b   :  { %15945 = vmatpush3.xpose.msk.msra.mxu0 %vm69_vm0, %v11809_v56  ;;  %v12620_v56 = vld [vmem:[#allocation3 + $0x1e2] sm:$0xff] }
 0x77c   :  { %15946 = vmatprep.subr.msk.mxu0 %vm69_vm0, %v11824_v39  ;;  %v10070_v39 = vpop.f32.mrf.mxu1 }
 0x77d   :  { %16047 = vmatpush3.xpose.msk.msra.mxu1 %vm69_vm0, %v12591_v29 }
 0x77e   :  { %16048 = vmatprep.subr.msk.mxu1 %vm69_vm0, %v12606_v22  ;;  %v10072_v29 = vpop.f32.mrf.mxu1 }
 0x77f   :  { %15947 = vmatpush3.xpose.msk.msra.mxu0 %vm69_vm0, %v11808_v23 }
 0x780   :  { %15948 = vmatprep.subr.msk.mxu0 %vm69_vm0, %v11823_v1  ;;  %v10473_v22 = vpop.f32.mrf.mxu1 }
 0x781   :  { %16049 = vmatpush3.xpose.msk.msra.mxu1 %vm69_vm0, %v12590_v19 }
 0x782   :  { %16050 = vmatprep.subr.msk.mxu1 %vm69_vm0, %v12605_v25  ;;  %v10475_v23 = vpop.f32.mrf.mxu1 }
 0x783   :  { %15949 = vmatpush3.xpose.msk.msra.mxu0 %vm69_vm0, %v11807_v24 }
 0x784   :  { %15950 = vmatprep.subr.msk.mxu0 %vm69_vm0, %v11822_v2  ;;  %v10880_v1 = vpop.f32.mrf.mxu1 }
 0x785   :  { %16051 = vmatpush3.xpose.msk.msra.mxu1 %vm69_vm0, %v12589_v41  ;;  %v9733_v41 = vpop.f32.mrf.mxu0 }
 0x786   :  { %16052 = vmatprep.subr.msk.mxu1 %vm69_vm0, %v12604_v11  ;;  %v10882_v19 = vpop.f32.mrf.mxu1 }
 0x787   :  { %15951 = vmatpush3.xpose.msk.msra.mxu0 %vm69_vm0, %v11806_v47  ;;  %v9735_v47 = vpop.f32.mrf.mxu0 }
 0x788   :  { %15988 = vmatprep.subr.msk.mxu0 %vm69_vm0, %v12244_v7  ;;  %v11287_v25 = vpop.f32.mrf.mxu1  ;;  %v10071_v7 = vadd.f32 %v10070_v39, %v9733_v41 }
 0x789   :  { %16053 = vmatpush3.xpose.msk.msra.mxu1 %vm69_vm0, %v12588_v21 }
 0x78a   :  { %17447 = vmatprep.subr.mxu1 %v23272_v34  ;;  %15953 = vmatmul.mubr.msk.f32.vlgmr.msra.gmra.mxu0 %vm69_vm0, %v22192_v46  ;;  %v12225_v46 = vld [vmem:[#allocation3 + $0x271] sm:$0xff]  ;;  %v11289_v24 = vpop.f32.mrf.mxu1 }
 0x78b   :  { %15989 = vmatpush3.xpose.msk.msra.mxu0 %vm69_vm0, %v22326_v49  ;;  %16020 = vmatprep.mubr.msk.f32.mxu0 %vm69_vm0, %v22354_v13  ;;  %v17570_v49 = vmov 1966171168  }
 0x78c   :  { %16055 = vmatmul.mubr.msk.f32.vlgmr.msra.gmra.mxu1 %vm69_vm0, %v22467_v16  ;;  %15990 = vmatprep.subr.msk.mxu0 %vm69_vm0, %v12243_v52  ;;  %v11694_v2 = vpop.f32.mrf.mxu1  ;;  %v10073_v52 = vadd.f32 %v10072_v29, %v9735_v47 }
 0x78d   :  { %17455 = vmatprep.mubr.msk.f32.mxu1 %vm17571_vm4, %v23272_v34 }
 0x78e   :  { %v11696_v11 = vpop.f32.mrf.mxu1 }
 0x78f   :  { %15991 = vmatpush3.xpose.msk.msra.mxu0 %vm69_vm0, %v22333_v45  ;;  %v13051_v45 = vunpack.c.l.s4 %v17570_v49  ;;  %v9804_v49 = vpop.f32.mrf.mxu0 }
 0x790   :  { %15992 = vmatprep.subr.msk.mxu0 %vm69_vm0, %v22177_v40  ;;  %v12651_v40 = vld [vmem:[#allocation3 + $0x352] sm:$0xff] }
 0x791   :  { %v13052_v35 = vunpack.c.0.s8 %v13051_v45  ;;  %v9806_v45 = vpop.f32.mrf.mxu0 }
 0x793   :  { %15993 = vmatpush3.xpose.msk.msra.mxu0 %vm69_vm0, %v12226_v50  ;;  %v10550_v50 = vadd.f32 %v10475_v23, %v10073_v52 }
 0x794   :  { %15994 = vmatprep.subr.msk.mxu0 %vm69_vm0, %v22188_v8  ;;  %v12650_v8 = vld [vmem:[#allocation3 + $0x34a] sm:$0xff] }
 0x797   :  { %15995 = vmatpush3.xpose.msk.msra.mxu0 %vm69_vm0, %v12225_v46 }
 0x798   :  { %15996 = vmatprep.subr.msk.mxu0 %vm69_vm0, %v22204_v54  ;;  %v12635_v54 = vld [vmem:[#allocation3 + $0x292] sm:$0xff] }
 0x79b   :  { %15997 = vmatpush3.xpose.msk.msra.mxu0 %vm69_vm0, %v22211_v17  ;;  %v12634_v17 = vld [vmem:[#allocation3 + $0x28a] sm:$0xff] }
 0x79c   :  { %15998 = vmatprep.subr.msk.mxu0 %vm69_vm0, %v22215_v3  ;;  %v12633_v3 = vld [vmem:[#allocation3 + $0x27a] sm:$0xff] }
 0x79f   :  { %15999 = vmatpush3.xpose.msk.msra.mxu0 %vm69_vm0, %v22222_v44  ;;  %v12632_v44 = vld [vmem:[#allocation3 + $0x272] sm:$0xff] }
 0x7a0   :  { %16000 = vmatprep.subr.msk.mxu0 %vm69_vm0, %v22226_v14  ;;  %v12647_v14 = vld [vmem:[#allocation3 + $0x322] sm:$0xff] }
 0x7a3   :  { %16001 = vmatpush3.xpose.msk.msra.mxu0 %vm69_vm0, %v22232_v26  ;;  %v12631_v26 = vld [vmem:[#allocation3 + $0x262] sm:$0xff] }
 0x7a4   :  { %16002 = vmatprep.subr.msk.mxu0 %vm69_vm0, %v22236_v9  ;;  %v12646_v9 = vld [vmem:[#allocation3 + $0x31a] sm:$0xff] }
 0x7a7   :  { %16003 = vmatpush3.xpose.msk.msra.mxu0 %vm69_vm0, %v22242_v51  ;;  %v12630_v51 = vld [vmem:[#allocation3 + $0x25a] sm:$0xff] }
 0x7a8   :  { %16004 = vmatprep.subr.msk.mxu0 %vm69_vm0, %v22246_v55  ;;  %v12645_v55 = vld [vmem:[#allocation3 + $0x30a] sm:$0xff] }
 0x7ab   :  { %16005 = vmatpush3.xpose.msk.msra.mxu0 %vm69_vm0, %v22252_v38  ;;  %v12629_v38 = vld [vmem:[#allocation3 + $0x24a] sm:$0xff] }
 0x7ac   :  { %16006 = vmatprep.subr.msk.mxu0 %vm69_vm0, %v22256_v42  ;;  %v12644_v42 = vld [vmem:[#allocation3 + $0x302] sm:$0xff] }
 0x7af   :  { %16007 = vmatpush3.xpose.msk.msra.mxu0 %vm69_vm0, %v22262_v37  ;;  %v12628_v37 = vld [vmem:[#allocation3 + $0x242] sm:$0xff] }
 0x7b0   :  { %16008 = vmatprep.subr.msk.mxu0 %vm69_vm0, %v22266_v20  ;;  %v12643_v20 = vld [vmem:[#allocation3 + $0x2f2] sm:$0xff] }
 0x7b3   :  { %16009 = vmatpush3.xpose.msk.msra.mxu0 %vm69_vm0, %v22272_v32  ;;  %v12627_v32 = vld [vmem:[#allocation3 + $0x232] sm:$0xff] }
 0x7b4   :  { %16010 = vmatprep.subr.msk.mxu0 %vm69_vm0, %v22276_v33  ;;  %v12642_v33 = vld [vmem:[#allocation3 + $0x2ea] sm:$0xff] }
 0x7b7   :  { %16011 = vmatpush3.xpose.msk.msra.mxu0 %vm69_vm0, %v22282_v62  ;;  %v12626_v62 = vld [vmem:[#allocation3 + $0x22a] sm:$0xff] }
 0x7b8   :  { %16012 = vmatprep.subr.msk.mxu0 %vm69_vm0, %v22286_v15  ;;  %v12641_v15 = vld [vmem:[#allocation3 + $0x2da] sm:$0xff] }
 0x7bb   :  { %16013 = vmatpush3.xpose.msk.msra.mxu0 %vm69_vm0, %v22292_v58  ;;  %v12625_v58 = vld [vmem:[#allocation3 + $0x21a] sm:$0xff] }
 0x7bc   :  { %16014 = vmatprep.subr.msk.mxu0 %vm69_vm0, %v22296_v63  ;;  %v13039_v63 = vld [vmem:[%s22711_s9 + $0x18] sm:$0xff] }
 0x7bd   :  { %17448 = vmatpush3.msra.mxu1 %v13039_v63 }
 0x7be   :  { %17449 = vmatprep.subr.mxu1 %v23272_v34 }
 0x7bf   :  { %16015 = vmatpush3.xpose.msk.msra.mxu0 %vm69_vm0, %v22302_v36  ;;  %v13038_v36 = vld [vmem:[%s22711_s9 + $0x10] sm:$0xff] }
 0x7c0   :  { %16016 = vmatprep.subr.msk.mxu0 %vm69_vm0, %v22306_v5  ;;  %v13053_v5 = vlaneseq  ;;  %17450 = vmatpush3.msra.mxu1 %v13038_v36 }
 0x7c1   :  { %17451 = vmatprep.subr.mxu1 %v23272_v34 }
 0x7c3   :  { %16017 = vmatpush3.xpose.msk.msra.mxu0 %vm69_vm0, %v22312_v57  ;;  %v12640_v57 = vld [vmem:[#allocation3 + $0x2d2] sm:$0xff] }
 0x7c4   :  { %16018 = vmatprep.subr.msk.mxu0 %vm69_vm0, %v22316_v27  ;;  %v13034_v27 = vld [vmem:[%s22703_s1] sm:$0x1] }
 0x7c7   :  { %16019 = vmatpush3.xpose.msk.msra.mxu0 %vm69_vm0, %v22322_v30  ;;  %v13035_v30 = vld [vmem:[%s22703_s1 + $0x1] sm:$0x1] }
 0x7c8   :  { %16056 = vmatprep.subr.msk.mxu0 %vm69_vm0, %v12651_v40 }
 0x7ca   :  { %16021 = vmatmul.mubr.msk.f32.vlgmr.msra.gmra.mxu0 %vm69_vm0, %v22354_v13  ;;  %v13049_v13 = vcombine.low %v13034_v27, %v13035_v30 }
 0x7cb   :  { %16057 = vmatpush3.xpose.msk.msra.mxu0 %vm69_vm0, %v12635_v54  ;;  %16088 = vmatprep.mubr.msk.f32.mxu0 %vm69_vm0, %v22467_v16 }
 0x7cc   :  { %16058 = vmatprep.subr.msk.mxu0 %vm69_vm0, %v12650_v8  ;;  %v12101_v21 = vpop.f32.mrf.mxu1 }
 0x7ce   :  { %v12103_v40 = vpop.f32.mrf.mxu1 }
 0x7cf   :  { %16059 = vmatpush3.xpose.msk.msra.mxu0 %vm69_vm0, %v12634_v17 }
 0x7d0   :  { %16060 = vmatprep.subr.msk.mxu0 %vm69_vm0, %v22340_v61  ;;  %v13037_v61 = vld [vmem:[%s22711_s9 + $0x8] sm:$0xff] }
 0x7d1   :  { %17452 = vmatpush3.msra.mxu1 %v13037_v61  ;;  %v10141_v61 = vpop.f32.mrf.mxu0 }
 0x7d2   :  { %17453 = vmatprep.subr.mxu1 %v23272_v34  ;;  %v10549_v34 = vadd.f32 %v10473_v22, %v10071_v7 }
 0x7d3   :  { %16061 = vmatpush3.xpose.msk.msra.mxu0 %vm69_vm0, %v12633_v3  ;;  %17454 = vmatpush3.msra.mxu1 %v13036_v28 }
 0x7d4   :  { %16062 = vmatprep.subr.msk.mxu0 %vm69_vm0, %v22350_v0  ;;  %v13054_v0 = vshrl.u32 %v13053_v5, 7  ;;  %v10956_v46 = vadd.f32 %v10880_v1, %v10549_v34 }
 0x7d6   :  { %v22659_v48 = vsub.s32 %v13052_v35, %v13054_v0  ;;  %v11363_v8 = vadd.f32 %v11287_v25, %v10956_v46  ;;  %v10143_v0 = vpop.f32.mrf.mxu0 }
 0x7d7   :  { %16063 = vmatpush3.xpose.msk.msra.mxu0 %vm69_vm0, %v12632_v44 }
 0x7d8   :  { %16064 = vmatprep.subr.msk.mxu0 %vm69_vm0, %v12647_v14  ;;  %v13056_v12 = vrot.slane %v13049_v13, %v22659_v48  ;;  %v11770_v3 = vadd.f32 %v11694_v2, %v11363_v8  ;;  %v10544_v13 = vpop.f32.mrf.mxu0 }
 0x7da   :  { %v13063_v18 = vrot.slane %v13056_v12, %v22659_v48  ;;  %v12177_v14 = vadd.f32 %v12101_v21, %v11770_v3  ;;  %v10546_v35 = vpop.f32.mrf.mxu0 }
 0x7db   :  { %16065 = vmatpush3.xpose.msk.msra.mxu0 %vm69_vm0, %v12631_v26 }
 0x7dc   :  { %16066 = vmatprep.subr.msk.mxu0 %vm69_vm0, %v12646_v9  ;;  %17456 = vmatmul.mubr.msk.f32.vlgmr.msra.gmra.mxu1 %vm69_vm0, %v13063_v18 }
 0x7df   :  { %16067 = vmatpush3.xpose.msk.msra.mxu0 %vm69_vm0, %v12630_v51 }
 0x7e0   :  { %16068 = vmatprep.subr.msk.mxu0 %vm69_vm0, %v12645_v55 }
 0x7e3   :  { %16069 = vmatpush3.xpose.msk.msra.mxu0 %vm69_vm0, %v12629_v38  ;;  %v22675_v38 = vpop.permute.xlu0 %12998 }
 0x7e4   :  { %16070 = vmatprep.subr.msk.mxu0 %vm69_vm0, %v12644_v42 }
 0x7e7   :  { %16071 = vmatpush3.xpose.msk.msra.mxu0 %vm69_vm0, %v12628_v37 }
 0x7e8   :  { %16072 = vmatprep.subr.msk.mxu0 %vm69_vm0, %v12643_v20 }
 0x7eb   :  { %16073 = vmatpush3.xpose.msk.msra.mxu0 %vm69_vm0, %v12627_v32 }
 0x7ec   :  { %16074 = vmatprep.subr.msk.mxu0 %vm69_vm0, %v12642_v33 }
 0x7ef   :  { %16075 = vmatpush3.xpose.msk.msra.mxu0 %vm69_vm0, %v12626_v62 }
 0x7f0   :  { %16076 = vmatprep.subr.msk.mxu0 %vm69_vm0, %v12641_v15 }
 0x7f3   :  { %16077 = vmatpush3.xpose.msk.msra.mxu0 %vm69_vm0, %v12625_v58 }
 0x7f4   :  { %16078 = vmatprep.subr.msk.mxu0 %vm69_vm0, %v12640_v57 }
 0x7f7   :  { %16079 = vmatpush3.xpose.msk.msra.mxu0 %vm69_vm0, %v12624_v53  ;;  %v10951_v53 = vpop.f32.mrf.mxu0 }
 0x7f8   :  { %16080 = vmatprep.subr.msk.mxu0 %vm69_vm0, %v12639_v59 }
 0x7f9   :  { %v10953_v28 = vpop.f32.mrf.mxu0 }
 0x7fb   :  { %16081 = vmatpush3.xpose.msk.msra.mxu0 %vm69_vm0, %v12623_v43  ;;  %v11358_v59 = vpop.f32.mrf.mxu0 }
 0x7fc   :  { %16082 = vmatprep.subr.msk.mxu0 %vm69_vm0, %v12638_v4  ;;  %v14604_v4 = vld [vmem:[%s22712_s10] ss:$0 sm:$0xff]  ;;  %s17538_s10 = scalar_lea.vmem %s13172_s27, 32 }
 0x7fd   :  { %v11360_v12 = vpop.f32.mrf.mxu0  ;;  %p17539_p10 = scmp.ne.s32.totalorder %s13172_s27, %s17538_s10  ;;  %p17544_p12 = scmp.lt.s32.totalorder %s17538_s10, %s17538_s10 }
 0x7ff   :  { %16083 = vmatpush3.xpose.msk.msra.mxu0 %vm69_vm0, %v12622_v60  ;;  %v10142_v60 = vadd.f32 %v10141_v61, %v9804_v49  ;;  %p17545_p13 = por %p17544_p12, %p17543_p11 }
 0x800   :  { %16084 = vmatprep.subr.msk.mxu0 %vm69_vm0, %v12637_v6 }
 0x801   :  { %v10551_v39 = vadd.f32 %v10544_v13, %v10142_v60  ;;  %p17546_p0 = pnand %p17545_p13, %p17539_p10 }
 0x803   :  { %16085 = vmatpush3.xpose.msk.msra.mxu0 %vm69_vm0, %v12621_v10  ;;  %v10958_v1 = vadd.f32 %v10951_v53, %v10551_v39 }
 0x804   :  { %16086 = vmatprep.subr.msk.mxu0 %vm69_vm0, %v12636_v31 }
 0x805   :  { %v11365_v41 = vadd.f32 %v11358_v59, %v10958_v1 }
 0x807   :  { %16087 = vmatpush3.xpose.msk.msra.mxu0 %vm69_vm0, %v12620_v56  ;;  %v10144_v56 = vadd.f32 %v10143_v0, %v9806_v45 }
 0x809   :  { %v10552_v23 = vadd.f32 %v10546_v35, %v10144_v56 }
 0x80a   :  { %16089 = vmatmul.mubr.msk.f32.vlgmr.msra.gmra.mxu0 %vm69_vm0, %v22467_v16  ;;  %v10957_v16 = vadd.f32 %v10882_v19, %v10550_v50  ;;  %v11765_v43 = vpop.f32.mrf.mxu0 }
 0x80b   :  { %v10959_v2 = vadd.f32 %v10953_v28, %v10552_v23  ;;  %v11772_v21 = vadd.f32 %v11765_v43, %v11365_v41 }
 0x80c   :  { %v12508_v54 = vpop.f32.mrf.mxu1  ;;  %v11364_v17 = vadd.f32 %v11289_v24, %v10957_v16  ;;  %v11767_v18 = vpop.f32.mrf.mxu0 }
 0x80d   :  { %v12584_v51 = vadd.f32 %v12508_v54, %v12177_v14  ;;  %v11366_v47 = vadd.f32 %v11360_v12, %v10959_v2 }
 0x80e   :  { %v11771_v44 = vadd.f32 %v11696_v11, %v11364_v17  ;;  %v12510_v26 = vpop.f32.mrf.mxu1 }
 0x80f   :  { %v11773_v52 = vadd.f32 %v11767_v18, %v11366_v47 }
 0x810   :  { %v12178_v9 = vadd.f32 %v12103_v40, %v11771_v44 }
 0x812   :  { %v12585_v42 = vadd.f32 %v12510_v26, %v12178_v9 }
 0x84a   :  { %v12172_v10 = vpop.f32.mrf.mxu0 }
 0x84b   :  { %v12179_v34 = vadd.f32 %v12172_v10, %v11772_v21 }
 0x84c   :  { %v12915_v55 = vpop.f32.mrf.mxu1  ;;  %v12174_v19 = vpop.f32.mrf.mxu0 }
 0x84d   :  { %v12991_v37 = vadd.f32 %v12915_v55, %v12584_v51 }
 0x84e   :  { %v12917_v20 = vpop.f32.mrf.mxu1 }
 0x84f   :  { %v13001_v32 = vadd.f32 %v22675_v38, %v12991_v37  ;;  %v12992_v33 = vadd.f32 %v12917_v20, %v12585_v42 }
 0x851   :  { %v14598_v62 = vmul.f32 -1.442695, %v13001_v32  ;;  %v13002_v15 = vadd.f32 %v22675_v38, %v12992_v33 }
 0x853   :  { %17478 = vpow2.f32 %v14598_v62  ;;  %v14599_v58 = vmul.f32 -1.442695, %v13002_v15 }
 0x855   :  { %17480 = vpow2.f32 %v14599_v58 }
 0x860   :  { %v17479_v63 = vpop.eup %17478 }
 0x861   :  { %v13017_v36 = vadd.f32 1.0, %v17479_v63 }
 0x862   :  { %v17481_v5 = vpop.eup %17480 }
 0x863   :  { %17482 = vrcp.f32 %v13017_v36  ;;  %v13018_v57 = vadd.f32 1.0, %v17481_v5 }
 0x865   :  { %17484 = vrcp.f32 %v13018_v57 }
 0x870   :  { %v17483_v27 = vpop.eup %17482 }
 0x871   :  { %13029 = vst [vmem:[%s22713_s11] sm:$0x1f] %v17483_v27 }
 0x872   :  { %v17485_v30 = vpop.eup %17484 }
 0x873   :  { %13030 = vst [vmem:[%s22713_s11 + $0x8] sm:$0x1f] %v17485_v30 }
 0x88a   :  { %v12579_v11 = vpop.f32.mrf.mxu0 }
 0x89c   :  { %v13132_v6 = vpop.f32.mrf.mxu1 }
 0x89d   :  { %v13133_v31 = vadd.f32 %v14604_v4, %v13132_v6 }
 0x89e   :  { %v17457_v29 = vpop.f32.mrf.mxu1 }
 0x89f   :  { %v13143_v22 = vrot.slane %v13133_v31, %v22659_v48 }
 0x8a1   :  { %v13144_v25 = vcombine.high %v13143_v22, %v13143_v22  ;;  %v13151_v24 = vrot.slane %v13143_v22, %v22659_v48 }
 0x8a3   :  { %v13158_v7 = vrot.slane %v13144_v25, %v22659_v48  ;;  %13162 = vst.msk [vmem:[#allocation9] sm:$0x1] %vm13161_vm5, %v13151_v24 }
 0x8a5   :  { %13163 = vst.msk [vmem:[#allocation9 + $0x1] sm:$0x1] %vm13161_vm5, %v13158_v7 }
 0x8a6   :  { %17549 = shalt.err (!%p17546_p0)
}
 0x8a7   :  { %s17573_s28 = smov 16   ;;  %s17574_s29 = smov 1   ;;  %v12581_v48 = vpop.f32.mrf.mxu0  ;;  %v12180_v50 = vadd.f32 %v12174_v19, %v11773_v52  ;;  %v12586_v46 = vadd.f32 %v12579_v11, %v12179_v34 }
 0x8a8   :  { %13177 = dma.vmem_to_hbm [thread:$0]  %s13172_s27, 32, %s22714_s12, [#allocation6], %s17573_s28, %s17573_s28, %s17574_s29  }
 0x8a9   :  { %v12587_v16 = vadd.f32 %v12581_v48, %v12180_v50 }
 0x8ca   :  { %v12986_v40 = vpop.f32.mrf.mxu0 }
 0x8cb   :  { %v12993_v8 = vadd.f32 %v12986_v40, %v12586_v46 }
 0x8cc   :  { %v12988_v54 = vpop.f32.mrf.mxu0 }
 0x8cd   :  { %v13003_v17 = vadd.f32 %v22675_v38, %v12993_v8  ;;  %v12994_v3 = vadd.f32 %v12988_v54, %v12587_v16 }
 0x8cf   :  { %v14600_v44 = vmul.f32 -1.442695, %v13003_v17  ;;  %v13004_v14 = vadd.f32 %v22675_v38, %v12994_v3 }
 0x8d1   :  { %17486 = vpow2.f32 %v14600_v44  ;;  %v14601_v26 = vmul.f32 -1.442695, %v13004_v14 }
 0x8d3   :  { %17488 = vpow2.f32 %v14601_v26 }
 0x8de   :  { %v17487_v9 = vpop.eup %17486 }
 0x8df   :  { %v13019_v51 = vadd.f32 1.0, %v17487_v9 }
 0x8e0   :  { %v17489_v55 = vpop.eup %17488 }
 0x8e1   :  { %17490 = vrcp.f32 %v13019_v51  ;;  %v13020_v42 = vadd.f32 1.0, %v17489_v55 }
 0x8e3   :  { %17492 = vrcp.f32 %v13020_v42 }
 0x8ee   :  { %v17491_v37 = vpop.eup %17490 }
 0x8ef   :  { %14602 = vst [vmem:[%s22713_s11 + $0x10] sm:$0x1f] %v17491_v37 }
 0x8f0   :  { %v17493_v20 = vpop.eup %17492 }
 0x8f1   :  { %14603 = vst [vmem:[%s22713_s11 + $0x18] sm:$0x1f] %v17493_v20 }
 0x8f2   :  { %17562 = dma.done.wait [#allocation6], 32  }
 0x8f3   :  { %17563 = vsyncadd [#allocation6], 4294967264 }
 0x8f4   :  { %13183 = vsyncpa [#allocation5], 1 }
 0x8f5   :  { %13184 = vsyncpa [#allocation8], 1 }
 0x8f6   :  { %13185 = vsyncpa [#allocation6], 1 }

</bundles_post_ra>
